<compile_context>
chip_gen: v7x
topology: tpu7x:2x2x1
jax: 0.10.0
libtpu: 0.0.40
codegen_flags: <defaults>
</compile_context>

<pallas_src>
import jax
import jax.numpy as jnp
from jax import lax
from jax.experimental import pallas as pl
from jax.experimental.pallas import tpu as pltpu

H = W = 16
K = 3
EPS = 1e-5          # nn.BatchNorm2d default
C_HID = 64
C_OUT = 3
C_OUT_PAD = 128     # lane-dense padded output channels


# ---------------------------------------------------------------------------
# In-kernel helpers
# ---------------------------------------------------------------------------
def _conv_from_taps(pad_ref, w_ref, b_ref, m):
  """3x3 'same' conv over all images as 9 accumulating MXU matmuls.

  pad_ref: (N, H+2, W+2, Cin) zero-border padded activations (VMEM ref)
  w_ref:   (9*Cin, Cout) tap-major flattened HWIO conv weight (VMEM ref)
  b_ref:   (1, Cout) bias (VMEM ref)
  m:       N*H*W rows
  returns: (m, Cout) float32
  """
  n, _, _, cin = pad_ref.shape
  cout = w_ref.shape[1]
  acc = jnp.broadcast_to(b_ref[...], (m, cout)).astype(jnp.float32)
  for dh in range(K):
    for dw in range(K):
      t = dh * K + dw
      tap = pad_ref[:, dh:dh + H, dw:dw + W, :].reshape(m, cin)   # (M, Cin)
      acc = acc + jnp.dot(tap, w_ref[t * cin:(t + 1) * cin, :],
                          preferred_element_type=jnp.float32)
  return acc


def _bn_train(y, g_ref, be_ref):
  """Training-mode BatchNorm2d over the rows of (M, C); single stats pass."""
  m = y.shape[0]
  inv_m = 1.0 / m
  s = jnp.sum(y, axis=0, keepdims=True)          # (1, C)
  ss = jnp.sum(y * y, axis=0, keepdims=True)     # (1, C)
  mean = s * inv_m
  var = ss * inv_m - mean * mean                 # biased variance
  scale = lax.rsqrt(var + EPS) * g_ref[...]      # (1, C)
  shift = be_ref[...] - mean * scale             # (1, C)
  return y * scale + shift


def _zero_border(pad_ref):
  """Zero only the 1-pixel conv-padding border of a (N, H+2, W+2, C) buffer."""
  n, hp, wp, c = pad_ref.shape
  zrow = jnp.zeros((n, 1, wp, c), jnp.float32)
  zcol = jnp.zeros((n, hp, 1, c), jnp.float32)
  pad_ref[:, 0:1, :, :] = zrow
  pad_ref[:, hp - 1:hp, :, :] = zrow
  pad_ref[:, :, 0:1, :] = zcol
  pad_ref[:, :, wp - 1:wp, :] = zcol


# ---------------------------------------------------------------------------
# Kernel: conv_t1 -> relu -> bn1 -> conv_t2 -> relu -> bn2 -> conv_t3
# Everything resident in VMEM (tiny 16x16 images).
# ---------------------------------------------------------------------------
def _generator_kernel(p1_ref, w1_ref, b1_ref, g1_ref, be1_ref,
                      w2_ref, b2_ref, g2_ref, be2_ref,
                      w3_ref, b3_ref,
                      out_ref, a1pad, a2pad):
  n = a1pad.shape[0]
  m = n * H * W

  # Interiors are fully overwritten; only the conv-padding border must be zero.
  _zero_border(a1pad)
  _zero_border(a2pad)

  # --- layer 1: (M, 36) @ (36, 64) + bias -> ReLU -> BN ---
  y1 = jnp.dot(p1_ref[...], w1_ref[...],
               preferred_element_type=jnp.float32) + b1_ref[...]
  y1 = _bn_train(jnp.maximum(y1, 0.0), g1_ref, be1_ref)
  a1pad[:, 1:1 + H, 1:1 + W, :] = y1.reshape(n, H, W, C_HID)

  # --- layer 2: 9 x (M, 64) @ (64, 64) + bias -> ReLU -> BN ---
  y2 = _conv_from_taps(a1pad, w2_ref, b2_ref, m)
  y2 = _bn_train(jnp.maximum(y2, 0.0), g2_ref, be2_ref)
  a2pad[:, 1:1 + H, 1:1 + W, :] = y2.reshape(n, H, W, C_HID)

  # --- layer 3: 9 x (M, 64) @ (64, 128) + bias, lane-dense padded output ---
  out_ref[...] = _conv_from_taps(a2pad, w3_ref, b3_ref, m).astype(out_ref.dtype)


# ---------------------------------------------------------------------------
# JAX glue
# ---------------------------------------------------------------------------
def _t_weight_to_conv(w_t):
  """ConvTranspose2d weight (Cin, Cout, kh, kw) -> same-conv HWIO weight."""
  return jnp.transpose(jnp.flip(w_t, axis=(2, 3)), (2, 3, 0, 1))


def _im2col_nhwc(x_pad):
  """(N, H+2, W+2, C) padded NHWC -> (N*H*W, 9*C) tap-major patches."""
  n, _, _, c = x_pad.shape
  taps = [x_pad[:, dh:dh + H, dw:dw + W, :]
          for dh in range(K) for dw in range(K)]
  return jnp.concatenate(taps, axis=-1).reshape(n * H * W, K * K * c)


@jax.jit
def generator_one_forward(x, condi_x, params):
  """x: noise (N, 256) (anything reshapeable to (N,1,16,16)),
     condi_x: (N, 3, 16, 16) NCHW. Returns (N, 3, 16, 16) NCHW."""
  n = condi_x.shape[0]
  m = n * H * W

  x_img = x.reshape(n, 1, H, W)
  inp = jnp.concatenate([condi_x, x_img], axis=1)                 # (N,4,H,W)
  inp = jnp.transpose(inp, (0, 2, 3, 1)).astype(jnp.float32)      # NHWC
  x_pad = jnp.pad(inp, ((0, 0), (1, 1), (1, 1), (0, 0)))          # (N,18,18,4)
  p1 = _im2col_nhwc(x_pad)                                        # (M, 36)

  w1 = _t_weight_to_conv(params['w1']).reshape(K * K * 4, C_HID)
  w2 = _t_weight_to_conv(params['w2']).reshape(K * K * C_HID, C_HID)
  w3 = _t_weight_to_conv(params['w3']).reshape(K * K * C_HID, C_OUT)
  w3 = jnp.pad(w3, ((0, 0), (0, C_OUT_PAD - C_OUT)))              # lane-dense
  b3 = jnp.pad(params['b3'], (0, C_OUT_PAD - C_OUT)).reshape(1, C_OUT_PAD)

  b1 = params['b1'].reshape(1, -1)
  b2 = params['b2'].reshape(1, -1)
  g1 = params['g1'].reshape(1, -1)
  be1 = params['be1'].reshape(1, -1)
  g2 = params['g2'].reshape(1, -1)
  be2 = params['be2'].reshape(1, -1)

  flops = 2 * m * (K * K * 4 * C_HID
                   + K * K * C_HID * C_HID
                   + K * K * C_HID * C_OUT_PAD)
  bytes_accessed = 4 * (p1.size + w1.size + w2.size + w3.size
                        + 6 * C_HID + C_OUT_PAD + m * C_OUT_PAD)

  vmem = pl.BlockSpec(memory_space=pltpu.MemorySpace.VMEM)
  out_flat = pl.pallas_call(
      _generator_kernel,
      out_shape=jax.ShapeDtypeStruct((m, C_OUT_PAD), jnp.float32),
      in_specs=[vmem] * 11,
      out_specs=vmem,
      scratch_shapes=[
          pltpu.VMEM((n, H + 2, W + 2, C_HID), jnp.float32),
          pltpu.VMEM((n, H + 2, W + 2, C_HID), jnp.float32),
      ],
      compiler_params=pltpu.CompilerParams(
          vmem_limit_bytes=32 * 1024 * 1024),
      cost_estimate=pl.CostEstimate(flops=flops,
                                    transcendentals=2 * C_HID,
                                    bytes_accessed=bytes_accessed),
  )(p1, w1, b1, g1, be1, w2, b2, g2, be2, w3, b3)

  out_nhwc = out_flat.reshape(n, H, W, C_OUT_PAD)[..., :C_OUT]
  return jnp.transpose(out_nhwc, (0, 3, 1, 2))                    # NCHW


# ---------------------------------------------------------------------------
# Pure-JAX reference (same math, XLA convs) for correctness check
# ---------------------------------------------------------------------------
def _reference(x, condi_x, params):
  n = condi_x.shape[0]
  x_img = x.reshape(n, 1, H, W)
  a = jnp.concatenate([condi_x, x_img], axis=1)
  a = jnp.transpose(a, (0, 2, 3, 1)).astype(jnp.float32)

  def conv(a, w_t, b):
    wk = _t_weight_to_conv(w_t)
    y = lax.conv_general_dilated(a, wk, (1, 1), 'SAME',
                                 dimension_numbers=('NHWC', 'HWIO', 'NHWC'))
    return y + b[None, None, None, :]

  def bn(a, g, be):
    mean = jnp.mean(a, axis=(0, 1, 2), keepdims=True)
    var = jnp.mean((a - mean) ** 2, axis=(0, 1, 2), keepdims=True)
    return (a - mean) * lax.rsqrt(var + EPS) * g + be

  a = bn(jax.nn.relu(conv(a, params['w1'], params['b1'])),
         params['g1'], params['be1'])
  a = bn(jax.nn.relu(conv(a, params['w2'], params['b2'])),
         params['g2'], params['be2'])
  a = conv(a, params['w3'], params['b3'])
  return jnp.transpose(a, (0, 3, 1, 2))


if __name__ == "__main__":
  key = jax.random.PRNGKey(0)
  ks = jax.random.split(key, 12)
  N = 2

  # Deterministic synthetic parameters (shapes from Generator_one.__init__;
  # ConvTranspose2d weights are (Cin, Cout, kH, kW)).
  params = dict(
      w1=0.1 * jax.random.normal(ks[0], (4, 64, 3, 3), jnp.float32),
      b1=0.1 * jax.random.normal(ks[1], (64,), jnp.float32),
      w2=0.1 * jax.random.normal(ks[2], (64, 64, 3, 3), jnp.float32),
      b2=0.1 * jax.random.normal(ks[3], (64,), jnp.float32),
      w3=0.1 * jax.random.normal(ks[4], (64, 3, 3, 3), jnp.float32),
      b3=0.1 * jax.random.normal(ks[5], (3,), jnp.float32),
      g1=1.0 + 0.1 * jax.random.normal(ks[6], (64,), jnp.float32),
      be1=0.1 * jax.random.normal(ks[7], (64,), jnp.float32),
      g2=1.0 + 0.1 * jax.random.normal(ks[8], (64,), jnp.float32),
      be2=0.1 * jax.random.normal(ks[9], (64,), jnp.float32),
  )

  x = jax.random.normal(ks[10], (N, 256), jnp.float32)      # noise -> view(-1,1,16,16)
  condi_x = jax.random.normal(ks[11], (N, 3, 16, 16), jnp.float32)

  out = jax.block_until_ready(generator_one_forward(x, condi_x, params))
  ref = jax.block_until_ready(_reference(x, condi_x, params))

  assert out.shape == (N, 3, 16, 16), out.shape
  max_err = float(jnp.max(jnp.abs(out - ref)))
  assert jnp.allclose(out, ref, rtol=1e-3, atol=1e-3), f"max abs err {max_err}"
  print("KERNEL_OK")
</pallas_src>

<mosaic_0001>
module attributes {stable_mosaic.version = 11 : i64} {
  func.func @_generator_kernel(%arg0: memref<512x36xf32, #tpu.memory_space<vmem>>, %arg1: memref<36x64xf32, #tpu.memory_space<vmem>>, %arg2: memref<1x64xf32, #tpu.memory_space<vmem>>, %arg3: memref<1x64xf32, #tpu.memory_space<vmem>>, %arg4: memref<1x64xf32, #tpu.memory_space<vmem>>, %arg5: memref<576x64xf32, #tpu.memory_space<vmem>>, %arg6: memref<1x64xf32, #tpu.memory_space<vmem>>, %arg7: memref<1x64xf32, #tpu.memory_space<vmem>>, %arg8: memref<1x64xf32, #tpu.memory_space<vmem>>, %arg9: memref<576x128xf32, #tpu.memory_space<vmem>>, %arg10: memref<1x128xf32, #tpu.memory_space<vmem>>, %arg11: memref<512x128xf32, #tpu.memory_space<vmem>>, %arg12: memref<2x18x18x64xf32, #tpu.memory_space<vmem>>, %arg13: memref<2x18x18x64xf32, #tpu.memory_space<vmem>>) attributes {dimension_semantics = [], scalar_prefetch = 0 : i64, scratch_operands = 2 : i64, tpu.core_type = #tpu.core_type<tc>} {
    %cst = arith.constant 0.000000e+00 : f32
    %0 = vector.broadcast %cst : f32 to vector<2x1x18x64xf32>
    %cst_0 = arith.constant 0.000000e+00 : f32
    %1 = vector.broadcast %cst_0 : f32 to vector<2x18x1x64xf32>
    %c0 = arith.constant 0 : index
    %c0_1 = arith.constant 0 : index
    %c0_2 = arith.constant 0 : index
    %c0_3 = arith.constant 0 : index
    %2 = vector.load %arg12[%c0, %c0_1, %c0_2, %c0_3] : memref<2x18x18x64xf32, #tpu.memory_space<vmem>>, vector<2x1x18x64xf32>
    tpu.vector_store %arg12[%c0, %c0_1, %c0_2, %c0_3], %0 {strides = array<i32>} : memref<2x18x18x64xf32, #tpu.memory_space<vmem>>, vector<2x1x18x64xf32>,
    %c0_4 = arith.constant 0 : index
    %c17 = arith.constant 17 : index
    %c0_5 = arith.constant 0 : index
    %c0_6 = arith.constant 0 : index
    %3 = vector.load %arg12[%c0_4, %c17, %c0_5, %c0_6] : memref<2x18x18x64xf32, #tpu.memory_space<vmem>>, vector<2x1x18x64xf32>
    tpu.vector_store %arg12[%c0_4, %c17, %c0_5, %c0_6], %0 {strides = array<i32>} : memref<2x18x18x64xf32, #tpu.memory_space<vmem>>, vector<2x1x18x64xf32>,
    %c0_7 = arith.constant 0 : index
    %c0_8 = arith.constant 0 : index
    %c0_9 = arith.constant 0 : index
    %c0_10 = arith.constant 0 : index
    %4 = vector.load %arg12[%c0_7, %c0_8, %c0_9, %c0_10] : memref<2x18x18x64xf32, #tpu.memory_space<vmem>>, vector<2x18x1x64xf32>
    tpu.vector_store %arg12[%c0_7, %c0_8, %c0_9, %c0_10], %1 {strides = array<i32>} : memref<2x18x18x64xf32, #tpu.memory_space<vmem>>, vector<2x18x1x64xf32>,
    %c0_11 = arith.constant 0 : index
    %c0_12 = arith.constant 0 : index
    %c17_13 = arith.constant 17 : index
    %c0_14 = arith.constant 0 : index
    %5 = vector.load %arg12[%c0_11, %c0_12, %c17_13, %c0_14] : memref<2x18x18x64xf32, #tpu.memory_space<vmem>>, vector<2x18x1x64xf32>
    tpu.vector_store %arg12[%c0_11, %c0_12, %c17_13, %c0_14], %1 {strides = array<i32>} : memref<2x18x18x64xf32, #tpu.memory_space<vmem>>, vector<2x18x1x64xf32>,
    %cst_15 = arith.constant 0.000000e+00 : f32
    %6 = vector.broadcast %cst_15 : f32 to vector<2x1x18x64xf32>
    %cst_16 = arith.constant 0.000000e+00 : f32
    %7 = vector.broadcast %cst_16 : f32 to vector<2x18x1x64xf32>
    %c0_17 = arith.constant 0 : index
    %c0_18 = arith.constant 0 : index
    %c0_19 = arith.constant 0 : index
    %c0_20 = arith.constant 0 : index
    %8 = vector.load %arg13[%c0_17, %c0_18, %c0_19, %c0_20] : memref<2x18x18x64xf32, #tpu.memory_space<vmem>>, vector<2x1x18x64xf32>
    tpu.vector_store %arg13[%c0_17, %c0_18, %c0_19, %c0_20], %6 {strides = array<i32>} : memref<2x18x18x64xf32, #tpu.memory_space<vmem>>, vector<2x1x18x64xf32>,
    %c0_21 = arith.constant 0 : index
    %c17_22 = arith.constant 17 : index
    %c0_23 = arith.constant 0 : index
    %c0_24 = arith.constant 0 : index
    %9 = vector.load %arg13[%c0_21, %c17_22, %c0_23, %c0_24] : memref<2x18x18x64xf32, #tpu.memory_space<vmem>>, vector<2x1x18x64xf32>
    tpu.vector_store %arg13[%c0_21, %c17_22, %c0_23, %c0_24], %6 {strides = array<i32>} : memref<2x18x18x64xf32, #tpu.memory_space<vmem>>, vector<2x1x18x64xf32>,
    %c0_25 = arith.constant 0 : index
    %c0_26 = arith.constant 0 : index
    %c0_27 = arith.constant 0 : index
    %c0_28 = arith.constant 0 : index
    %10 = vector.load %arg13[%c0_25, %c0_26, %c0_27, %c0_28] : memref<2x18x18x64xf32, #tpu.memory_space<vmem>>, vector<2x18x1x64xf32>
    tpu.vector_store %arg13[%c0_25, %c0_26, %c0_27, %c0_28], %7 {strides = array<i32>} : memref<2x18x18x64xf32, #tpu.memory_space<vmem>>, vector<2x18x1x64xf32>,
    %c0_29 = arith.constant 0 : index
    %c0_30 = arith.constant 0 : index
    %c17_31 = arith.constant 17 : index
    %c0_32 = arith.constant 0 : index
    %11 = vector.load %arg13[%c0_29, %c0_30, %c17_31, %c0_32] : memref<2x18x18x64xf32, #tpu.memory_space<vmem>>, vector<2x18x1x64xf32>
    tpu.vector_store %arg13[%c0_29, %c0_30, %c17_31, %c0_32], %7 {strides = array<i32>} : memref<2x18x18x64xf32, #tpu.memory_space<vmem>>, vector<2x18x1x64xf32>,
    %c0_33 = arith.constant 0 : index
    %c0_34 = arith.constant 0 : index
    %12 = vector.load %arg0[%c0_33, %c0_34] : memref<512x36xf32, #tpu.memory_space<vmem>>, vector<512x36xf32>
    %c0_35 = arith.constant 0 : index
    %c0_36 = arith.constant 0 : index
    %13 = vector.load %arg1[%c0_35, %c0_36] : memref<36x64xf32, #tpu.memory_space<vmem>>, vector<36x64xf32>
    %cst_37 = arith.constant dense<0.000000e+00> : vector<512x64xf32>
    %14 = tpu.matmul %12, %13, %cst_37 {dimension_numbers = #tpu.dot_dimension_numbers<[1], [0], [0], [1], [0, 0, 1, 1], [], []>} : vector<512x36xf32>, vector<36x64xf32>, vector<512x64xf32> -> vector<512x64xf32>
    %c0_38 = arith.constant 0 : index
    %c0_39 = arith.constant 0 : index
    %15 = vector.load %arg2[%c0_38, %c0_39] : memref<1x64xf32, #tpu.memory_space<vmem>>, vector<1x64xf32>
    %16 = vector.broadcast %15 : vector<1x64xf32> to vector<512x64xf32>
    %17 = arith.addf %14, %16 : vector<512x64xf32>
    %cst_40 = arith.constant 0.000000e+00 : f32
    %18 = vector.broadcast %cst_40 : f32 to vector<512x64xf32>
    %19 = arith.maximumf %17, %18 : vector<512x64xf32>
    %cst_41 = arith.constant dense<0.000000e+00> : vector<64xf32>
    %20 = vector.multi_reduction <add>, %19, %cst_41 [0] : vector<512x64xf32> to vector<64xf32>
    %21 = vector.shape_cast %20 : vector<64xf32> to vector<1x64xf32>
    %22 = arith.mulf %19, %19 : vector<512x64xf32>
    %cst_42 = arith.constant dense<0.000000e+00> : vector<64xf32>
    %23 = vector.multi_reduction <add>, %22, %cst_42 [0] : vector<512x64xf32> to vector<64xf32>
    %24 = vector.shape_cast %23 : vector<64xf32> to vector<1x64xf32>
    %cst_43 = arith.constant 0.001953125 : f32
    %25 = vector.broadcast %cst_43 : f32 to vector<1x64xf32>
    %26 = arith.mulf %21, %25 : vector<1x64xf32>
    %cst_44 = arith.constant 0.001953125 : f32
    %27 = vector.broadcast %cst_44 : f32 to vector<1x64xf32>
    %28 = arith.mulf %24, %27 : vector<1x64xf32>
    %29 = arith.mulf %26, %26 : vector<1x64xf32>
    %30 = arith.subf %28, %29 : vector<1x64xf32>
    %cst_45 = arith.constant 9.99999974E-6 : f32
    %31 = vector.broadcast %cst_45 : f32 to vector<1x64xf32>
    %32 = arith.addf %30, %31 : vector<1x64xf32>
    %33 = math.rsqrt %32 : vector<1x64xf32>
    %c0_46 = arith.constant 0 : index
    %c0_47 = arith.constant 0 : index
    %34 = vector.load %arg3[%c0_46, %c0_47] : memref<1x64xf32, #tpu.memory_space<vmem>>, vector<1x64xf32>
    %35 = arith.mulf %33, %34 : vector<1x64xf32>
    %c0_48 = arith.constant 0 : index
    %c0_49 = arith.constant 0 : index
    %36 = vector.load %arg4[%c0_48, %c0_49] : memref<1x64xf32, #tpu.memory_space<vmem>>, vector<1x64xf32>
    %37 = arith.mulf %26, %35 : vector<1x64xf32>
    %38 = arith.subf %36, %37 : vector<1x64xf32>
    %39 = vector.broadcast %35 : vector<1x64xf32> to vector<512x64xf32>
    %40 = arith.mulf %19, %39 : vector<512x64xf32>
    %41 = vector.broadcast %38 : vector<1x64xf32> to vector<512x64xf32>
    %42 = arith.addf %40, %41 : vector<512x64xf32>
    %43 = vector.shape_cast %42 : vector<512x64xf32> to vector<2x16x16x64xf32>
    %c0_50 = arith.constant 0 : index
    %c1 = arith.constant 1 : index
    %c1_51 = arith.constant 1 : index
    %c0_52 = arith.constant 0 : index
    %44 = vector.load %arg12[%c0_50, %c1, %c1_51, %c0_52] : memref<2x18x18x64xf32, #tpu.memory_space<vmem>>, vector<2x16x16x64xf32>
    tpu.vector_store %arg12[%c0_50, %c1, %c1_51, %c0_52], %43 {strides = array<i32>} : memref<2x18x18x64xf32, #tpu.memory_space<vmem>>, vector<2x16x16x64xf32>,
    %c0_53 = arith.constant 0 : index
    %c0_54 = arith.constant 0 : index
    %45 = vector.load %arg6[%c0_53, %c0_54] : memref<1x64xf32, #tpu.memory_space<vmem>>, vector<1x64xf32>
    %46 = vector.shape_cast %45 : vector<1x64xf32> to vector<1x64xf32>
    %47 = vector.broadcast %46 : vector<1x64xf32> to vector<512x64xf32>
    %c0_55 = arith.constant 0 : index
    %c0_56 = arith.constant 0 : index
    %c0_57 = arith.constant 0 : index
    %c0_58 = arith.constant 0 : index
    %48 = vector.load %arg12[%c0_55, %c0_56, %c0_57, %c0_58] : memref<2x18x18x64xf32, #tpu.memory_space<vmem>>, vector<2x16x16x64xf32>
    %49 = vector.shape_cast %48 : vector<2x16x16x64xf32> to vector<512x64xf32>
    %c0_59 = arith.constant 0 : index
    %c0_60 = arith.constant 0 : index
    %50 = vector.load %arg5[%c0_59, %c0_60] : memref<576x64xf32, #tpu.memory_space<vmem>>, vector<64x64xf32>
    %cst_61 = arith.constant dense<0.000000e+00> : vector<512x64xf32>
    %51 = tpu.matmul %49, %50, %cst_61 {dimension_numbers = #tpu.dot_dimension_numbers<[1], [0], [0], [1], [0, 0, 1, 1], [], []>} : vector<512x64xf32>, vector<64x64xf32>, vector<512x64xf32> -> vector<512x64xf32>
    %52 = arith.addf %47, %51 : vector<512x64xf32>
    %c0_62 = arith.constant 0 : index
    %c0_63 = arith.constant 0 : index
    %c1_64 = arith.constant 1 : index
    %c0_65 = arith.constant 0 : index
    %53 = vector.load %arg12[%c0_62, %c0_63, %c1_64, %c0_65] : memref<2x18x18x64xf32, #tpu.memory_space<vmem>>, vector<2x16x16x64xf32>
    %54 = vector.shape_cast %53 : vector<2x16x16x64xf32> to vector<512x64xf32>
    %c64 = arith.constant 64 : index
    %c0_66 = arith.constant 0 : index
    %55 = vector.load %arg5[%c64, %c0_66] : memref<576x64xf32, #tpu.memory_space<vmem>>, vector<64x64xf32>
    %cst_67 = arith.constant dense<0.000000e+00> : vector<512x64xf32>
    %56 = tpu.matmul %54, %55, %cst_67 {dimension_numbers = #tpu.dot_dimension_numbers<[1], [0], [0], [1], [0, 0, 1, 1], [], []>} : vector<512x64xf32>, vector<64x64xf32>, vector<512x64xf32> -> vector<512x64xf32>
    %57 = arith.addf %52, %56 : vector<512x64xf32>
    %c0_68 = arith.constant 0 : index
    %c0_69 = arith.constant 0 : index
    %c2 = arith.constant 2 : index
    %c0_70 = arith.constant 0 : index
    %58 = vector.load %arg12[%c0_68, %c0_69, %c2, %c0_70] : memref<2x18x18x64xf32, #tpu.memory_space<vmem>>, vector<2x16x16x64xf32>
    %59 = vector.shape_cast %58 : vector<2x16x16x64xf32> to vector<512x64xf32>
    %c128 = arith.constant 128 : index
    %c0_71 = arith.constant 0 : index
    %60 = vector.load %arg5[%c128, %c0_71] : memref<576x64xf32, #tpu.memory_space<vmem>>, vector<64x64xf32>
    %cst_72 = arith.constant dense<0.000000e+00> : vector<512x64xf32>
    %61 = tpu.matmul %59, %60, %cst_72 {dimension_numbers = #tpu.dot_dimension_numbers<[1], [0], [0], [1], [0, 0, 1, 1], [], []>} : vector<512x64xf32>, vector<64x64xf32>, vector<512x64xf32> -> vector<512x64xf32>
    %62 = arith.addf %57, %61 : vector<512x64xf32>
    %c0_73 = arith.constant 0 : index
    %c1_74 = arith.constant 1 : index
    %c0_75 = arith.constant 0 : index
    %c0_76 = arith.constant 0 : index
    %63 = vector.load %arg12[%c0_73, %c1_74, %c0_75, %c0_76] : memref<2x18x18x64xf32, #tpu.memory_space<vmem>>, vector<2x16x16x64xf32>
    %64 = vector.shape_cast %63 : vector<2x16x16x64xf32> to vector<512x64xf32>
    %c192 = arith.constant 192 : index
    %c0_77 = arith.constant 0 : index
    %65 = vector.load %arg5[%c192, %c0_77] : memref<576x64xf32, #tpu.memory_space<vmem>>, vector<64x64xf32>
    %cst_78 = arith.constant dense<0.000000e+00> : vector<512x64xf32>
    %66 = tpu.matmul %64, %65, %cst_78 {dimension_numbers = #tpu.dot_dimension_numbers<[1], [0], [0], [1], [0, 0, 1, 1], [], []>} : vector<512x64xf32>, vector<64x64xf32>, vector<512x64xf32> -> vector<512x64xf32>
    %67 = arith.addf %62, %66 : vector<512x64xf32>
    %c0_79 = arith.constant 0 : index
    %c1_80 = arith.constant 1 : index
    %c1_81 = arith.constant 1 : index
    %c0_82 = arith.constant 0 : index
    %68 = vector.load %arg12[%c0_79, %c1_80, %c1_81, %c0_82] : memref<2x18x18x64xf32, #tpu.memory_space<vmem>>, vector<2x16x16x64xf32>
    %69 = vector.shape_cast %68 : vector<2x16x16x64xf32> to vector<512x64xf32>
    %c256 = arith.constant 256 : index
    %c0_83 = arith.constant 0 : index
    %70 = vector.load %arg5[%c256, %c0_83] : memref<576x64xf32, #tpu.memory_space<vmem>>, vector<64x64xf32>
    %cst_84 = arith.constant dense<0.000000e+00> : vector<512x64xf32>
    %71 = tpu.matmul %69, %70, %cst_84 {dimension_numbers = #tpu.dot_dimension_numbers<[1], [0], [0], [1], [0, 0, 1, 1], [], []>} : vector<512x64xf32>, vector<64x64xf32>, vector<512x64xf32> -> vector<512x64xf32>
    %72 = arith.addf %67, %71 : vector<512x64xf32>
    %c0_85 = arith.constant 0 : index
    %c1_86 = arith.constant 1 : index
    %c2_87 = arith.constant 2 : index
    %c0_88 = arith.constant 0 : index
    %73 = vector.load %arg12[%c0_85, %c1_86, %c2_87, %c0_88] : memref<2x18x18x64xf32, #tpu.memory_space<vmem>>, vector<2x16x16x64xf32>
    %74 = vector.shape_cast %73 : vector<2x16x16x64xf32> to vector<512x64xf32>
    %c320 = arith.constant 320 : index
    %c0_89 = arith.constant 0 : index
    %75 = vector.load %arg5[%c320, %c0_89] : memref<576x64xf32, #tpu.memory_space<vmem>>, vector<64x64xf32>
    %cst_90 = arith.constant dense<0.000000e+00> : vector<512x64xf32>
    %76 = tpu.matmul %74, %75, %cst_90 {dimension_numbers = #tpu.dot_dimension_numbers<[1], [0], [0], [1], [0, 0, 1, 1], [], []>} : vector<512x64xf32>, vector<64x64xf32>, vector<512x64xf32> -> vector<512x64xf32>
    %77 = arith.addf %72, %76 : vector<512x64xf32>
    %c0_91 = arith.constant 0 : index
    %c2_92 = arith.constant 2 : index
    %c0_93 = arith.constant 0 : index
    %c0_94 = arith.constant 0 : index
    %78 = vector.load %arg12[%c0_91, %c2_92, %c0_93, %c0_94] : memref<2x18x18x64xf32, #tpu.memory_space<vmem>>, vector<2x16x16x64xf32>
    %79 = vector.shape_cast %78 : vector<2x16x16x64xf32> to vector<512x64xf32>
    %c384 = arith.constant 384 : index
    %c0_95 = arith.constant 0 : index
    %80 = vector.load %arg5[%c384, %c0_95] : memref<576x64xf32, #tpu.memory_space<vmem>>, vector<64x64xf32>
    %cst_96 = arith.constant dense<0.000000e+00> : vector<512x64xf32>
    %81 = tpu.matmul %79, %80, %cst_96 {dimension_numbers = #tpu.dot_dimension_numbers<[1], [0], [0], [1], [0, 0, 1, 1], [], []>} : vector<512x64xf32>, vector<64x64xf32>, vector<512x64xf32> -> vector<512x64xf32>
    %82 = arith.addf %77, %81 : vector<512x64xf32>
    %c0_97 = arith.constant 0 : index
    %c2_98 = arith.constant 2 : index
    %c1_99 = arith.constant 1 : index
    %c0_100 = arith.constant 0 : index
    %83 = vector.load %arg12[%c0_97, %c2_98, %c1_99, %c0_100] : memref<2x18x18x64xf32, #tpu.memory_space<vmem>>, vector<2x16x16x64xf32>
    %84 = vector.shape_cast %83 : vector<2x16x16x64xf32> to vector<512x64xf32>
    %c448 = arith.constant 448 : index
    %c0_101 = arith.constant 0 : index
    %85 = vector.load %arg5[%c448, %c0_101] : memref<576x64xf32, #tpu.memory_space<vmem>>, vector<64x64xf32>
    %cst_102 = arith.constant dense<0.000000e+00> : vector<512x64xf32>
    %86 = tpu.matmul %84, %85, %cst_102 {dimension_numbers = #tpu.dot_dimension_numbers<[1], [0], [0], [1], [0, 0, 1, 1], [], []>} : vector<512x64xf32>, vector<64x64xf32>, vector<512x64xf32> -> vector<512x64xf32>
    %87 = arith.addf %82, %86 : vector<512x64xf32>
    %c0_103 = arith.constant 0 : index
    %c2_104 = arith.constant 2 : index
    %c2_105 = arith.constant 2 : index
    %c0_106 = arith.constant 0 : index
    %88 = vector.load %arg12[%c0_103, %c2_104, %c2_105, %c0_106] : memref<2x18x18x64xf32, #tpu.memory_space<vmem>>, vector<2x16x16x64xf32>
    %89 = vector.shape_cast %88 : vector<2x16x16x64xf32> to vector<512x64xf32>
    %c512 = arith.constant 512 : index
    %c0_107 = arith.constant 0 : index
    %90 = vector.load %arg5[%c512, %c0_107] : memref<576x64xf32, #tpu.memory_space<vmem>>, vector<64x64xf32>
    %cst_108 = arith.constant dense<0.000000e+00> : vector<512x64xf32>
    %91 = tpu.matmul %89, %90, %cst_108 {dimension_numbers = #tpu.dot_dimension_numbers<[1], [0], [0], [1], [0, 0, 1, 1], [], []>} : vector<512x64xf32>, vector<64x64xf32>, vector<512x64xf32> -> vector<512x64xf32>
    %92 = arith.addf %87, %91 : vector<512x64xf32>
    %cst_109 = arith.constant 0.000000e+00 : f32
    %93 = vector.broadcast %cst_109 : f32 to vector<512x64xf32>
    %94 = arith.maximumf %92, %93 : vector<512x64xf32>
    %cst_110 = arith.constant dense<0.000000e+00> : vector<64xf32>
    %95 = vector.multi_reduction <add>, %94, %cst_110 [0] : vector<512x64xf32> to vector<64xf32>
    %96 = vector.shape_cast %95 : vector<64xf32> to vector<1x64xf32>
    %97 = arith.mulf %94, %94 : vector<512x64xf32>
    %cst_111 = arith.constant dense<0.000000e+00> : vector<64xf32>
    %98 = vector.multi_reduction <add>, %97, %cst_111 [0] : vector<512x64xf32> to vector<64xf32>
    %99 = vector.shape_cast %98 : vector<64xf32> to vector<1x64xf32>
    %cst_112 = arith.constant 0.001953125 : f32
    %100 = vector.broadcast %cst_112 : f32 to vector<1x64xf32>
    %101 = arith.mulf %96, %100 : vector<1x64xf32>
    %cst_113 = arith.constant 0.001953125 : f32
    %102 = vector.broadcast %cst_113 : f32 to vector<1x64xf32>
    %103 = arith.mulf %99, %102 : vector<1x64xf32>
    %104 = arith.mulf %101, %101 : vector<1x64xf32>
    %105 = arith.subf %103, %104 : vector<1x64xf32>
    %cst_114 = arith.constant 9.99999974E-6 : f32
    %106 = vector.broadcast %cst_114 : f32 to vector<1x64xf32>
    %107 = arith.addf %105, %106 : vector<1x64xf32>
    %108 = math.rsqrt %107 : vector<1x64xf32>
    %c0_115 = arith.constant 0 : index
    %c0_116 = arith.constant 0 : index
    %109 = vector.load %arg7[%c0_115, %c0_116] : memref<1x64xf32, #tpu.memory_space<vmem>>, vector<1x64xf32>
    %110 = arith.mulf %108, %109 : vector<1x64xf32>
    %c0_117 = arith.constant 0 : index
    %c0_118 = arith.constant 0 : index
    %111 = vector.load %arg8[%c0_117, %c0_118] : memref<1x64xf32, #tpu.memory_space<vmem>>, vector<1x64xf32>
    %112 = arith.mulf %101, %110 : vector<1x64xf32>
    %113 = arith.subf %111, %112 : vector<1x64xf32>
    %114 = vector.broadcast %110 : vector<1x64xf32> to vector<512x64xf32>
    %115 = arith.mulf %94, %114 : vector<512x64xf32>
    %116 = vector.broadcast %113 : vector<1x64xf32> to vector<512x64xf32>
    %117 = arith.addf %115, %116 : vector<512x64xf32>
    %118 = vector.shape_cast %117 : vector<512x64xf32> to vector<2x16x16x64xf32>
    %c0_119 = arith.constant 0 : index
    %c1_120 = arith.constant 1 : index
    %c1_121 = arith.constant 1 : index
    %c0_122 = arith.constant 0 : index
    %119 = vector.load %arg13[%c0_119, %c1_120, %c1_121, %c0_122] : memref<2x18x18x64xf32, #tpu.memory_space<vmem>>, vector<2x16x16x64xf32>
    tpu.vector_store %arg13[%c0_119, %c1_120, %c1_121, %c0_122], %118 {strides = array<i32>} : memref<2x18x18x64xf32, #tpu.memory_space<vmem>>, vector<2x16x16x64xf32>,
    %c0_123 = arith.constant 0 : index
    %c0_124 = arith.constant 0 : index
    %120 = vector.load %arg10[%c0_123, %c0_124] : memref<1x128xf32, #tpu.memory_space<vmem>>, vector<1x128xf32>
    %121 = vector.shape_cast %120 : vector<1x128xf32> to vector<1x128xf32>
    %122 = vector.broadcast %121 : vector<1x128xf32> to vector<512x128xf32>
    %c0_125 = arith.constant 0 : index
    %c0_126 = arith.constant 0 : index
    %c0_127 = arith.constant 0 : index
    %c0_128 = arith.constant 0 : index
    %123 = vector.load %arg13[%c0_125, %c0_126, %c0_127, %c0_128] : memref<2x18x18x64xf32, #tpu.memory_space<vmem>>, vector<2x16x16x64xf32>
    %124 = vector.shape_cast %123 : vector<2x16x16x64xf32> to vector<512x64xf32>
    %c0_129 = arith.constant 0 : index
    %c0_130 = arith.constant 0 : index
    %125 = vector.load %arg9[%c0_129, %c0_130] : memref<576x128xf32, #tpu.memory_space<vmem>>, vector<64x128xf32>
    %cst_131 = arith.constant dense<0.000000e+00> : vector<512x128xf32>
    %126 = tpu.matmul %124, %125, %cst_131 {dimension_numbers = #tpu.dot_dimension_numbers<[1], [0], [0], [1], [0, 0, 1, 1], [], []>} : vector<512x64xf32>, vector<64x128xf32>, vector<512x128xf32> -> vector<512x128xf32>
    %127 = arith.addf %122, %126 : vector<512x128xf32>
    %c0_132 = arith.constant 0 : index
    %c0_133 = arith.constant 0 : index
    %c1_134 = arith.constant 1 : index
    %c0_135 = arith.constant 0 : index
    %128 = vector.load %arg13[%c0_132, %c0_133, %c1_134, %c0_135] : memref<2x18x18x64xf32, #tpu.memory_space<vmem>>, vector<2x16x16x64xf32>
    %129 = vector.shape_cast %128 : vector<2x16x16x64xf32> to vector<512x64xf32>
    %c64_136 = arith.constant 64 : index
    %c0_137 = arith.constant 0 : index
    %130 = vector.load %arg9[%c64_136, %c0_137] : memref<576x128xf32, #tpu.memory_space<vmem>>, vector<64x128xf32>
    %cst_138 = arith.constant dense<0.000000e+00> : vector<512x128xf32>
    %131 = tpu.matmul %129, %130, %cst_138 {dimension_numbers = #tpu.dot_dimension_numbers<[1], [0], [0], [1], [0, 0, 1, 1], [], []>} : vector<512x64xf32>, vector<64x128xf32>, vector<512x128xf32> -> vector<512x128xf32>
    %132 = arith.addf %127, %131 : vector<512x128xf32>
    %c0_139 = arith.constant 0 : index
    %c0_140 = arith.constant 0 : index
    %c2_141 = arith.constant 2 : index
    %c0_142 = arith.constant 0 : index
    %133 = vector.load %arg13[%c0_139, %c0_140, %c2_141, %c0_142] : memref<2x18x18x64xf32, #tpu.memory_space<vmem>>, vector<2x16x16x64xf32>
    %134 = vector.shape_cast %133 : vector<2x16x16x64xf32> to vector<512x64xf32>
    %c128_143 = arith.constant 128 : index
    %c0_144 = arith.constant 0 : index
    %135 = vector.load %arg9[%c128_143, %c0_144] : memref<576x128xf32, #tpu.memory_space<vmem>>, vector<64x128xf32>
    %cst_145 = arith.constant dense<0.000000e+00> : vector<512x128xf32>
    %136 = tpu.matmul %134, %135, %cst_145 {dimension_numbers = #tpu.dot_dimension_numbers<[1], [0], [0], [1], [0, 0, 1, 1], [], []>} : vector<512x64xf32>, vector<64x128xf32>, vector<512x128xf32> -> vector<512x128xf32>
    %137 = arith.addf %132, %136 : vector<512x128xf32>
    %c0_146 = arith.constant 0 : index
    %c1_147 = arith.constant 1 : index
    %c0_148 = arith.constant 0 : index
    %c0_149 = arith.constant 0 : index
    %138 = vector.load %arg13[%c0_146, %c1_147, %c0_148, %c0_149] : memref<2x18x18x64xf32, #tpu.memory_space<vmem>>, vector<2x16x16x64xf32>
    %139 = vector.shape_cast %138 : vector<2x16x16x64xf32> to vector<512x64xf32>
    %c192_150 = arith.constant 192 : index
    %c0_151 = arith.constant 0 : index
    %140 = vector.load %arg9[%c192_150, %c0_151] : memref<576x128xf32, #tpu.memory_space<vmem>>, vector<64x128xf32>
    %cst_152 = arith.constant dense<0.000000e+00> : vector<512x128xf32>
    %141 = tpu.matmul %139, %140, %cst_152 {dimension_numbers = #tpu.dot_dimension_numbers<[1], [0], [0], [1], [0, 0, 1, 1], [], []>} : vector<512x64xf32>, vector<64x128xf32>, vector<512x128xf32> -> vector<512x128xf32>
    %142 = arith.addf %137, %141 : vector<512x128xf32>
    %c0_153 = arith.constant 0 : index
    %c1_154 = arith.constant 1 : index
    %c1_155 = arith.constant 1 : index
    %c0_156 = arith.constant 0 : index
    %143 = vector.load %arg13[%c0_153, %c1_154, %c1_155, %c0_156] : memref<2x18x18x64xf32, #tpu.memory_space<vmem>>, vector<2x16x16x64xf32>
    %144 = vector.shape_cast %143 : vector<2x16x16x64xf32> to vector<512x64xf32>
    %c256_157 = arith.constant 256 : index
    %c0_158 = arith.constant 0 : index
    %145 = vector.load %arg9[%c256_157, %c0_158] : memref<576x128xf32, #tpu.memory_space<vmem>>, vector<64x128xf32>
    %cst_159 = arith.constant dense<0.000000e+00> : vector<512x128xf32>
    %146 = tpu.matmul %144, %145, %cst_159 {dimension_numbers = #tpu.dot_dimension_numbers<[1], [0], [0], [1], [0, 0, 1, 1], [], []>} : vector<512x64xf32>, vector<64x128xf32>, vector<512x128xf32> -> vector<512x128xf32>
    %147 = arith.addf %142, %146 : vector<512x128xf32>
    %c0_160 = arith.constant 0 : index
    %c1_161 = arith.constant 1 : index
    %c2_162 = arith.constant 2 : index
    %c0_163 = arith.constant 0 : index
    %148 = vector.load %arg13[%c0_160, %c1_161, %c2_162, %c0_163] : memref<2x18x18x64xf32, #tpu.memory_space<vmem>>, vector<2x16x16x64xf32>
    %149 = vector.shape_cast %148 : vector<2x16x16x64xf32> to vector<512x64xf32>
    %c320_164 = arith.constant 320 : index
    %c0_165 = arith.constant 0 : index
    %150 = vector.load %arg9[%c320_164, %c0_165] : memref<576x128xf32, #tpu.memory_space<vmem>>, vector<64x128xf32>
    %cst_166 = arith.constant dense<0.000000e+00> : vector<512x128xf32>
    %151 = tpu.matmul %149, %150, %cst_166 {dimension_numbers = #tpu.dot_dimension_numbers<[1], [0], [0], [1], [0, 0, 1, 1], [], []>} : vector<512x64xf32>, vector<64x128xf32>, vector<512x128xf32> -> vector<512x128xf32>
    %152 = arith.addf %147, %151 : vector<512x128xf32>
    %c0_167 = arith.constant 0 : index
    %c2_168 = arith.constant 2 : index
    %c0_169 = arith.constant 0 : index
    %c0_170 = arith.constant 0 : index
    %153 = vector.load %arg13[%c0_167, %c2_168, %c0_169, %c0_170] : memref<2x18x18x64xf32, #tpu.memory_space<vmem>>, vector<2x16x16x64xf32>
    %154 = vector.shape_cast %153 : vector<2x16x16x64xf32> to vector<512x64xf32>
    %c384_171 = arith.constant 384 : index
    %c0_172 = arith.constant 0 : index
    %155 = vector.load %arg9[%c384_171, %c0_172] : memref<576x128xf32, #tpu.memory_space<vmem>>, vector<64x128xf32>
    %cst_173 = arith.constant dense<0.000000e+00> : vector<512x128xf32>
    %156 = tpu.matmul %154, %155, %cst_173 {dimension_numbers = #tpu.dot_dimension_numbers<[1], [0], [0], [1], [0, 0, 1, 1], [], []>} : vector<512x64xf32>, vector<64x128xf32>, vector<512x128xf32> -> vector<512x128xf32>
    %157 = arith.addf %152, %156 : vector<512x128xf32>
    %c0_174 = arith.constant 0 : index
    %c2_175 = arith.constant 2 : index
    %c1_176 = arith.constant 1 : index
    %c0_177 = arith.constant 0 : index
    %158 = vector.load %arg13[%c0_174, %c2_175, %c1_176, %c0_177] : memref<2x18x18x64xf32, #tpu.memory_space<vmem>>, vector<2x16x16x64xf32>
    %159 = vector.shape_cast %158 : vector<2x16x16x64xf32> to vector<512x64xf32>
    %c448_178 = arith.constant 448 : index
    %c0_179 = arith.constant 0 : index
    %160 = vector.load %arg9[%c448_178, %c0_179] : memref<576x128xf32, #tpu.memory_space<vmem>>, vector<64x128xf32>
    %cst_180 = arith.constant dense<0.000000e+00> : vector<512x128xf32>
    %161 = tpu.matmul %159, %160, %cst_180 {dimension_numbers = #tpu.dot_dimension_numbers<[1], [0], [0], [1], [0, 0, 1, 1], [], []>} : vector<512x64xf32>, vector<64x128xf32>, vector<512x128xf32> -> vector<512x128xf32>
    %162 = arith.addf %157, %161 : vector<512x128xf32>
    %c0_181 = arith.constant 0 : index
    %c2_182 = arith.constant 2 : index
    %c2_183 = arith.constant 2 : index
    %c0_184 = arith.constant 0 : index
    %163 = vector.load %arg13[%c0_181, %c2_182, %c2_183, %c0_184] : memref<2x18x18x64xf32, #tpu.memory_space<vmem>>, vector<2x16x16x64xf32>
    %164 = vector.shape_cast %163 : vector<2x16x16x64xf32> to vector<512x64xf32>
    %c512_185 = arith.constant 512 : index
    %c0_186 = arith.constant 0 : index
    %165 = vector.load %arg9[%c512_185, %c0_186] : memref<576x128xf32, #tpu.memory_space<vmem>>, vector<64x128xf32>
    %cst_187 = arith.constant dense<0.000000e+00> : vector<512x128xf32>
    %166 = tpu.matmul %164, %165, %cst_187 {dimension_numbers = #tpu.dot_dimension_numbers<[1], [0], [0], [1], [0, 0, 1, 1], [], []>} : vector<512x64xf32>, vector<64x128xf32>, vector<512x128xf32> -> vector<512x128xf32>
    %167 = arith.addf %162, %166 : vector<512x128xf32>
    %c0_188 = arith.constant 0 : index
    %c0_189 = arith.constant 0 : index
    %168 = vector.load %arg11[%c0_188, %c0_189] : memref<512x128xf32, #tpu.memory_space<vmem>>, vector<512x128xf32>
    tpu.vector_store %arg11[%c0_188, %c0_189], %167 {strides = array<i32>} : memref<512x128xf32, #tpu.memory_space<vmem>>, vector<512x128xf32>,
    return
  }
}

</mosaic_0001>

<bundles_post_ra>
// kernel: generator_one_forward.1
= control target key start
LH: loop header
LB: loop body
LE: loop exit
PB: predicated region body
PF: predicated region fallthrough
CT: control target
= control target key end

     0   :  { %vm287_vm0 = vcmask 293888   ;;  %vm480_vm1 = vcmask 1043456   ;;  %vm38_vm2 = vcmask 523264   ;;  %vm53_vm3 = vcmask 516096   ;;  %s27352_s1 = inlined_call_operand.vmem [shape: f32[36,64], index: 1, kind: input, shape index: {}]   ;;  %s27353_s0 = inlined_call_operand.vmem [shape: f32[512,36], index: 0, kind: input, shape index: {}]   ;;  %s27354_s2 = inlined_call_operand.vmem [shape: f32[1,64], index: 2, kind: input, shape index: {}]   ;;  %s27355_s5 = inlined_call_operand.vmem [shape: f32[576,64], index: 5, kind: input, shape index: {}]   ;;  %s27356_s3 = inlined_call_operand.vmem [shape: f32[1,64], index: 3, kind: input, shape index: {}]   ;;  %s27357_s4 = inlined_call_operand.vmem [shape: f32[1,64], index: 4, kind: input, shape index: {}]   ;;  %s27358_s6 = inlined_call_operand.vmem [shape: f32[1,64], index: 6, kind: input, shape index: {}]   ;;  %s27359_s9 = inlined_call_operand.vmem [shape: f32[576,128], index: 9, kind: input, shape index: {}]   ;;  %s27360_s7 = inlined_call_operand.vmem [shape: f32[1,64], index: 7, kind: input, shape index: {}]   ;;  %s27361_s8 = inlined_call_operand.vmem [shape: f32[1,64], index: 8, kind: input, shape index: {}]   ;;  %s27362_s10 = inlined_call_operand.vmem [shape: f32[1,128], index: 10, kind: input, shape index: {}]   ;;  %s27363_s11 = inlined_call_operand.vmem [shape: f32[512,128], index: 11, kind: output, shape index: {}]  }
   0x1   :  { %v275_v0 = vld [vmem:[%s27352_s1] sm:$0xff]  ;;  %v276_v1 = vld [vmem:[%s27352_s1 + $0x8] sm:$0xff]  ;;  %v277_v2 = vld [vmem:[%s27352_s1 + $0x10] sm:$0xff]  ;;  %vm41_vm4 = vcmask 517120  }
   0x2   :  { %v19710_v3 = vpack.c.bf16 %v276_v1, %v275_v0  ;;  %v278_v4 = vld [vmem:[%s27352_s1 + $0x18] sm:$0xff]  ;;  %v211_v5 = vld [vmem:[%s27353_s0] sm:$0xff]  ;;  %v212_v8 = vld [vmem:[%s27353_s0 + $0x8] sm:$0xff] }
   0x3   :  { %v19714_v6 = vpack.c.bf16 %v278_v4, %v277_v2  ;;  %17598 = vmatprep.mubr.msk.f32.mxu0 %vm287_vm0, %v211_v5  ;;  %v279_v7 = vld [vmem:[%s27352_s1 + $0x20] sm:$0xf]  ;;  %v213_v9 = vld [vmem:[%s27353_s0 + $0x10] sm:$0xff]  ;;  %v244_v11 = vld [vmem:[%s27353_s0 + $0x108] sm:$0xff] }
   0x4   :  { %19711 = vmatprep.subr.bf16.mxu0 %v19710_v3  ;;  %20006 = vmatprep.subr.bf16.mxu1 %v19710_v3  ;;  %v243_v10 = vld [vmem:[%s27353_s0 + $0x100] sm:$0xff]  ;;  %v245_v12 = vld [vmem:[%s27353_s0 + $0x110] sm:$0xff]  ;;  %v214_v13 = vld [vmem:[%s27353_s0 + $0x18] sm:$0xff] }
   0x5   :  { %19713 = vmatpush3.bf16.msra.mxu0 %v19710_v3  ;;  %20009 = vmatpush3.bf16.msra.mxu1 %v19710_v3  ;;  %v215_v14 = vld [vmem:[%s27353_s0 + $0x20] sm:$0xff]  ;;  %v246_v15 = vld [vmem:[%s27353_s0 + $0x118] sm:$0xff]  ;;  %v216_v17 = vld [vmem:[%s27353_s0 + $0x28] sm:$0xff] }
   0x6   :  { %19715 = vmatprep.subr.bf16.mxu0 %v19714_v6  ;;  %20007 = vmatprep.subr.bf16.mxu1 %v19714_v6  ;;  %v247_v16 = vld [vmem:[%s27353_s0 + $0x120] sm:$0xff]  ;;  %v217_v18 = vld [vmem:[%s27353_s0 + $0x30] sm:$0xff]  ;;  %v248_v19 = vld [vmem:[%s27353_s0 + $0x128] sm:$0xff] }
   0x7   :  { %17646 = vmatprep.mubr.msk.f32.mxu1 %vm287_vm0, %v243_v10  ;;  %v249_v20 = vld [vmem:[%s27353_s0 + $0x130] sm:$0xff]  ;;  %v218_v21 = vld [vmem:[%s27353_s0 + $0x38] sm:$0xff]  ;;  %v219_v22 = vld [vmem:[%s27353_s0 + $0x40] sm:$0xff] }
   0x8   :  { %v250_v23 = vld [vmem:[%s27353_s0 + $0x138] sm:$0xff]  ;;  %v251_v24 = vld [vmem:[%s27353_s0 + $0x140] sm:$0xff]  ;;  %v220_v25 = vld [vmem:[%s27353_s0 + $0x48] sm:$0xff] }
   0x9   :  { %19717 = vmatpush3.bf16.msra.mxu0 %v19714_v6  ;;  %20010 = vmatpush3.bf16.msra.mxu1 %v19714_v6  ;;  %v221_v26 = vld [vmem:[%s27353_s0 + $0x50] sm:$0xff]  ;;  %v252_v27 = vld [vmem:[%s27353_s0 + $0x148] sm:$0xff]  ;;  %v222_v29 = vld [vmem:[%s27353_s0 + $0x58] sm:$0xff] }
   0xa   :  { %17596 = vmatprep.subr.msk.mxu0 %vm480_vm1, %v279_v7  ;;  %20008 = vmatprep.subr.msk.mxu1 %vm480_vm1, %v279_v7  ;;  %v253_v28 = vld [vmem:[%s27353_s0 + $0x150] sm:$0xff]  ;;  %v223_v30 = vld [vmem:[%s27353_s0 + $0x60] sm:$0xff]  ;;  %v254_v31 = vld [vmem:[%s27353_s0 + $0x158] sm:$0xff] }
   0xb   :  { %v255_v32 = vld [vmem:[%s27353_s0 + $0x160] sm:$0xff]  ;;  %v224_v33 = vld [vmem:[%s27353_s0 + $0x68] sm:$0xff]  ;;  %v225_v34 = vld [vmem:[%s27353_s0 + $0x70] sm:$0xff] }
   0xc   :  { %v256_v35 = vld [vmem:[%s27353_s0 + $0x168] sm:$0xff]  ;;  %v257_v36 = vld [vmem:[%s27353_s0 + $0x170] sm:$0xff]  ;;  %v226_v37 = vld [vmem:[%s27353_s0 + $0x78] sm:$0xff] }
   0xd   :  { %17597 = vmatpush3.msk.msra.mxu0 %vm480_vm1, %v279_v7  ;;  %20011 = vmatpush3.msk.msra.mxu1 %vm480_vm1, %v279_v7  ;;  %v227_v38 = vld [vmem:[%s27353_s0 + $0x80] sm:$0xff]  ;;  %v258_v39 = vld [vmem:[%s27353_s0 + $0x178] sm:$0xff]  ;;  %v228_v41 = vld [vmem:[%s27353_s0 + $0x88] sm:$0xff] }
   0xe   :  { %17599 = vmatmul.mubr.msk.f32.vlgmr.msra.gmra.mrb[0].mxu0 %vm287_vm0, %v212_v8  ;;  %17647 = vmatmul.mubr.msk.f32.vlgmr.msra.gmra.mrb[0].mxu1 %vm287_vm0, %v244_v11  ;;  %v259_v40 = vld [vmem:[%s27353_s0 + $0x180] sm:$0xff]  ;;  %v229_v42 = vld [vmem:[%s27353_s0 + $0x90] sm:$0xff]  ;;  %v260_v43 = vld [vmem:[%s27353_s0 + $0x188] sm:$0xff] }
   0xf   :  { %17601 = vmatprep.mubr.msk.f32.mxu0 %vm287_vm0, %v213_v9  ;;  %17649 = vmatprep.mubr.msk.f32.mxu1 %vm287_vm0, %v245_v12  ;;  %v261_v44 = vld [vmem:[%s27353_s0 + $0x190] sm:$0xff]  ;;  %v230_v45 = vld [vmem:[%s27353_s0 + $0x98] sm:$0xff]  ;;  %v231_v46 = vld [vmem:[%s27353_s0 + $0xa0] sm:$0xff] }
  0x10   :  { %v262_v47 = vld [vmem:[%s27353_s0 + $0x198] sm:$0xff]  ;;  %v263_v48 = vld [vmem:[%s27353_s0 + $0x1a0] sm:$0xff]  ;;  %v232_v49 = vld [vmem:[%s27353_s0 + $0xa8] sm:$0xff] }
  0x11   :  { %v233_v50 = vld [vmem:[%s27353_s0 + $0xb0] sm:$0xff]  ;;  %v264_v51 = vld [vmem:[%s27353_s0 + $0x1a8] sm:$0xff]  ;;  %v234_v53 = vld [vmem:[%s27353_s0 + $0xb8] sm:$0xff] }
  0x12   :  { %17602 = vmatmul.mubr.msk.f32.gmra.mrb[2].mxu0 %vm287_vm0, %v214_v13  ;;  %17650 = vmatmul.mubr.msk.f32.gmra.mrb[2].mxu1 %vm287_vm0, %v246_v15  ;;  %v265_v52 = vld [vmem:[%s27353_s0 + $0x1b0] sm:$0xff]  ;;  %v235_v54 = vld [vmem:[%s27353_s0 + $0xc0] sm:$0xff]  ;;  %v266_v55 = vld [vmem:[%s27353_s0 + $0x1b8] sm:$0xff] }
  0x13   :  { %17604 = vmatprep.mubr.msk.f32.mxu0 %vm287_vm0, %v215_v14  ;;  %17652 = vmatprep.mubr.msk.f32.mxu1 %vm287_vm0, %v247_v16  ;;  %v267_v56 = vld [vmem:[%s27353_s0 + $0x1c0] sm:$0xff]  ;;  %v236_v57 = vld [vmem:[%s27353_s0 + $0xc8] sm:$0xff]  ;;  %v237_v58 = vld [vmem:[%s27353_s0 + $0xd0] sm:$0xff] }
  0x14   :  { %v268_v59 = vld [vmem:[%s27353_s0 + $0x1c8] sm:$0xff]  ;;  %v269_v60 = vld [vmem:[%s27353_s0 + $0x1d0] sm:$0xff]  ;;  %v238_v61 = vld [vmem:[%s27353_s0 + $0xd8] sm:$0xff] }
  0x15   :  { %v239_v62 = vld [vmem:[%s27353_s0 + $0xe0] sm:$0xff]  ;;  %v270_v63 = vld [vmem:[%s27353_s0 + $0x1d8] sm:$0xff]  ;;  %v240_v1 = vld [vmem:[%s27353_s0 + $0xe8] sm:$0xff] }
  0x16   :  { %17605 = vmatmul.mubr.msk.f32.gmra.mrb[4].mxu0 %vm287_vm0, %v216_v17  ;;  %17653 = vmatmul.mubr.msk.f32.gmra.mrb[4].mxu1 %vm287_vm0, %v248_v19  ;;  %v271_v0 = vld [vmem:[%s27353_s0 + $0x1e0] sm:$0xff]  ;;  %v241_v2 = vld [vmem:[%s27353_s0 + $0xf0] sm:$0xff]  ;;  %v272_v3 = vld [vmem:[%s27353_s0 + $0x1e8] sm:$0xff] }
  0x17   :  { %17607 = vmatprep.mubr.msk.f32.mxu0 %vm287_vm0, %v217_v18  ;;  %17655 = vmatprep.mubr.msk.f32.mxu1 %vm287_vm0, %v249_v20  ;;  %v273_v4 = vld [vmem:[%s27353_s0 + $0x1f0] sm:$0xff]  ;;  %v242_v5 = vld [vmem:[%s27353_s0 + $0xf8] sm:$0xff]  ;;  %v21506_v7 = vld [vmem:[%s27354_s2] ss:$0 sm:$0xff] }
  0x18   :  { %v274_v6 = vld [vmem:[%s27353_s0 + $0x1f8] sm:$0xff]  ;;  %v1548_v8 = vld [vmem:[%s27355_s5] sm:$0xff]  ;;  %v1549_v9 = vld [vmem:[%s27355_s5 + $0x8] sm:$0xff] }
  0x19   :  { %v19718_v11 = vpack.c.bf16 %v1549_v9, %v1548_v8 }
  0x1a   :  { %17608 = vmatmul.mubr.msk.f32.gmra.mrb[6].mxu0 %vm287_vm0, %v218_v21  ;;  %17656 = vmatmul.mubr.msk.f32.gmra.mrb[6].mxu1 %vm287_vm0, %v250_v23 }
  0x1b   :  { %17610 = vmatprep.mubr.msk.f32.mxu0 %vm287_vm0, %v219_v22  ;;  %17658 = vmatprep.mubr.msk.f32.mxu1 %vm287_vm0, %v251_v24 }
  0x1c   :  { %19719 = vmatprep.subr.bf16.mxu1 %v19718_v11 }
  0x1d   :  { %19721 = vmatpush3.bf16.msra.mxu1 %v19718_v11 }
  0x1e   :  { %17611 = vmatmul.mubr.msk.f32.gmra.mrb[8].mxu0 %vm287_vm0, %v220_v25  ;;  %17659 = vmatmul.mubr.msk.f32.gmra.mrb[8].mxu1 %vm287_vm0, %v252_v27 }
  0x1f   :  { %17613 = vmatprep.mubr.msk.f32.mxu0 %vm287_vm0, %v221_v26  ;;  %17661 = vmatprep.mubr.msk.f32.mxu1 %vm287_vm0, %v253_v28 }
  0x22   :  { %17614 = vmatmul.mubr.msk.f32.gmra.mrb[10].mxu0 %vm287_vm0, %v222_v29  ;;  %17662 = vmatmul.mubr.msk.f32.gmra.mrb[10].mxu1 %vm287_vm0, %v254_v31 }
  0x23   :  { %17616 = vmatprep.mubr.msk.f32.mxu0 %vm287_vm0, %v223_v30  ;;  %17664 = vmatprep.mubr.msk.f32.mxu1 %vm287_vm0, %v255_v32 }
  0x26   :  { %17617 = vmatmul.mubr.msk.f32.gmra.mrb[12].mxu0 %vm287_vm0, %v224_v33  ;;  %17665 = vmatmul.mubr.msk.f32.gmra.mrb[12].mxu1 %vm287_vm0, %v256_v35 }
  0x27   :  { %17619 = vmatprep.mubr.msk.f32.mxu0 %vm287_vm0, %v225_v34  ;;  %17667 = vmatprep.mubr.msk.f32.mxu1 %vm287_vm0, %v257_v36 }
  0x2a   :  { %17620 = vmatmul.mubr.msk.f32.gmra.mrb[14].mxu0 %vm287_vm0, %v226_v37  ;;  %17668 = vmatmul.mubr.msk.f32.gmra.mrb[14].mxu1 %vm287_vm0, %v258_v39 }
  0x2b   :  { %17622 = vmatprep.mubr.msk.f32.mxu0 %vm287_vm0, %v227_v38  ;;  %17670 = vmatprep.mubr.msk.f32.mxu1 %vm287_vm0, %v259_v40 }
  0x2e   :  { %17623 = vmatmul.mubr.msk.f32.gmra.mrb[16].mxu0 %vm287_vm0, %v228_v41  ;;  %17671 = vmatmul.mubr.msk.f32.gmra.mrb[16].mxu1 %vm287_vm0, %v260_v43 }
  0x2f   :  { %17625 = vmatprep.mubr.msk.f32.mxu0 %vm287_vm0, %v229_v42  ;;  %17673 = vmatprep.mubr.msk.f32.mxu1 %vm287_vm0, %v261_v44 }
  0x32   :  { %17626 = vmatmul.mubr.msk.f32.gmra.mrb[18].mxu0 %vm287_vm0, %v230_v45  ;;  %17674 = vmatmul.mubr.msk.f32.gmra.mrb[18].mxu1 %vm287_vm0, %v262_v47 }
  0x33   :  { %17628 = vmatprep.mubr.msk.f32.mxu0 %vm287_vm0, %v231_v46  ;;  %17676 = vmatprep.mubr.msk.f32.mxu1 %vm287_vm0, %v263_v48 }
  0x36   :  { %17629 = vmatmul.mubr.msk.f32.gmra.mrb[20].mxu0 %vm287_vm0, %v232_v49  ;;  %17677 = vmatmul.mubr.msk.f32.gmra.mrb[20].mxu1 %vm287_vm0, %v264_v51 }
  0x37   :  { %17631 = vmatprep.mubr.msk.f32.mxu0 %vm287_vm0, %v233_v50  ;;  %17679 = vmatprep.mubr.msk.f32.mxu1 %vm287_vm0, %v265_v52 }
  0x3a   :  { %17632 = vmatmul.mubr.msk.f32.gmra.mrb[22].mxu0 %vm287_vm0, %v234_v53  ;;  %17680 = vmatmul.mubr.msk.f32.gmra.mrb[22].mxu1 %vm287_vm0, %v266_v55 }
  0x3b   :  { %17634 = vmatprep.mubr.msk.f32.mxu0 %vm287_vm0, %v235_v54  ;;  %17682 = vmatprep.mubr.msk.f32.mxu1 %vm287_vm0, %v267_v56 }
  0x3e   :  { %17635 = vmatmul.mubr.msk.f32.gmra.mrb[24].mxu0 %vm287_vm0, %v236_v57  ;;  %17683 = vmatmul.mubr.msk.f32.gmra.mrb[24].mxu1 %vm287_vm0, %v268_v59 }
  0x3f   :  { %17637 = vmatprep.mubr.msk.f32.mxu0 %vm287_vm0, %v237_v58  ;;  %17685 = vmatprep.mubr.msk.f32.mxu1 %vm287_vm0, %v269_v60 }
  0x42   :  { %17638 = vmatmul.mubr.msk.f32.gmra.mrb[26].mxu0 %vm287_vm0, %v238_v61  ;;  %17686 = vmatmul.mubr.msk.f32.gmra.mrb[26].mxu1 %vm287_vm0, %v270_v63 }
  0x43   :  { %17640 = vmatprep.mubr.msk.f32.mxu0 %vm287_vm0, %v239_v62  ;;  %17688 = vmatprep.mubr.msk.f32.mxu1 %vm287_vm0, %v271_v0 }
  0x46   :  { %17641 = vmatmul.mubr.msk.f32.gmra.mrb[28].mxu0 %vm287_vm0, %v240_v1  ;;  %17689 = vmatmul.mubr.msk.f32.gmra.mrb[28].mxu1 %vm287_vm0, %v272_v3 }
  0x47   :  { %17643 = vmatprep.mubr.msk.f32.mxu0 %vm287_vm0, %v241_v2  ;;  %17691 = vmatprep.mubr.msk.f32.mxu1 %vm287_vm0, %v273_v4 }
  0x4a   :  { %17644 = vmatmul.mubr.msk.f32.gmra.mrb[30].mxu0 %vm287_vm0, %v242_v5  ;;  %17692 = vmatmul.mubr.msk.f32.gmra.mrb[30].mxu1 %vm287_vm0, %v274_v6 }
  0xe1   :  { %v17600_v10 = vpop.f32.mrb[0].mxu0  ;;  %v21515_v14 = vpop.f32.mrb[0].mxu1 }
  0xe2   :  { %v556_v12 = vadd.f32 %v17600_v10, %v21506_v7  ;;  %v550_v13 = vpop.f32.mrb[1].mxu0  ;;  %v21518_v16 = vpop.f32.mrb[1].mxu1 }
  0xe3   :  { %v551_v15 = vadd.f32 %v21506_v7, %v550_v13 }
  0xe4   :  { %v21520_v17 = vmax.f32 %v556_v12, 0.0 }
  0xe5   :  { %v21522_v18 = vmax.f32 %v551_v15, 0.0  ;;  %v17603_v19 = vpop.f32.mrb[2].mxu0  ;;  %v21527_v23 = vpop.f32.mrb[2].mxu1 }
  0xe6   :  { %v1067_v20 = vmul.f32 %v21520_v17, %v21520_v17  ;;  %v566_v21 = vadd.f32 %v17603_v19, %v21506_v7  ;;  %v560_v22 = vpop.f32.mrb[3].mxu0  ;;  %v934_v24 = vsel %vm38_vm2, %v21520_v17, 0.0  ;;  %v21536_v28 = vpop.f32.mrb[3].mxu1 }
  0xe7   :  { %v933_v25 = vsel %vm38_vm2, %v21522_v18, 0.0  ;;  %v1066_v26 = vmul.f32 %v21522_v18, %v21522_v18  ;;  %v561_v27 = vadd.f32 %v21506_v7, %v560_v22 }
  0xe8   :  { %v21538_v29 = vmax.f32 %v566_v21, 0.0  ;;  %v1131_v30 = vsel %vm38_vm2, %v1067_v20, 0.0  ;;  %v935_v34 = vadd.f32 %v934_v24, %v933_v25 }
  0xe9   :  { %v1130_v31 = vsel %vm38_vm2, %v1066_v26, 0.0  ;;  %v21542_v32 = vmax.f32 %v561_v27, 0.0  ;;  %v17606_v33 = vpop.f32.mrb[4].mxu0  ;;  %v21547_v38 = vpop.f32.mrb[4].mxu1 }
  0xea   :  { %v1069_v35 = vmul.f32 %v21538_v29, %v21538_v29  ;;  %v576_v36 = vadd.f32 %v17606_v33, %v21506_v7  ;;  %v570_v37 = vpop.f32.mrb[5].mxu0  ;;  %v21554_v42 = vpop.f32.mrb[5].mxu1  ;;  %v1132_v43 = vadd.f32 %v1131_v30, %v1130_v31  ;;  %v938_v46 = vsel %vm38_vm2, %v21538_v29, 0.0 }
  0xeb   :  { %v936_v39 = vsel %vm38_vm2, %v21542_v32, 0.0  ;;  %v1068_v40 = vmul.f32 %v21542_v32, %v21542_v32  ;;  %v571_v41 = vadd.f32 %v21506_v7, %v570_v37 }
  0xec   :  { %v937_v44 = vadd.f32 %v936_v39, %v935_v34  ;;  %v21556_v45 = vmax.f32 %v576_v36, 0.0  ;;  %v1135_v50 = vsel %vm38_vm2, %v1069_v35, 0.0 }
  0xed   :  { %v1133_v47 = vsel %vm38_vm2, %v1068_v40, 0.0  ;;  %v21561_v48 = vmax.f32 %v571_v41, 0.0  ;;  %v17609_v49 = vpop.f32.mrb[6].mxu0  ;;  %v21566_v55 = vpop.f32.mrb[6].mxu1 }
  0xee   :  { %v939_v51 = vadd.f32 %v938_v46, %v937_v44  ;;  %v1134_v52 = vadd.f32 %v1133_v47, %v1132_v43  ;;  %v1071_v53 = vmul.f32 %v21556_v45, %v21556_v45  ;;  %v580_v54 = vpop.f32.mrb[7].mxu0  ;;  %v586_v58 = vadd.f32 %v17609_v49, %v21506_v7  ;;  %v21574_v60 = vpop.f32.mrb[7].mxu1 }
  0xef   :  { %v940_v56 = vsel %vm38_vm2, %v21561_v48, 0.0  ;;  %v1070_v57 = vmul.f32 %v21561_v48, %v21561_v48  ;;  %v581_v59 = vadd.f32 %v21506_v7, %v580_v54  ;;  %v942_v63 = vsel %vm38_vm2, %v21556_v45, 0.0 }
  0xf0   :  { %v1136_v61 = vadd.f32 %v1135_v50, %v1134_v52  ;;  %v941_v62 = vadd.f32 %v940_v56, %v939_v51  ;;  %v21579_v1 = vmax.f32 %v586_v58, 0.0  ;;  %v1139_v10 = vsel %vm38_vm2, %v1071_v53, 0.0 }
  0xf1   :  { %v1137_v0 = vsel %vm38_vm2, %v1070_v57, 0.0  ;;  %v21581_v2 = vmax.f32 %v581_v59, 0.0  ;;  %v17612_v3 = vpop.f32.mrb[8].mxu0  ;;  %v21584_v9 = vpop.f32.mrb[8].mxu1 }
  0xf2   :  { %v1138_v4 = vadd.f32 %v1137_v0, %v1136_v61  ;;  %v943_v5 = vadd.f32 %v942_v63, %v941_v62  ;;  %v596_v6 = vadd.f32 %v17612_v3, %v21506_v7  ;;  %v590_v8 = vpop.f32.mrb[9].mxu0  ;;  %v1073_v11 = vmul.f32 %v21579_v1, %v21579_v1  ;;  %v21593_v15 = vpop.f32.mrb[9].mxu1 }
  0xf3   :  { %v944_v12 = vsel %vm38_vm2, %v21581_v2, 0.0  ;;  %v1072_v13 = vmul.f32 %v21581_v2, %v21581_v2  ;;  %v591_v22 = vadd.f32 %v21506_v7, %v590_v8  ;;  %v946_v26 = vsel %vm38_vm2, %v21579_v1, 0.0 }
  0xf4   :  { %v945_v19 = vadd.f32 %v944_v12, %v943_v5  ;;  %v1140_v20 = vadd.f32 %v1139_v10, %v1138_v4  ;;  %v21595_v21 = vmax.f32 %v596_v6, 0.0  ;;  %v1143_v27 = vsel %vm38_vm2, %v1073_v11, 0.0 }
  0xf5   :  { %v1141_v24 = vsel %vm38_vm2, %v1072_v13, 0.0  ;;  %v17615_v25 = vpop.f32.mrb[10].mxu0  ;;  %v21602_v31 = vmax.f32 %v591_v22, 0.0  ;;  %v21604_v34 = vpop.f32.mrb[10].mxu1 }
  0xf6   :  { %v1142_v30 = vadd.f32 %v1141_v24, %v1140_v20  ;;  %v600_v33 = vpop.f32.mrb[11].mxu0  ;;  %v1075_v35 = vmul.f32 %v21595_v21, %v21595_v21  ;;  %v947_v36 = vadd.f32 %v946_v26, %v945_v19  ;;  %v606_v37 = vadd.f32 %v17615_v25, %v21506_v7  ;;  %v21610_v40 = vpop.f32.mrb[11].mxu1 }
  0xf7   :  { %v601_v39 = vadd.f32 %v21506_v7, %v600_v33  ;;  %v948_v41 = vsel %vm38_vm2, %v21602_v31, 0.0  ;;  %v1074_v43 = vmul.f32 %v21602_v31, %v21602_v31  ;;  %v950_v51 = vsel %vm38_vm2, %v21595_v21, 0.0 }
  0xf8   :  { %v1144_v44 = vadd.f32 %v1143_v27, %v1142_v30  ;;  %v949_v46 = vadd.f32 %v948_v41, %v947_v36  ;;  %v21616_v47 = vmax.f32 %v606_v37, 0.0  ;;  %v1147_v57 = vsel %vm38_vm2, %v1075_v35, 0.0 }
  0xf9   :  { %v21618_v49 = vmax.f32 %v601_v39, 0.0  ;;  %v17618_v50 = vpop.f32.mrb[12].mxu0  ;;  %v1145_v52 = vsel %vm38_vm2, %v1074_v43, 0.0  ;;  %v21624_v56 = vpop.f32.mrb[12].mxu1 }
  0xfa   :  { %27662 = vst [vmem:[#allocation4_spill] sm:$0xff] %v21616_v47  ;;  %v616_v53 = vadd.f32 %v17618_v50, %v21506_v7  ;;  %v610_v54 = vpop.f32.mrb[13].mxu0  ;;  %v1146_v58 = vadd.f32 %v1145_v52, %v1144_v44  ;;  %v1077_v59 = vmul.f32 %v21616_v47, %v21616_v47  ;;  %v951_v61 = vadd.f32 %v950_v51, %v949_v46  ;;  %v21629_v62 = vpop.f32.mrb[13].mxu1 }
  0xfb   :  { %v952_v63 = vsel %vm38_vm2, %v21618_v49, 0.0  ;;  %v1076_v0 = vmul.f32 %v21618_v49, %v21618_v49  ;;  %v611_v4 = vadd.f32 %v21506_v7, %v610_v54  ;;  %v954_v10 = vsel %vm38_vm2, %v21616_v47, 0.0 }
  0xfc   :  { %v21635_v3 = vmax.f32 %v616_v53, 0.0  ;;  %v953_v5 = vadd.f32 %v952_v63, %v951_v61  ;;  %v1148_v6 = vadd.f32 %v1147_v57, %v1146_v58  ;;  %v1151_v30 = vsel %vm38_vm2, %v1077_v59, 0.0 }
  0xfd   :  { %v17621_v8 = vpop.f32.mrb[14].mxu0  ;;  %v1149_v11 = vsel %vm38_vm2, %v1076_v0, 0.0  ;;  %v21643_v13 = vmax.f32 %v611_v4, 0.0  ;;  %v21645_v20 = vpop.f32.mrb[14].mxu1 }
  0xfe   :  { %27663 = vst [vmem:[#allocation5_spill] sm:$0xff] %v21635_v3  ;;  %v1079_v12 = vmul.f32 %v21635_v3, %v21635_v3  ;;  %v620_v19 = vpop.f32.mrb[15].mxu0  ;;  %v1150_v22 = vadd.f32 %v1149_v11, %v1148_v6  ;;  %v955_v24 = vadd.f32 %v954_v10, %v953_v5  ;;  %v626_v25 = vadd.f32 %v17621_v8, %v21506_v7  ;;  %v21649_v27 = vpop.f32.mrb[15].mxu1 }
  0xff   :  { %27664 = vst [vmem:[#allocation6_spill] sm:$0xff] %v21643_v13  ;;  %v621_v26 = vadd.f32 %v21506_v7, %v620_v19  ;;  %v956_v33 = vsel %vm38_vm2, %v21643_v13, 0.0  ;;  %v1078_v35 = vmul.f32 %v21643_v13, %v21643_v13  ;;  %v958_v44 = vsel %vm38_vm2, %v21635_v3, 0.0 }
 0x100   :  { %v957_v36 = vadd.f32 %v956_v33, %v955_v24  ;;  %v1152_v37 = vadd.f32 %v1151_v30, %v1150_v22  ;;  %v21656_v39 = vmax.f32 %v626_v25, 0.0  ;;  %v1155_v53 = vsel %vm38_vm2, %v1079_v12, 0.0 }
 0x101   :  { %v21658_v41 = vmax.f32 %v621_v26, 0.0  ;;  %v17624_v43 = vpop.f32.mrb[16].mxu0  ;;  %v1153_v46 = vsel %vm38_vm2, %v1078_v35, 0.0  ;;  %v21664_v52 = vpop.f32.mrb[16].mxu1 }
 0x102   :  { %27665 = vst [vmem:[#allocation7_spill] sm:$0xff] %v21656_v39  ;;  %v636_v50 = vadd.f32 %v17624_v43, %v21506_v7  ;;  %v630_v51 = vpop.f32.mrb[17].mxu0  ;;  %v1154_v54 = vadd.f32 %v1153_v46, %v1152_v37  ;;  %v1081_v57 = vmul.f32 %v21656_v39, %v21656_v39  ;;  %v959_v58 = vadd.f32 %v958_v44, %v957_v36  ;;  %v21669_v59 = vpop.f32.mrb[17].mxu1 }
 0x103   :  { %27666 = vst [vmem:[#allocation8_spill] sm:$0xff] %v21658_v41  ;;  %v960_v61 = vsel %vm38_vm2, %v21658_v41, 0.0  ;;  %v1080_v63 = vmul.f32 %v21658_v41, %v21658_v41  ;;  %v631_v4 = vadd.f32 %v21506_v7, %v630_v51  ;;  %v962_v10 = vsel %vm38_vm2, %v21656_v39, 0.0 }
 0x104   :  { %v21675_v0 = vmax.f32 %v636_v50, 0.0  ;;  %v961_v5 = vadd.f32 %v960_v61, %v959_v58  ;;  %v1156_v6 = vadd.f32 %v1155_v53, %v1154_v54  ;;  %v1159_v36 = vsel %vm38_vm2, %v1081_v57, 0.0 }
 0x105   :  { %v17627_v8 = vpop.f32.mrb[18].mxu0  ;;  %v1157_v11 = vsel %vm38_vm2, %v1080_v63, 0.0  ;;  %v21683_v19 = vmax.f32 %v631_v4, 0.0  ;;  %v21685_v24 = vpop.f32.mrb[18].mxu1 }
 0x106   :  { %27667 = vst [vmem:[#allocation9_spill] sm:$0xff] %v21675_v0  ;;  %v1083_v12 = vmul.f32 %v21675_v0, %v21675_v0  ;;  %v640_v22 = vpop.f32.mrb[19].mxu0  ;;  %v1158_v25 = vadd.f32 %v1157_v11, %v1156_v6  ;;  %v963_v26 = vadd.f32 %v962_v10, %v961_v5  ;;  %v646_v30 = vadd.f32 %v17627_v8, %v21506_v7  ;;  %v21689_v35 = vpop.f32.mrb[19].mxu1 }
 0x107   :  { %27668 = vst [vmem:[#allocation10_spill] sm:$0xff] %v21683_v19  ;;  %v641_v33 = vadd.f32 %v21506_v7, %v640_v22  ;;  %v964_v37 = vsel %vm38_vm2, %v21683_v19, 0.0  ;;  %v1082_v43 = vmul.f32 %v21683_v19, %v21683_v19  ;;  %v966_v54 = vsel %vm38_vm2, %v21675_v0, 0.0 }
 0x108   :  { %v965_v44 = vadd.f32 %v964_v37, %v963_v26  ;;  %v1160_v46 = vadd.f32 %v1159_v36, %v1158_v25  ;;  %v21696_v50 = vmax.f32 %v646_v30, 0.0  ;;  %v1163_v4 = vsel %vm38_vm2, %v1083_v12, 0.0 }
 0x109   :  { %v21698_v51 = vmax.f32 %v641_v33, 0.0  ;;  %v17630_v53 = vpop.f32.mrb[20].mxu0  ;;  %v1161_v58 = vsel %vm38_vm2, %v1082_v43, 0.0  ;;  %v21704_v63 = vpop.f32.mrb[20].mxu1 }
 0x10a   :  { %27669 = vst [vmem:[#allocation11_spill] sm:$0xff] %v21696_v50  ;;  %v656_v57 = vadd.f32 %v17630_v53, %v21506_v7  ;;  %v650_v61 = vpop.f32.mrb[21].mxu0  ;;  %v1162_v5 = vadd.f32 %v1161_v58, %v1160_v46  ;;  %v1085_v6 = vmul.f32 %v21696_v50, %v21696_v50  ;;  %v967_v8 = vadd.f32 %v966_v54, %v965_v44  ;;  %v21709_v10 = vpop.f32.mrb[21].mxu1 }
 0x10b   :  { %27670 = vst [vmem:[#allocation12_spill] sm:$0xff] %v21698_v51  ;;  %v968_v11 = vsel %vm38_vm2, %v21698_v51, 0.0  ;;  %v1084_v22 = vmul.f32 %v21698_v51, %v21698_v51  ;;  %v651_v26 = vadd.f32 %v21506_v7, %v650_v61  ;;  %v970_v36 = vsel %vm38_vm2, %v21696_v50, 0.0 }
 0x10c   :  { %v21715_v25 = vmax.f32 %v656_v57, 0.0  ;;  %v969_v30 = vadd.f32 %v968_v11, %v967_v8  ;;  %v1164_v33 = vadd.f32 %v1163_v4, %v1162_v5  ;;  %v1167_v5 = vsel %vm38_vm2, %v1085_v6, 0.0 }
 0x10d   :  { %v17633_v12 = vpop.f32.mrb[22].mxu0  ;;  %v1165_v37 = vsel %vm38_vm2, %v1084_v22, 0.0  ;;  %v21723_v44 = vmax.f32 %v651_v26, 0.0  ;;  %v21725_v53 = vpop.f32.mrb[22].mxu1 }
 0x10e   :  { %27671 = vst [vmem:[#allocation13_spill] sm:$0xff] %v21715_v25  ;;  %v1087_v43 = vmul.f32 %v21715_v25, %v21715_v25  ;;  %v660_v46 = vpop.f32.mrb[23].mxu0  ;;  %v1166_v54 = vadd.f32 %v1165_v37, %v1164_v33  ;;  %v971_v58 = vadd.f32 %v970_v36, %v969_v30  ;;  %v666_v57 = vadd.f32 %v17633_v12, %v21506_v7  ;;  %v21729_v4 = vpop.f32.mrb[23].mxu1 }
 0x10f   :  { %27672 = vst [vmem:[#allocation14_spill] sm:$0xff] %v21723_v44  ;;  %v661_v61 = vadd.f32 %v21506_v7, %v660_v46  ;;  %v972_v8 = vsel %vm38_vm2, %v21723_v44, 0.0  ;;  %v1086_v11 = vmul.f32 %v21723_v44, %v21723_v44  ;;  %v974_v12 = vsel %vm38_vm2, %v21715_v25, 0.0 }
 0x110   :  { %v973_v22 = vadd.f32 %v972_v8, %v971_v58  ;;  %v1168_v26 = vadd.f32 %v1167_v5, %v1166_v54  ;;  %v21736_v50 = vmax.f32 %v666_v57, 0.0  ;;  %v1171_v51 = vsel %vm38_vm2, %v1087_v43, 0.0 }
 0x111   :  { %v21738_v33 = vmax.f32 %v661_v61, 0.0  ;;  %v17636_v30 = vpop.f32.mrb[24].mxu0  ;;  %v1169_v36 = vsel %vm38_vm2, %v1086_v11, 0.0  ;;  %v21744_v46 = vpop.f32.mrb[24].mxu1 }
 0x112   :  { %27673 = vst [vmem:[#allocation15_spill] sm:$0xff] %v21736_v50  ;;  %v676_v6 = vadd.f32 %v17636_v30, %v21506_v7  ;;  %v670_v37 = vpop.f32.mrb[25].mxu0  ;;  %v1170_v44 = vadd.f32 %v1169_v36, %v1168_v26  ;;  %v1089_v54 = vmul.f32 %v21736_v50, %v21736_v50  ;;  %v975_v58 = vadd.f32 %v974_v12, %v973_v22  ;;  %v21749_v57 = vpop.f32.mrb[25].mxu1 }
 0x113   :  { %27674 = vst [vmem:[#allocation16_spill] sm:$0xff] %v21738_v33  ;;  %v976_v61 = vsel %vm38_vm2, %v21738_v33, 0.0  ;;  %v1088_v5 = vmul.f32 %v21738_v33, %v21738_v33  ;;  %v671_v11 = vadd.f32 %v21506_v7, %v670_v37  ;;  %v716_v26 = vadd.f32 %v21515_v14, %v21506_v7 }
 0x114   :  { %v21755_v8 = vmax.f32 %v676_v6, 0.0  ;;  %v977_v30 = vadd.f32 %v976_v61, %v975_v58  ;;  %v1172_v25 = vadd.f32 %v1171_v51, %v1170_v44  ;;  %v978_v22 = vsel %vm38_vm2, %v21736_v50, 0.0 }
 0x115   :  { %v17639_v43 = vpop.f32.mrb[26].mxu0  ;;  %v1173_v12 = vsel %vm38_vm2, %v1088_v5, 0.0  ;;  %v21765_v0 = vmax.f32 %v671_v11, 0.0  ;;  %v21767_v33 = vpop.f32.mrb[26].mxu1  ;;  %v1175_v61 = vsel %vm38_vm2, %v1089_v54, 0.0  ;;  %v711_v50 = vadd.f32 %v21506_v7, %v21518_v16 }
 0x116   :  { %27675 = vst [vmem:[#allocation17_spill] sm:$0xff] %v21755_v8  ;;  %v1091_v36 = vmul.f32 %v21755_v8, %v21755_v8  ;;  %v680_v6 = vpop.f32.mrb[27].mxu0  ;;  %v1174_v37 = vadd.f32 %v1173_v12, %v1172_v25  ;;  %v979_v58 = vadd.f32 %v978_v22, %v977_v30  ;;  %v686_v51 = vadd.f32 %v17639_v43, %v21506_v7  ;;  %v21771_v14 = vpop.f32.mrb[27].mxu1 }
 0x117   :  { %27676 = vst [vmem:[#allocation18_spill] sm:$0xff] %v21765_v0  ;;  %v681_v44 = vadd.f32 %v21506_v7, %v680_v6  ;;  %v980_v5 = vsel %vm38_vm2, %v21765_v0, 0.0  ;;  %v1090_v11 = vmul.f32 %v21765_v0, %v21765_v0  ;;  %v982_v12 = vsel %vm38_vm2, %v21755_v8, 0.0 }
 0x118   :  { %v981_v19 = vadd.f32 %v980_v5, %v979_v58  ;;  %v1176_v25 = vadd.f32 %v1175_v61, %v1174_v37  ;;  %v21780_v30 = vmax.f32 %v686_v51, 0.0  ;;  %v1179_v0 = vsel %vm38_vm2, %v1091_v36, 0.0 }
 0x119   :  { %v21782_v43 = vmax.f32 %v681_v44, 0.0  ;;  %v17642_v22 = vpop.f32.mrb[28].mxu0  ;;  %v1177_v54 = vsel %vm38_vm2, %v1090_v11, 0.0  ;;  %v21788_v41 = vpop.f32.mrb[28].mxu1 }
 0x11a   :  { %27677 = vst [vmem:[#allocation19_spill] sm:$0xff] %v21780_v30  ;;  %v696_v6 = vadd.f32 %v17642_v22, %v21506_v7  ;;  %v690_v39 = vpop.f32.mrb[29].mxu0  ;;  %v1178_v16 = vadd.f32 %v1177_v54, %v1176_v25  ;;  %v1093_v37 = vmul.f32 %v21780_v30, %v21780_v30  ;;  %v983_v58 = vadd.f32 %v982_v12, %v981_v19  ;;  %v21793_v51 = vpop.f32.mrb[29].mxu1 }
 0x11b   :  { %27678 = vst [vmem:[#allocation20_spill] sm:$0xff] %v21782_v43  ;;  %v984_v44 = vsel %vm38_vm2, %v21782_v43, 0.0  ;;  %v1092_v61 = vmul.f32 %v21782_v43, %v21782_v43  ;;  %v691_v11 = vadd.f32 %v21506_v7, %v690_v39  ;;  %v21802_v25 = vmax.f32 %v716_v26, 0.0 }
 0x11c   :  { %v21799_v5 = vmax.f32 %v696_v6, 0.0  ;;  %v985_v22 = vadd.f32 %v984_v44, %v983_v58  ;;  %v1180_v8 = vadd.f32 %v1179_v0, %v1178_v16  ;;  %v21804_v54 = vmax.f32 %v711_v50, 0.0 }
 0x11d   :  { %v17645_v36 = vpop.f32.mrb[30].mxu0  ;;  %v986_v19 = vsel %vm38_vm2, %v21780_v30, 0.0  ;;  %v1181_v12 = vsel %vm38_vm2, %v1092_v61, 0.0  ;;  %v21809_v3 = vmax.f32 %v691_v11, 0.0  ;;  %v721_v6 = vadd.f32 %v21506_v7, %v21536_v28  ;;  %v21813_v43 = vpop.f32.mrb[30].mxu1 }
 0x11e   :  { %27679 = vst [vmem:[#allocation21_spill] sm:$0xff] %v21804_v54  ;;  %v700_v13 = vpop.f32.mrb[31].mxu0  ;;  %v1182_v39 = vadd.f32 %v1181_v12, %v1180_v8  ;;  %v987_v0 = vadd.f32 %v986_v19, %v985_v22  ;;  %v706_v26 = vadd.f32 %v17645_v36, %v21506_v7  ;;  %v21817_v16 = vpop.f32.mrb[31].mxu1  ;;  %v1183_v58 = vsel %vm38_vm2, %v1093_v37, 0.0 }
 0x11f   :  { %27680 = vst [vmem:[#allocation22_spill] sm:$0xff] %v21809_v3  ;;  %v701_v50 = vadd.f32 %v21506_v7, %v700_v13  ;;  %v1095_v44 = vmul.f32 %v21799_v5, %v21799_v5  ;;  %v988_v61 = vsel %vm38_vm2, %v21809_v3, 0.0  ;;  %v1094_v28 = vmul.f32 %v21809_v3, %v21809_v3 }
 0x120   :  { %v989_v11 = vadd.f32 %v988_v61, %v987_v0  ;;  %v1184_v8 = vadd.f32 %v1183_v58, %v1182_v39  ;;  %v21826_v22 = vmax.f32 %v706_v26, 0.0  ;;  %v990_v13 = vsel %vm38_vm2, %v21799_v5, 0.0 }
 0x121   :  { %v21828_v36 = vmax.f32 %v701_v50, 0.0  ;;  %v1185_v37 = vsel %vm38_vm2, %v1094_v28, 0.0  ;;  %v1098_v19 = vmul.f32 %v21804_v54, %v21804_v54  ;;  %v726_v12 = vadd.f32 %v21527_v23, %v21506_v7 }
 0x122   :  { %27681 = vst [vmem:[#allocation23_spill] sm:$0xff] %v21826_v22  ;;  %v1186_v30 = vadd.f32 %v1185_v37, %v1184_v8  ;;  %v991_v47 = vadd.f32 %v990_v13, %v989_v11  ;;  %v21837_v3 = vmax.f32 %v721_v6, 0.0  ;;  %v731_v39 = vadd.f32 %v21506_v7, %v21554_v42 }
 0x123   :  { %v1187_v0 = vsel %vm38_vm2, %v1095_v44, 0.0  ;;  %v1097_v26 = vmul.f32 %v21826_v22, %v21826_v22  ;;  %v992_v50 = vsel %vm38_vm2, %v21828_v36, 0.0  ;;  %v1096_v58 = vmul.f32 %v21828_v36, %v21828_v36 }
 0x124   :  { %v993_v61 = vadd.f32 %v992_v50, %v991_v47  ;;  %v1188_v23 = vadd.f32 %v1187_v0, %v1186_v30  ;;  %v1099_v6 = vmul.f32 %v21802_v25, %v21802_v25  ;;  %v994_v28 = vsel %vm38_vm2, %v21826_v22, 0.0 }
 0x125   :  { %v1189_v42 = vsel %vm38_vm2, %v1096_v58, 0.0  ;;  %v996_v44 = vsel %vm38_vm2, %v21804_v54, 0.0  ;;  %v1193_v11 = vsel %vm38_vm2, %v1098_v19, 0.0  ;;  %v21856_v37 = vmax.f32 %v726_v12, 0.0 }
 0x126   :  { %v1190_v8 = vadd.f32 %v1189_v42, %v1188_v23  ;;  %v995_v13 = vadd.f32 %v994_v28, %v993_v61  ;;  %v736_v47 = vadd.f32 %v21547_v38, %v21506_v7  ;;  %v1191_v30 = vsel %vm38_vm2, %v1097_v26, 0.0 }
 0x127   :  { %v1100_v0 = vmul.f32 %v21837_v3, %v21837_v3  ;;  %v21863_v50 = vmax.f32 %v731_v39, 0.0  ;;  %v741_v58 = vadd.f32 %v21506_v7, %v21574_v60  ;;  %v998_v19 = vsel %vm38_vm2, %v21802_v25, 0.0 }
 0x128   :  { %v997_v54 = vadd.f32 %v996_v44, %v995_v13  ;;  %v1192_v22 = vadd.f32 %v1191_v30, %v1190_v8  ;;  %v1195_v12 = vsel %vm38_vm2, %v1099_v6, 0.0  ;;  %v1000_v38 = vsel %vm38_vm2, %v21837_v3, 0.0 }
 0x129   :  { %v746_v26 = vadd.f32 %v21566_v55, %v21506_v7  ;;  %v1101_v39 = vmul.f32 %v21856_v37, %v21856_v37  ;;  %v21876_v28 = vmax.f32 %v736_v47, 0.0  ;;  %v1197_v60 = vsel %vm38_vm2, %v1100_v0, 0.0 }
 0x12a   :  { %v1194_v61 = vadd.f32 %v1193_v11, %v1192_v22  ;;  %v999_v23 = vadd.f32 %v998_v19, %v997_v54  ;;  %v1102_v42 = vmul.f32 %v21863_v50, %v21863_v50  ;;  %v21881_v44 = vmax.f32 %v741_v58, 0.0 }
 0x12b   :  { %v751_v6 = vadd.f32 %v21506_v7, %v21593_v15  ;;  %v1002_v55 = vsel %vm38_vm2, %v21856_v37, 0.0  ;;  %v1004_v54 = vsel %vm38_vm2, %v21863_v50, 0.0  ;;  %v21889_v22 = vmax.f32 %v746_v26, 0.0 }
 0x12c   :  { %v1001_v8 = vadd.f32 %v1000_v38, %v999_v23  ;;  %v1196_v13 = vadd.f32 %v1195_v12, %v1194_v61  ;;  %v756_v11 = vadd.f32 %v21584_v9, %v21506_v7  ;;  %v1199_v47 = vsel %vm38_vm2, %v1101_v39, 0.0 }
 0x12d   :  { %v1103_v0 = vmul.f32 %v21876_v28, %v21876_v28  ;;  %v1201_v58 = vsel %vm38_vm2, %v1102_v42, 0.0  ;;  %v1104_v19 = vmul.f32 %v21881_v44, %v21881_v44  ;;  %v21899_v12 = vmax.f32 %v751_v6, 0.0 }
 0x12e   :  { %v1198_v30 = vadd.f32 %v1197_v60, %v1196_v13  ;;  %v1003_v15 = vadd.f32 %v1002_v55, %v1001_v8  ;;  %v761_v38 = vadd.f32 %v21506_v7, %v21610_v40  ;;  %v1006_v9 = vsel %vm38_vm2, %v21876_v28, 0.0 }
 0x12f   :  { %v1105_v39 = vmul.f32 %v21889_v22, %v21889_v22  ;;  %v1008_v23 = vsel %vm38_vm2, %v21881_v44, 0.0  ;;  %v21909_v60 = vmax.f32 %v756_v11, 0.0  ;;  %v1203_v42 = vsel %vm38_vm2, %v1103_v0, 0.0 }
 0x130   :  { %v1005_v26 = vadd.f32 %v1004_v54, %v1003_v15  ;;  %v1200_v61 = vadd.f32 %v1199_v47, %v1198_v30  ;;  %v766_v40 = vadd.f32 %v21604_v34, %v21506_v7  ;;  %v1205_v13 = vsel %vm38_vm2, %v1104_v19, 0.0 }
 0x131   :  { %v1106_v55 = vmul.f32 %v21899_v12, %v21899_v12  ;;  %v21917_v54 = vmax.f32 %v761_v38, 0.0  ;;  %v771_v47 = vadd.f32 %v21506_v7, %v21629_v62  ;;  %v1010_v0 = vsel %vm38_vm2, %v21889_v22, 0.0 }
 0x132   :  { %v1202_v6 = vadd.f32 %v1201_v58, %v1200_v61  ;;  %v1007_v8 = vadd.f32 %v1006_v9, %v1005_v26  ;;  %v1207_v15 = vsel %vm38_vm2, %v1105_v39, 0.0  ;;  %v1107_v34 = vmul.f32 %v21909_v60, %v21909_v60 }
 0x133   :  { %v1012_v58 = vsel %vm38_vm2, %v21899_v12, 0.0  ;;  %v21928_v38 = vmax.f32 %v766_v40, 0.0  ;;  %v776_v62 = vadd.f32 %v21624_v56, %v21506_v7  ;;  %v1209_v61 = vsel %vm38_vm2, %v1106_v55, 0.0 }
 0x134   :  { %v1009_v30 = vadd.f32 %v1008_v23, %v1007_v8  ;;  %v1204_v11 = vadd.f32 %v1203_v42, %v1202_v6  ;;  %v1108_v9 = vmul.f32 %v21917_v54, %v21917_v54  ;;  %v21935_v23 = vmax.f32 %v771_v47, 0.0 }
 0x135   :  { %v781_v39 = vadd.f32 %v21506_v7, %v21649_v27  ;;  %v1014_v8 = vsel %vm38_vm2, %v21909_v60, 0.0  ;;  %v1211_v40 = vsel %vm38_vm2, %v1107_v34, 0.0  ;;  %v1016_v56 = vsel %vm38_vm2, %v21917_v54, 0.0 }
 0x136   :  { %v1206_v19 = vadd.f32 %v1205_v13, %v1204_v11  ;;  %v1011_v26 = vadd.f32 %v1010_v0, %v1009_v30  ;;  %v786_v13 = vadd.f32 %v21645_v20, %v21506_v7  ;;  %v1109_v47 = vmul.f32 %v21928_v38, %v21928_v38 }
 0x137   :  { %v21948_v11 = vmax.f32 %v776_v62, 0.0  ;;  %v1213_v27 = vsel %vm38_vm2, %v1108_v9, 0.0  ;;  %v1110_v0 = vmul.f32 %v21935_v23, %v21935_v23  ;;  %v791_v34 = vadd.f32 %v21506_v7, %v21669_v59 }
 0x138   :  { %v1013_v42 = vadd.f32 %v1012_v58, %v1011_v26  ;;  %v1208_v6 = vadd.f32 %v1207_v15, %v1206_v19  ;;  %v21953_v15 = vmax.f32 %v781_v39, 0.0  ;;  %v796_v20 = vadd.f32 %v21664_v52, %v21506_v7 }
 0x139   :  { %v1018_v26 = vsel %vm38_vm2, %v21928_v38, 0.0  ;;  %v1020_v62 = vsel %vm38_vm2, %v21935_v23, 0.0  ;;  %v1215_v9 = vsel %vm38_vm2, %v1109_v47, 0.0  ;;  %v801_v59 = vadd.f32 %v21506_v7, %v21689_v35 }
 0x13a   :  { %v1210_v55 = vadd.f32 %v1209_v61, %v1208_v6  ;;  %v1015_v30 = vadd.f32 %v1014_v8, %v1013_v42  ;;  %v21963_v61 = vmax.f32 %v786_v13, 0.0  ;;  %v1111_v6 = vmul.f32 %v21948_v11, %v21948_v11 }
 0x13b   :  { %v1217_v52 = vsel %vm38_vm2, %v1110_v0, 0.0  ;;  %v1112_v8 = vmul.f32 %v21953_v15, %v21953_v15  ;;  %v1022_v47 = vsel %vm38_vm2, %v21948_v11, 0.0 }
 0x13c   :  { %v1017_v58 = vadd.f32 %v1016_v56, %v1015_v30  ;;  %v1212_v19 = vadd.f32 %v1211_v40, %v1210_v55  ;;  %v21973_v40 = vmax.f32 %v791_v34, 0.0  ;;  %v21975_v55 = vmax.f32 %v796_v20, 0.0 }
 0x13d   :  { %v1113_v35 = vmul.f32 %v21963_v61, %v21963_v61  ;;  %v1024_v30 = vsel %vm38_vm2, %v21953_v15, 0.0  ;;  %v21985_v34 = vmax.f32 %v801_v59, 0.0  ;;  %v1221_v20 = vsel %vm38_vm2, %v1112_v8, 0.0  ;;  %v1550_v8 = vld [vmem:[%s27355_s5 + $0x10] sm:$0xff] }
 0x13e   :  { %v1214_v39 = vadd.f32 %v1213_v27, %v1212_v19  ;;  %v1019_v42 = vadd.f32 %v1018_v26, %v1017_v58  ;;  %27682 = vst [vmem:[#allocation24_spill] sm:$0xff] %v21975_v55  ;;  %v806_v27 = vadd.f32 %v21685_v24, %v21506_v7  ;;  %v1219_v19 = vsel %vm38_vm2, %v1111_v6, 0.0 }
 0x13f   :  { %27683 = vst [vmem:[#allocation25_spill] sm:$0xff] %v21985_v34  ;;  %v1114_v26 = vmul.f32 %v21973_v40, %v21973_v40  ;;  %v1026_v24 = vsel %vm38_vm2, %v21963_v61, 0.0  ;;  %v1223_v59 = vsel %vm38_vm2, %v1113_v35, 0.0  ;;  %v1028_v6 = vsel %vm38_vm2, %v21973_v40, 0.0 }
 0x140   :  { %v1021_v56 = vadd.f32 %v1020_v62, %v1019_v42  ;;  %v1216_v13 = vadd.f32 %v1215_v9, %v1214_v39  ;;  %v811_v62 = vadd.f32 %v21506_v7, %v21709_v10  ;;  %v1115_v42 = vmul.f32 %v21975_v55, %v21975_v55  ;;  %v1551_v10 = vld [vmem:[%s27355_s5 + $0x18] sm:$0xff] }
 0x141   :  { %v816_v35 = vadd.f32 %v21704_v63, %v21506_v7  ;;  %v1553_v63 = vld [vmem:[%s27355_s5 + $0x28] sm:$0xff] }
 0x142   :  { %v1218_v0 = vadd.f32 %v1217_v52, %v1216_v13  ;;  %v1023_v58 = vadd.f32 %v1022_v47, %v1021_v56  ;;  %v22000_v52 = vmax.f32 %v806_v27, 0.0  ;;  %v1116_v47 = vmul.f32 %v21985_v34, %v21985_v34 }
 0x143   :  { %v1225_v27 = vsel %vm38_vm2, %v1114_v26, 0.0 }
 0x144   :  { %v1025_v9 = vadd.f32 %v1024_v30, %v1023_v58  ;;  %v1220_v39 = vadd.f32 %v1219_v19, %v1218_v0  ;;  %27684 = vst [vmem:[#allocation26_spill] sm:$0xff] %v22000_v52  ;;  %v1030_v30 = vsel %vm38_vm2, %v21975_v55, 0.0  ;;  %v22015_v0 = vmax.f32 %v811_v62, 0.0 }
 0x145   :  { %v821_v58 = vadd.f32 %v21506_v7, %v21729_v4  ;;  %v1227_v19 = vsel %vm38_vm2, %v1115_v42, 0.0  ;;  %v1034_v26 = vsel %vm38_vm2, %v22000_v52, 0.0  ;;  %v1117_v62 = vmul.f32 %v22000_v52, %v22000_v52 }
 0x146   :  { %v1222_v56 = vadd.f32 %v1221_v20, %v1220_v39  ;;  %v1027_v13 = vadd.f32 %v1026_v24, %v1025_v9  ;;  %v19722_v39 = vpack.c.bf16 %v1551_v10, %v1550_v8  ;;  %v1552_v24 = vld [vmem:[%s27355_s5 + $0x20] sm:$0xff]  ;;  %v1032_v4 = vsel %vm38_vm2, %v21985_v34, 0.0 }
 0x147   :  { %v826_v42 = vadd.f32 %v21725_v53, %v21506_v7  ;;  %v22045_v52 = vmul.f32 %v22015_v0, %v22015_v0  ;;  %v22047_v53 = vmax.f32 %v821_v58, 0.0  ;;  %v22051_v34 = vadd.f32 %v21506_v7, %v21749_v57  ;;  %v22071_v57 = vld [vmem:[%s27355_s5 + $0x40] sm:$0xff] }
 0x148   :  { %v1029_v20 = vadd.f32 %v1028_v6, %v1027_v13  ;;  %v1224_v9 = vadd.f32 %v1223_v59, %v1222_v56  ;;  %v1554_v59 = vld [vmem:[%s27355_s5 + $0x30] sm:$0xff]  ;;  %v1555_v6 = vld [vmem:[%s27355_s5 + $0x38] sm:$0xff]  ;;  %v1229_v56 = vsel %vm38_vm2, %v1116_v47, 0.0  ;;  %v22041_v13 = vmax.f32 %v816_v35, 0.0  ;;  %19723 = vmatprep.subr.bf16.mxu1 %v19722_v39 }
 0x149   :  { %19725 = vmatpush3.bf16.msra.mxu1 %v19722_v39  ;;  %v22053_v55 = vpack.c.bf16 %v1553_v63, %v1552_v24  ;;  %v22057_v47 = vsel %vm38_vm2, %v22015_v0, 0.0  ;;  %v22059_v35 = vpack.c.bf16 %v1555_v6, %v1554_v59  ;;  %v22065_v58 = vadd.f32 %v21744_v46, %v21506_v7 }
 0x14a   :  { %v1226_v8 = vadd.f32 %v1225_v27, %v1224_v9  ;;  %v1031_v10 = vadd.f32 %v1030_v30, %v1029_v20  ;;  %v22061_v20 = vmax.f32 %v826_v42, 0.0  ;;  %v22079_v9 = vsel %vm38_vm2, %v1117_v62, 0.0 }
 0x14b   :  { %19727 = vmatprep.subr.bf16.mxu1 %v22053_v55  ;;  %v22085_v7 = vmul.f32 %v22041_v13, %v22041_v13  ;;  %v27387_v24 = vmov 0.0   ;;  %v1233_v63 = vsel %vm38_vm2, %v22045_v52, 0.0  ;;  %v22382_v62 = vmax.f32 %v22051_v34, 0.0 }
 0x14c   :  { %v1033_v27 = vadd.f32 %v1032_v4, %v1031_v10  ;;  %v1228_v30 = vadd.f32 %v1227_v19, %v1226_v8  ;;  %v22076_v19 = vld [vmem:[%s27355_s5 + $0x48] sm:$0xff]  ;;  %39 = vst.msk [vmem:[#allocation2] sm:$0xff] %vm38_vm2, %v27387_v24  ;;  %40 = vst.msk [vmem:[#allocation2 + $0x8] sm:$0xff] %vm38_vm2, %v27387_v24  ;;  %v22387_v4 = vld [vmem:[%s27354_s2] ss:$0 sm:$0xff]  ;;  %v1121_v59 = vmul.f32 %v22061_v20, %v22061_v20  ;;  %v1040_v6 = vsel %vm38_vm2, %v22047_v53, 0.0 }
 0x14d   :  { %43 = vst.msk [vmem:[#allocation2 + $0x1b0] sm:$0xff] %vm38_vm2, %v27387_v24  ;;  %44 = vst.msk [vmem:[#allocation2 + $0x1b8] sm:$0xff] %vm38_vm2, %v27387_v24  ;;  %v841_v42 = vadd.f32 %v22387_v4, %v21771_v14  ;;  %19729 = vmatpush3.bf16.msra.mxu1 %v22053_v55  ;;  %v1038_v14 = vsel %vm38_vm2, %v22041_v13, 0.0  ;;  %v19734_v52 = vpack.c.bf16 %v22076_v19, %v22071_v57  ;;  %v22422_v8 = vmax.f32 %v22065_v58, 0.0  ;;  %v2264_v58 = vld [vmem:[%s27355_s5 + $0x58] sm:$0xff] }
 0x14e   :  { %v22081_v39 = vadd.f32 %v1229_v56, %v1228_v30  ;;  %v22087_v46 = vadd.f32 %v1034_v26, %v1033_v27  ;;  %47 = vst.msk [vmem:[#allocation2 + $0x198] sm:$0xff] %vm38_vm2, %v27387_v24  ;;  %48 = vst.msk [vmem:[#allocation2 + $0x1a0] sm:$0xff] %vm38_vm2, %v27387_v24  ;;  %v1120_v26 = vmul.f32 %v22047_v53, %v22047_v53  ;;  %19731 = vmatprep.subr.bf16.mxu1 %v22059_v35 }
 0x14f   :  { %50 = vst.msk [vmem:[#allocation2 + $0x348] sm:$0xff] %vm38_vm2, %v27387_v24  ;;  %51 = vst.msk [vmem:[#allocation2 + $0x350] sm:$0xff] %vm38_vm2, %v27387_v24  ;;  %v846_v10 = vadd.f32 %v22387_v4, %v21767_v33  ;;  %v1235_v56 = vsel %vm38_vm2, %v22085_v7, 0.0  ;;  %v1122_v57 = vmul.f32 %v22382_v62, %v22382_v62  ;;  %v22431_v19 = vmax.f32 %v841_v42, 0.0  ;;  %v2263_v33 = vld [vmem:[%s27355_s5 + $0x50] sm:$0xff] }
 0x150   :  { %55 = vst.msk [vmem:[#allocation2 + $0x18] sm:$0x1] %vm53_vm3, %v27387_v24  ;;  %56 = vst.msk [vmem:[#allocation2 + $0x30] sm:$0x1] %vm53_vm3, %v27387_v24  ;;  %v1037_v55 = vadd.f32 %v22057_v47, %v22087_v46  ;;  %v1232_v34 = vadd.f32 %v22079_v9, %v22081_v39  ;;  %v1237_v47 = vsel %vm38_vm2, %v1120_v26, 0.0  ;;  %v851_v9 = vadd.f32 %v22387_v4, %v21793_v51 }
 0x151   :  { %57 = vst.msk [vmem:[#allocation2 + $0x48] sm:$0x1] %vm53_vm3, %v27387_v24  ;;  %58 = vst.msk [vmem:[#allocation2 + $0x60] sm:$0x1] %vm53_vm3, %v27387_v24  ;;  %19733 = vmatpush3.bf16.msra.mxu1 %v22059_v35  ;;  %v1042_v39 = vsel %vm38_vm2, %v22061_v20, 0.0  ;;  %v1123_v51 = vmul.f32 %v22422_v8, %v22422_v8  ;;  %v1044_v35 = vsel %vm38_vm2, %v22382_v62, 0.0 }
 0x152   :  { %59 = vst.msk [vmem:[#allocation2 + $0x78] sm:$0x1] %vm53_vm3, %v27387_v24  ;;  %60 = vst.msk [vmem:[#allocation2 + $0x90] sm:$0x1] %vm53_vm3, %v27387_v24  ;;  %v1234_v27 = vadd.f32 %v1233_v63, %v1232_v34  ;;  %v1039_v30 = vadd.f32 %v1038_v14, %v1037_v55  ;;  %19735 = vmatprep.subr.bf16.mxu1 %v19734_v52  ;;  %v1239_v63 = vsel %vm38_vm2, %v1121_v59, 0.0  ;;  %v22449_v26 = vmax.f32 %v846_v10, 0.0 }
 0x153   :  { %61 = vst.msk [vmem:[#allocation2 + $0xa8] sm:$0x1] %vm53_vm3, %v27387_v24  ;;  %62 = vst.msk [vmem:[#allocation2 + $0xc0] sm:$0x1] %vm53_vm3, %v27387_v24  ;;  %v1485_v42 = vld [vmem:[#allocation2 + $0x8] sm:$0xff]  ;;  %v856_v34 = vadd.f32 %v22387_v4, %v21788_v41  ;;  %v1124_v59 = vmul.f32 %v22431_v19, %v22431_v19  ;;  %v1046_v41 = vsel %vm38_vm2, %v22422_v8, 0.0 }
 0x154   :  { %63 = vst.msk [vmem:[#allocation2 + $0xd8] sm:$0x1] %vm53_vm3, %v27387_v24  ;;  %64 = vst.msk [vmem:[#allocation2 + $0xf0] sm:$0x1] %vm53_vm3, %v27387_v24  ;;  %v1041_v7 = vadd.f32 %v1040_v6, %v1039_v30  ;;  %v1236_v46 = vadd.f32 %v1235_v56, %v1234_v27  ;;  %v19738_v6 = vpack.c.bf16 %v2264_v58, %v2263_v33  ;;  %v1241_v56 = vsel %vm38_vm2, %v1122_v57, 0.0 }
 0x155   :  { %65 = vst.msk [vmem:[#allocation2 + $0x108] sm:$0x1] %vm53_vm3, %v27387_v24  ;;  %66 = vst.msk [vmem:[#allocation2 + $0x120] sm:$0x1] %vm53_vm3, %v27387_v24  ;;  %v22456_v27 = vmax.f32 %v851_v9, 0.0  ;;  %v861_v30 = vadd.f32 %v22387_v4, %v21817_v16  ;;  %v1243_v33 = vsel %vm38_vm2, %v1123_v51, 0.0  ;;  %v1125_v58 = vmul.f32 %v22449_v26, %v22449_v26 }
 0x156   :  { %67 = vst.msk [vmem:[#allocation2 + $0x138] sm:$0x1] %vm53_vm3, %v27387_v24  ;;  %68 = vst.msk [vmem:[#allocation2 + $0x150] sm:$0x1] %vm53_vm3, %v27387_v24  ;;  %v1238_v14 = vadd.f32 %v1237_v47, %v1236_v46  ;;  %v1043_v55 = vadd.f32 %v1042_v39, %v1041_v7  ;;  %v1048_v57 = vsel %vm38_vm2, %v22431_v19, 0.0  ;;  %v22469_v39 = vmax.f32 %v856_v34, 0.0 }
 0x157   :  { %69 = vst.msk [vmem:[#allocation2 + $0x168] sm:$0x1] %vm53_vm3, %v27387_v24  ;;  %70 = vst.msk [vmem:[#allocation2 + $0x180] sm:$0x1] %vm53_vm3, %v27387_v24  ;;  %v1126_v7 = vmul.f32 %v22456_v27, %v22456_v27  ;;  %v866_v46 = vadd.f32 %v22387_v4, %v21813_v43 }
 0x158   :  { %73 = vst.msk [vmem:[#allocation2 + $0x1c8] sm:$0x1] %vm53_vm3, %v27387_v24  ;;  %74 = vst.msk [vmem:[#allocation2 + $0x1e0] sm:$0x1] %vm53_vm3, %v27387_v24  ;;  %v1045_v10 = vadd.f32 %v1044_v35, %v1043_v55  ;;  %v1240_v47 = vadd.f32 %v1239_v63, %v1238_v14  ;;  %v22476_v63 = vmax.f32 %v861_v30, 0.0  ;;  %v1050_v35 = vsel %vm38_vm2, %v22449_v26, 0.0 }
 0x159   :  { %75 = vst.msk [vmem:[#allocation2 + $0x1f8] sm:$0x1] %vm53_vm3, %v27387_v24  ;;  %76 = vst.msk [vmem:[#allocation2 + $0x210] sm:$0x1] %vm53_vm3, %v27387_v24  ;;  %v1247_v14 = vsel %vm38_vm2, %v1125_v58, 0.0  ;;  %v1249_v43 = vsel %vm38_vm2, %v1126_v7, 0.0 }
 0x15a   :  { %77 = vst.msk [vmem:[#allocation2 + $0x228] sm:$0x1] %vm53_vm3, %v27387_v24  ;;  %78 = vst.msk [vmem:[#allocation2 + $0x240] sm:$0x1] %vm53_vm3, %v27387_v24  ;;  %v1242_v9 = vadd.f32 %v1241_v56, %v1240_v47  ;;  %v1047_v16 = vadd.f32 %v1046_v41, %v1045_v10  ;;  %v1127_v56 = vmul.f32 %v22469_v39, %v22469_v39  ;;  %v22486_v4 = vmax.f32 %v866_v46, 0.0  ;;  %v2265_v30 = vld [vmem:[%s27355_s5 + $0x60] sm:$0xff] }
 0x15b   :  { %79 = vst.msk [vmem:[#allocation2 + $0x258] sm:$0x1] %vm53_vm3, %v27387_v24  ;;  %80 = vst.msk [vmem:[#allocation2 + $0x270] sm:$0x1] %vm53_vm3, %v27387_v24 }
 0x15c   :  { %81 = vst.msk [vmem:[#allocation2 + $0x288] sm:$0x1] %vm53_vm3, %v27387_v24  ;;  %82 = vst.msk [vmem:[#allocation2 + $0x2a0] sm:$0x1] %vm53_vm3, %v27387_v24  ;;  %v1049_v51 = vadd.f32 %v1048_v57, %v1047_v16  ;;  %v1056_v57 = vsel %vm38_vm2, %v22476_v63, 0.0  ;;  %v1251_v16 = vsel %vm38_vm2, %v1127_v56, 0.0 }
 0x15d   :  { %83 = vst.msk [vmem:[#allocation2 + $0x2b8] sm:$0x1] %vm53_vm3, %v27387_v24  ;;  %84 = vst.msk [vmem:[#allocation2 + $0x2d0] sm:$0x1] %vm53_vm3, %v27387_v24 }
 0x15e   :  { %85 = vst.msk [vmem:[#allocation2 + $0x2e8] sm:$0x1] %vm53_vm3, %v27387_v24  ;;  %86 = vst.msk [vmem:[#allocation2 + $0x300] sm:$0x1] %vm53_vm3, %v27387_v24  ;;  %v1051_v34 = vadd.f32 %v1050_v35, %v1049_v51 }
 0x15f   :  { %87 = vst.msk [vmem:[#allocation2 + $0x318] sm:$0x1] %vm53_vm3, %v27387_v24  ;;  %88 = vst.msk [vmem:[#allocation2 + $0x330] sm:$0x1] %vm53_vm3, %v27387_v24 }
 0x160   :  { %91 = vst.msk [vmem:[#allocation2 + $0x29] sm:$0x1] %vm53_vm3, %v27387_v24  ;;  %92 = vst.msk [vmem:[#allocation2 + $0x41] sm:$0x1] %vm53_vm3, %v27387_v24 }
 0x161   :  { %93 = vst.msk [vmem:[#allocation2 + $0x59] sm:$0x1] %vm53_vm3, %v27387_v24  ;;  %94 = vst.msk [vmem:[#allocation2 + $0x71] sm:$0x1] %vm53_vm3, %v27387_v24 }
 0x162   :  { %95 = vst.msk [vmem:[#allocation2 + $0x89] sm:$0x1] %vm53_vm3, %v27387_v24  ;;  %96 = vst.msk [vmem:[#allocation2 + $0xa1] sm:$0x1] %vm53_vm3, %v27387_v24 }
 0x163   :  { %97 = vst.msk [vmem:[#allocation2 + $0xb9] sm:$0x1] %vm53_vm3, %v27387_v24  ;;  %98 = vst.msk [vmem:[#allocation2 + $0xd1] sm:$0x1] %vm53_vm3, %v27387_v24 }
 0x164   :  { %99 = vst.msk [vmem:[#allocation2 + $0xe9] sm:$0x1] %vm53_vm3, %v27387_v24  ;;  %100 = vst.msk [vmem:[#allocation2 + $0x101] sm:$0x1] %vm53_vm3, %v27387_v24 }
 0x165   :  { %101 = vst.msk [vmem:[#allocation2 + $0x119] sm:$0x1] %vm53_vm3, %v27387_v24  ;;  %102 = vst.msk [vmem:[#allocation2 + $0x131] sm:$0x1] %vm53_vm3, %v27387_v24 }
 0x166   :  { %103 = vst.msk [vmem:[#allocation2 + $0x149] sm:$0x1] %vm53_vm3, %v27387_v24  ;;  %104 = vst.msk [vmem:[#allocation2 + $0x161] sm:$0x1] %vm53_vm3, %v27387_v24 }
 0x167   :  { %105 = vst.msk [vmem:[#allocation2 + $0x179] sm:$0x1] %vm53_vm3, %v27387_v24  ;;  %106 = vst.msk [vmem:[#allocation2 + $0x191] sm:$0x1] %vm53_vm3, %v27387_v24 }
 0x168   :  { %109 = vst.msk [vmem:[#allocation2 + $0x1d9] sm:$0x1] %vm53_vm3, %v27387_v24  ;;  %110 = vst.msk [vmem:[#allocation2 + $0x1f1] sm:$0x1] %vm53_vm3, %v27387_v24 }
 0x169   :  { %111 = vst.msk [vmem:[#allocation2 + $0x209] sm:$0x1] %vm53_vm3, %v27387_v24  ;;  %112 = vst.msk [vmem:[#allocation2 + $0x221] sm:$0x1] %vm53_vm3, %v27387_v24 }
 0x16a   :  { %113 = vst.msk [vmem:[#allocation2 + $0x239] sm:$0x1] %vm53_vm3, %v27387_v24  ;;  %114 = vst.msk [vmem:[#allocation2 + $0x251] sm:$0x1] %vm53_vm3, %v27387_v24 }
 0x16b   :  { %115 = vst.msk [vmem:[#allocation2 + $0x269] sm:$0x1] %vm53_vm3, %v27387_v24  ;;  %116 = vst.msk [vmem:[#allocation2 + $0x281] sm:$0x1] %vm53_vm3, %v27387_v24 }
 0x16c   :  { %117 = vst.msk [vmem:[#allocation2 + $0x299] sm:$0x1] %vm53_vm3, %v27387_v24  ;;  %118 = vst.msk [vmem:[#allocation2 + $0x2b1] sm:$0x1] %vm53_vm3, %v27387_v24 }
 0x16d   :  { %119 = vst.msk [vmem:[#allocation2 + $0x2c9] sm:$0x1] %vm53_vm3, %v27387_v24  ;;  %120 = vst.msk [vmem:[#allocation2 + $0x2e1] sm:$0x1] %vm53_vm3, %v27387_v24 }
 0x16e   :  { %121 = vst.msk [vmem:[#allocation2 + $0x2f9] sm:$0x1] %vm53_vm3, %v27387_v24  ;;  %122 = vst.msk [vmem:[#allocation2 + $0x311] sm:$0x1] %vm53_vm3, %v27387_v24 }
 0x16f   :  { %123 = vst.msk [vmem:[#allocation2 + $0x329] sm:$0x1] %vm53_vm3, %v27387_v24  ;;  %124 = vst.msk [vmem:[#allocation2 + $0x341] sm:$0x1] %vm53_vm3, %v27387_v24 }
 0x170   :  { %126 = vst.msk [vmem:[#allocation3] sm:$0xff] %vm38_vm2, %v27387_v24  ;;  %127 = vst.msk [vmem:[#allocation3 + $0x8] sm:$0xff] %vm38_vm2, %v27387_v24 }
 0x171   :  { %129 = vst.msk [vmem:[#allocation3 + $0x1b0] sm:$0xff] %vm38_vm2, %v27387_v24  ;;  %130 = vst.msk [vmem:[#allocation3 + $0x1b8] sm:$0xff] %vm38_vm2, %v27387_v24 }
 0x172   :  { %133 = vst.msk [vmem:[#allocation3 + $0x198] sm:$0xff] %vm38_vm2, %v27387_v24  ;;  %134 = vst.msk [vmem:[#allocation3 + $0x1a0] sm:$0xff] %vm38_vm2, %v27387_v24 }
 0x173   :  { %136 = vst.msk [vmem:[#allocation3 + $0x348] sm:$0xff] %vm38_vm2, %v27387_v24  ;;  %137 = vst.msk [vmem:[#allocation3 + $0x350] sm:$0xff] %vm38_vm2, %v27387_v24 }
 0x174   :  { %140 = vst.msk [vmem:[#allocation3 + $0x18] sm:$0x1] %vm53_vm3, %v27387_v24  ;;  %141 = vst.msk [vmem:[#allocation3 + $0x30] sm:$0x1] %vm53_vm3, %v27387_v24 }
 0x175   :  { %142 = vst.msk [vmem:[#allocation3 + $0x48] sm:$0x1] %vm53_vm3, %v27387_v24  ;;  %143 = vst.msk [vmem:[#allocation3 + $0x60] sm:$0x1] %vm53_vm3, %v27387_v24 }
 0x176   :  { %144 = vst.msk [vmem:[#allocation3 + $0x78] sm:$0x1] %vm53_vm3, %v27387_v24  ;;  %145 = vst.msk [vmem:[#allocation3 + $0x90] sm:$0x1] %vm53_vm3, %v27387_v24 }
 0x177   :  { %146 = vst.msk [vmem:[#allocation3 + $0xa8] sm:$0x1] %vm53_vm3, %v27387_v24  ;;  %147 = vst.msk [vmem:[#allocation3 + $0xc0] sm:$0x1] %vm53_vm3, %v27387_v24 }
 0x178   :  { %148 = vst.msk [vmem:[#allocation3 + $0xd8] sm:$0x1] %vm53_vm3, %v27387_v24  ;;  %149 = vst.msk [vmem:[#allocation3 + $0xf0] sm:$0x1] %vm53_vm3, %v27387_v24 }
 0x179   :  { %150 = vst.msk [vmem:[#allocation3 + $0x108] sm:$0x1] %vm53_vm3, %v27387_v24  ;;  %151 = vst.msk [vmem:[#allocation3 + $0x120] sm:$0x1] %vm53_vm3, %v27387_v24 }
 0x17a   :  { %152 = vst.msk [vmem:[#allocation3 + $0x138] sm:$0x1] %vm53_vm3, %v27387_v24  ;;  %153 = vst.msk [vmem:[#allocation3 + $0x150] sm:$0x1] %vm53_vm3, %v27387_v24 }
 0x17b   :  { %154 = vst.msk [vmem:[#allocation3 + $0x168] sm:$0x1] %vm53_vm3, %v27387_v24  ;;  %155 = vst.msk [vmem:[#allocation3 + $0x180] sm:$0x1] %vm53_vm3, %v27387_v24 }
 0x17c   :  { %158 = vst.msk [vmem:[#allocation3 + $0x1c8] sm:$0x1] %vm53_vm3, %v27387_v24  ;;  %159 = vst.msk [vmem:[#allocation3 + $0x1e0] sm:$0x1] %vm53_vm3, %v27387_v24 }
 0x17d   :  { %160 = vst.msk [vmem:[#allocation3 + $0x1f8] sm:$0x1] %vm53_vm3, %v27387_v24  ;;  %161 = vst.msk [vmem:[#allocation3 + $0x210] sm:$0x1] %vm53_vm3, %v27387_v24 }
 0x17e   :  { %162 = vst.msk [vmem:[#allocation3 + $0x228] sm:$0x1] %vm53_vm3, %v27387_v24  ;;  %163 = vst.msk [vmem:[#allocation3 + $0x240] sm:$0x1] %vm53_vm3, %v27387_v24 }
 0x17f   :  { %164 = vst.msk [vmem:[#allocation3 + $0x258] sm:$0x1] %vm53_vm3, %v27387_v24  ;;  %165 = vst.msk [vmem:[#allocation3 + $0x270] sm:$0x1] %vm53_vm3, %v27387_v24 }
 0x180   :  { %166 = vst.msk [vmem:[#allocation3 + $0x288] sm:$0x1] %vm53_vm3, %v27387_v24  ;;  %167 = vst.msk [vmem:[#allocation3 + $0x2a0] sm:$0x1] %vm53_vm3, %v27387_v24 }
 0x181   :  { %168 = vst.msk [vmem:[#allocation3 + $0x2b8] sm:$0x1] %vm53_vm3, %v27387_v24  ;;  %169 = vst.msk [vmem:[#allocation3 + $0x2d0] sm:$0x1] %vm53_vm3, %v27387_v24 }
 0x182   :  { %170 = vst.msk [vmem:[#allocation3 + $0x2e8] sm:$0x1] %vm53_vm3, %v27387_v24  ;;  %171 = vst.msk [vmem:[#allocation3 + $0x300] sm:$0x1] %vm53_vm3, %v27387_v24 }
 0x183   :  { %172 = vst.msk [vmem:[#allocation3 + $0x318] sm:$0x1] %vm53_vm3, %v27387_v24  ;;  %173 = vst.msk [vmem:[#allocation3 + $0x330] sm:$0x1] %vm53_vm3, %v27387_v24 }
 0x184   :  { %176 = vst.msk [vmem:[#allocation3 + $0x29] sm:$0x1] %vm53_vm3, %v27387_v24  ;;  %177 = vst.msk [vmem:[#allocation3 + $0x41] sm:$0x1] %vm53_vm3, %v27387_v24 }
 0x185   :  { %178 = vst.msk [vmem:[#allocation3 + $0x59] sm:$0x1] %vm53_vm3, %v27387_v24  ;;  %179 = vst.msk [vmem:[#allocation3 + $0x71] sm:$0x1] %vm53_vm3, %v27387_v24 }
 0x186   :  { %180 = vst.msk [vmem:[#allocation3 + $0x89] sm:$0x1] %vm53_vm3, %v27387_v24  ;;  %181 = vst.msk [vmem:[#allocation3 + $0xa1] sm:$0x1] %vm53_vm3, %v27387_v24 }
 0x187   :  { %182 = vst.msk [vmem:[#allocation3 + $0xb9] sm:$0x1] %vm53_vm3, %v27387_v24  ;;  %183 = vst.msk [vmem:[#allocation3 + $0xd1] sm:$0x1] %vm53_vm3, %v27387_v24 }
 0x188   :  { %184 = vst.msk [vmem:[#allocation3 + $0xe9] sm:$0x1] %vm53_vm3, %v27387_v24  ;;  %185 = vst.msk [vmem:[#allocation3 + $0x101] sm:$0x1] %vm53_vm3, %v27387_v24 }
 0x189   :  { %186 = vst.msk [vmem:[#allocation3 + $0x119] sm:$0x1] %vm53_vm3, %v27387_v24  ;;  %187 = vst.msk [vmem:[#allocation3 + $0x131] sm:$0x1] %vm53_vm3, %v27387_v24 }
 0x18a   :  { %188 = vst.msk [vmem:[#allocation3 + $0x149] sm:$0x1] %vm53_vm3, %v27387_v24  ;;  %189 = vst.msk [vmem:[#allocation3 + $0x161] sm:$0x1] %vm53_vm3, %v27387_v24 }
 0x18b   :  { %190 = vst.msk [vmem:[#allocation3 + $0x179] sm:$0x1] %vm53_vm3, %v27387_v24  ;;  %191 = vst.msk [vmem:[#allocation3 + $0x191] sm:$0x1] %vm53_vm3, %v27387_v24 }
 0x18c   :  { %194 = vst.msk [vmem:[#allocation3 + $0x1d9] sm:$0x1] %vm53_vm3, %v27387_v24  ;;  %195 = vst.msk [vmem:[#allocation3 + $0x1f1] sm:$0x1] %vm53_vm3, %v27387_v24 }
 0x18d   :  { %196 = vst.msk [vmem:[#allocation3 + $0x209] sm:$0x1] %vm53_vm3, %v27387_v24  ;;  %197 = vst.msk [vmem:[#allocation3 + $0x221] sm:$0x1] %vm53_vm3, %v27387_v24 }
 0x18e   :  { %198 = vst.msk [vmem:[#allocation3 + $0x239] sm:$0x1] %vm53_vm3, %v27387_v24  ;;  %199 = vst.msk [vmem:[#allocation3 + $0x251] sm:$0x1] %vm53_vm3, %v27387_v24 }
 0x18f   :  { %200 = vst.msk [vmem:[#allocation3 + $0x269] sm:$0x1] %vm53_vm3, %v27387_v24  ;;  %201 = vst.msk [vmem:[#allocation3 + $0x281] sm:$0x1] %vm53_vm3, %v27387_v24 }
 0x190   :  { %202 = vst.msk [vmem:[#allocation3 + $0x299] sm:$0x1] %vm53_vm3, %v27387_v24  ;;  %203 = vst.msk [vmem:[#allocation3 + $0x2b1] sm:$0x1] %vm53_vm3, %v27387_v24 }
 0x191   :  { %204 = vst.msk [vmem:[#allocation3 + $0x2c9] sm:$0x1] %vm53_vm3, %v27387_v24  ;;  %205 = vst.msk [vmem:[#allocation3 + $0x2e1] sm:$0x1] %vm53_vm3, %v27387_v24 }
 0x192   :  { %206 = vst.msk [vmem:[#allocation3 + $0x2f9] sm:$0x1] %vm53_vm3, %v27387_v24  ;;  %207 = vst.msk [vmem:[#allocation3 + $0x311] sm:$0x1] %vm53_vm3, %v27387_v24 }
 0x193   :  { %208 = vst.msk [vmem:[#allocation3 + $0x329] sm:$0x1] %vm53_vm3, %v27387_v24  ;;  %209 = vst.msk [vmem:[#allocation3 + $0x341] sm:$0x1] %vm53_vm3, %v27387_v24 }
 0x194   :  { %54 = vst.msk [vmem:[#allocation2] sm:$0x1] %vm53_vm3, %v27387_v24  ;;  %71 = vst.msk [vmem:[#allocation2 + $0x198] sm:$0x1] %vm53_vm3, %v27387_v24 }
 0x195   :  { %72 = vst.msk [vmem:[#allocation2 + $0x1b0] sm:$0x1] %vm53_vm3, %v27387_v24  ;;  %89 = vst.msk [vmem:[#allocation2 + $0x348] sm:$0x1] %vm53_vm3, %v27387_v24 }
 0x196   :  { %139 = vst.msk [vmem:[#allocation3] sm:$0x1] %vm53_vm3, %v27387_v24  ;;  %156 = vst.msk [vmem:[#allocation3 + $0x198] sm:$0x1] %vm53_vm3, %v27387_v24 }
 0x197   :  { %157 = vst.msk [vmem:[#allocation3 + $0x1b0] sm:$0x1] %vm53_vm3, %v27387_v24  ;;  %174 = vst.msk [vmem:[#allocation3 + $0x348] sm:$0x1] %vm53_vm3, %v27387_v24 }
 0x198   :  { %27685 = vst [vmem:[#allocation27_spill] sm:$0xff] %v22486_v4 }
 0x19b   :  { %v1484_v24 = vld [vmem:[#allocation2] sm:$0xff] }
 0x19c   :  { %17710 = vmatprep.mubr.msk.f32.mxu1 %vm38_vm2, %v1484_v24  ;;  %v1245_v24 = vsel %vm38_vm2, %v1124_v59, 0.0  ;;  %v1128_v59 = vmul.f32 %v22476_v63, %v22476_v63 }
 0x19d   :  { %17711 = vmatmul.mubr.msk.f32.vlgmr.msra.gmra.mrb[32].mxu1 %vm38_vm2, %v1485_v42  ;;  %v1052_v42 = vsel %vm38_vm2, %v22456_v27, 0.0 }
 0x19e   :  { %19737 = vmatpush3.bf16.msra.mxu1 %v19734_v52  ;;  %v1244_v52 = vadd.f32 %v1243_v33, %v1242_v9  ;;  %v1053_v10 = vadd.f32 %v1052_v42, %v1051_v34  ;;  %v1054_v33 = vsel %vm38_vm2, %v22469_v39, 0.0  ;;  %v1253_v7 = vsel %vm38_vm2, %v1128_v59, 0.0 }
 0x19f   :  { %19739 = vmatprep.subr.bf16.mxu1 %v19738_v6 }
 0x1a0   :  { %v1246_v55 = vadd.f32 %v1245_v24, %v1244_v52  ;;  %v1055_v58 = vadd.f32 %v1054_v33, %v1053_v10  ;;  %v1129_v24 = vmul.f32 %v22486_v4, %v22486_v4  ;;  %v1058_v52 = vsel %vm38_vm2, %v22486_v4, 0.0 }
 0x1a2   :  { %19741 = vmatpush3.bf16.msra.mxu1 %v19738_v6  ;;  %v2266_v6 = vld [vmem:[%s27355_s5 + $0x68] sm:$0xff]  ;;  %v1248_v47 = vadd.f32 %v1247_v14, %v1246_v55  ;;  %v1057_v46 = vadd.f32 %v1056_v57, %v1055_v58  ;;  %v1255_v14 = vsel %vm38_vm2, %v1129_v24, 0.0  ;;  %v1274_v24 = vlaneseq }
 0x1a3   :  { %v19742_v41 = vpack.c.bf16 %v2266_v6, %v2265_v30 }
 0x1a4   :  { %v1250_v9 = vadd.f32 %v1249_v43, %v1248_v47  ;;  %v1059_v35 = vadd.f32 %v1058_v52, %v1057_v46  ;;  %v2268_v52 = vld [vmem:[%s27355_s5 + $0x78] sm:$0xff] }
 0x1a5   :  { %19743 = vmatprep.subr.bf16.mxu1 %v19742_v41 }
 0x1a6   :  { %19745 = vmatpush3.bf16.msra.mxu1 %v19742_v41  ;;  %v1252_v51 = vadd.f32 %v1251_v16, %v1250_v9  ;;  %v1060_v55 = vrot.slane %v1059_v35, 4 }
 0x1a8   :  { %v1254_v42 = vadd.f32 %v1253_v7, %v1252_v51  ;;  %v1061_v43 = vadd.f32 %v1060_v55, %v1059_v35  ;;  %v2267_v51 = vld [vmem:[%s27355_s5 + $0x70] sm:$0xff] }
 0x1a9   :  { %v19746_v35 = vpack.c.bf16 %v2268_v52, %v2267_v51  ;;  %v27692_v51 = vld [vmem:[#allocation10_spill] sm:$0xff] }
 0x1aa   :  { %v1256_v34 = vadd.f32 %v1255_v14, %v1254_v42  ;;  %v1062_v56 = vrot.slane %v1061_v43, 2  ;;  %v1275_v42 = vshrl.u32 %v1274_v24, 7  ;;  %v1269_v14 = vld [vmem:[%s27356_s3] sm:$0x1] }
 0x1ab   :  { %19747 = vmatprep.subr.bf16.mxu1 %v19746_v35 }
 0x1ac   :  { %v1257_v30 = vrot.slane %v1256_v34, 4  ;;  %v1063_v10 = vadd.f32 %v1062_v56, %v1061_v43  ;;  %19749 = vmatpush3.bf16.msra.mxu1 %v19746_v35  ;;  %v1271_v43 = vld [vmem:[%s27357_s4] sm:$0x1]  ;;  %v27693_v35 = vld [vmem:[#allocation9_spill] sm:$0xff] }
 0x1ae   :  { %v1258_v6 = vadd.f32 %v1257_v30, %v1256_v34  ;;  %v1064_v33 = vrot.slane %v1063_v10, 1 }
 0x1b0   :  { %v1259_v47 = vrot.slane %v1258_v6, 2  ;;  %v1065_v41 = vadd.f32 %v1064_v33, %v1063_v10 }
 0x1b2   :  { %v1260_v59 = vadd.f32 %v1259_v47, %v1258_v6  ;;  %v1263_v58 = vmul.f32 0.001953125, %v1065_v41 }
 0x1b4   :  { %v1261_v57 = vrot.slane %v1260_v59, 1  ;;  %v1265_v4 = vmul.f32 %v1263_v58, %v1263_v58 }
 0x1b6   :  { %v1262_v9 = vadd.f32 %v1261_v57, %v1260_v59 }
 0x1b8   :  { %v1264_v16 = vmul.f32 0.001953125, %v1262_v9  ;;  %v27687_v9 = vld [vmem:[#allocation4_spill] sm:$0xff] }
 0x1ba   :  { %v1266_v46 = vsub.f32 %v1264_v16, %v1265_v4  ;;  %v22516_v4 = vsub.s32 0, %v1275_v42 }
 0x1bc   :  { %v1267_v7 = vadd.f32 1e-05, %v1266_v46  ;;  %27686 = vst [vmem:[#allocation28_spill] sm:$0xff] %v22516_v4 }
 0x1be   :  { %21165 = vrsqrt.f32 %v1267_v7 }
 0x1c8   :  { %v21166_v55 = vpop.eup %21165 }
 0x1c9   :  { %v1270_v34 = vmul.f32 %v21166_v55, %v1269_v14  ;;  %v27694_v14 = vld [vmem:[#allocation12_spill] sm:$0xff] }
 0x1cb   :  { %v1272_v30 = vmul.f32 %v1270_v34, %v1263_v58  ;;  %v22522_v56 = vrot.slane %v1270_v34, %v22516_v4  ;;  %v27688_v58 = vld [vmem:[#allocation6_spill] sm:$0xff]  ;;  %v27695_v34 = vld [vmem:[#allocation11_spill] sm:$0xff] }
 0x1cd   :  { %v1273_v6 = vsub.f32 %v1271_v43, %v1272_v30  ;;  %v1340_v10 = vmul.f32 %v22522_v56, %v22476_v63  ;;  %v22528_v47 = vmul.f32 %v22522_v56, %v21522_v18  ;;  %v22532_v33 = vmul.f32 %v22522_v56, %v21520_v17  ;;  %v27696_v30 = vld [vmem:[#allocation14_spill] sm:$0xff] }
 0x1ce   :  { %v22536_v59 = vmul.f32 %v22522_v56, %v21542_v32  ;;  %v22540_v41 = vmul.f32 %v22522_v56, %v21538_v29  ;;  %v22544_v57 = vmul.f32 %v22522_v56, %v21561_v48  ;;  %v22548_v18 = vmul.f32 %v22522_v56, %v21556_v45 }
 0x1cf   :  { %v22551_v63 = vrot.slane %v1273_v6, %v22516_v4  ;;  %v22555_v17 = vmul.f32 %v22522_v56, %v21581_v2  ;;  %v22559_v32 = vmul.f32 %v22522_v56, %v21579_v1  ;;  %v22563_v29 = vmul.f32 %v22522_v56, %v21602_v31  ;;  %v27689_v31 = vld [vmem:[#allocation5_spill] sm:$0xff]  ;;  %v27706_v4 = vld [vmem:[#allocation22_spill] sm:$0xff] }
 0x1d0   :  { %v22567_v48 = vmul.f32 %v22522_v56, %v21595_v21  ;;  %v22571_v45 = vmul.f32 %v22522_v56, %v21618_v49  ;;  %v22575_v2 = vmul.f32 %v22522_v56, %v27687_v9  ;;  %v22579_v1 = vmul.f32 %v22522_v56, %v27688_v58  ;;  %v27690_v21 = vld [vmem:[#allocation8_spill] sm:$0xff]  ;;  %v27691_v49 = vld [vmem:[#allocation7_spill] sm:$0xff] }
 0x1d1   :  { %v1410_v16 = vadd.f32 %v22551_v63, %v1340_v10  ;;  %v22584_v46 = vmul.f32 %v22522_v56, %v27689_v31  ;;  %v22588_v7 = vmul.f32 %v22522_v56, %v27690_v21  ;;  %v22592_v24 = vmul.f32 %v22522_v56, %v27691_v49  ;;  %v27697_v10 = vld [vmem:[#allocation13_spill] sm:$0xff]  ;;  %v27698_v58 = vld [vmem:[#allocation16_spill] sm:$0xff]  ;;  %v27699_v21 = vld [vmem:[#allocation15_spill] sm:$0xff] }
 0x1d2   :  { %v22596_v52 = vmul.f32 %v22522_v56, %v27692_v51  ;;  %v22600_v42 = vmul.f32 %v22522_v56, %v27693_v35  ;;  %v22604_v55 = vmul.f32 %v22522_v56, %v27694_v14  ;;  %v22608_v43 = vmul.f32 %v22522_v56, %v27695_v34  ;;  %v27700_v51 = vld [vmem:[#allocation18_spill] sm:$0xff]  ;;  %v27703_v34 = vld [vmem:[#allocation20_spill] sm:$0xff] }
 0x1d3   :  { %1475 = vst.msk [vmem:[#allocation2 + $0x331] sm:$0xff] %vm38_vm2, %v1410_v16  ;;  %v22613_v6 = vmul.f32 %v22522_v56, %v27696_v30  ;;  %v22617_v9 = vmul.f32 %v22522_v56, %v27697_v10  ;;  %v22621_v31 = vmul.f32 %v22522_v56, %v27698_v58  ;;  %v22625_v49 = vmul.f32 %v22522_v56, %v27699_v21  ;;  %v27701_v16 = vld [vmem:[#allocation17_spill] sm:$0xff]  ;;  %v27705_v10 = vld [vmem:[#allocation19_spill] sm:$0xff] }
 0x1d4   :  { %v22629_v35 = vmul.f32 %v22522_v56, %v27700_v51  ;;  %v22633_v14 = vmul.f32 %v22522_v56, %v27701_v16  ;;  %v22637_v30 = vmul.f32 %v22522_v56, %v27703_v34  ;;  %v22641_v58 = vmul.f32 %v22522_v56, %v27705_v10 }
 0x1d5   :  { %v22645_v21 = vmul.f32 %v22522_v56, %v27706_v4  ;;  %v22649_v51 = vmul.f32 %v22522_v56, %v21799_v5  ;;  %v22653_v16 = vmul.f32 %v22522_v56, %v21828_v36  ;;  %v22665_v4 = vmul.f32 %v22522_v56, %v21802_v25 }
 0x1d6   :  { %27702 = vst [vmem:[#allocation4_spill] sm:$0xff] %v22633_v14  ;;  %27704 = vst [vmem:[#allocation6_spill] sm:$0xff] %v22637_v30  ;;  %v27707_v14 = vld [vmem:[#allocation23_spill] sm:$0xff]  ;;  %v27708_v30 = vld [vmem:[#allocation21_spill] sm:$0xff]  ;;  %v22669_v5 = vmul.f32 %v22522_v56, %v21837_v3  ;;  %v22673_v36 = vmul.f32 %v22522_v56, %v21856_v37  ;;  %v22685_v25 = vmul.f32 %v22522_v56, %v21881_v44 }
 0x1d7   :  { %v22657_v34 = vmul.f32 %v22522_v56, %v27707_v14  ;;  %v22661_v10 = vmul.f32 %v22522_v56, %v27708_v30  ;;  %v22677_v14 = vmul.f32 %v22522_v56, %v21863_v50  ;;  %v22681_v30 = vmul.f32 %v22522_v56, %v21876_v28 }
 0x1d8   :  { %v22689_v3 = vmul.f32 %v22522_v56, %v21889_v22  ;;  %v22693_v37 = vmul.f32 %v22522_v56, %v21899_v12  ;;  %v22697_v50 = vmul.f32 %v22522_v56, %v21909_v60  ;;  %v22701_v28 = vmul.f32 %v22522_v56, %v21917_v54 }
 0x1d9   :  { %v22705_v44 = vmul.f32 %v22522_v56, %v21928_v38  ;;  %v22709_v22 = vmul.f32 %v22522_v56, %v21935_v23  ;;  %v22713_v12 = vmul.f32 %v22522_v56, %v21948_v11  ;;  %v22717_v60 = vmul.f32 %v22522_v56, %v21953_v15 }
 0x1da   :  { %v22721_v54 = vmul.f32 %v22522_v56, %v21963_v61  ;;  %v22725_v38 = vmul.f32 %v22522_v56, %v21973_v40  ;;  %v22741_v61 = vmul.f32 %v22522_v56, %v22015_v0  ;;  %v22745_v40 = vmul.f32 %v22522_v56, %v22041_v13 }
 0x1db   :  { %27709 = vst [vmem:[#allocation5_spill] sm:$0xff] %v22705_v44  ;;  %27710 = vst [vmem:[#allocation8_spill] sm:$0xff] %v22709_v22  ;;  %v27712_v44 = vld [vmem:[#allocation24_spill] sm:$0xff]  ;;  %v27713_v22 = vld [vmem:[#allocation25_spill] sm:$0xff]  ;;  %v22761_v0 = vmul.f32 %v22522_v56, %v22422_v8  ;;  %v22765_v13 = vmul.f32 %v22522_v56, %v22431_v19  ;;  %v1348_v19 = vadd.f32 %v22551_v63, %v22528_v47 }
 0x1dc   :  { %27711 = vst [vmem:[#allocation7_spill] sm:$0xff] %v22713_v12  ;;  %v22729_v23 = vmul.f32 %v22522_v56, %v27712_v44  ;;  %v22733_v11 = vmul.f32 %v22522_v56, %v27713_v22  ;;  %v27714_v12 = vld [vmem:[#allocation26_spill] sm:$0xff]  ;;  %v22749_v44 = vmul.f32 %v22522_v56, %v22047_v53  ;;  %v22753_v22 = vmul.f32 %v22522_v56, %v22061_v20 }
 0x1dd   :  { %v22737_v15 = vmul.f32 %v22522_v56, %v27714_v12  ;;  %v22757_v12 = vmul.f32 %v22522_v56, %v22382_v62  ;;  %27716 = vst [vmem:[#allocation9_spill] sm:$0xff] %v22765_v13  ;;  %v22769_v53 = vmul.f32 %v22522_v56, %v22449_v26  ;;  %v22773_v20 = vmul.f32 %v22522_v56, %v22456_v27 }
 0x1de   :  { %v22777_v62 = vmul.f32 %v22522_v56, %v22469_v39  ;;  %v1349_v13 = vadd.f32 %v22551_v63, %v22532_v33  ;;  %v1350_v26 = vadd.f32 %v22551_v63, %v22536_v59  ;;  %v1351_v27 = vadd.f32 %v22551_v63, %v22540_v41  ;;  %1413 = vst.msk [vmem:[#allocation2 + $0x19] sm:$0xff] %vm38_vm2, %v1348_v19 }
 0x1df   :  { %27715 = vst [vmem:[#allocation10_spill] sm:$0xff] %v22757_v12  ;;  %v27718_v12 = vld [vmem:[#allocation27_spill] sm:$0xff]  ;;  %v1352_v39 = vadd.f32 %v22551_v63, %v22544_v57  ;;  %v1355_v47 = vadd.f32 %v22551_v63, %v22559_v32  ;;  %v1356_v33 = vadd.f32 %v22551_v63, %v22563_v29  ;;  %v1357_v59 = vadd.f32 %v22551_v63, %v22567_v48 }
 0x1e0   :  { %27717 = vst [vmem:[#allocation12_spill] sm:$0xff] %v22777_v62  ;;  %v22781_v8 = vmul.f32 %v22522_v56, %v27718_v12  ;;  %v1353_v62 = vadd.f32 %v22551_v63, %v22548_v18  ;;  %v1354_v56 = vadd.f32 %v22551_v63, %v22555_v17  ;;  %v1358_v41 = vadd.f32 %v22551_v63, %v22571_v45 }
 0x1e1   :  { %v1359_v57 = vadd.f32 %v22551_v63, %v22575_v2  ;;  %v1360_v18 = vadd.f32 %v22551_v63, %v22579_v1  ;;  %1414 = vst.msk [vmem:[#allocation2 + $0x21] sm:$0xff] %vm38_vm2, %v1349_v13  ;;  %1415 = vst.msk [vmem:[#allocation2 + $0x31] sm:$0xff] %vm38_vm2, %v1350_v26  ;;  %v1361_v17 = vadd.f32 %v22551_v63, %v22584_v46 }
 0x1e2   :  { %1416 = vst.msk [vmem:[#allocation2 + $0x39] sm:$0xff] %vm38_vm2, %v1351_v27  ;;  %1417 = vst.msk [vmem:[#allocation2 + $0x49] sm:$0xff] %vm38_vm2, %v1352_v39  ;;  %v1362_v32 = vadd.f32 %v22551_v63, %v22588_v7  ;;  %v1363_v29 = vadd.f32 %v22551_v63, %v22592_v24  ;;  %v1364_v48 = vadd.f32 %v22551_v63, %v22596_v52  ;;  %v27722_v19 = vld [vmem:[#allocation8_spill] sm:$0xff] }
 0x1e3   :  { %1418 = vst.msk [vmem:[#allocation2 + $0x51] sm:$0xff] %vm38_vm2, %v1353_v62  ;;  %1419 = vst.msk [vmem:[#allocation2 + $0x61] sm:$0xff] %vm38_vm2, %v1354_v56  ;;  %v1365_v45 = vadd.f32 %v22551_v63, %v22600_v42  ;;  %v1366_v2 = vadd.f32 %v22551_v63, %v22604_v55  ;;  %v1367_v1 = vadd.f32 %v22551_v63, %v22608_v43  ;;  %v27719_v55 = vld [vmem:[#allocation4_spill] sm:$0xff] }
 0x1e4   :  { %1420 = vst.msk [vmem:[#allocation2 + $0x69] sm:$0xff] %vm38_vm2, %v1355_v47  ;;  %1421 = vst.msk [vmem:[#allocation2 + $0x79] sm:$0xff] %vm38_vm2, %v1356_v33  ;;  %v1368_v46 = vadd.f32 %v22551_v63, %v22613_v6  ;;  %v1369_v7 = vadd.f32 %v22551_v63, %v22617_v9  ;;  %v1370_v24 = vadd.f32 %v22551_v63, %v22621_v31  ;;  %v27720_v6 = vld [vmem:[#allocation6_spill] sm:$0xff] }
 0x1e5   :  { %1422 = vst.msk [vmem:[#allocation2 + $0x81] sm:$0xff] %vm38_vm2, %v1357_v59  ;;  %1423 = vst.msk [vmem:[#allocation2 + $0x91] sm:$0xff] %vm38_vm2, %v1358_v41  ;;  %v1371_v52 = vadd.f32 %v22551_v63, %v22625_v49  ;;  %v1372_v42 = vadd.f32 %v22551_v63, %v22629_v35  ;;  %v1373_v43 = vadd.f32 %v22551_v63, %v27719_v55  ;;  %v22886_v13 = vld [vmem:[#allocation2 + $0x18] sm:$0xff] }
 0x1e6   :  { %1424 = vst.msk [vmem:[#allocation2 + $0x99] sm:$0xff] %vm38_vm2, %v1359_v57  ;;  %1425 = vst.msk [vmem:[#allocation2 + $0xa9] sm:$0xff] %vm38_vm2, %v1360_v18  ;;  %v1374_v9 = vadd.f32 %v22551_v63, %v27720_v6  ;;  %v1375_v31 = vadd.f32 %v22551_v63, %v22641_v58  ;;  %v1376_v49 = vadd.f32 %v22551_v63, %v22645_v21  ;;  %17713 = vmatprep.mubr.msk.f32.mxu1 %vm38_vm2, %v22886_v13  ;;  %v27724_v41 = vld [vmem:[#allocation10_spill] sm:$0xff] }
 0x1e7   :  { %1426 = vst.msk [vmem:[#allocation2 + $0xb1] sm:$0xff] %vm38_vm2, %v1361_v17  ;;  %1427 = vst.msk [vmem:[#allocation2 + $0xc1] sm:$0xff] %vm38_vm2, %v1362_v32  ;;  %v1377_v35 = vadd.f32 %v22551_v63, %v22649_v51  ;;  %v1378_v12 = vadd.f32 %v22551_v63, %v22653_v16  ;;  %v1379_v58 = vadd.f32 %v22551_v63, %v22657_v34 }
 0x1e8   :  { %1428 = vst.msk [vmem:[#allocation2 + $0xc9] sm:$0xff] %vm38_vm2, %v1363_v29  ;;  %1429 = vst.msk [vmem:[#allocation2 + $0xd9] sm:$0xff] %vm38_vm2, %v1364_v48  ;;  %v1380_v21 = vadd.f32 %v22551_v63, %v22661_v10  ;;  %v1381_v51 = vadd.f32 %v22551_v63, %v22665_v4  ;;  %v1382_v16 = vadd.f32 %v22551_v63, %v22669_v5  ;;  %v27726_v29 = vld [vmem:[#allocation12_spill] sm:$0xff] }
 0x1e9   :  { %1430 = vst.msk [vmem:[#allocation2 + $0xe1] sm:$0xff] %vm38_vm2, %v1365_v45  ;;  %1431 = vst.msk [vmem:[#allocation2 + $0xf1] sm:$0xff] %vm38_vm2, %v1366_v2  ;;  %v1383_v34 = vadd.f32 %v22551_v63, %v22673_v36  ;;  %v1384_v10 = vadd.f32 %v22551_v63, %v22677_v14  ;;  %v1385_v4 = vadd.f32 %v22551_v63, %v22681_v30  ;;  %v22902_v30 = vld [vmem:[#allocation2 + $0x20] sm:$0xff]  ;;  %v22964_v18 = vld [vmem:[#allocation2 + $0x38] sm:$0xff] }
 0x1ea   :  { %1432 = vst.msk [vmem:[#allocation2 + $0xf9] sm:$0xff] %vm38_vm2, %v1367_v1  ;;  %1433 = vst.msk [vmem:[#allocation2 + $0x109] sm:$0xff] %vm38_vm2, %v1368_v46  ;;  %v1386_v5 = vadd.f32 %v22551_v63, %v22685_v25  ;;  %v1387_v36 = vadd.f32 %v22551_v63, %v22689_v3  ;;  %v1388_v14 = vadd.f32 %v22551_v63, %v22693_v37  ;;  %v27721_v37 = vld [vmem:[#allocation5_spill] sm:$0xff]  ;;  %17714 = vmatmul.mubr.msk.f32.gmra.mrb[34].mxu1 %vm38_vm2, %v22902_v30  ;;  %v23029_v45 = vld [vmem:[#allocation2 + $0x60] sm:$0xff] }
 0x1eb   :  { %1434 = vst.msk [vmem:[#allocation2 + $0x111] sm:$0xff] %vm38_vm2, %v1369_v7  ;;  %1435 = vst.msk [vmem:[#allocation2 + $0x121] sm:$0xff] %vm38_vm2, %v1370_v24  ;;  %v1389_v25 = vadd.f32 %v22551_v63, %v22697_v50  ;;  %v1390_v3 = vadd.f32 %v22551_v63, %v22701_v28  ;;  %v1391_v62 = vadd.f32 %v22551_v63, %v27721_v37  ;;  %v22918_v50 = vld [vmem:[#allocation2 + $0x30] sm:$0xff]  ;;  %v27723_v28 = vld [vmem:[#allocation7_spill] sm:$0xff] }
 0x1ec   :  { %1436 = vst.msk [vmem:[#allocation2 + $0x129] sm:$0xff] %vm38_vm2, %v1371_v52  ;;  %1437 = vst.msk [vmem:[#allocation2 + $0x139] sm:$0xff] %vm38_vm2, %v1372_v42  ;;  %v1392_v26 = vadd.f32 %v22551_v63, %v27722_v19  ;;  %v1393_v27 = vadd.f32 %v22551_v63, %v27723_v28  ;;  %v1394_v39 = vadd.f32 %v22551_v63, %v22717_v60  ;;  %17716 = vmatprep.mubr.msk.f32.mxu1 %vm38_vm2, %v22918_v50  ;;  %v23033_v2 = vld [vmem:[#allocation2 + $0x68] sm:$0xff]  ;;  %v23037_v1 = vld [vmem:[#allocation2 + $0x78] sm:$0xff] }
 0x1ed   :  { %1438 = vst.msk [vmem:[#allocation2 + $0x141] sm:$0xff] %vm38_vm2, %v1373_v43  ;;  %1439 = vst.msk [vmem:[#allocation2 + $0x151] sm:$0xff] %vm38_vm2, %v1374_v9  ;;  %v1395_v56 = vadd.f32 %v22551_v63, %v22721_v54  ;;  %v1396_v47 = vadd.f32 %v22551_v63, %v22725_v38  ;;  %v1397_v60 = vadd.f32 %v22551_v63, %v22729_v23  ;;  %v2974_v23 = vld [vmem:[%s27355_s5 + $0x80] sm:$0xff]  ;;  %v23045_v7 = vld [vmem:[#allocation2 + $0x90] sm:$0xff] }
 0x1ee   :  { %1440 = vst.msk [vmem:[#allocation2 + $0x159] sm:$0xff] %vm38_vm2, %v1375_v31  ;;  %1441 = vst.msk [vmem:[#allocation2 + $0x169] sm:$0xff] %vm38_vm2, %v1376_v49  ;;  %v1398_v54 = vadd.f32 %v22551_v63, %v22733_v11  ;;  %v1399_v38 = vadd.f32 %v22551_v63, %v22737_v15  ;;  %v1400_v33 = vadd.f32 %v22551_v63, %v22741_v61  ;;  %v2975_v11 = vld [vmem:[%s27355_s5 + $0x88] sm:$0xff]  ;;  %17717 = vmatmul.mubr.msk.f32.gmra.mrb[36].mxu1 %vm38_vm2, %v22964_v18  ;;  %v23041_v46 = vld [vmem:[#allocation2 + $0x80] sm:$0xff] }
 0x1ef   :  { %1442 = vst.msk [vmem:[#allocation2 + $0x171] sm:$0xff] %vm38_vm2, %v1377_v35  ;;  %1443 = vst.msk [vmem:[#allocation2 + $0x181] sm:$0xff] %vm38_vm2, %v1378_v12  ;;  %v1401_v15 = vadd.f32 %v22551_v63, %v22745_v40  ;;  %v1402_v61 = vadd.f32 %v22551_v63, %v22749_v44  ;;  %v1403_v59 = vadd.f32 %v22551_v63, %v22753_v22  ;;  %v27725_v44 = vld [vmem:[#allocation9_spill] sm:$0xff]  ;;  %v23049_v24 = vld [vmem:[#allocation2 + $0x98] sm:$0xff] }
 0x1f0   :  { %1444 = vst.msk [vmem:[#allocation2 + $0x189] sm:$0xff] %vm38_vm2, %v1379_v58  ;;  %1445 = vst.msk [vmem:[#allocation2 + $0x1c9] sm:$0xff] %vm38_vm2, %v1380_v21  ;;  %v1404_v57 = vadd.f32 %v22551_v63, %v27724_v41  ;;  %v1405_v40 = vadd.f32 %v22551_v63, %v22761_v0  ;;  %v1406_v17 = vadd.f32 %v22551_v63, %v27725_v44  ;;  %v22980_v0 = vld [vmem:[#allocation2 + $0x48] sm:$0xff]  ;;  %v23057_v42 = vld [vmem:[#allocation2 + $0xb0] sm:$0xff] }
 0x1f1   :  { %1446 = vst.msk [vmem:[#allocation2 + $0x1d1] sm:$0xff] %vm38_vm2, %v1381_v51  ;;  %1447 = vst.msk [vmem:[#allocation2 + $0x1e1] sm:$0xff] %vm38_vm2, %v1382_v16  ;;  %v1407_v22 = vadd.f32 %v22551_v63, %v22769_v53  ;;  %v1408_v32 = vadd.f32 %v22551_v63, %v22773_v20  ;;  %v1409_v48 = vadd.f32 %v22551_v63, %v27726_v29  ;;  %17719 = vmatprep.mubr.msk.f32.mxu1 %vm38_vm2, %v22980_v0  ;;  %v23053_v52 = vld [vmem:[#allocation2 + $0xa8] sm:$0xff]  ;;  %v23061_v55 = vld [vmem:[#allocation2 + $0xc0] sm:$0xff] }
 0x1f2   :  { %1448 = vst.msk [vmem:[#allocation2 + $0x1e9] sm:$0xff] %vm38_vm2, %v1383_v34  ;;  %1449 = vst.msk [vmem:[#allocation2 + $0x1f9] sm:$0xff] %vm38_vm2, %v1384_v10  ;;  %v1411_v53 = vadd.f32 %v22551_v63, %v22781_v8  ;;  %v22992_v20 = vpack.c.bf16 %v2975_v11, %v2974_v23  ;;  %v27727_v63 = vmov 0.0   ;;  %v23008_v8 = vld [vmem:[#allocation2 + $0x50] sm:$0xff]  ;;  %v23065_v43 = vld [vmem:[#allocation2 + $0xc8] sm:$0xff] }
 0x1f3   :  { %1450 = vst.msk [vmem:[#allocation2 + $0x201] sm:$0xff] %vm38_vm2, %v1385_v4  ;;  %1451 = vst.msk [vmem:[#allocation2 + $0x211] sm:$0xff] %vm38_vm2, %v1386_v5  ;;  %17720 = vmatmul.mubr.msk.f32.gmra.mrb[38].mxu1 %vm38_vm2, %v23008_v8  ;;  %v23069_v6 = vld [vmem:[#allocation2 + $0xd8] sm:$0xff]  ;;  %v23073_v9 = vld [vmem:[#allocation2 + $0xe0] sm:$0xff] }
 0x1f4   :  { %1452 = vst.msk [vmem:[#allocation2 + $0x219] sm:$0xff] %vm38_vm2, %v1387_v36  ;;  %1453 = vst.msk [vmem:[#allocation2 + $0x229] sm:$0xff] %vm38_vm2, %v1388_v14  ;;  %19751 = vmatprep.subr.bf16.mxu1 %v22992_v20  ;;  %17722 = vmatprep.mubr.msk.f32.mxu1 %vm38_vm2, %v23029_v45  ;;  %v23077_v31 = vld [vmem:[#allocation2 + $0xf0] sm:$0xff]  ;;  %v23081_v49 = vld [vmem:[#allocation2 + $0xf8] sm:$0xff] }
 0x1f5   :  { %1454 = vst.msk [vmem:[#allocation2 + $0x231] sm:$0xff] %vm38_vm2, %v1389_v25  ;;  %1455 = vst.msk [vmem:[#allocation2 + $0x241] sm:$0xff] %vm38_vm2, %v1390_v3  ;;  %v23085_v35 = vld [vmem:[#allocation2 + $0x108] sm:$0xff]  ;;  %v23089_v12 = vld [vmem:[#allocation2 + $0x110] sm:$0xff] }
 0x1f6   :  { %1456 = vst.msk [vmem:[#allocation2 + $0x249] sm:$0xff] %vm38_vm2, %v1391_v62  ;;  %1457 = vst.msk [vmem:[#allocation2 + $0x259] sm:$0xff] %vm38_vm2, %v1392_v26  ;;  %v23093_v58 = vld [vmem:[#allocation2 + $0x120] sm:$0xff]  ;;  %v23097_v21 = vld [vmem:[#allocation2 + $0x128] sm:$0xff] }
 0x1f7   :  { %1458 = vst.msk [vmem:[#allocation2 + $0x261] sm:$0xff] %vm38_vm2, %v1393_v27  ;;  %1459 = vst.msk [vmem:[#allocation2 + $0x271] sm:$0xff] %vm38_vm2, %v1394_v39  ;;  %17723 = vmatmul.mubr.msk.f32.gmra.mrb[40].mxu1 %vm38_vm2, %v23033_v2  ;;  %v23101_v51 = vld [vmem:[#allocation2 + $0x138] sm:$0xff]  ;;  %v23105_v16 = vld [vmem:[#allocation2 + $0x140] sm:$0xff] }
 0x1f8   :  { %1460 = vst.msk [vmem:[#allocation2 + $0x279] sm:$0xff] %vm38_vm2, %v1395_v56  ;;  %1461 = vst.msk [vmem:[#allocation2 + $0x289] sm:$0xff] %vm38_vm2, %v1396_v47  ;;  %17725 = vmatprep.mubr.msk.f32.mxu1 %vm38_vm2, %v23037_v1  ;;  %v23109_v34 = vld [vmem:[#allocation2 + $0x150] sm:$0xff]  ;;  %v23113_v10 = vld [vmem:[#allocation2 + $0x158] sm:$0xff] }
 0x1f9   :  { %1462 = vst.msk [vmem:[#allocation2 + $0x291] sm:$0xff] %vm38_vm2, %v1397_v60  ;;  %1463 = vst.msk [vmem:[#allocation2 + $0x2a1] sm:$0xff] %vm38_vm2, %v1398_v54  ;;  %v23117_v4 = vld [vmem:[#allocation2 + $0x168] sm:$0xff]  ;;  %v1516_v5 = vld [vmem:[#allocation2 + $0x1b0] sm:$0xff] }
 0x1fa   :  { %1464 = vst.msk [vmem:[#allocation2 + $0x2a9] sm:$0xff] %vm38_vm2, %v1399_v38  ;;  %1465 = vst.msk [vmem:[#allocation2 + $0x2b9] sm:$0xff] %vm38_vm2, %v1400_v33  ;;  %v23121_v36 = vld [vmem:[#allocation2 + $0x170] sm:$0xff]  ;;  %v1517_v14 = vld [vmem:[#allocation2 + $0x1b8] sm:$0xff] }
 0x1fb   :  { %1466 = vst.msk [vmem:[#allocation2 + $0x2c1] sm:$0xff] %vm38_vm2, %v1401_v15  ;;  %1467 = vst.msk [vmem:[#allocation2 + $0x2d1] sm:$0xff] %vm38_vm2, %v1402_v61  ;;  %17726 = vmatmul.mubr.msk.f32.gmra.mrb[42].mxu1 %vm38_vm2, %v23041_v46  ;;  %v23127_v25 = vld [vmem:[#allocation2 + $0x1c8] sm:$0xff]  ;;  %v23131_v3 = vld [vmem:[#allocation2 + $0x1d0] sm:$0xff] }
 0x1fc   :  { %1468 = vst.msk [vmem:[#allocation2 + $0x2d9] sm:$0xff] %vm38_vm2, %v1403_v59  ;;  %1469 = vst.msk [vmem:[#allocation2 + $0x2e9] sm:$0xff] %vm38_vm2, %v1404_v57  ;;  %17728 = vmatprep.mubr.msk.f32.mxu1 %vm38_vm2, %v23045_v7  ;;  %v23135_v37 = vld [vmem:[#allocation2 + $0x1e0] sm:$0xff]  ;;  %v23139_v62 = vld [vmem:[#allocation2 + $0x1e8] sm:$0xff] }
 0x1fd   :  { %1470 = vst.msk [vmem:[#allocation2 + $0x2f1] sm:$0xff] %vm38_vm2, %v1405_v40  ;;  %1471 = vst.msk [vmem:[#allocation2 + $0x301] sm:$0xff] %vm38_vm2, %v1406_v17  ;;  %v23143_v19 = vld [vmem:[#allocation2 + $0x1f8] sm:$0xff]  ;;  %v23147_v26 = vld [vmem:[#allocation2 + $0x200] sm:$0xff] }
 0x1fe   :  { %1472 = vst.msk [vmem:[#allocation2 + $0x309] sm:$0xff] %vm38_vm2, %v1407_v22  ;;  %1473 = vst.msk [vmem:[#allocation2 + $0x319] sm:$0xff] %vm38_vm2, %v1408_v32  ;;  %v23151_v28 = vld [vmem:[#allocation2 + $0x210] sm:$0xff]  ;;  %v23155_v27 = vld [vmem:[#allocation2 + $0x218] sm:$0xff] }
 0x1ff   :  { %42 = vst.msk [vmem:[#allocation2 + $0x10] sm:$0x3] %vm41_vm4, %v27727_v63  ;;  %45 = vst.msk [vmem:[#allocation2 + $0x1c0] sm:$0x3] %vm41_vm4, %v27727_v63  ;;  %17729 = vmatmul.mubr.msk.f32.gmra.mrb[44].mxu1 %vm38_vm2, %v23049_v24  ;;  %v23159_v39 = vld [vmem:[#allocation2 + $0x228] sm:$0xff]  ;;  %v23163_v56 = vld [vmem:[#allocation2 + $0x230] sm:$0xff] }
 0x200   :  { %49 = vst.msk [vmem:[#allocation2 + $0x1a8] sm:$0x3] %vm41_vm4, %v27727_v63  ;;  %52 = vst.msk [vmem:[#allocation2 + $0x358] sm:$0x3] %vm41_vm4, %v27727_v63  ;;  %17731 = vmatprep.mubr.msk.f32.mxu1 %vm38_vm2, %v23053_v52  ;;  %v23167_v47 = vld [vmem:[#allocation2 + $0x240] sm:$0xff]  ;;  %v23171_v60 = vld [vmem:[#allocation2 + $0x248] sm:$0xff] }
 0x201   :  { %128 = vst.msk [vmem:[#allocation3 + $0x10] sm:$0x3] %vm41_vm4, %v27727_v63  ;;  %131 = vst.msk [vmem:[#allocation3 + $0x1c0] sm:$0x3] %vm41_vm4, %v27727_v63  ;;  %v23175_v54 = vld [vmem:[#allocation2 + $0x258] sm:$0xff]  ;;  %v23179_v38 = vld [vmem:[#allocation2 + $0x260] sm:$0xff] }
 0x202   :  { %135 = vst.msk [vmem:[#allocation3 + $0x1a8] sm:$0x3] %vm41_vm4, %v27727_v63  ;;  %138 = vst.msk [vmem:[#allocation3 + $0x358] sm:$0x3] %vm41_vm4, %v27727_v63  ;;  %v23183_v33 = vld [vmem:[#allocation2 + $0x270] sm:$0xff]  ;;  %v23187_v23 = vld [vmem:[#allocation2 + $0x278] sm:$0xff] }
 0x203   :  { %1474 = vst.msk [vmem:[#allocation2 + $0x321] sm:$0xff] %vm38_vm2, %v1409_v48  ;;  %1476 = vst.msk [vmem:[#allocation2 + $0x339] sm:$0xff] %vm38_vm2, %v1411_v53  ;;  %17732 = vmatmul.mubr.msk.f32.gmra.mrb[46].mxu1 %vm38_vm2, %v23057_v42  ;;  %v23191_v11 = vld [vmem:[#allocation2 + $0x288] sm:$0xff]  ;;  %v23195_v15 = vld [vmem:[#allocation2 + $0x290] sm:$0xff] }
 0x204   :  { %90 = vst.msk [vmem:[#allocation2 + $0x11] sm:$0x1] %vm53_vm3, %v27727_v63  ;;  %107 = vst.msk [vmem:[#allocation2 + $0x1a9] sm:$0x1] %vm53_vm3, %v27727_v63  ;;  %17734 = vmatprep.mubr.msk.f32.mxu1 %vm38_vm2, %v23061_v55  ;;  %v23199_v61 = vld [vmem:[#allocation2 + $0x2a0] sm:$0xff]  ;;  %v23203_v59 = vld [vmem:[#allocation2 + $0x2a8] sm:$0xff] }
 0x205   :  { %108 = vst.msk [vmem:[#allocation2 + $0x1c1] sm:$0x1] %vm53_vm3, %v27727_v63  ;;  %125 = vst.msk [vmem:[#allocation2 + $0x359] sm:$0x1] %vm53_vm3, %v27727_v63  ;;  %v23207_v41 = vld [vmem:[#allocation2 + $0x2b8] sm:$0xff]  ;;  %v23211_v57 = vld [vmem:[#allocation2 + $0x2c0] sm:$0xff] }
 0x206   :  { %175 = vst.msk [vmem:[#allocation3 + $0x11] sm:$0x1] %vm53_vm3, %v27727_v63  ;;  %192 = vst.msk [vmem:[#allocation3 + $0x1a9] sm:$0x1] %vm53_vm3, %v27727_v63  ;;  %v23215_v40 = vld [vmem:[#allocation2 + $0x2d0] sm:$0xff]  ;;  %v23219_v44 = vld [vmem:[#allocation2 + $0x2d8] sm:$0xff] }
 0x207   :  { %193 = vst.msk [vmem:[#allocation3 + $0x1c1] sm:$0x1] %vm53_vm3, %v27727_v63  ;;  %210 = vst.msk [vmem:[#allocation3 + $0x359] sm:$0x1] %vm53_vm3, %v27727_v63  ;;  %17735 = vmatmul.mubr.msk.f32.gmra.mrb[48].mxu1 %vm38_vm2, %v23065_v43  ;;  %v23223_v17 = vld [vmem:[#allocation2 + $0x2e8] sm:$0xff]  ;;  %v23227_v22 = vld [vmem:[#allocation2 + $0x2f0] sm:$0xff] }
 0x208   :  { %17737 = vmatprep.mubr.msk.f32.mxu1 %vm38_vm2, %v23069_v6  ;;  %27728 = vst [vmem:[#allocation11_spill] sm:$0xff] %v23223_v17  ;;  %27729 = vst [vmem:[#allocation14_spill] sm:$0xff] %v23227_v22  ;;  %v23231_v32 = vld [vmem:[#allocation2 + $0x300] sm:$0xff]  ;;  %v23235_v29 = vld [vmem:[#allocation2 + $0x308] sm:$0xff] }
 0x209   :  { %27730 = vst [vmem:[#allocation13_spill] sm:$0xff] %v23231_v32  ;;  %27731 = vst [vmem:[#allocation16_spill] sm:$0xff] %v23235_v29  ;;  %v23239_v48 = vld [vmem:[#allocation2 + $0x318] sm:$0xff]  ;;  %v2197_v53 = vld [vmem:[#allocation2 + $0x1] sm:$0xff] }
 0x20a   :  { %27732 = vst [vmem:[#allocation15_spill] sm:$0xff] %v23239_v48  ;;  %v23243_v63 = vld [vmem:[#allocation2 + $0x320] sm:$0xff] }
 0x20b   :  { %17738 = vmatmul.mubr.msk.f32.gmra.mrb[50].mxu1 %vm38_vm2, %v23073_v9  ;;  %27733 = vst [vmem:[#allocation18_spill] sm:$0xff] %v23243_v63 }
 0x20c   :  { %17740 = vmatprep.mubr.msk.f32.mxu1 %vm38_vm2, %v23077_v31 }
 0x20f   :  { %17741 = vmatmul.mubr.msk.f32.gmra.mrb[52].mxu1 %vm38_vm2, %v23081_v49 }
 0x210   :  { %17743 = vmatprep.mubr.msk.f32.mxu1 %vm38_vm2, %v23085_v35 }
 0x213   :  { %17744 = vmatmul.mubr.msk.f32.gmra.mrb[54].mxu1 %vm38_vm2, %v23089_v12 }
 0x214   :  { %17746 = vmatprep.mubr.msk.f32.mxu1 %vm38_vm2, %v23093_v58 }
 0x217   :  { %17747 = vmatmul.mubr.msk.f32.gmra.mrb[56].mxu1 %vm38_vm2, %v23097_v21 }
 0x218   :  { %17749 = vmatprep.mubr.msk.f32.mxu1 %vm38_vm2, %v23101_v51 }
 0x21b   :  { %17750 = vmatmul.mubr.msk.f32.gmra.mrb[58].mxu1 %vm38_vm2, %v23105_v16 }
 0x21c   :  { %17752 = vmatprep.mubr.msk.f32.mxu1 %vm38_vm2, %v23109_v34 }
 0x21f   :  { %17753 = vmatmul.mubr.msk.f32.gmra.mrb[60].mxu1 %vm38_vm2, %v23113_v10 }
 0x220   :  { %17755 = vmatprep.mubr.msk.f32.mxu1 %vm38_vm2, %v23117_v4 }
 0x223   :  { %17756 = vmatmul.mubr.msk.f32.gmra.mrb[62].mxu1 %vm38_vm2, %v23121_v36 }
 0x224   :  { %17758 = vmatprep.mubr.msk.f32.mxu1 %vm38_vm2, %v1516_v5  ;;  %v2976_v5 = vld [vmem:[%s27355_s5 + $0x90] sm:$0xff] }
 0x227   :  { %17759 = vmatmul.mubr.msk.f32.gmra.mrb[64].mxu1 %vm38_vm2, %v1517_v14  ;;  %v2977_v14 = vld [vmem:[%s27355_s5 + $0x98] sm:$0xff] }
 0x228   :  { %17761 = vmatprep.mubr.msk.f32.mxu1 %vm38_vm2, %v23127_v25 }
 0x22b   :  { %17762 = vmatmul.mubr.msk.f32.gmra.mrb[66].mxu1 %vm38_vm2, %v23131_v3 }
 0x22c   :  { %17764 = vmatprep.mubr.msk.f32.mxu1 %vm38_vm2, %v23135_v37 }
 0x22f   :  { %17765 = vmatmul.mubr.msk.f32.gmra.mrb[68].mxu1 %vm38_vm2, %v23139_v62 }
 0x230   :  { %17767 = vmatprep.mubr.msk.f32.mxu1 %vm38_vm2, %v23143_v19 }
 0x233   :  { %17768 = vmatmul.mubr.msk.f32.gmra.mrb[70].mxu1 %vm38_vm2, %v23147_v26 }
 0x234   :  { %17770 = vmatprep.mubr.msk.f32.mxu1 %vm38_vm2, %v23151_v28 }
 0x237   :  { %17771 = vmatmul.mubr.msk.f32.gmra.mrb[72].mxu1 %vm38_vm2, %v23155_v27 }
 0x238   :  { %17773 = vmatprep.mubr.msk.f32.mxu1 %vm38_vm2, %v23159_v39 }
 0x23b   :  { %17774 = vmatmul.mubr.msk.f32.gmra.mrb[74].mxu1 %vm38_vm2, %v23163_v56 }
 0x23c   :  { %17776 = vmatprep.mubr.msk.f32.mxu1 %vm38_vm2, %v23167_v47 }
 0x23f   :  { %17777 = vmatmul.mubr.msk.f32.gmra.mrb[76].mxu1 %vm38_vm2, %v23171_v60 }
 0x240   :  { %17779 = vmatprep.mubr.msk.f32.mxu1 %vm38_vm2, %v23175_v54 }
 0x243   :  { %17780 = vmatmul.mubr.msk.f32.gmra.mrb[78].mxu1 %vm38_vm2, %v23179_v38 }
 0x244   :  { %17782 = vmatprep.mubr.msk.f32.mxu1 %vm38_vm2, %v23183_v33 }
 0x247   :  { %17783 = vmatmul.mubr.msk.f32.gmra.mrb[80].mxu1 %vm38_vm2, %v23187_v23 }
 0x248   :  { %17785 = vmatprep.mubr.msk.f32.mxu1 %vm38_vm2, %v23191_v11 }
 0x24b   :  { %17786 = vmatmul.mubr.msk.f32.gmra.mrb[82].mxu1 %vm38_vm2, %v23195_v15 }
 0x24c   :  { %17788 = vmatprep.mubr.msk.f32.mxu1 %vm38_vm2, %v23199_v61 }
 0x24f   :  { %17789 = vmatmul.mubr.msk.f32.gmra.mrb[84].mxu1 %vm38_vm2, %v23203_v59 }
 0x250   :  { %17791 = vmatprep.mubr.msk.f32.mxu1 %vm38_vm2, %v23207_v41 }
 0x253   :  { %17792 = vmatmul.mubr.msk.f32.gmra.mrb[86].mxu1 %vm38_vm2, %v23211_v57 }
 0x254   :  { %17794 = vmatprep.mubr.msk.f32.mxu1 %vm38_vm2, %v23215_v40 }
 0x257   :  { %17795 = vmatmul.mubr.msk.f32.gmra.mrb[88].mxu1 %vm38_vm2, %v23219_v44 }
 0x258   :  { %17797 = vmatprep.mubr.msk.f32.mxu1 %vm38_vm2, %v23223_v17  ;;  %v23261_v17 = vld [vmem:[#allocation2 + $0x19] sm:$0xff] }
 0x259   :  { %27734 = vst [vmem:[#allocation17_spill] sm:$0xff] %v23261_v17 }
 0x25b   :  { %17798 = vmatmul.mubr.msk.f32.gmra.mrb[90].mxu1 %vm38_vm2, %v23227_v22  ;;  %v2979_v22 = vld [vmem:[%s27355_s5 + $0xa8] sm:$0xff] }
 0x25c   :  { %17800 = vmatprep.mubr.msk.f32.mxu1 %vm38_vm2, %v23231_v32  ;;  %v19754_v32 = vpack.c.bf16 %v2977_v14, %v2976_v5  ;;  %v23266_v5 = vld [vmem:[#allocation2 + $0x21] sm:$0xff]  ;;  %v2980_v14 = vld [vmem:[%s27355_s5 + $0xb0] sm:$0xff] }
 0x25d   :  { %27735 = vst [vmem:[#allocation20_spill] sm:$0xff] %v23266_v5 }
 0x25f   :  { %17801 = vmatmul.mubr.msk.f32.gmra.mrb[92].mxu1 %vm38_vm2, %v23235_v29  ;;  %v2198_v29 = vld [vmem:[#allocation2 + $0x9] sm:$0xff] }
 0x260   :  { %17803 = vmatprep.mubr.msk.f32.mxu1 %vm38_vm2, %v23239_v48  ;;  %v2978_v48 = vld [vmem:[%s27355_s5 + $0xa0] sm:$0xff] }
 0x263   :  { %17804 = vmatmul.mubr.msk.f32.gmra.mrb[94].mxu1 %vm38_vm2, %v23243_v63  ;;  %v2981_v63 = vld [vmem:[%s27355_s5 + $0xb8] sm:$0xff] }
 0x264   :  { %17822 = vmatprep.mubr.msk.f32.mxu1 %vm38_vm2, %v2197_v53  ;;  %v19758_v53 = vpack.c.bf16 %v2979_v22, %v2978_v48  ;;  %v23280_v22 = vld [vmem:[#allocation2 + $0x39] sm:$0xff] }
 0x265   :  { %27737 = vst [vmem:[#allocation22_spill] sm:$0xff] %v23280_v22  ;;  %v3687_v48 = vld [vmem:[%s27355_s5 + $0xc0] sm:$0xff] }
 0x267   :  { %17823 = vmatmul.mubr.msk.f32.vlgmr.msra.gmra.mrb[32].mxu1 %vm38_vm2, %v2198_v29  ;;  %v23276_v29 = vld [vmem:[#allocation2 + $0x31] sm:$0xff] }
 0x268   :  { %19753 = vmatpush3.bf16.msra.mxu1 %v22992_v20  ;;  %17825 = vmatprep.mubr.msk.f32.mxu1 %vm38_vm2, %v23261_v17  ;;  %27736 = vst [vmem:[#allocation19_spill] sm:$0xff] %v23276_v29  ;;  %v19762_v20 = vpack.c.bf16 %v2981_v63, %v2980_v14  ;;  %v3688_v17 = vld [vmem:[%s27355_s5 + $0xc8] sm:$0xff]  ;;  %v23296_v63 = vld [vmem:[#allocation2 + $0x51] sm:$0xff] }
 0x269   :  { %19755 = vmatprep.subr.bf16.mxu1 %v19754_v32  ;;  %27739 = vst [vmem:[#allocation21_spill] sm:$0xff] %v23296_v63  ;;  %v23300_v14 = vld [vmem:[#allocation2 + $0x61] sm:$0xff] }
 0x26a   :  { %27740 = vst [vmem:[#allocation24_spill] sm:$0xff] %v23300_v14 }
 0x26b   :  { %17826 = vmatmul.mubr.msk.f32.gmra.mrb[34].mxu1 %vm38_vm2, %v23266_v5  ;;  %v23290_v5 = vld [vmem:[#allocation2 + $0x49] sm:$0xff] }
 0x26c   :  { %17828 = vmatprep.mubr.msk.f32.mxu1 %vm38_vm2, %v23276_v29  ;;  %19757 = vmatpush3.bf16.msra.mxu1 %v19754_v32  ;;  %27738 = vst [vmem:[#allocation23_spill] sm:$0xff] %v23290_v5  ;;  %v23294_v32 = vpack.c.bf16 %v3688_v17, %v3687_v48  ;;  %v23309_v17 = vld [vmem:[#allocation2 + $0x79] sm:$0xff]  ;;  %v23317_v48 = vld [vmem:[#allocation2 + $0x91] sm:$0xff] }
 0x26d   :  { %19759 = vmatprep.subr.bf16.mxu1 %v19758_v53  ;;  %27742 = vst [vmem:[#allocation26_spill] sm:$0xff] %v23309_v17  ;;  %27744 = vst [vmem:[#allocation4_spill] sm:$0xff] %v23317_v48  ;;  %v23533_v29 = vld [vmem:[#allocation2 + $0x1a] sm:$0xff] }
 0x26e   :  { %27794 = vst [vmem:[#allocation71_spill] sm:$0xff] %v23533_v29 }
 0x26f   :  { %17829 = vmatmul.mubr.msk.f32.gmra.mrb[36].mxu1 %vm38_vm2, %v23280_v22  ;;  %v23305_v22 = vld [vmem:[#allocation2 + $0x69] sm:$0xff] }
 0x270   :  { %17831 = vmatprep.mubr.msk.f32.mxu1 %vm38_vm2, %v23290_v5  ;;  %19761 = vmatpush3.bf16.msra.mxu1 %v19758_v53  ;;  %27741 = vst [vmem:[#allocation25_spill] sm:$0xff] %v23305_v22  ;;  %v23313_v53 = vld [vmem:[#allocation2 + $0x81] sm:$0xff] }
 0x271   :  { %19763 = vmatprep.subr.bf16.mxu1 %v19762_v20  ;;  %27743 = vst [vmem:[#allocation27_spill] sm:$0xff] %v23313_v53  ;;  %v3692_v5 = vld [vmem:[%s27355_s5 + $0xe8] sm:$0xff] }
 0x273   :  { %17832 = vmatmul.mubr.msk.f32.gmra.mrb[38].mxu1 %vm38_vm2, %v23296_v63 }
 0x274   :  { %17834 = vmatprep.mubr.msk.f32.mxu1 %vm38_vm2, %v23300_v14  ;;  %19765 = vmatpush3.bf16.msra.mxu1 %v19762_v20  ;;  %v23321_v20 = vld [vmem:[#allocation2 + $0x99] sm:$0xff]  ;;  %v23393_v14 = vld [vmem:[#allocation2 + $0x171] sm:$0xff] }
 0x275   :  { %19767 = vmatprep.subr.bf16.mxu1 %v23294_v32  ;;  %27745 = vst [vmem:[#allocation6_spill] sm:$0xff] %v23321_v20  ;;  %27763 = vst [vmem:[#allocation40_spill] sm:$0xff] %v23393_v14 }
 0x277   :  { %17835 = vmatmul.mubr.msk.f32.gmra.mrb[40].mxu1 %vm38_vm2, %v23305_v22  ;;  %v23325_v22 = vld [vmem:[#allocation2 + $0xa9] sm:$0xff] }
 0x278   :  { %17837 = vmatprep.mubr.msk.f32.mxu1 %vm38_vm2, %v23309_v17  ;;  %27746 = vst [vmem:[#allocation5_spill] sm:$0xff] %v23325_v22  ;;  %v23329_v17 = vld [vmem:[#allocation2 + $0xb1] sm:$0xff] }
 0x279   :  { %27747 = vst [vmem:[#allocation8_spill] sm:$0xff] %v23329_v17 }
 0x27b   :  { %17838 = vmatmul.mubr.msk.f32.gmra.mrb[42].mxu1 %vm38_vm2, %v23313_v53  ;;  %v23333_v53 = vld [vmem:[#allocation2 + $0xc1] sm:$0xff] }
 0x27c   :  { %17840 = vmatprep.mubr.msk.f32.mxu1 %vm38_vm2, %v23317_v48  ;;  %27748 = vst [vmem:[#allocation7_spill] sm:$0xff] %v23333_v53  ;;  %v23337_v48 = vld [vmem:[#allocation2 + $0xc9] sm:$0xff] }
 0x27d   :  { %27749 = vst [vmem:[#allocation10_spill] sm:$0xff] %v23337_v48 }
 0x27f   :  { %17841 = vmatmul.mubr.msk.f32.gmra.mrb[44].mxu1 %vm38_vm2, %v23321_v20  ;;  %v23341_v20 = vld [vmem:[#allocation2 + $0xd9] sm:$0xff] }
 0x280   :  { %17843 = vmatprep.mubr.msk.f32.mxu1 %vm38_vm2, %v23325_v22  ;;  %27750 = vst [vmem:[#allocation9_spill] sm:$0xff] %v23341_v20  ;;  %v23345_v22 = vld [vmem:[#allocation2 + $0xe1] sm:$0xff] }
 0x281   :  { %27751 = vst [vmem:[#allocation12_spill] sm:$0xff] %v23345_v22 }
 0x283   :  { %17844 = vmatmul.mubr.msk.f32.gmra.mrb[46].mxu1 %vm38_vm2, %v23329_v17  ;;  %v23349_v17 = vld [vmem:[#allocation2 + $0xf1] sm:$0xff] }
 0x284   :  { %17846 = vmatprep.mubr.msk.f32.mxu1 %vm38_vm2, %v23333_v53  ;;  %27752 = vst [vmem:[#allocation29_spill] sm:$0xff] %v23349_v17  ;;  %v23353_v53 = vld [vmem:[#allocation2 + $0xf9] sm:$0xff] }
 0x285   :  { %27753 = vst [vmem:[#allocation30_spill] sm:$0xff] %v23353_v53 }
 0x287   :  { %17847 = vmatmul.mubr.msk.f32.gmra.mrb[48].mxu1 %vm38_vm2, %v23337_v48  ;;  %v23357_v48 = vld [vmem:[#allocation2 + $0x109] sm:$0xff] }
 0x288   :  { %17849 = vmatprep.mubr.msk.f32.mxu1 %vm38_vm2, %v23341_v20  ;;  %27754 = vst [vmem:[#allocation31_spill] sm:$0xff] %v23357_v48  ;;  %v23361_v20 = vld [vmem:[#allocation2 + $0x111] sm:$0xff] }
 0x289   :  { %27755 = vst [vmem:[#allocation32_spill] sm:$0xff] %v23361_v20 }
 0x28b   :  { %17850 = vmatmul.mubr.msk.f32.gmra.mrb[50].mxu1 %vm38_vm2, %v23345_v22  ;;  %v23365_v22 = vld [vmem:[#allocation2 + $0x121] sm:$0xff] }
 0x28c   :  { %17852 = vmatprep.mubr.msk.f32.mxu1 %vm38_vm2, %v23349_v17  ;;  %27756 = vst [vmem:[#allocation33_spill] sm:$0xff] %v23365_v22  ;;  %v23369_v17 = vld [vmem:[#allocation2 + $0x129] sm:$0xff] }
 0x28d   :  { %27757 = vst [vmem:[#allocation34_spill] sm:$0xff] %v23369_v17 }
 0x28f   :  { %17853 = vmatmul.mubr.msk.f32.gmra.mrb[52].mxu1 %vm38_vm2, %v23353_v53  ;;  %v23373_v53 = vld [vmem:[#allocation2 + $0x139] sm:$0xff] }
 0x290   :  { %17855 = vmatprep.mubr.msk.f32.mxu1 %vm38_vm2, %v23357_v48  ;;  %27758 = vst [vmem:[#allocation35_spill] sm:$0xff] %v23373_v53  ;;  %v23377_v48 = vld [vmem:[#allocation2 + $0x141] sm:$0xff] }
 0x291   :  { %27759 = vst [vmem:[#allocation36_spill] sm:$0xff] %v23377_v48 }
 0x293   :  { %17856 = vmatmul.mubr.msk.f32.gmra.mrb[54].mxu1 %vm38_vm2, %v23361_v20  ;;  %v23381_v20 = vld [vmem:[#allocation2 + $0x151] sm:$0xff] }
 0x294   :  { %17858 = vmatprep.mubr.msk.f32.mxu1 %vm38_vm2, %v23365_v22  ;;  %27760 = vst [vmem:[#allocation37_spill] sm:$0xff] %v23381_v20  ;;  %v23385_v22 = vld [vmem:[#allocation2 + $0x159] sm:$0xff] }
 0x295   :  { %27761 = vst [vmem:[#allocation38_spill] sm:$0xff] %v23385_v22 }
 0x297   :  { %17859 = vmatmul.mubr.msk.f32.gmra.mrb[56].mxu1 %vm38_vm2, %v23369_v17  ;;  %v23389_v17 = vld [vmem:[#allocation2 + $0x169] sm:$0xff] }
 0x298   :  { %17861 = vmatprep.mubr.msk.f32.mxu1 %vm38_vm2, %v23373_v53  ;;  %27762 = vst [vmem:[#allocation39_spill] sm:$0xff] %v23389_v17  ;;  %v2229_v53 = vld [vmem:[#allocation2 + $0x1b1] sm:$0xff] }
 0x29b   :  { %17862 = vmatmul.mubr.msk.f32.gmra.mrb[58].mxu1 %vm38_vm2, %v23377_v48  ;;  %v2230_v48 = vld [vmem:[#allocation2 + $0x1b9] sm:$0xff] }
 0x29c   :  { %17864 = vmatprep.mubr.msk.f32.mxu1 %vm38_vm2, %v23381_v20  ;;  %v23399_v20 = vld [vmem:[#allocation2 + $0x1c9] sm:$0xff] }
 0x29d   :  { %27764 = vst [vmem:[#allocation41_spill] sm:$0xff] %v23399_v20 }
 0x29f   :  { %17865 = vmatmul.mubr.msk.f32.gmra.mrb[60].mxu1 %vm38_vm2, %v23385_v22  ;;  %v23403_v22 = vld [vmem:[#allocation2 + $0x1d1] sm:$0xff] }
 0x2a0   :  { %17867 = vmatprep.mubr.msk.f32.mxu1 %vm38_vm2, %v23389_v17  ;;  %27765 = vst [vmem:[#allocation42_spill] sm:$0xff] %v23403_v22  ;;  %v23407_v17 = vld [vmem:[#allocation2 + $0x1e1] sm:$0xff] }
 0x2a1   :  { %27766 = vst [vmem:[#allocation43_spill] sm:$0xff] %v23407_v17 }
 0x2a3   :  { %17868 = vmatmul.mubr.msk.f32.gmra.mrb[62].mxu1 %vm38_vm2, %v23393_v14  ;;  %v23411_v14 = vld [vmem:[#allocation2 + $0x1e9] sm:$0xff] }
 0x2a4   :  { %17870 = vmatprep.mubr.msk.f32.mxu1 %vm38_vm2, %v2229_v53  ;;  %27767 = vst [vmem:[#allocation44_spill] sm:$0xff] %v23411_v14  ;;  %v23415_v53 = vld [vmem:[#allocation2 + $0x1f9] sm:$0xff] }
 0x2a5   :  { %27768 = vst [vmem:[#allocation45_spill] sm:$0xff] %v23415_v53 }
 0x2a7   :  { %17871 = vmatmul.mubr.msk.f32.gmra.mrb[64].mxu1 %vm38_vm2, %v2230_v48  ;;  %v23419_v48 = vld [vmem:[#allocation2 + $0x201] sm:$0xff] }
 0x2a8   :  { %17873 = vmatprep.mubr.msk.f32.mxu1 %vm38_vm2, %v23399_v20  ;;  %27769 = vst [vmem:[#allocation46_spill] sm:$0xff] %v23419_v48  ;;  %v23515_v20 = vld [vmem:[#allocation2 + $0x321] sm:$0xff] }
 0x2a9   :  { %27793 = vst [vmem:[#allocation70_spill] sm:$0xff] %v23515_v20 }
 0x2ab   :  { %17874 = vmatmul.mubr.msk.f32.gmra.mrb[66].mxu1 %vm38_vm2, %v23403_v22  ;;  %v23423_v22 = vld [vmem:[#allocation2 + $0x211] sm:$0xff] }
 0x2ac   :  { %17876 = vmatprep.mubr.msk.f32.mxu1 %vm38_vm2, %v23407_v17  ;;  %27770 = vst [vmem:[#allocation47_spill] sm:$0xff] %v23423_v22  ;;  %v23427_v17 = vld [vmem:[#allocation2 + $0x219] sm:$0xff] }
 0x2ad   :  { %27771 = vst [vmem:[#allocation48_spill] sm:$0xff] %v23427_v17 }
 0x2af   :  { %17877 = vmatmul.mubr.msk.f32.gmra.mrb[68].mxu1 %vm38_vm2, %v23411_v14  ;;  %v23431_v14 = vld [vmem:[#allocation2 + $0x229] sm:$0xff] }
 0x2b0   :  { %17879 = vmatprep.mubr.msk.f32.mxu1 %vm38_vm2, %v23415_v53  ;;  %27772 = vst [vmem:[#allocation49_spill] sm:$0xff] %v23431_v14  ;;  %v23435_v53 = vld [vmem:[#allocation2 + $0x231] sm:$0xff] }
 0x2b1   :  { %27773 = vst [vmem:[#allocation50_spill] sm:$0xff] %v23435_v53 }
 0x2b3   :  { %17880 = vmatmul.mubr.msk.f32.gmra.mrb[70].mxu1 %vm38_vm2, %v23419_v48  ;;  %v23439_v48 = vld [vmem:[#allocation2 + $0x241] sm:$0xff] }
 0x2b4   :  { %17882 = vmatprep.mubr.msk.f32.mxu1 %vm38_vm2, %v23423_v22  ;;  %27774 = vst [vmem:[#allocation51_spill] sm:$0xff] %v23439_v48  ;;  %v23443_v22 = vld [vmem:[#allocation2 + $0x249] sm:$0xff] }
 0x2b5   :  { %27775 = vst [vmem:[#allocation52_spill] sm:$0xff] %v23443_v22 }
 0x2b7   :  { %17883 = vmatmul.mubr.msk.f32.gmra.mrb[72].mxu1 %vm38_vm2, %v23427_v17  ;;  %v23447_v17 = vld [vmem:[#allocation2 + $0x259] sm:$0xff] }
 0x2b8   :  { %17885 = vmatprep.mubr.msk.f32.mxu1 %vm38_vm2, %v23431_v14  ;;  %27776 = vst [vmem:[#allocation53_spill] sm:$0xff] %v23447_v17  ;;  %v23451_v14 = vld [vmem:[#allocation2 + $0x261] sm:$0xff] }
 0x2b9   :  { %27777 = vst [vmem:[#allocation54_spill] sm:$0xff] %v23451_v14 }
 0x2bb   :  { %17886 = vmatmul.mubr.msk.f32.gmra.mrb[74].mxu1 %vm38_vm2, %v23435_v53  ;;  %v23455_v53 = vld [vmem:[#allocation2 + $0x271] sm:$0xff] }
 0x2bc   :  { %17888 = vmatprep.mubr.msk.f32.mxu1 %vm38_vm2, %v23439_v48  ;;  %27778 = vst [vmem:[#allocation55_spill] sm:$0xff] %v23455_v53  ;;  %v23459_v48 = vld [vmem:[#allocation2 + $0x279] sm:$0xff] }
 0x2bd   :  { %27779 = vst [vmem:[#allocation56_spill] sm:$0xff] %v23459_v48 }
 0x2bf   :  { %17889 = vmatmul.mubr.msk.f32.gmra.mrb[76].mxu1 %vm38_vm2, %v23443_v22  ;;  %v23463_v22 = vld [vmem:[#allocation2 + $0x289] sm:$0xff] }
 0x2c0   :  { %17891 = vmatprep.mubr.msk.f32.mxu1 %vm38_vm2, %v23447_v17  ;;  %27780 = vst [vmem:[#allocation57_spill] sm:$0xff] %v23463_v22  ;;  %v23467_v17 = vld [vmem:[#allocation2 + $0x291] sm:$0xff] }
 0x2c1   :  { %27781 = vst [vmem:[#allocation58_spill] sm:$0xff] %v23467_v17 }
 0x2c3   :  { %17892 = vmatmul.mubr.msk.f32.gmra.mrb[78].mxu1 %vm38_vm2, %v23451_v14  ;;  %v23471_v14 = vld [vmem:[#allocation2 + $0x2a1] sm:$0xff] }
 0x2c4   :  { %17894 = vmatprep.mubr.msk.f32.mxu1 %vm38_vm2, %v23455_v53  ;;  %27782 = vst [vmem:[#allocation59_spill] sm:$0xff] %v23471_v14  ;;  %v23475_v53 = vld [vmem:[#allocation2 + $0x2a9] sm:$0xff] }
 0x2c5   :  { %27783 = vst [vmem:[#allocation60_spill] sm:$0xff] %v23475_v53 }
 0x2c7   :  { %17895 = vmatmul.mubr.msk.f32.gmra.mrb[80].mxu1 %vm38_vm2, %v23459_v48  ;;  %v23479_v48 = vld [vmem:[#allocation2 + $0x2b9] sm:$0xff] }
 0x2c8   :  { %17897 = vmatprep.mubr.msk.f32.mxu1 %vm38_vm2, %v23463_v22  ;;  %27784 = vst [vmem:[#allocation61_spill] sm:$0xff] %v23479_v48  ;;  %v23483_v22 = vld [vmem:[#allocation2 + $0x2c1] sm:$0xff] }
 0x2c9   :  { %27785 = vst [vmem:[#allocation62_spill] sm:$0xff] %v23483_v22 }
 0x2cb   :  { %17898 = vmatmul.mubr.msk.f32.gmra.mrb[82].mxu1 %vm38_vm2, %v23467_v17  ;;  %v23487_v17 = vld [vmem:[#allocation2 + $0x2d1] sm:$0xff] }
 0x2cc   :  { %17900 = vmatprep.mubr.msk.f32.mxu1 %vm38_vm2, %v23471_v14  ;;  %27786 = vst [vmem:[#allocation63_spill] sm:$0xff] %v23487_v17  ;;  %v23491_v14 = vld [vmem:[#allocation2 + $0x2d9] sm:$0xff] }
 0x2cd   :  { %27787 = vst [vmem:[#allocation64_spill] sm:$0xff] %v23491_v14 }
 0x2cf   :  { %17901 = vmatmul.mubr.msk.f32.gmra.mrb[84].mxu1 %vm38_vm2, %v23475_v53  ;;  %v23495_v53 = vld [vmem:[#allocation2 + $0x2e9] sm:$0xff] }
 0x2d0   :  { %17903 = vmatprep.mubr.msk.f32.mxu1 %vm38_vm2, %v23479_v48  ;;  %27788 = vst [vmem:[#allocation65_spill] sm:$0xff] %v23495_v53  ;;  %v23499_v48 = vld [vmem:[#allocation2 + $0x2f1] sm:$0xff] }
 0x2d1   :  { %27789 = vst [vmem:[#allocation66_spill] sm:$0xff] %v23499_v48 }
 0x2d3   :  { %17904 = vmatmul.mubr.msk.f32.gmra.mrb[86].mxu1 %vm38_vm2, %v23483_v22  ;;  %v23503_v22 = vld [vmem:[#allocation2 + $0x301] sm:$0xff] }
 0x2d4   :  { %17906 = vmatprep.mubr.msk.f32.mxu1 %vm38_vm2, %v23487_v17  ;;  %27790 = vst [vmem:[#allocation67_spill] sm:$0xff] %v23503_v22  ;;  %v23507_v17 = vld [vmem:[#allocation2 + $0x309] sm:$0xff] }
 0x2d5   :  { %27791 = vst [vmem:[#allocation68_spill] sm:$0xff] %v23507_v17 }
 0x2d7   :  { %17907 = vmatmul.mubr.msk.f32.gmra.mrb[88].mxu1 %vm38_vm2, %v23491_v14  ;;  %v23511_v14 = vld [vmem:[#allocation2 + $0x319] sm:$0xff] }
 0x2d8   :  { %17909 = vmatprep.mubr.msk.f32.mxu1 %vm38_vm2, %v23495_v53  ;;  %27792 = vst [vmem:[#allocation69_spill] sm:$0xff] %v23511_v14  ;;  %v2910_v53 = vld [vmem:[#allocation2 + $0x2] sm:$0xff] }
 0x2db   :  { %17910 = vmatmul.mubr.msk.f32.gmra.mrb[90].mxu1 %vm38_vm2, %v23499_v48  ;;  %v3689_v48 = vld [vmem:[%s27355_s5 + $0xd0] sm:$0xff] }
 0x2dc   :  { %17912 = vmatprep.mubr.msk.f32.mxu1 %vm38_vm2, %v23503_v22  ;;  %v3690_v22 = vld [vmem:[%s27355_s5 + $0xd8] sm:$0xff] }
 0x2dd   :  { %v19770_v63 = vpack.c.bf16 %v3690_v22, %v3689_v48  ;;  %v23538_v22 = vld [vmem:[#allocation2 + $0x22] sm:$0xff]  ;;  %v3693_v48 = vld [vmem:[%s27355_s5 + $0xf0] sm:$0xff] }
 0x2de   :  { %27795 = vst [vmem:[#allocation72_spill] sm:$0xff] %v23538_v22 }
 0x2df   :  { %17913 = vmatmul.mubr.msk.f32.gmra.mrb[92].mxu1 %vm38_vm2, %v23507_v17  ;;  %v2911_v17 = vld [vmem:[#allocation2 + $0xa] sm:$0xff] }
 0x2e0   :  { %17915 = vmatprep.mubr.msk.f32.mxu1 %vm38_vm2, %v23511_v14  ;;  %v3691_v14 = vld [vmem:[%s27355_s5 + $0xe0] sm:$0xff] }
 0x2e3   :  { %17916 = vmatmul.mubr.msk.f32.gmra.mrb[94].mxu1 %vm38_vm2, %v23515_v20  ;;  %v3694_v20 = vld [vmem:[%s27355_s5 + $0xf8] sm:$0xff] }
 0x2e4   :  { %17934 = vmatprep.mubr.msk.f32.mxu1 %vm38_vm2, %v2910_v53  ;;  %v19774_v53 = vpack.c.bf16 %v3692_v5, %v3691_v14  ;;  %v19778_v5 = vpack.c.bf16 %v3694_v20, %v3693_v48  ;;  %v4400_v14 = vld [vmem:[%s27355_s5 + $0x100] sm:$0xff]  ;;  %v23568_v20 = vld [vmem:[#allocation2 + $0x52] sm:$0xff] }
 0x2e5   :  { %v23572_v48 = vld [vmem:[#allocation2 + $0x62] sm:$0xff] }
 0x2e6   :  { %27797 = vst [vmem:[#allocation74_spill] sm:$0xff] %v23572_v48 }
 0x2e7   :  { %17935 = vmatmul.mubr.msk.f32.vlgmr.msra.gmra.mrb[32].mxu1 %vm38_vm2, %v2911_v17  ;;  %v23548_v17 = vld [vmem:[#allocation2 + $0x32] sm:$0xff] }
 0x2e8   :  { %19769 = vmatpush3.bf16.msra.mxu1 %v23294_v32  ;;  %17937 = vmatprep.mubr.msk.f32.mxu1 %vm38_vm2, %v23533_v29  ;;  %v23552_v32 = vld [vmem:[#allocation2 + $0x3a] sm:$0xff]  ;;  %v4401_v29 = vld [vmem:[%s27355_s5 + $0x108] sm:$0xff] }
 0x2e9   :  { %19771 = vmatprep.subr.bf16.mxu1 %v19770_v63  ;;  %27796 = vst [vmem:[#allocation73_spill] sm:$0xff] %v23552_v32 }
 0x2eb   :  { %17938 = vmatmul.mubr.msk.f32.gmra.mrb[34].mxu1 %vm38_vm2, %v23538_v22  ;;  %v23562_v22 = vld [vmem:[#allocation2 + $0x4a] sm:$0xff] }
 0x2ec   :  { %17940 = vmatprep.mubr.msk.f32.mxu1 %vm38_vm2, %v23548_v17  ;;  %19773 = vmatpush3.bf16.msra.mxu1 %v19770_v63  ;;  %v23566_v63 = vpack.c.bf16 %v4401_v29, %v4400_v14  ;;  %v23581_v29 = vld [vmem:[#allocation2 + $0x7a] sm:$0xff]  ;;  %v23589_v14 = vld [vmem:[#allocation2 + $0x92] sm:$0xff] }
 0x2ed   :  { %19775 = vmatprep.subr.bf16.mxu1 %v19774_v53  ;;  %27799 = vst [vmem:[#allocation76_spill] sm:$0xff] %v23581_v29  ;;  %27801 = vst [vmem:[#allocation78_spill] sm:$0xff] %v23589_v14 }
 0x2ef   :  { %17941 = vmatmul.mubr.msk.f32.gmra.mrb[36].mxu1 %vm38_vm2, %v23552_v32  ;;  %v23577_v32 = vld [vmem:[#allocation2 + $0x6a] sm:$0xff] }
 0x2f0   :  { %17943 = vmatprep.mubr.msk.f32.mxu1 %vm38_vm2, %v23562_v22  ;;  %19777 = vmatpush3.bf16.msra.mxu1 %v19774_v53  ;;  %27798 = vst [vmem:[#allocation75_spill] sm:$0xff] %v23577_v32  ;;  %v23585_v53 = vld [vmem:[#allocation2 + $0x82] sm:$0xff] }
 0x2f1   :  { %19779 = vmatprep.subr.bf16.mxu1 %v19778_v5  ;;  %27800 = vst [vmem:[#allocation77_spill] sm:$0xff] %v23585_v53 }
 0x2f3   :  { %17944 = vmatmul.mubr.msk.f32.gmra.mrb[38].mxu1 %vm38_vm2, %v23568_v20 }
 0x2f4   :  { %17946 = vmatprep.mubr.msk.f32.mxu1 %vm38_vm2, %v23572_v48  ;;  %19781 = vmatpush3.bf16.msra.mxu1 %v19778_v5  ;;  %v23593_v5 = vld [vmem:[#allocation2 + $0x9a] sm:$0xff]  ;;  %v23665_v48 = vld [vmem:[#allocation2 + $0x172] sm:$0xff] }
 0x2f5   :  { %19783 = vmatprep.subr.bf16.mxu1 %v23566_v63  ;;  %27802 = vst [vmem:[#allocation79_spill] sm:$0xff] %v23593_v5  ;;  %27820 = vst [vmem:[#allocation97_spill] sm:$0xff] %v23665_v48 }
 0x2f7   :  { %17947 = vmatmul.mubr.msk.f32.gmra.mrb[40].mxu1 %vm38_vm2, %v23577_v32  ;;  %v23597_v32 = vld [vmem:[#allocation2 + $0xaa] sm:$0xff] }
 0x2f8   :  { %17949 = vmatprep.mubr.msk.f32.mxu1 %vm38_vm2, %v23581_v29  ;;  %27803 = vst [vmem:[#allocation80_spill] sm:$0xff] %v23597_v32  ;;  %v23601_v29 = vld [vmem:[#allocation2 + $0xb2] sm:$0xff] }
 0x2f9   :  { %27804 = vst [vmem:[#allocation81_spill] sm:$0xff] %v23601_v29 }
 0x2fb   :  { %17950 = vmatmul.mubr.msk.f32.gmra.mrb[42].mxu1 %vm38_vm2, %v23585_v53  ;;  %v23605_v53 = vld [vmem:[#allocation2 + $0xc2] sm:$0xff] }
 0x2fc   :  { %17952 = vmatprep.mubr.msk.f32.mxu1 %vm38_vm2, %v23589_v14  ;;  %27805 = vst [vmem:[#allocation82_spill] sm:$0xff] %v23605_v53  ;;  %v23609_v14 = vld [vmem:[#allocation2 + $0xca] sm:$0xff] }
 0x2fd   :  { %27806 = vst [vmem:[#allocation83_spill] sm:$0xff] %v23609_v14 }
 0x2ff   :  { %17953 = vmatmul.mubr.msk.f32.gmra.mrb[44].mxu1 %vm38_vm2, %v23593_v5  ;;  %v23613_v5 = vld [vmem:[#allocation2 + $0xda] sm:$0xff] }
 0x300   :  { %17955 = vmatprep.mubr.msk.f32.mxu1 %vm38_vm2, %v23597_v32  ;;  %27807 = vst [vmem:[#allocation84_spill] sm:$0xff] %v23613_v5  ;;  %v23617_v32 = vld [vmem:[#allocation2 + $0xe2] sm:$0xff] }
 0x301   :  { %27808 = vst [vmem:[#allocation85_spill] sm:$0xff] %v23617_v32 }
 0x303   :  { %17956 = vmatmul.mubr.msk.f32.gmra.mrb[46].mxu1 %vm38_vm2, %v23601_v29  ;;  %v23621_v29 = vld [vmem:[#allocation2 + $0xf2] sm:$0xff] }
 0x304   :  { %17958 = vmatprep.mubr.msk.f32.mxu1 %vm38_vm2, %v23605_v53  ;;  %27809 = vst [vmem:[#allocation86_spill] sm:$0xff] %v23621_v29  ;;  %v23625_v53 = vld [vmem:[#allocation2 + $0xfa] sm:$0xff] }
 0x305   :  { %27810 = vst [vmem:[#allocation87_spill] sm:$0xff] %v23625_v53 }
 0x307   :  { %17959 = vmatmul.mubr.msk.f32.gmra.mrb[48].mxu1 %vm38_vm2, %v23609_v14  ;;  %v23629_v14 = vld [vmem:[#allocation2 + $0x10a] sm:$0xff] }
 0x308   :  { %17961 = vmatprep.mubr.msk.f32.mxu1 %vm38_vm2, %v23613_v5  ;;  %27811 = vst [vmem:[#allocation88_spill] sm:$0xff] %v23629_v14  ;;  %v23633_v5 = vld [vmem:[#allocation2 + $0x112] sm:$0xff] }
 0x309   :  { %27812 = vst [vmem:[#allocation89_spill] sm:$0xff] %v23633_v5 }
 0x30b   :  { %17962 = vmatmul.mubr.msk.f32.gmra.mrb[50].mxu1 %vm38_vm2, %v23617_v32  ;;  %v23637_v32 = vld [vmem:[#allocation2 + $0x122] sm:$0xff] }
 0x30c   :  { %17964 = vmatprep.mubr.msk.f32.mxu1 %vm38_vm2, %v23621_v29  ;;  %27813 = vst [vmem:[#allocation90_spill] sm:$0xff] %v23637_v32  ;;  %v23641_v29 = vld [vmem:[#allocation2 + $0x12a] sm:$0xff] }
 0x30d   :  { %27814 = vst [vmem:[#allocation91_spill] sm:$0xff] %v23641_v29 }
 0x30f   :  { %17965 = vmatmul.mubr.msk.f32.gmra.mrb[52].mxu1 %vm38_vm2, %v23625_v53  ;;  %v23645_v53 = vld [vmem:[#allocation2 + $0x13a] sm:$0xff] }
 0x310   :  { %17967 = vmatprep.mubr.msk.f32.mxu1 %vm38_vm2, %v23629_v14  ;;  %27815 = vst [vmem:[#allocation92_spill] sm:$0xff] %v23645_v53  ;;  %v23649_v14 = vld [vmem:[#allocation2 + $0x142] sm:$0xff] }
 0x311   :  { %27816 = vst [vmem:[#allocation93_spill] sm:$0xff] %v23649_v14 }
 0x313   :  { %17968 = vmatmul.mubr.msk.f32.gmra.mrb[54].mxu1 %vm38_vm2, %v23633_v5  ;;  %v23653_v5 = vld [vmem:[#allocation2 + $0x152] sm:$0xff] }
 0x314   :  { %17970 = vmatprep.mubr.msk.f32.mxu1 %vm38_vm2, %v23637_v32  ;;  %27817 = vst [vmem:[#allocation94_spill] sm:$0xff] %v23653_v5  ;;  %v23657_v32 = vld [vmem:[#allocation2 + $0x15a] sm:$0xff] }
 0x315   :  { %27818 = vst [vmem:[#allocation95_spill] sm:$0xff] %v23657_v32 }
 0x317   :  { %17971 = vmatmul.mubr.msk.f32.gmra.mrb[56].mxu1 %vm38_vm2, %v23641_v29  ;;  %v23661_v29 = vld [vmem:[#allocation2 + $0x16a] sm:$0xff] }
 0x318   :  { %17973 = vmatprep.mubr.msk.f32.mxu1 %vm38_vm2, %v23645_v53  ;;  %27819 = vst [vmem:[#allocation96_spill] sm:$0xff] %v23661_v29  ;;  %v2942_v53 = vld [vmem:[#allocation2 + $0x1b2] sm:$0xff] }
 0x31b   :  { %17974 = vmatmul.mubr.msk.f32.gmra.mrb[58].mxu1 %vm38_vm2, %v23649_v14  ;;  %v2943_v14 = vld [vmem:[#allocation2 + $0x1ba] sm:$0xff] }
 0x31c   :  { %17976 = vmatprep.mubr.msk.f32.mxu1 %vm38_vm2, %v23653_v5  ;;  %v23671_v5 = vld [vmem:[#allocation2 + $0x1ca] sm:$0xff] }
 0x31d   :  { %27821 = vst [vmem:[#allocation98_spill] sm:$0xff] %v23671_v5 }
 0x31f   :  { %17977 = vmatmul.mubr.msk.f32.gmra.mrb[60].mxu1 %vm38_vm2, %v23657_v32  ;;  %v23675_v32 = vld [vmem:[#allocation2 + $0x1d2] sm:$0xff] }
 0x320   :  { %17979 = vmatprep.mubr.msk.f32.mxu1 %vm38_vm2, %v23661_v29  ;;  %27822 = vst [vmem:[#allocation99_spill] sm:$0xff] %v23675_v32  ;;  %v23679_v29 = vld [vmem:[#allocation2 + $0x1e2] sm:$0xff] }
 0x321   :  { %27823 = vst [vmem:[#allocation100_spill] sm:$0xff] %v23679_v29 }
 0x323   :  { %17980 = vmatmul.mubr.msk.f32.gmra.mrb[62].mxu1 %vm38_vm2, %v23665_v48  ;;  %v23683_v48 = vld [vmem:[#allocation2 + $0x1ea] sm:$0xff] }
 0x324   :  { %17982 = vmatprep.mubr.msk.f32.mxu1 %vm38_vm2, %v2942_v53  ;;  %27824 = vst [vmem:[#allocation101_spill] sm:$0xff] %v23683_v48  ;;  %v23687_v53 = vld [vmem:[#allocation2 + $0x1fa] sm:$0xff] }
 0x325   :  { %27825 = vst [vmem:[#allocation102_spill] sm:$0xff] %v23687_v53 }
 0x327   :  { %17983 = vmatmul.mubr.msk.f32.gmra.mrb[64].mxu1 %vm38_vm2, %v2943_v14  ;;  %v23691_v14 = vld [vmem:[#allocation2 + $0x202] sm:$0xff] }
 0x328   :  { %17985 = vmatprep.mubr.msk.f32.mxu1 %vm38_vm2, %v23671_v5  ;;  %27826 = vst [vmem:[#allocation103_spill] sm:$0xff] %v23691_v14  ;;  %v4405_v5 = vld [vmem:[%s27355_s5 + $0x128] sm:$0xff] }
 0x32b   :  { %17986 = vmatmul.mubr.msk.f32.gmra.mrb[66].mxu1 %vm38_vm2, %v23675_v32  ;;  %v23695_v32 = vld [vmem:[#allocation2 + $0x212] sm:$0xff] }
 0x32c   :  { %17988 = vmatprep.mubr.msk.f32.mxu1 %vm38_vm2, %v23679_v29  ;;  %27827 = vst [vmem:[#allocation104_spill] sm:$0xff] %v23695_v32  ;;  %v23699_v29 = vld [vmem:[#allocation2 + $0x21a] sm:$0xff] }
 0x32d   :  { %27828 = vst [vmem:[#allocation105_spill] sm:$0xff] %v23699_v29 }
 0x32f   :  { %17989 = vmatmul.mubr.msk.f32.gmra.mrb[68].mxu1 %vm38_vm2, %v23683_v48  ;;  %v23703_v48 = vld [vmem:[#allocation2 + $0x22a] sm:$0xff] }
 0x330   :  { %17991 = vmatprep.mubr.msk.f32.mxu1 %vm38_vm2, %v23687_v53  ;;  %27829 = vst [vmem:[#allocation106_spill] sm:$0xff] %v23703_v48  ;;  %v23707_v53 = vld [vmem:[#allocation2 + $0x232] sm:$0xff] }
 0x331   :  { %27830 = vst [vmem:[#allocation107_spill] sm:$0xff] %v23707_v53 }
 0x333   :  { %17992 = vmatmul.mubr.msk.f32.gmra.mrb[70].mxu1 %vm38_vm2, %v23691_v14  ;;  %v23711_v14 = vld [vmem:[#allocation2 + $0x242] sm:$0xff] }
 0x334   :  { %17994 = vmatprep.mubr.msk.f32.mxu1 %vm38_vm2, %v23695_v32  ;;  %27831 = vst [vmem:[#allocation108_spill] sm:$0xff] %v23711_v14  ;;  %v23715_v32 = vld [vmem:[#allocation2 + $0x24a] sm:$0xff] }
 0x335   :  { %27832 = vst [vmem:[#allocation109_spill] sm:$0xff] %v23715_v32 }
 0x337   :  { %17995 = vmatmul.mubr.msk.f32.gmra.mrb[72].mxu1 %vm38_vm2, %v23699_v29  ;;  %v23719_v29 = vld [vmem:[#allocation2 + $0x25a] sm:$0xff] }
 0x338   :  { %17997 = vmatprep.mubr.msk.f32.mxu1 %vm38_vm2, %v23703_v48  ;;  %27833 = vst [vmem:[#allocation110_spill] sm:$0xff] %v23719_v29  ;;  %v23723_v48 = vld [vmem:[#allocation2 + $0x262] sm:$0xff] }
 0x339   :  { %27834 = vst [vmem:[#allocation111_spill] sm:$0xff] %v23723_v48 }
 0x33b   :  { %17998 = vmatmul.mubr.msk.f32.gmra.mrb[74].mxu1 %vm38_vm2, %v23707_v53  ;;  %v23727_v53 = vld [vmem:[#allocation2 + $0x272] sm:$0xff] }
 0x33c   :  { %18000 = vmatprep.mubr.msk.f32.mxu1 %vm38_vm2, %v23711_v14  ;;  %27835 = vst [vmem:[#allocation112_spill] sm:$0xff] %v23727_v53  ;;  %v23731_v14 = vld [vmem:[#allocation2 + $0x27a] sm:$0xff] }
 0x33d   :  { %27836 = vst [vmem:[#allocation113_spill] sm:$0xff] %v23731_v14 }
 0x33f   :  { %18001 = vmatmul.mubr.msk.f32.gmra.mrb[76].mxu1 %vm38_vm2, %v23715_v32  ;;  %v23735_v32 = vld [vmem:[#allocation2 + $0x28a] sm:$0xff] }
 0x340   :  { %18003 = vmatprep.mubr.msk.f32.mxu1 %vm38_vm2, %v23719_v29  ;;  %27837 = vst [vmem:[#allocation114_spill] sm:$0xff] %v23735_v32  ;;  %v23739_v29 = vld [vmem:[#allocation2 + $0x292] sm:$0xff] }
 0x341   :  { %27838 = vst [vmem:[#allocation115_spill] sm:$0xff] %v23739_v29 }
 0x343   :  { %18004 = vmatmul.mubr.msk.f32.gmra.mrb[78].mxu1 %vm38_vm2, %v23723_v48  ;;  %v23743_v48 = vld [vmem:[#allocation2 + $0x2a2] sm:$0xff] }
 0x344   :  { %18006 = vmatprep.mubr.msk.f32.mxu1 %vm38_vm2, %v23727_v53  ;;  %27839 = vst [vmem:[#allocation116_spill] sm:$0xff] %v23743_v48  ;;  %v23747_v53 = vld [vmem:[#allocation2 + $0x2aa] sm:$0xff] }
 0x345   :  { %27840 = vst [vmem:[#allocation117_spill] sm:$0xff] %v23747_v53 }
 0x347   :  { %18007 = vmatmul.mubr.msk.f32.gmra.mrb[80].mxu1 %vm38_vm2, %v23731_v14  ;;  %v23751_v14 = vld [vmem:[#allocation2 + $0x2ba] sm:$0xff] }
 0x348   :  { %18009 = vmatprep.mubr.msk.f32.mxu1 %vm38_vm2, %v23735_v32  ;;  %27841 = vst [vmem:[#allocation118_spill] sm:$0xff] %v23751_v14  ;;  %v23755_v32 = vld [vmem:[#allocation2 + $0x2c2] sm:$0xff] }
 0x349   :  { %27842 = vst [vmem:[#allocation119_spill] sm:$0xff] %v23755_v32 }
 0x34b   :  { %18010 = vmatmul.mubr.msk.f32.gmra.mrb[82].mxu1 %vm38_vm2, %v23739_v29  ;;  %v23759_v29 = vld [vmem:[#allocation2 + $0x2d2] sm:$0xff] }
 0x34c   :  { %18012 = vmatprep.mubr.msk.f32.mxu1 %vm38_vm2, %v23743_v48  ;;  %27843 = vst [vmem:[#allocation120_spill] sm:$0xff] %v23759_v29  ;;  %v23763_v48 = vld [vmem:[#allocation2 + $0x2da] sm:$0xff] }
 0x34d   :  { %27844 = vst [vmem:[#allocation121_spill] sm:$0xff] %v23763_v48 }
 0x34f   :  { %18013 = vmatmul.mubr.msk.f32.gmra.mrb[84].mxu1 %vm38_vm2, %v23747_v53  ;;  %v23767_v53 = vld [vmem:[#allocation2 + $0x2ea] sm:$0xff] }
 0x350   :  { %18015 = vmatprep.mubr.msk.f32.mxu1 %vm38_vm2, %v23751_v14  ;;  %27845 = vst [vmem:[#allocation122_spill] sm:$0xff] %v23767_v53  ;;  %v23771_v14 = vld [vmem:[#allocation2 + $0x2f2] sm:$0xff] }
 0x351   :  { %27846 = vst [vmem:[#allocation123_spill] sm:$0xff] %v23771_v14 }
 0x353   :  { %18016 = vmatmul.mubr.msk.f32.gmra.mrb[86].mxu1 %vm38_vm2, %v23755_v32  ;;  %v23775_v32 = vld [vmem:[#allocation2 + $0x302] sm:$0xff] }
 0x354   :  { %18018 = vmatprep.mubr.msk.f32.mxu1 %vm38_vm2, %v23759_v29  ;;  %27847 = vst [vmem:[#allocation124_spill] sm:$0xff] %v23775_v32  ;;  %v23779_v29 = vld [vmem:[#allocation2 + $0x30a] sm:$0xff] }
 0x355   :  { %27848 = vst [vmem:[#allocation125_spill] sm:$0xff] %v23779_v29 }
 0x357   :  { %18019 = vmatmul.mubr.msk.f32.gmra.mrb[88].mxu1 %vm38_vm2, %v23763_v48  ;;  %v23783_v48 = vld [vmem:[#allocation2 + $0x31a] sm:$0xff] }
 0x358   :  { %18021 = vmatprep.mubr.msk.f32.mxu1 %vm38_vm2, %v23767_v53  ;;  %27849 = vst [vmem:[#allocation126_spill] sm:$0xff] %v23783_v48  ;;  %v23787_v53 = vld [vmem:[#allocation2 + $0x322] sm:$0xff] }
 0x359   :  { %27850 = vst [vmem:[#allocation127_spill] sm:$0xff] %v23787_v53 }
 0x35b   :  { %18022 = vmatmul.mubr.msk.f32.gmra.mrb[90].mxu1 %vm38_vm2, %v23771_v14  ;;  %v4402_v14 = vld [vmem:[%s27355_s5 + $0x110] sm:$0xff] }
 0x35c   :  { %18024 = vmatprep.mubr.msk.f32.mxu1 %vm38_vm2, %v23775_v32  ;;  %v4403_v32 = vld [vmem:[%s27355_s5 + $0x118] sm:$0xff] }
 0x35f   :  { %18025 = vmatmul.mubr.msk.f32.gmra.mrb[92].mxu1 %vm38_vm2, %v23779_v29  ;;  %v19786_v29 = vpack.c.bf16 %v4403_v32, %v4402_v14  ;;  %v4407_v32 = vld [vmem:[%s27355_s5 + $0x138] sm:$0xff]  ;;  %v27887_v14 = vld [vmem:[#allocation41_spill] sm:$0xff] }
 0x360   :  { %18027 = vmatprep.mubr.msk.f32.mxu1 %vm38_vm2, %v23783_v48  ;;  %v4404_v48 = vld [vmem:[%s27355_s5 + $0x120] sm:$0xff] }
 0x363   :  { %18028 = vmatmul.mubr.msk.f32.gmra.mrb[94].mxu1 %vm38_vm2, %v23787_v53  ;;  %v19790_v53 = vpack.c.bf16 %v4405_v5, %v4404_v48  ;;  %v27885_v48 = vld [vmem:[#allocation39_spill] sm:$0xff]  ;;  %v24043_v5 = vld [vmem:[#allocation2 + $0x181] sm:$0xff] }
 0x364   :  { %18046 = vmatprep.mubr.msk.f32.mxu1 %vm38_vm2, %v22886_v13  ;;  %v4406_v13 = vld [vmem:[%s27355_s5 + $0x130] sm:$0xff] }
 0x367   :  { %18047 = vmatmul.mubr.msk.f32.vlgmr.msra.gmra.mrb[32].mxu1 %vm38_vm2, %v22902_v30  ;;  %v19794_v30 = vpack.c.bf16 %v4407_v32, %v4406_v13  ;;  %v27888_v13 = vld [vmem:[#allocation42_spill] sm:$0xff]  ;;  %v27889_v32 = vld [vmem:[#allocation43_spill] sm:$0xff] }
 0x368   :  { %19785 = vmatpush3.bf16.msra.mxu1 %v23566_v63  ;;  %18049 = vmatprep.mubr.msk.f32.mxu1 %vm38_vm2, %v22918_v50  ;;  %v5113_v50 = vld [vmem:[%s27355_s5 + $0x140] sm:$0xff]  ;;  %v5114_v63 = vld [vmem:[%s27355_s5 + $0x148] sm:$0xff] }
 0x369   :  { %19787 = vmatprep.subr.bf16.mxu1 %v19786_v29 }
 0x36b   :  { %18050 = vmatmul.mubr.msk.f32.gmra.mrb[34].mxu1 %vm38_vm2, %v22964_v18  ;;  %v23830_v18 = vpack.c.bf16 %v5114_v63, %v5113_v50  ;;  %v27891_v50 = vld [vmem:[#allocation45_spill] sm:$0xff]  ;;  %v27892_v63 = vld [vmem:[#allocation46_spill] sm:$0xff] }
 0x36c   :  { %18052 = vmatprep.mubr.msk.f32.mxu1 %vm38_vm2, %v22980_v0  ;;  %19789 = vmatpush3.bf16.msra.mxu1 %v19786_v29  ;;  %v23879_v0 = vld [vmem:[#allocation2 + $0x180] sm:$0xff] }
 0x36d   :  { %19791 = vmatprep.subr.bf16.mxu1 %v19790_v53  ;;  %v27886_v29 = vld [vmem:[#allocation40_spill] sm:$0xff] }
 0x36f   :  { %18053 = vmatmul.mubr.msk.f32.gmra.mrb[36].mxu1 %vm38_vm2, %v23008_v8  ;;  %v23883_v8 = vld [vmem:[#allocation2 + $0x188] sm:$0xff] }
 0x370   :  { %18055 = vmatprep.mubr.msk.f32.mxu1 %vm38_vm2, %v23029_v45  ;;  %19793 = vmatpush3.bf16.msra.mxu1 %v19790_v53  ;;  %v27851_v45 = vld [vmem:[#allocation11_spill] sm:$0xff]  ;;  %v24047_v53 = vld [vmem:[#allocation2 + $0x189] sm:$0xff] }
 0x371   :  { %19795 = vmatprep.subr.bf16.mxu1 %v19794_v30 }
 0x373   :  { %18056 = vmatmul.mubr.msk.f32.gmra.mrb[38].mxu1 %vm38_vm2, %v23033_v2  ;;  %v27852_v2 = vld [vmem:[#allocation14_spill] sm:$0xff] }
 0x374   :  { %18058 = vmatprep.mubr.msk.f32.mxu1 %vm38_vm2, %v23037_v1  ;;  %19797 = vmatpush3.bf16.msra.mxu1 %v19794_v30  ;;  %v27853_v1 = vld [vmem:[#allocation13_spill] sm:$0xff]  ;;  %v27890_v30 = vld [vmem:[#allocation44_spill] sm:$0xff] }
 0x375   :  { %19799 = vmatprep.subr.bf16.mxu1 %v23830_v18 }
 0x377   :  { %18059 = vmatmul.mubr.msk.f32.gmra.mrb[40].mxu1 %vm38_vm2, %v23041_v46  ;;  %v27854_v46 = vld [vmem:[#allocation16_spill] sm:$0xff] }
 0x378   :  { %18061 = vmatprep.mubr.msk.f32.mxu1 %vm38_vm2, %v23045_v7  ;;  %v27855_v7 = vld [vmem:[#allocation15_spill] sm:$0xff] }
 0x37b   :  { %18062 = vmatmul.mubr.msk.f32.gmra.mrb[42].mxu1 %vm38_vm2, %v23049_v24  ;;  %v27856_v24 = vld [vmem:[#allocation18_spill] sm:$0xff] }
 0x37c   :  { %18064 = vmatprep.mubr.msk.f32.mxu1 %vm38_vm2, %v23053_v52  ;;  %v23947_v52 = vld [vmem:[#allocation2 + $0x330] sm:$0xff] }
 0x37f   :  { %18065 = vmatmul.mubr.msk.f32.gmra.mrb[44].mxu1 %vm38_vm2, %v23057_v42  ;;  %v23951_v42 = vld [vmem:[#allocation2 + $0x338] sm:$0xff] }
 0x380   :  { %18067 = vmatprep.mubr.msk.f32.mxu1 %vm38_vm2, %v23061_v55  ;;  %v5115_v55 = vld [vmem:[%s27355_s5 + $0x150] sm:$0xff] }
 0x383   :  { %18068 = vmatmul.mubr.msk.f32.gmra.mrb[46].mxu1 %vm38_vm2, %v23065_v43  ;;  %v5116_v43 = vld [vmem:[%s27355_s5 + $0x158] sm:$0xff] }
 0x384   :  { %18070 = vmatprep.mubr.msk.f32.mxu1 %vm38_vm2, %v23069_v6  ;;  %v27857_v6 = vld [vmem:[#allocation17_spill] sm:$0xff] }
 0x387   :  { %18071 = vmatmul.mubr.msk.f32.gmra.mrb[48].mxu1 %vm38_vm2, %v23073_v9  ;;  %v19802_v9 = vpack.c.bf16 %v5116_v43, %v5115_v55  ;;  %v27900_v55 = vld [vmem:[#allocation54_spill] sm:$0xff]  ;;  %v27901_v43 = vld [vmem:[#allocation55_spill] sm:$0xff] }
 0x388   :  { %18073 = vmatprep.mubr.msk.f32.mxu1 %vm38_vm2, %v23077_v31  ;;  %v5117_v31 = vld [vmem:[%s27355_s5 + $0x160] sm:$0xff] }
 0x38b   :  { %18074 = vmatmul.mubr.msk.f32.gmra.mrb[50].mxu1 %vm38_vm2, %v23081_v49  ;;  %v5118_v49 = vld [vmem:[%s27355_s5 + $0x168] sm:$0xff] }
 0x38c   :  { %18076 = vmatprep.mubr.msk.f32.mxu1 %vm38_vm2, %v23085_v35  ;;  %v27858_v35 = vld [vmem:[#allocation20_spill] sm:$0xff] }
 0x38f   :  { %18077 = vmatmul.mubr.msk.f32.gmra.mrb[52].mxu1 %vm38_vm2, %v23089_v12  ;;  %v27859_v12 = vld [vmem:[#allocation19_spill] sm:$0xff] }
 0x390   :  { %18079 = vmatprep.mubr.msk.f32.mxu1 %vm38_vm2, %v23093_v58  ;;  %v19806_v58 = vpack.c.bf16 %v5118_v49, %v5117_v31  ;;  %v27904_v31 = vld [vmem:[#allocation58_spill] sm:$0xff]  ;;  %v27905_v49 = vld [vmem:[#allocation59_spill] sm:$0xff] }
 0x393   :  { %18080 = vmatmul.mubr.msk.f32.gmra.mrb[54].mxu1 %vm38_vm2, %v23097_v21  ;;  %v5119_v21 = vld [vmem:[%s27355_s5 + $0x170] sm:$0xff] }
 0x394   :  { %18082 = vmatprep.mubr.msk.f32.mxu1 %vm38_vm2, %v23101_v51  ;;  %v5120_v51 = vld [vmem:[%s27355_s5 + $0x178] sm:$0xff] }
 0x397   :  { %18083 = vmatmul.mubr.msk.f32.gmra.mrb[56].mxu1 %vm38_vm2, %v23105_v16  ;;  %v27860_v16 = vld [vmem:[#allocation22_spill] sm:$0xff] }
 0x398   :  { %18085 = vmatprep.mubr.msk.f32.mxu1 %vm38_vm2, %v23109_v34  ;;  %v27861_v34 = vld [vmem:[#allocation23_spill] sm:$0xff] }
 0x39b   :  { %18086 = vmatmul.mubr.msk.f32.gmra.mrb[58].mxu1 %vm38_vm2, %v23113_v10  ;;  %v19810_v10 = vpack.c.bf16 %v5120_v51, %v5119_v21  ;;  %v27909_v21 = vld [vmem:[#allocation63_spill] sm:$0xff]  ;;  %v27910_v51 = vld [vmem:[#allocation64_spill] sm:$0xff] }
 0x39c   :  { %18088 = vmatprep.mubr.msk.f32.mxu1 %vm38_vm2, %v23117_v4  ;;  %v5827_v4 = vld [vmem:[%s27355_s5 + $0x180] sm:$0xff] }
 0x39f   :  { %18089 = vmatmul.mubr.msk.f32.gmra.mrb[60].mxu1 %vm38_vm2, %v23121_v36  ;;  %v5828_v36 = vld [vmem:[%s27355_s5 + $0x188] sm:$0xff] }
 0x3a0   :  { %18091 = vmatprep.mubr.msk.f32.mxu1 %vm38_vm2, %v23879_v0 }
 0x3a3   :  { %18092 = vmatmul.mubr.msk.f32.gmra.mrb[62].mxu1 %vm38_vm2, %v23883_v8 }
 0x3a4   :  { %18094 = vmatprep.mubr.msk.f32.mxu1 %vm38_vm2, %v23127_v25  ;;  %v27862_v25 = vld [vmem:[#allocation21_spill] sm:$0xff] }
 0x3a7   :  { %18095 = vmatmul.mubr.msk.f32.gmra.mrb[64].mxu1 %vm38_vm2, %v23131_v3  ;;  %v27863_v3 = vld [vmem:[#allocation24_spill] sm:$0xff] }
 0x3a8   :  { %18097 = vmatprep.mubr.msk.f32.mxu1 %vm38_vm2, %v23135_v37  ;;  %v23994_v37 = vpack.c.bf16 %v5828_v36, %v5827_v4  ;;  %v27914_v4 = vld [vmem:[#allocation68_spill] sm:$0xff]  ;;  %v27915_v36 = vld [vmem:[#allocation69_spill] sm:$0xff] }
 0x3ab   :  { %18098 = vmatmul.mubr.msk.f32.gmra.mrb[66].mxu1 %vm38_vm2, %v23139_v62  ;;  %v27864_v62 = vld [vmem:[#allocation25_spill] sm:$0xff] }
 0x3ac   :  { %18100 = vmatprep.mubr.msk.f32.mxu1 %vm38_vm2, %v23143_v19  ;;  %v27865_v19 = vld [vmem:[#allocation26_spill] sm:$0xff] }
 0x3af   :  { %18101 = vmatmul.mubr.msk.f32.gmra.mrb[68].mxu1 %vm38_vm2, %v23147_v26  ;;  %v27866_v26 = vld [vmem:[#allocation27_spill] sm:$0xff] }
 0x3b0   :  { %18103 = vmatprep.mubr.msk.f32.mxu1 %vm38_vm2, %v23151_v28  ;;  %v27867_v28 = vld [vmem:[#allocation4_spill] sm:$0xff] }
 0x3b3   :  { %18104 = vmatmul.mubr.msk.f32.gmra.mrb[70].mxu1 %vm38_vm2, %v23155_v27  ;;  %v27868_v27 = vld [vmem:[#allocation6_spill] sm:$0xff] }
 0x3b4   :  { %18106 = vmatprep.mubr.msk.f32.mxu1 %vm38_vm2, %v23159_v39  ;;  %v27869_v39 = vld [vmem:[#allocation5_spill] sm:$0xff] }
 0x3b7   :  { %18107 = vmatmul.mubr.msk.f32.gmra.mrb[72].mxu1 %vm38_vm2, %v23163_v56  ;;  %v27870_v56 = vld [vmem:[#allocation8_spill] sm:$0xff] }
 0x3b8   :  { %18109 = vmatprep.mubr.msk.f32.mxu1 %vm38_vm2, %v23167_v47  ;;  %v27871_v47 = vld [vmem:[#allocation7_spill] sm:$0xff] }
 0x3bb   :  { %18110 = vmatmul.mubr.msk.f32.gmra.mrb[74].mxu1 %vm38_vm2, %v23171_v60  ;;  %v27872_v60 = vld [vmem:[#allocation10_spill] sm:$0xff] }
 0x3bc   :  { %18112 = vmatprep.mubr.msk.f32.mxu1 %vm38_vm2, %v23175_v54  ;;  %v27873_v54 = vld [vmem:[#allocation9_spill] sm:$0xff] }
 0x3bf   :  { %18113 = vmatmul.mubr.msk.f32.gmra.mrb[76].mxu1 %vm38_vm2, %v23179_v38  ;;  %v27874_v38 = vld [vmem:[#allocation12_spill] sm:$0xff] }
 0x3c0   :  { %18115 = vmatprep.mubr.msk.f32.mxu1 %vm38_vm2, %v23183_v33  ;;  %v27875_v33 = vld [vmem:[#allocation29_spill] sm:$0xff] }
 0x3c3   :  { %18116 = vmatmul.mubr.msk.f32.gmra.mrb[78].mxu1 %vm38_vm2, %v23187_v23  ;;  %v27876_v23 = vld [vmem:[#allocation30_spill] sm:$0xff] }
 0x3c4   :  { %18118 = vmatprep.mubr.msk.f32.mxu1 %vm38_vm2, %v23191_v11  ;;  %v27877_v11 = vld [vmem:[#allocation31_spill] sm:$0xff] }
 0x3c7   :  { %18119 = vmatmul.mubr.msk.f32.gmra.mrb[80].mxu1 %vm38_vm2, %v23195_v15  ;;  %v27878_v15 = vld [vmem:[#allocation32_spill] sm:$0xff] }
 0x3c8   :  { %18121 = vmatprep.mubr.msk.f32.mxu1 %vm38_vm2, %v23199_v61  ;;  %v27879_v61 = vld [vmem:[#allocation33_spill] sm:$0xff] }
 0x3cb   :  { %18122 = vmatmul.mubr.msk.f32.gmra.mrb[82].mxu1 %vm38_vm2, %v23203_v59  ;;  %v27880_v59 = vld [vmem:[#allocation34_spill] sm:$0xff] }
 0x3cc   :  { %18124 = vmatprep.mubr.msk.f32.mxu1 %vm38_vm2, %v23207_v41  ;;  %v27881_v41 = vld [vmem:[#allocation35_spill] sm:$0xff] }
 0x3cf   :  { %18125 = vmatmul.mubr.msk.f32.gmra.mrb[84].mxu1 %vm38_vm2, %v23211_v57  ;;  %v27882_v57 = vld [vmem:[#allocation36_spill] sm:$0xff] }
 0x3d0   :  { %18127 = vmatprep.mubr.msk.f32.mxu1 %vm38_vm2, %v23215_v40  ;;  %v27883_v40 = vld [vmem:[#allocation37_spill] sm:$0xff] }
 0x3d3   :  { %18128 = vmatmul.mubr.msk.f32.gmra.mrb[86].mxu1 %vm38_vm2, %v23219_v44  ;;  %v27884_v44 = vld [vmem:[#allocation38_spill] sm:$0xff] }
 0x3d4   :  { %18130 = vmatprep.mubr.msk.f32.mxu1 %vm38_vm2, %v27851_v45  ;;  %v27894_v45 = vld [vmem:[#allocation48_spill] sm:$0xff] }
 0x3d7   :  { %18131 = vmatmul.mubr.msk.f32.gmra.mrb[88].mxu1 %vm38_vm2, %v27852_v2  ;;  %v27895_v2 = vld [vmem:[#allocation49_spill] sm:$0xff] }
 0x3d8   :  { %18133 = vmatprep.mubr.msk.f32.mxu1 %vm38_vm2, %v27853_v1  ;;  %v27896_v1 = vld [vmem:[#allocation50_spill] sm:$0xff] }
 0x3db   :  { %18134 = vmatmul.mubr.msk.f32.gmra.mrb[90].mxu1 %vm38_vm2, %v27854_v46  ;;  %v27897_v46 = vld [vmem:[#allocation51_spill] sm:$0xff] }
 0x3dc   :  { %18136 = vmatprep.mubr.msk.f32.mxu1 %vm38_vm2, %v27855_v7  ;;  %v27898_v7 = vld [vmem:[#allocation52_spill] sm:$0xff] }
 0x3df   :  { %18137 = vmatmul.mubr.msk.f32.gmra.mrb[92].mxu1 %vm38_vm2, %v27856_v24  ;;  %v27899_v24 = vld [vmem:[#allocation53_spill] sm:$0xff] }
 0x3e0   :  { %18139 = vmatprep.mubr.msk.f32.mxu1 %vm38_vm2, %v23947_v52 }
 0x3e3   :  { %18140 = vmatmul.mubr.msk.f32.gmra.mrb[94].mxu1 %vm38_vm2, %v23951_v42 }
 0x3e4   :  { %18158 = vmatprep.mubr.msk.f32.mxu1 %vm38_vm2, %v27857_v6  ;;  %v27902_v6 = vld [vmem:[#allocation56_spill] sm:$0xff] }
 0x3e7   :  { %18159 = vmatmul.mubr.msk.f32.vlgmr.msra.gmra.mrb[32].mxu1 %vm38_vm2, %v27858_v35  ;;  %v27906_v35 = vld [vmem:[#allocation60_spill] sm:$0xff] }
 0x3e8   :  { %19801 = vmatpush3.bf16.msra.mxu1 %v23830_v18  ;;  %18161 = vmatprep.mubr.msk.f32.mxu1 %vm38_vm2, %v27859_v12  ;;  %v27893_v18 = vld [vmem:[#allocation47_spill] sm:$0xff]  ;;  %v27907_v12 = vld [vmem:[#allocation61_spill] sm:$0xff] }
 0x3e9   :  { %19803 = vmatprep.subr.bf16.mxu1 %v19802_v9 }
 0x3eb   :  { %18162 = vmatmul.mubr.msk.f32.gmra.mrb[34].mxu1 %vm38_vm2, %v27860_v16  ;;  %v27911_v16 = vld [vmem:[#allocation65_spill] sm:$0xff] }
 0x3ec   :  { %18164 = vmatprep.mubr.msk.f32.mxu1 %vm38_vm2, %v27861_v34  ;;  %19805 = vmatpush3.bf16.msra.mxu1 %v19802_v9  ;;  %v27903_v9 = vld [vmem:[#allocation57_spill] sm:$0xff]  ;;  %v27912_v34 = vld [vmem:[#allocation66_spill] sm:$0xff] }
 0x3ed   :  { %19807 = vmatprep.subr.bf16.mxu1 %v19806_v58 }
 0x3ef   :  { %18165 = vmatmul.mubr.msk.f32.gmra.mrb[36].mxu1 %vm38_vm2, %v27862_v25  ;;  %v27916_v25 = vld [vmem:[#allocation70_spill] sm:$0xff] }
 0x3f0   :  { %18167 = vmatprep.mubr.msk.f32.mxu1 %vm38_vm2, %v27863_v3  ;;  %19809 = vmatpush3.bf16.msra.mxu1 %v19806_v58  ;;  %v27908_v58 = vld [vmem:[#allocation62_spill] sm:$0xff] }
 0x3f1   :  { %19811 = vmatprep.subr.bf16.mxu1 %v19810_v10  ;;  %v24111_v3 = vld [vmem:[#allocation2 + $0x331] sm:$0xff] }
 0x3f3   :  { %18168 = vmatmul.mubr.msk.f32.gmra.mrb[38].mxu1 %vm38_vm2, %v27864_v62  ;;  %v24115_v62 = vld [vmem:[#allocation2 + $0x339] sm:$0xff] }
 0x3f4   :  { %18170 = vmatprep.mubr.msk.f32.mxu1 %vm38_vm2, %v27865_v19  ;;  %19813 = vmatpush3.bf16.msra.mxu1 %v19810_v10  ;;  %v27913_v10 = vld [vmem:[#allocation67_spill] sm:$0xff]  ;;  %v5829_v19 = vld [vmem:[%s27355_s5 + $0x190] sm:$0xff] }
 0x3f5   :  { %19815 = vmatprep.subr.bf16.mxu1 %v23994_v37 }
 0x3f7   :  { %18171 = vmatmul.mubr.msk.f32.gmra.mrb[40].mxu1 %vm38_vm2, %v27866_v26  ;;  %v5830_v26 = vld [vmem:[%s27355_s5 + $0x198] sm:$0xff] }
 0x3f8   :  { %18173 = vmatprep.mubr.msk.f32.mxu1 %vm38_vm2, %v27867_v28  ;;  %v27917_v28 = vld [vmem:[#allocation71_spill] sm:$0xff] }
 0x3fb   :  { %18174 = vmatmul.mubr.msk.f32.gmra.mrb[42].mxu1 %vm38_vm2, %v27868_v27  ;;  %v19818_v27 = vpack.c.bf16 %v5830_v26, %v5829_v19  ;;  %v27959_v19 = vld [vmem:[#allocation113_spill] sm:$0xff]  ;;  %v27960_v26 = vld [vmem:[#allocation114_spill] sm:$0xff] }
 0x3fc   :  { %18176 = vmatprep.mubr.msk.f32.mxu1 %vm38_vm2, %v27869_v39  ;;  %v5831_v39 = vld [vmem:[%s27355_s5 + $0x1a0] sm:$0xff] }
 0x3ff   :  { %18177 = vmatmul.mubr.msk.f32.gmra.mrb[44].mxu1 %vm38_vm2, %v27870_v56  ;;  %v5832_v56 = vld [vmem:[%s27355_s5 + $0x1a8] sm:$0xff] }
 0x400   :  { %18179 = vmatprep.mubr.msk.f32.mxu1 %vm38_vm2, %v27871_v47  ;;  %v27918_v47 = vld [vmem:[#allocation72_spill] sm:$0xff] }
 0x403   :  { %18180 = vmatmul.mubr.msk.f32.gmra.mrb[46].mxu1 %vm38_vm2, %v27872_v60  ;;  %v19822_v60 = vpack.c.bf16 %v5832_v56, %v5831_v39  ;;  %v27963_v39 = vld [vmem:[#allocation117_spill] sm:$0xff]  ;;  %v27964_v56 = vld [vmem:[#allocation118_spill] sm:$0xff] }
 0x404   :  { %18182 = vmatprep.mubr.msk.f32.mxu1 %vm38_vm2, %v27873_v54  ;;  %v5833_v54 = vld [vmem:[%s27355_s5 + $0x1b0] sm:$0xff] }
 0x407   :  { %18183 = vmatmul.mubr.msk.f32.gmra.mrb[48].mxu1 %vm38_vm2, %v27874_v38  ;;  %v5834_v38 = vld [vmem:[%s27355_s5 + $0x1b8] sm:$0xff] }
 0x408   :  { %18185 = vmatprep.mubr.msk.f32.mxu1 %vm38_vm2, %v27875_v33  ;;  %v27919_v33 = vld [vmem:[#allocation73_spill] sm:$0xff] }
 0x40b   :  { %18186 = vmatmul.mubr.msk.f32.gmra.mrb[50].mxu1 %vm38_vm2, %v27876_v23  ;;  %v6541_v23 = vld [vmem:[%s27355_s5 + $0x1c8] sm:$0xff] }
 0x40c   :  { %18188 = vmatprep.mubr.msk.f32.mxu1 %vm38_vm2, %v27877_v11  ;;  %v27920_v11 = vld [vmem:[#allocation74_spill] sm:$0xff] }
 0x40f   :  { %18189 = vmatmul.mubr.msk.f32.gmra.mrb[52].mxu1 %vm38_vm2, %v27878_v15  ;;  %v27921_v15 = vld [vmem:[#allocation75_spill] sm:$0xff] }
 0x410   :  { %18191 = vmatprep.mubr.msk.f32.mxu1 %vm38_vm2, %v27879_v61  ;;  %v27922_v61 = vld [vmem:[#allocation76_spill] sm:$0xff] }
 0x413   :  { %18192 = vmatmul.mubr.msk.f32.gmra.mrb[54].mxu1 %vm38_vm2, %v27880_v59  ;;  %v27923_v59 = vld [vmem:[#allocation77_spill] sm:$0xff] }
 0x414   :  { %18194 = vmatprep.mubr.msk.f32.mxu1 %vm38_vm2, %v27881_v41  ;;  %v27925_v41 = vld [vmem:[#allocation79_spill] sm:$0xff] }
 0x417   :  { %18195 = vmatmul.mubr.msk.f32.gmra.mrb[56].mxu1 %vm38_vm2, %v27882_v57  ;;  %v27926_v57 = vld [vmem:[#allocation80_spill] sm:$0xff] }
 0x418   :  { %18197 = vmatprep.mubr.msk.f32.mxu1 %vm38_vm2, %v27883_v40  ;;  %v27927_v40 = vld [vmem:[#allocation81_spill] sm:$0xff] }
 0x41b   :  { %18198 = vmatmul.mubr.msk.f32.gmra.mrb[58].mxu1 %vm38_vm2, %v27884_v44  ;;  %v27928_v44 = vld [vmem:[#allocation82_spill] sm:$0xff] }
 0x41c   :  { %18200 = vmatprep.mubr.msk.f32.mxu1 %vm38_vm2, %v27885_v48  ;;  %v27929_v48 = vld [vmem:[#allocation83_spill] sm:$0xff] }
 0x41f   :  { %18201 = vmatmul.mubr.msk.f32.gmra.mrb[60].mxu1 %vm38_vm2, %v27886_v29  ;;  %v27930_v29 = vld [vmem:[#allocation84_spill] sm:$0xff] }
 0x420   :  { %18203 = vmatprep.mubr.msk.f32.mxu1 %vm38_vm2, %v24043_v5 }
 0x423   :  { %18204 = vmatmul.mubr.msk.f32.gmra.mrb[62].mxu1 %vm38_vm2, %v24047_v53 }
 0x424   :  { %18206 = vmatprep.mubr.msk.f32.mxu1 %vm38_vm2, %v27887_v14  ;;  %v27931_v14 = vld [vmem:[#allocation85_spill] sm:$0xff] }
 0x427   :  { %18207 = vmatmul.mubr.msk.f32.gmra.mrb[64].mxu1 %vm38_vm2, %v27888_v13  ;;  %v27932_v13 = vld [vmem:[#allocation86_spill] sm:$0xff] }
 0x428   :  { %18209 = vmatprep.mubr.msk.f32.mxu1 %vm38_vm2, %v27889_v32  ;;  %v27933_v32 = vld [vmem:[#allocation87_spill] sm:$0xff] }
 0x42b   :  { %18210 = vmatmul.mubr.msk.f32.gmra.mrb[66].mxu1 %vm38_vm2, %v27890_v30  ;;  %v27934_v30 = vld [vmem:[#allocation88_spill] sm:$0xff] }
 0x42c   :  { %18212 = vmatprep.mubr.msk.f32.mxu1 %vm38_vm2, %v27891_v50  ;;  %v27935_v50 = vld [vmem:[#allocation89_spill] sm:$0xff] }
 0x42f   :  { %18213 = vmatmul.mubr.msk.f32.gmra.mrb[68].mxu1 %vm38_vm2, %v27892_v63  ;;  %v27936_v63 = vld [vmem:[#allocation90_spill] sm:$0xff] }
 0x430   :  { %18215 = vmatprep.mubr.msk.f32.mxu1 %vm38_vm2, %v27893_v18  ;;  %v27937_v18 = vld [vmem:[#allocation91_spill] sm:$0xff] }
 0x433   :  { %18216 = vmatmul.mubr.msk.f32.gmra.mrb[70].mxu1 %vm38_vm2, %v27894_v45  ;;  %v27938_v45 = vld [vmem:[#allocation92_spill] sm:$0xff] }
 0x434   :  { %18218 = vmatprep.mubr.msk.f32.mxu1 %vm38_vm2, %v27895_v2  ;;  %v27939_v2 = vld [vmem:[#allocation93_spill] sm:$0xff] }
 0x437   :  { %18219 = vmatmul.mubr.msk.f32.gmra.mrb[72].mxu1 %vm38_vm2, %v27896_v1  ;;  %v27940_v1 = vld [vmem:[#allocation94_spill] sm:$0xff] }
 0x438   :  { %18221 = vmatprep.mubr.msk.f32.mxu1 %vm38_vm2, %v27897_v46  ;;  %v27941_v46 = vld [vmem:[#allocation95_spill] sm:$0xff] }
 0x43b   :  { %18222 = vmatmul.mubr.msk.f32.gmra.mrb[74].mxu1 %vm38_vm2, %v27898_v7  ;;  %v27942_v7 = vld [vmem:[#allocation96_spill] sm:$0xff] }
 0x43c   :  { %18224 = vmatprep.mubr.msk.f32.mxu1 %vm38_vm2, %v27899_v24  ;;  %v27943_v24 = vld [vmem:[#allocation97_spill] sm:$0xff] }
 0x43f   :  { %18225 = vmatmul.mubr.msk.f32.gmra.mrb[76].mxu1 %vm38_vm2, %v27900_v55  ;;  %v24207_v55 = vld [vmem:[#allocation2 + $0x182] sm:$0xff] }
 0x440   :  { %18227 = vmatprep.mubr.msk.f32.mxu1 %vm38_vm2, %v27901_v43  ;;  %v24211_v43 = vld [vmem:[#allocation2 + $0x18a] sm:$0xff] }
 0x443   :  { %18228 = vmatmul.mubr.msk.f32.gmra.mrb[78].mxu1 %vm38_vm2, %v27902_v6  ;;  %v27944_v6 = vld [vmem:[#allocation98_spill] sm:$0xff] }
 0x444   :  { %18230 = vmatprep.mubr.msk.f32.mxu1 %vm38_vm2, %v27903_v9  ;;  %v27945_v9 = vld [vmem:[#allocation99_spill] sm:$0xff] }
 0x447   :  { %18231 = vmatmul.mubr.msk.f32.gmra.mrb[80].mxu1 %vm38_vm2, %v27904_v31  ;;  %v27946_v31 = vld [vmem:[#allocation100_spill] sm:$0xff] }
 0x448   :  { %18233 = vmatprep.mubr.msk.f32.mxu1 %vm38_vm2, %v27905_v49  ;;  %v27947_v49 = vld [vmem:[#allocation101_spill] sm:$0xff] }
 0x44b   :  { %18234 = vmatmul.mubr.msk.f32.gmra.mrb[82].mxu1 %vm38_vm2, %v27906_v35  ;;  %v27948_v35 = vld [vmem:[#allocation102_spill] sm:$0xff] }
 0x44c   :  { %18236 = vmatprep.mubr.msk.f32.mxu1 %vm38_vm2, %v27907_v12  ;;  %v27949_v12 = vld [vmem:[#allocation103_spill] sm:$0xff] }
 0x44f   :  { %18237 = vmatmul.mubr.msk.f32.gmra.mrb[84].mxu1 %vm38_vm2, %v27908_v58  ;;  %v27950_v58 = vld [vmem:[#allocation104_spill] sm:$0xff] }
 0x450   :  { %18239 = vmatprep.mubr.msk.f32.mxu1 %vm38_vm2, %v27909_v21  ;;  %v27951_v21 = vld [vmem:[#allocation105_spill] sm:$0xff] }
 0x453   :  { %18240 = vmatmul.mubr.msk.f32.gmra.mrb[86].mxu1 %vm38_vm2, %v27910_v51  ;;  %v27952_v51 = vld [vmem:[#allocation106_spill] sm:$0xff] }
 0x454   :  { %18242 = vmatprep.mubr.msk.f32.mxu1 %vm38_vm2, %v27911_v16  ;;  %v27953_v16 = vld [vmem:[#allocation107_spill] sm:$0xff] }
 0x457   :  { %18243 = vmatmul.mubr.msk.f32.gmra.mrb[88].mxu1 %vm38_vm2, %v27912_v34  ;;  %v27954_v34 = vld [vmem:[#allocation108_spill] sm:$0xff] }
 0x458   :  { %18245 = vmatprep.mubr.msk.f32.mxu1 %vm38_vm2, %v27913_v10  ;;  %v27955_v10 = vld [vmem:[#allocation109_spill] sm:$0xff] }
 0x45b   :  { %18246 = vmatmul.mubr.msk.f32.gmra.mrb[90].mxu1 %vm38_vm2, %v27914_v4  ;;  %v27956_v4 = vld [vmem:[#allocation110_spill] sm:$0xff] }
 0x45c   :  { %18248 = vmatprep.mubr.msk.f32.mxu1 %vm38_vm2, %v27915_v36  ;;  %v27957_v36 = vld [vmem:[#allocation111_spill] sm:$0xff] }
 0x45f   :  { %18249 = vmatmul.mubr.msk.f32.gmra.mrb[92].mxu1 %vm38_vm2, %v27916_v25  ;;  %v27958_v25 = vld [vmem:[#allocation112_spill] sm:$0xff] }
 0x460   :  { %18251 = vmatprep.mubr.msk.f32.mxu1 %vm38_vm2, %v24111_v3 }
 0x463   :  { %18252 = vmatmul.mubr.msk.f32.gmra.mrb[94].mxu1 %vm38_vm2, %v24115_v62 }
 0x464   :  { %18270 = vmatprep.mubr.msk.f32.mxu1 %vm38_vm2, %v27917_v28  ;;  %v27961_v28 = vld [vmem:[#allocation115_spill] sm:$0xff] }
 0x467   :  { %18271 = vmatmul.mubr.msk.f32.vlgmr.msra.gmra.mrb[32].mxu1 %vm38_vm2, %v27918_v47  ;;  %v27965_v47 = vld [vmem:[#allocation119_spill] sm:$0xff] }
 0x468   :  { %19817 = vmatpush3.bf16.msra.mxu1 %v23994_v37  ;;  %18273 = vmatprep.mubr.msk.f32.mxu1 %vm38_vm2, %v23548_v17  ;;  %v19826_v37 = vpack.c.bf16 %v5834_v38, %v5833_v54  ;;  %v6540_v17 = vld [vmem:[%s27355_s5 + $0x1c0] sm:$0xff]  ;;  %v27967_v54 = vld [vmem:[#allocation121_spill] sm:$0xff]  ;;  %v27968_v38 = vld [vmem:[#allocation122_spill] sm:$0xff] }
 0x469   :  { %19819 = vmatprep.subr.bf16.mxu1 %v19818_v27 }
 0x46b   :  { %18274 = vmatmul.mubr.msk.f32.gmra.mrb[34].mxu1 %vm38_vm2, %v27919_v33  ;;  %v27969_v33 = vld [vmem:[#allocation123_spill] sm:$0xff] }
 0x46c   :  { %18276 = vmatprep.mubr.msk.f32.mxu1 %vm38_vm2, %v23562_v22  ;;  %19821 = vmatpush3.bf16.msra.mxu1 %v19818_v27  ;;  %v24158_v22 = vpack.c.bf16 %v6541_v23, %v6540_v17  ;;  %v27962_v27 = vld [vmem:[#allocation116_spill] sm:$0xff]  ;;  %v27971_v17 = vld [vmem:[#allocation125_spill] sm:$0xff]  ;;  %v27972_v23 = vld [vmem:[#allocation126_spill] sm:$0xff] }
 0x46d   :  { %19823 = vmatprep.subr.bf16.mxu1 %v19822_v60 }
 0x46f   :  { %18277 = vmatmul.mubr.msk.f32.gmra.mrb[36].mxu1 %vm38_vm2, %v23568_v20  ;;  %v27924_v20 = vld [vmem:[#allocation78_spill] sm:$0xff] }
 0x470   :  { %18279 = vmatprep.mubr.msk.f32.mxu1 %vm38_vm2, %v27920_v11  ;;  %19825 = vmatpush3.bf16.msra.mxu1 %v19822_v60  ;;  %v27966_v60 = vld [vmem:[#allocation120_spill] sm:$0xff]  ;;  %v27973_v11 = vld [vmem:[#allocation127_spill] sm:$0xff] }
 0x471   :  { %19827 = vmatprep.subr.bf16.mxu1 %v19826_v37 }
 0x473   :  { %18280 = vmatmul.mubr.msk.f32.gmra.mrb[38].mxu1 %vm38_vm2, %v27921_v15  ;;  %v24275_v15 = vld [vmem:[#allocation2 + $0x332] sm:$0xff] }
 0x474   :  { %18282 = vmatprep.mubr.msk.f32.mxu1 %vm38_vm2, %v27922_v61  ;;  %19829 = vmatpush3.bf16.msra.mxu1 %v19826_v37  ;;  %v27970_v37 = vld [vmem:[#allocation124_spill] sm:$0xff] }
 0x475   :  { %19831 = vmatprep.subr.bf16.mxu1 %v24158_v22  ;;  %v24279_v61 = vld [vmem:[#allocation2 + $0x33a] sm:$0xff] }
 0x477   :  { %18283 = vmatmul.mubr.msk.f32.gmra.mrb[40].mxu1 %vm38_vm2, %v27923_v59  ;;  %v6542_v59 = vld [vmem:[%s27355_s5 + $0x1d0] sm:$0xff] }
 0x478   :  { %18285 = vmatprep.mubr.msk.f32.mxu1 %vm38_vm2, %v27924_v20  ;;  %v6543_v20 = vld [vmem:[%s27355_s5 + $0x1d8] sm:$0xff] }
 0x47b   :  { %18286 = vmatmul.mubr.msk.f32.gmra.mrb[42].mxu1 %vm38_vm2, %v27925_v41  ;;  %v5763_v41 = vld [vmem:[#allocation2 + $0x30] sm:$0xff] }
 0x47c   :  { %18288 = vmatprep.mubr.msk.f32.mxu1 %vm38_vm2, %v27926_v57  ;;  %v19834_v57 = vpack.c.bf16 %v6543_v20, %v6542_v59  ;;  %v5807_v59 = vld [vmem:[#allocation2 + $0x270] sm:$0xff]  ;;  %v5808_v20 = vld [vmem:[#allocation2 + $0x278] sm:$0xff] }
 0x47f   :  { %18289 = vmatmul.mubr.msk.f32.gmra.mrb[44].mxu1 %vm38_vm2, %v27927_v40  ;;  %v5764_v40 = vld [vmem:[#allocation2 + $0x38] sm:$0xff] }
 0x480   :  { %18291 = vmatprep.mubr.msk.f32.mxu1 %vm38_vm2, %v27928_v44  ;;  %v6544_v44 = vld [vmem:[%s27355_s5 + $0x1e0] sm:$0xff] }
 0x483   :  { %18292 = vmatmul.mubr.msk.f32.gmra.mrb[46].mxu1 %vm38_vm2, %v27929_v48  ;;  %v6545_v48 = vld [vmem:[%s27355_s5 + $0x1e8] sm:$0xff] }
 0x484   :  { %18294 = vmatprep.mubr.msk.f32.mxu1 %vm38_vm2, %v27930_v29  ;;  %v5765_v29 = vld [vmem:[#allocation2 + $0x48] sm:$0xff] }
 0x487   :  { %18295 = vmatmul.mubr.msk.f32.gmra.mrb[48].mxu1 %vm38_vm2, %v27931_v14  ;;  %v19838_v14 = vpack.c.bf16 %v6545_v48, %v6544_v44  ;;  %v5812_v44 = vld [vmem:[#allocation2 + $0x2a8] sm:$0xff]  ;;  %v5813_v48 = vld [vmem:[#allocation2 + $0x2b8] sm:$0xff] }
 0x488   :  { %18297 = vmatprep.mubr.msk.f32.mxu1 %vm38_vm2, %v27932_v13  ;;  %v5766_v13 = vld [vmem:[#allocation2 + $0x50] sm:$0xff] }
 0x48b   :  { %18298 = vmatmul.mubr.msk.f32.gmra.mrb[50].mxu1 %vm38_vm2, %v27933_v32  ;;  %v6546_v32 = vld [vmem:[%s27355_s5 + $0x1f0] sm:$0xff] }
 0x48c   :  { %18300 = vmatprep.mubr.msk.f32.mxu1 %vm38_vm2, %v27934_v30  ;;  %v6547_v30 = vld [vmem:[%s27355_s5 + $0x1f8] sm:$0xff] }
 0x48f   :  { %18301 = vmatmul.mubr.msk.f32.gmra.mrb[52].mxu1 %vm38_vm2, %v27935_v50  ;;  %v5767_v50 = vld [vmem:[#allocation2 + $0x60] sm:$0xff] }
 0x490   :  { %18303 = vmatprep.mubr.msk.f32.mxu1 %vm38_vm2, %v27936_v63  ;;  %v5768_v63 = vld [vmem:[#allocation2 + $0x68] sm:$0xff] }
 0x493   :  { %18304 = vmatmul.mubr.msk.f32.gmra.mrb[54].mxu1 %vm38_vm2, %v27937_v18  ;;  %v7253_v18 = vld [vmem:[%s27355_s5 + $0x200] sm:$0xff] }
 0x494   :  { %18306 = vmatprep.mubr.msk.f32.mxu1 %vm38_vm2, %v27938_v45  ;;  %v7254_v45 = vld [vmem:[%s27355_s5 + $0x208] sm:$0xff] }
 0x497   :  { %18307 = vmatmul.mubr.msk.f32.gmra.mrb[56].mxu1 %vm38_vm2, %v27939_v2  ;;  %v5769_v2 = vld [vmem:[#allocation2 + $0x78] sm:$0xff] }
 0x498   :  { %18309 = vmatprep.mubr.msk.f32.mxu1 %vm38_vm2, %v27940_v1  ;;  %v24315_v1 = vpack.c.bf16 %v7254_v45, %v7253_v18  ;;  %v5822_v18 = vld [vmem:[#allocation2 + $0x320] sm:$0xff]  ;;  %v5825_v45 = vld [vmem:[#allocation2 + $0x348] sm:$0xff] }
 0x49b   :  { %18310 = vmatmul.mubr.msk.f32.gmra.mrb[58].mxu1 %vm38_vm2, %v27941_v46  ;;  %v5770_v46 = vld [vmem:[#allocation2 + $0x80] sm:$0xff] }
 0x49c   :  { %18312 = vmatprep.mubr.msk.f32.mxu1 %vm38_vm2, %v27942_v7  ;;  %v5771_v7 = vld [vmem:[#allocation2 + $0x90] sm:$0xff] }
 0x49f   :  { %18313 = vmatmul.mubr.msk.f32.gmra.mrb[60].mxu1 %vm38_vm2, %v27943_v24  ;;  %v5772_v24 = vld [vmem:[#allocation2 + $0x98] sm:$0xff] }
 0x4a0   :  { %18315 = vmatprep.mubr.msk.f32.mxu1 %vm38_vm2, %v24207_v55 }
 0x4a3   :  { %18316 = vmatmul.mubr.msk.f32.gmra.mrb[62].mxu1 %vm38_vm2, %v24211_v43 }
 0x4a4   :  { %18318 = vmatprep.mubr.msk.f32.mxu1 %vm38_vm2, %v27944_v6  ;;  %v5773_v6 = vld [vmem:[#allocation2 + $0xa8] sm:$0xff] }
 0x4a7   :  { %18319 = vmatmul.mubr.msk.f32.gmra.mrb[64].mxu1 %vm38_vm2, %v27945_v9  ;;  %v5774_v9 = vld [vmem:[#allocation2 + $0xb0] sm:$0xff] }
 0x4a8   :  { %18321 = vmatprep.mubr.msk.f32.mxu1 %vm38_vm2, %v27946_v31  ;;  %v5775_v31 = vld [vmem:[#allocation2 + $0xc0] sm:$0xff] }
 0x4ab   :  { %18322 = vmatmul.mubr.msk.f32.gmra.mrb[66].mxu1 %vm38_vm2, %v27947_v49  ;;  %v5776_v49 = vld [vmem:[#allocation2 + $0xc8] sm:$0xff] }
 0x4ac   :  { %18324 = vmatprep.mubr.msk.f32.mxu1 %vm38_vm2, %v27948_v35  ;;  %v5777_v35 = vld [vmem:[#allocation2 + $0xd8] sm:$0xff] }
 0x4af   :  { %18325 = vmatmul.mubr.msk.f32.gmra.mrb[68].mxu1 %vm38_vm2, %v27949_v12  ;;  %v5778_v12 = vld [vmem:[#allocation2 + $0xe0] sm:$0xff] }
 0x4b0   :  { %18327 = vmatprep.mubr.msk.f32.mxu1 %vm38_vm2, %v27950_v58  ;;  %v5779_v58 = vld [vmem:[#allocation2 + $0xf0] sm:$0xff] }
 0x4b3   :  { %18328 = vmatmul.mubr.msk.f32.gmra.mrb[70].mxu1 %vm38_vm2, %v27951_v21  ;;  %v5780_v21 = vld [vmem:[#allocation2 + $0xf8] sm:$0xff] }
 0x4b4   :  { %18330 = vmatprep.mubr.msk.f32.mxu1 %vm38_vm2, %v27952_v51  ;;  %v5781_v51 = vld [vmem:[#allocation2 + $0x108] sm:$0xff] }
 0x4b7   :  { %18331 = vmatmul.mubr.msk.f32.gmra.mrb[72].mxu1 %vm38_vm2, %v27953_v16  ;;  %v5782_v16 = vld [vmem:[#allocation2 + $0x110] sm:$0xff] }
 0x4b8   :  { %18333 = vmatprep.mubr.msk.f32.mxu1 %vm38_vm2, %v27954_v34  ;;  %v5783_v34 = vld [vmem:[#allocation2 + $0x120] sm:$0xff] }
 0x4bb   :  { %18334 = vmatmul.mubr.msk.f32.gmra.mrb[74].mxu1 %vm38_vm2, %v27955_v10  ;;  %v5784_v10 = vld [vmem:[#allocation2 + $0x128] sm:$0xff] }
 0x4bc   :  { %18336 = vmatprep.mubr.msk.f32.mxu1 %vm38_vm2, %v27956_v4  ;;  %v5785_v4 = vld [vmem:[#allocation2 + $0x138] sm:$0xff] }
 0x4bf   :  { %18337 = vmatmul.mubr.msk.f32.gmra.mrb[76].mxu1 %vm38_vm2, %v27957_v36  ;;  %v5786_v36 = vld [vmem:[#allocation2 + $0x140] sm:$0xff] }
 0x4c0   :  { %18339 = vmatprep.mubr.msk.f32.mxu1 %vm38_vm2, %v27958_v25  ;;  %v5787_v25 = vld [vmem:[#allocation2 + $0x150] sm:$0xff] }
 0x4c3   :  { %18340 = vmatmul.mubr.msk.f32.gmra.mrb[78].mxu1 %vm38_vm2, %v27959_v19  ;;  %v5788_v19 = vld [vmem:[#allocation2 + $0x158] sm:$0xff] }
 0x4c4   :  { %18342 = vmatprep.mubr.msk.f32.mxu1 %vm38_vm2, %v27960_v26  ;;  %v5789_v26 = vld [vmem:[#allocation2 + $0x168] sm:$0xff] }
 0x4c7   :  { %18343 = vmatmul.mubr.msk.f32.gmra.mrb[80].mxu1 %vm38_vm2, %v27961_v28  ;;  %v5790_v28 = vld [vmem:[#allocation2 + $0x170] sm:$0xff] }
 0x4c8   :  { %18345 = vmatprep.mubr.msk.f32.mxu1 %vm38_vm2, %v27962_v27  ;;  %v5793_v27 = vld [vmem:[#allocation2 + $0x198] sm:$0xff] }
 0x4cb   :  { %18346 = vmatmul.mubr.msk.f32.gmra.mrb[82].mxu1 %vm38_vm2, %v27963_v39  ;;  %v5794_v39 = vld [vmem:[#allocation2 + $0x1a0] sm:$0xff] }
 0x4cc   :  { %18348 = vmatprep.mubr.msk.f32.mxu1 %vm38_vm2, %v27964_v56  ;;  %v5795_v56 = vld [vmem:[#allocation2 + $0x1e0] sm:$0xff] }
 0x4cf   :  { %18349 = vmatmul.mubr.msk.f32.gmra.mrb[84].mxu1 %vm38_vm2, %v27965_v47  ;;  %v5796_v47 = vld [vmem:[#allocation2 + $0x1e8] sm:$0xff] }
 0x4d0   :  { %18351 = vmatprep.mubr.msk.f32.mxu1 %vm38_vm2, %v27966_v60  ;;  %v5797_v60 = vld [vmem:[#allocation2 + $0x1f8] sm:$0xff] }
 0x4d3   :  { %18352 = vmatmul.mubr.msk.f32.gmra.mrb[86].mxu1 %vm38_vm2, %v27967_v54  ;;  %v5798_v54 = vld [vmem:[#allocation2 + $0x200] sm:$0xff] }
 0x4d4   :  { %18354 = vmatprep.mubr.msk.f32.mxu1 %vm38_vm2, %v27968_v38  ;;  %v5801_v38 = vld [vmem:[#allocation2 + $0x228] sm:$0xff] }
 0x4d7   :  { %18355 = vmatmul.mubr.msk.f32.gmra.mrb[88].mxu1 %vm38_vm2, %v27969_v33  ;;  %v5802_v33 = vld [vmem:[#allocation2 + $0x230] sm:$0xff] }
 0x4d8   :  { %18357 = vmatprep.mubr.msk.f32.mxu1 %vm38_vm2, %v27970_v37  ;;  %v5803_v37 = vld [vmem:[#allocation2 + $0x240] sm:$0xff] }
 0x4db   :  { %18358 = vmatmul.mubr.msk.f32.gmra.mrb[90].mxu1 %vm38_vm2, %v27971_v17  ;;  %v5804_v17 = vld [vmem:[#allocation2 + $0x248] sm:$0xff] }
 0x4dc   :  { %18360 = vmatprep.mubr.msk.f32.mxu1 %vm38_vm2, %v27972_v23  ;;  %v5805_v23 = vld [vmem:[#allocation2 + $0x258] sm:$0xff] }
 0x4df   :  { %18361 = vmatmul.mubr.msk.f32.gmra.mrb[92].mxu1 %vm38_vm2, %v27973_v11  ;;  %v5806_v11 = vld [vmem:[#allocation2 + $0x260] sm:$0xff] }
 0x4e0   :  { %18363 = vmatprep.mubr.msk.f32.mxu1 %vm38_vm2, %v24275_v15 }
 0x4e3   :  { %18364 = vmatmul.mubr.msk.f32.gmra.mrb[94].mxu1 %vm38_vm2, %v24279_v61 }
 0x4e4   :  { %18382 = vmatprep.mubr.msk.f32.mxu1 %vm38_vm2, %v5763_v41  ;;  %v5809_v41 = vld [vmem:[#allocation2 + $0x288] sm:$0xff] }
 0x4e7   :  { %18383 = vmatmul.mubr.msk.f32.vlgmr.msra.gmra.mrb[32].mxu1 %vm38_vm2, %v5764_v40  ;;  %v5811_v40 = vld [vmem:[#allocation2 + $0x2a0] sm:$0xff] }
 0x4e8   :  { %19833 = vmatpush3.bf16.msra.mxu1 %v24158_v22  ;;  %18385 = vmatprep.mubr.msk.f32.mxu1 %vm38_vm2, %v5765_v29  ;;  %v19842_v22 = vpack.c.bf16 %v6547_v30, %v6546_v32  ;;  %v5814_v29 = vld [vmem:[#allocation2 + $0x2c0] sm:$0xff]  ;;  %v5817_v32 = vld [vmem:[#allocation2 + $0x2e8] sm:$0xff]  ;;  %v5818_v30 = vld [vmem:[#allocation2 + $0x2f0] sm:$0xff] }
 0x4e9   :  { %19835 = vmatprep.subr.bf16.mxu1 %v19834_v57 }
 0x4eb   :  { %18386 = vmatmul.mubr.msk.f32.gmra.mrb[34].mxu1 %vm38_vm2, %v5766_v13  ;;  %v5816_v13 = vld [vmem:[#allocation2 + $0x2d8] sm:$0xff] }
 0x4ec   :  { %18388 = vmatprep.mubr.msk.f32.mxu1 %vm38_vm2, %v5767_v50  ;;  %19837 = vmatpush3.bf16.msra.mxu1 %v19834_v57  ;;  %v5810_v57 = vld [vmem:[#allocation2 + $0x290] sm:$0xff]  ;;  %v5819_v50 = vld [vmem:[#allocation2 + $0x300] sm:$0xff] }
 0x4ed   :  { %19839 = vmatprep.subr.bf16.mxu1 %v19838_v14 }
 0x4ef   :  { %18389 = vmatmul.mubr.msk.f32.gmra.mrb[36].mxu1 %vm38_vm2, %v5768_v63  ;;  %v5821_v63 = vld [vmem:[#allocation2 + $0x318] sm:$0xff] }
 0x4f0   :  { %18391 = vmatprep.mubr.msk.f32.mxu1 %vm38_vm2, %v5769_v2  ;;  %19841 = vmatpush3.bf16.msra.mxu1 %v19838_v14  ;;  %v5815_v14 = vld [vmem:[#allocation2 + $0x2d0] sm:$0xff] }
 0x4f1   :  { %19843 = vmatprep.subr.bf16.mxu1 %v19842_v22  ;;  %v5826_v2 = vld [vmem:[#allocation2 + $0x350] sm:$0xff] }
 0x4f3   :  { %18392 = vmatmul.mubr.msk.f32.gmra.mrb[38].mxu1 %vm38_vm2, %v5770_v46  ;;  %v7255_v46 = vld [vmem:[%s27355_s5 + $0x210] sm:$0xff] }
 0x4f4   :  { %18394 = vmatprep.mubr.msk.f32.mxu1 %vm38_vm2, %v5771_v7  ;;  %19845 = vmatpush3.bf16.msra.mxu1 %v19842_v22  ;;  %v5820_v22 = vld [vmem:[#allocation2 + $0x308] sm:$0xff]  ;;  %v7256_v7 = vld [vmem:[%s27355_s5 + $0x218] sm:$0xff] }
 0x4f5   :  { %19847 = vmatprep.subr.bf16.mxu1 %v24315_v1 }
 0x4f7   :  { %18395 = vmatmul.mubr.msk.f32.gmra.mrb[40].mxu1 %vm38_vm2, %v5772_v24  ;;  %v6476_v24 = vld [vmem:[#allocation2 + $0x31] sm:$0xff] }
 0x4f8   :  { %18397 = vmatprep.mubr.msk.f32.mxu1 %vm38_vm2, %v5773_v6  ;;  %v6477_v6 = vld [vmem:[#allocation2 + $0x39] sm:$0xff] }
 0x4fb   :  { %18398 = vmatmul.mubr.msk.f32.gmra.mrb[42].mxu1 %vm38_vm2, %v5774_v9  ;;  %v7258_v9 = vld [vmem:[%s27355_s5 + $0x228] sm:$0xff] }
 0x4fc   :  { %18400 = vmatprep.mubr.msk.f32.mxu1 %vm38_vm2, %v5775_v31  ;;  %v6478_v31 = vld [vmem:[#allocation2 + $0x49] sm:$0xff] }
 0x4ff   :  { %18401 = vmatmul.mubr.msk.f32.gmra.mrb[44].mxu1 %vm38_vm2, %v5776_v49 }
 0x500   :  { %18403 = vmatprep.mubr.msk.f32.mxu1 %vm38_vm2, %v5777_v35  ;;  %v6479_v35 = vld [vmem:[#allocation2 + $0x51] sm:$0xff] }
 0x503   :  { %18404 = vmatmul.mubr.msk.f32.gmra.mrb[46].mxu1 %vm38_vm2, %v5778_v12  ;;  %v7259_v12 = vld [vmem:[%s27355_s5 + $0x230] sm:$0xff] }
 0x504   :  { %18406 = vmatprep.mubr.msk.f32.mxu1 %vm38_vm2, %v5779_v58  ;;  %v7260_v58 = vld [vmem:[%s27355_s5 + $0x238] sm:$0xff] }
 0x507   :  { %18407 = vmatmul.mubr.msk.f32.gmra.mrb[48].mxu1 %vm38_vm2, %v5780_v21  ;;  %v6480_v21 = vld [vmem:[#allocation2 + $0x61] sm:$0xff] }
 0x508   :  { %18409 = vmatprep.mubr.msk.f32.mxu1 %vm38_vm2, %v5781_v51  ;;  %v6481_v51 = vld [vmem:[#allocation2 + $0x69] sm:$0xff] }
 0x50b   :  { %18410 = vmatmul.mubr.msk.f32.gmra.mrb[50].mxu1 %vm38_vm2, %v5782_v16  ;;  %v6482_v16 = vld [vmem:[#allocation2 + $0x79] sm:$0xff] }
 0x50c   :  { %18412 = vmatprep.mubr.msk.f32.mxu1 %vm38_vm2, %v5783_v34  ;;  %v6483_v34 = vld [vmem:[#allocation2 + $0x81] sm:$0xff] }
 0x50f   :  { %18413 = vmatmul.mubr.msk.f32.gmra.mrb[52].mxu1 %vm38_vm2, %v5784_v10  ;;  %v6484_v10 = vld [vmem:[#allocation2 + $0x91] sm:$0xff] }
 0x510   :  { %18415 = vmatprep.mubr.msk.f32.mxu1 %vm38_vm2, %v5785_v4  ;;  %v6485_v4 = vld [vmem:[#allocation2 + $0x99] sm:$0xff] }
 0x513   :  { %18416 = vmatmul.mubr.msk.f32.gmra.mrb[54].mxu1 %vm38_vm2, %v5786_v36  ;;  %v6486_v36 = vld [vmem:[#allocation2 + $0xa9] sm:$0xff] }
 0x514   :  { %18418 = vmatprep.mubr.msk.f32.mxu1 %vm38_vm2, %v5787_v25  ;;  %v6487_v25 = vld [vmem:[#allocation2 + $0xb1] sm:$0xff] }
 0x517   :  { %18419 = vmatmul.mubr.msk.f32.gmra.mrb[56].mxu1 %vm38_vm2, %v5788_v19  ;;  %v6488_v19 = vld [vmem:[#allocation2 + $0xc1] sm:$0xff] }
 0x518   :  { %18421 = vmatprep.mubr.msk.f32.mxu1 %vm38_vm2, %v5789_v26  ;;  %v6489_v26 = vld [vmem:[#allocation2 + $0xc9] sm:$0xff] }
 0x51b   :  { %18422 = vmatmul.mubr.msk.f32.gmra.mrb[58].mxu1 %vm38_vm2, %v5790_v28  ;;  %v6490_v28 = vld [vmem:[#allocation2 + $0xd9] sm:$0xff] }
 0x51c   :  { %18424 = vmatprep.mubr.msk.f32.mxu1 %vm38_vm2, %v23879_v0  ;;  %v5799_v0 = vld [vmem:[#allocation2 + $0x210] sm:$0xff] }
 0x51f   :  { %18425 = vmatmul.mubr.msk.f32.gmra.mrb[60].mxu1 %vm38_vm2, %v23883_v8  ;;  %v5800_v8 = vld [vmem:[#allocation2 + $0x218] sm:$0xff] }
 0x520   :  { %18427 = vmatprep.mubr.msk.f32.mxu1 %vm38_vm2, %v5793_v27  ;;  %v6491_v27 = vld [vmem:[#allocation2 + $0xe1] sm:$0xff] }
 0x523   :  { %18428 = vmatmul.mubr.msk.f32.gmra.mrb[62].mxu1 %vm38_vm2, %v5794_v39  ;;  %v6492_v39 = vld [vmem:[#allocation2 + $0xf1] sm:$0xff] }
 0x524   :  { %18430 = vmatprep.mubr.msk.f32.mxu1 %vm38_vm2, %v5795_v56  ;;  %v6493_v56 = vld [vmem:[#allocation2 + $0xf9] sm:$0xff] }
 0x527   :  { %18431 = vmatmul.mubr.msk.f32.gmra.mrb[64].mxu1 %vm38_vm2, %v5796_v47  ;;  %v6494_v47 = vld [vmem:[#allocation2 + $0x109] sm:$0xff] }
 0x528   :  { %18433 = vmatprep.mubr.msk.f32.mxu1 %vm38_vm2, %v5797_v60  ;;  %v6495_v60 = vld [vmem:[#allocation2 + $0x111] sm:$0xff] }
 0x52b   :  { %18434 = vmatmul.mubr.msk.f32.gmra.mrb[66].mxu1 %vm38_vm2, %v5798_v54  ;;  %v6496_v54 = vld [vmem:[#allocation2 + $0x121] sm:$0xff] }
 0x52c   :  { %18436 = vmatprep.mubr.msk.f32.mxu1 %vm38_vm2, %v5799_v0  ;;  %v6497_v0 = vld [vmem:[#allocation2 + $0x129] sm:$0xff] }
 0x52f   :  { %18437 = vmatmul.mubr.msk.f32.gmra.mrb[68].mxu1 %vm38_vm2, %v5800_v8  ;;  %v6498_v8 = vld [vmem:[#allocation2 + $0x139] sm:$0xff] }
 0x530   :  { %18439 = vmatprep.mubr.msk.f32.mxu1 %vm38_vm2, %v5801_v38  ;;  %v6499_v38 = vld [vmem:[#allocation2 + $0x141] sm:$0xff] }
 0x533   :  { %18440 = vmatmul.mubr.msk.f32.gmra.mrb[70].mxu1 %vm38_vm2, %v5802_v33  ;;  %v6500_v33 = vld [vmem:[#allocation2 + $0x151] sm:$0xff] }
 0x534   :  { %18442 = vmatprep.mubr.msk.f32.mxu1 %vm38_vm2, %v5803_v37  ;;  %v6501_v37 = vld [vmem:[#allocation2 + $0x159] sm:$0xff] }
 0x537   :  { %18443 = vmatmul.mubr.msk.f32.gmra.mrb[72].mxu1 %vm38_vm2, %v5804_v17  ;;  %v6502_v17 = vld [vmem:[#allocation2 + $0x169] sm:$0xff] }
 0x538   :  { %18445 = vmatprep.mubr.msk.f32.mxu1 %vm38_vm2, %v5805_v23  ;;  %v6503_v23 = vld [vmem:[#allocation2 + $0x171] sm:$0xff] }
 0x53b   :  { %18446 = vmatmul.mubr.msk.f32.gmra.mrb[74].mxu1 %vm38_vm2, %v5806_v11  ;;  %v6506_v11 = vld [vmem:[#allocation2 + $0x199] sm:$0xff] }
 0x53c   :  { %18448 = vmatprep.mubr.msk.f32.mxu1 %vm38_vm2, %v5807_v59  ;;  %v6507_v59 = vld [vmem:[#allocation2 + $0x1a1] sm:$0xff] }
 0x53f   :  { %18449 = vmatmul.mubr.msk.f32.gmra.mrb[76].mxu1 %vm38_vm2, %v5808_v20  ;;  %v6508_v20 = vld [vmem:[#allocation2 + $0x1e1] sm:$0xff] }
 0x540   :  { %18451 = vmatprep.mubr.msk.f32.mxu1 %vm38_vm2, %v5809_v41  ;;  %v6509_v41 = vld [vmem:[#allocation2 + $0x1e9] sm:$0xff] }
 0x543   :  { %18452 = vmatmul.mubr.msk.f32.gmra.mrb[78].mxu1 %vm38_vm2, %v5810_v57  ;;  %v6510_v57 = vld [vmem:[#allocation2 + $0x1f9] sm:$0xff] }
 0x544   :  { %18454 = vmatprep.mubr.msk.f32.mxu1 %vm38_vm2, %v5811_v40  ;;  %v6511_v40 = vld [vmem:[#allocation2 + $0x201] sm:$0xff] }
 0x547   :  { %18455 = vmatmul.mubr.msk.f32.gmra.mrb[80].mxu1 %vm38_vm2, %v5812_v44  ;;  %v6514_v44 = vld [vmem:[#allocation2 + $0x229] sm:$0xff] }
 0x548   :  { %18457 = vmatprep.mubr.msk.f32.mxu1 %vm38_vm2, %v5813_v48  ;;  %v6515_v48 = vld [vmem:[#allocation2 + $0x231] sm:$0xff] }
 0x54b   :  { %18458 = vmatmul.mubr.msk.f32.gmra.mrb[82].mxu1 %vm38_vm2, %v5814_v29  ;;  %v6516_v29 = vld [vmem:[#allocation2 + $0x241] sm:$0xff] }
 0x54c   :  { %18460 = vmatprep.mubr.msk.f32.mxu1 %vm38_vm2, %v5815_v14  ;;  %v6517_v14 = vld [vmem:[#allocation2 + $0x249] sm:$0xff] }
 0x54f   :  { %18461 = vmatmul.mubr.msk.f32.gmra.mrb[84].mxu1 %vm38_vm2, %v5816_v13  ;;  %v6518_v13 = vld [vmem:[#allocation2 + $0x259] sm:$0xff] }
 0x550   :  { %18463 = vmatprep.mubr.msk.f32.mxu1 %vm38_vm2, %v5817_v32  ;;  %v6519_v32 = vld [vmem:[#allocation2 + $0x261] sm:$0xff] }
 0x553   :  { %18464 = vmatmul.mubr.msk.f32.gmra.mrb[86].mxu1 %vm38_vm2, %v5818_v30  ;;  %v6520_v30 = vld [vmem:[#allocation2 + $0x271] sm:$0xff] }
 0x554   :  { %18466 = vmatprep.mubr.msk.f32.mxu1 %vm38_vm2, %v5819_v50  ;;  %v6521_v50 = vld [vmem:[#allocation2 + $0x279] sm:$0xff] }
 0x557   :  { %18467 = vmatmul.mubr.msk.f32.gmra.mrb[88].mxu1 %vm38_vm2, %v5820_v22  ;;  %v6522_v22 = vld [vmem:[#allocation2 + $0x289] sm:$0xff] }
 0x558   :  { %18469 = vmatprep.mubr.msk.f32.mxu1 %vm38_vm2, %v5821_v63  ;;  %v6523_v63 = vld [vmem:[#allocation2 + $0x291] sm:$0xff] }
 0x55b   :  { %18470 = vmatmul.mubr.msk.f32.gmra.mrb[90].mxu1 %vm38_vm2, %v5822_v18  ;;  %v6524_v18 = vld [vmem:[#allocation2 + $0x2a1] sm:$0xff] }
 0x55c   :  { %18472 = vmatprep.mubr.msk.f32.mxu1 %vm38_vm2, %v23947_v52  ;;  %v19850_v52 = vpack.c.bf16 %v7256_v7, %v7255_v46  ;;  %v6527_v46 = vld [vmem:[#allocation2 + $0x2c1] sm:$0xff]  ;;  %v6528_v7 = vld [vmem:[#allocation2 + $0x2d1] sm:$0xff] }
 0x55f   :  { %18473 = vmatmul.mubr.msk.f32.gmra.mrb[92].mxu1 %vm38_vm2, %v23951_v42  ;;  %v7257_v42 = vld [vmem:[%s27355_s5 + $0x220] sm:$0xff] }
 0x560   :  { %18475 = vmatprep.mubr.msk.f32.mxu1 %vm38_vm2, %v5825_v45  ;;  %v19854_v49 = vpack.c.bf16 %v7258_v9, %v7257_v42  ;;  %v6525_v45 = vld [vmem:[#allocation2 + $0x2a9] sm:$0xff]  ;;  %v6532_v42 = vld [vmem:[#allocation2 + $0x301] sm:$0xff] }
 0x561   :  { %v6533_v9 = vld [vmem:[#allocation2 + $0x309] sm:$0xff] }
 0x563   :  { %18476 = vmatmul.mubr.msk.f32.gmra.mrb[94].mxu1 %vm38_vm2, %v5826_v2  ;;  %v6526_v2 = vld [vmem:[#allocation2 + $0x2b9] sm:$0xff] }
 0x564   :  { %18494 = vmatprep.mubr.msk.f32.mxu1 %vm38_vm2, %v6476_v24  ;;  %v6529_v24 = vld [vmem:[#allocation2 + $0x2d9] sm:$0xff] }
 0x567   :  { %18495 = vmatmul.mubr.msk.f32.vlgmr.msra.gmra.mrb[32].mxu1 %vm38_vm2, %v6477_v6  ;;  %v6531_v6 = vld [vmem:[#allocation2 + $0x2f1] sm:$0xff] }
 0x568   :  { %19849 = vmatpush3.bf16.msra.mxu1 %v24315_v1  ;;  %18497 = vmatprep.mubr.msk.f32.mxu1 %vm38_vm2, %v6478_v31  ;;  %v19858_v1 = vpack.c.bf16 %v7260_v58, %v7259_v12  ;;  %v6534_v31 = vld [vmem:[#allocation2 + $0x319] sm:$0xff]  ;;  %v6539_v12 = vld [vmem:[#allocation2 + $0x351] sm:$0xff] }
 0x569   :  { %19851 = vmatprep.subr.bf16.mxu1 %v19850_v52  ;;  %v7189_v58 = vld [vmem:[#allocation2 + $0x32] sm:$0xff] }
 0x56b   :  { %18498 = vmatmul.mubr.msk.f32.gmra.mrb[34].mxu1 %vm38_vm2, %v6479_v35  ;;  %v6538_v35 = vld [vmem:[#allocation2 + $0x349] sm:$0xff] }
 0x56c   :  { %18500 = vmatprep.mubr.msk.f32.mxu1 %vm38_vm2, %v6480_v21  ;;  %19853 = vmatpush3.bf16.msra.mxu1 %v19850_v52  ;;  %v6530_v52 = vld [vmem:[#allocation2 + $0x2e9] sm:$0xff]  ;;  %v7190_v21 = vld [vmem:[#allocation2 + $0x3a] sm:$0xff] }
 0x56d   :  { %19855 = vmatprep.subr.bf16.mxu1 %v19854_v49 }
 0x56f   :  { %18501 = vmatmul.mubr.msk.f32.gmra.mrb[36].mxu1 %vm38_vm2, %v6481_v51  ;;  %v7192_v51 = vld [vmem:[#allocation2 + $0x52] sm:$0xff] }
 0x570   :  { %18503 = vmatprep.mubr.msk.f32.mxu1 %vm38_vm2, %v6482_v16  ;;  %19857 = vmatpush3.bf16.msra.mxu1 %v19854_v49  ;;  %v6535_v49 = vld [vmem:[#allocation2 + $0x321] sm:$0xff] }
 0x571   :  { %19859 = vmatprep.subr.bf16.mxu1 %v19858_v1  ;;  %v7195_v16 = vld [vmem:[#allocation2 + $0x7a] sm:$0xff] }
 0x573   :  { %18504 = vmatmul.mubr.msk.f32.gmra.mrb[38].mxu1 %vm38_vm2, %v6483_v34  ;;  %v7196_v34 = vld [vmem:[#allocation2 + $0x82] sm:$0xff] }
 0x574   :  { %18506 = vmatprep.mubr.msk.f32.mxu1 %vm38_vm2, %v6484_v10  ;;  %19861 = vmatpush3.bf16.msra.mxu1 %v19858_v1  ;;  %v7191_v1 = vld [vmem:[#allocation2 + $0x4a] sm:$0xff]  ;;  %v7197_v10 = vld [vmem:[#allocation2 + $0x92] sm:$0xff] }
 0x577   :  { %18507 = vmatmul.mubr.msk.f32.gmra.mrb[40].mxu1 %vm38_vm2, %v6485_v4  ;;  %v7198_v4 = vld [vmem:[#allocation2 + $0x9a] sm:$0xff] }
 0x578   :  { %18509 = vmatprep.mubr.msk.f32.mxu1 %vm38_vm2, %v6486_v36  ;;  %v7199_v36 = vld [vmem:[#allocation2 + $0xaa] sm:$0xff] }
 0x57b   :  { %18510 = vmatmul.mubr.msk.f32.gmra.mrb[42].mxu1 %vm38_vm2, %v6487_v25  ;;  %v7200_v25 = vld [vmem:[#allocation2 + $0xb2] sm:$0xff] }
 0x57c   :  { %18512 = vmatprep.mubr.msk.f32.mxu1 %vm38_vm2, %v6488_v19  ;;  %v7201_v19 = vld [vmem:[#allocation2 + $0xc2] sm:$0xff] }
 0x57f   :  { %18513 = vmatmul.mubr.msk.f32.gmra.mrb[44].mxu1 %vm38_vm2, %v6489_v26  ;;  %v7202_v26 = vld [vmem:[#allocation2 + $0xca] sm:$0xff] }
 0x580   :  { %18515 = vmatprep.mubr.msk.f32.mxu1 %vm38_vm2, %v6490_v28  ;;  %v7203_v28 = vld [vmem:[#allocation2 + $0xda] sm:$0xff] }
 0x583   :  { %18516 = vmatmul.mubr.msk.f32.gmra.mrb[46].mxu1 %vm38_vm2, %v6491_v27  ;;  %v7204_v27 = vld [vmem:[#allocation2 + $0xe2] sm:$0xff] }
 0x584   :  { %18518 = vmatprep.mubr.msk.f32.mxu1 %vm38_vm2, %v6492_v39  ;;  %v7205_v39 = vld [vmem:[#allocation2 + $0xf2] sm:$0xff] }
 0x587   :  { %18519 = vmatmul.mubr.msk.f32.gmra.mrb[48].mxu1 %vm38_vm2, %v6493_v56  ;;  %v7206_v56 = vld [vmem:[#allocation2 + $0xfa] sm:$0xff] }
 0x588   :  { %18521 = vmatprep.mubr.msk.f32.mxu1 %vm38_vm2, %v6494_v47  ;;  %v7207_v47 = vld [vmem:[#allocation2 + $0x10a] sm:$0xff] }
 0x58b   :  { %18522 = vmatmul.mubr.msk.f32.gmra.mrb[50].mxu1 %vm38_vm2, %v6495_v60  ;;  %v7208_v60 = vld [vmem:[#allocation2 + $0x112] sm:$0xff] }
 0x58c   :  { %18524 = vmatprep.mubr.msk.f32.mxu1 %vm38_vm2, %v6496_v54  ;;  %v7209_v54 = vld [vmem:[#allocation2 + $0x122] sm:$0xff] }
 0x58f   :  { %18525 = vmatmul.mubr.msk.f32.gmra.mrb[52].mxu1 %vm38_vm2, %v6497_v0  ;;  %v7210_v0 = vld [vmem:[#allocation2 + $0x12a] sm:$0xff] }
 0x590   :  { %18527 = vmatprep.mubr.msk.f32.mxu1 %vm38_vm2, %v6498_v8  ;;  %v7211_v8 = vld [vmem:[#allocation2 + $0x13a] sm:$0xff] }
 0x593   :  { %18528 = vmatmul.mubr.msk.f32.gmra.mrb[54].mxu1 %vm38_vm2, %v6499_v38  ;;  %v7212_v38 = vld [vmem:[#allocation2 + $0x142] sm:$0xff] }
 0x594   :  { %18530 = vmatprep.mubr.msk.f32.mxu1 %vm38_vm2, %v6500_v33  ;;  %v7213_v33 = vld [vmem:[#allocation2 + $0x152] sm:$0xff] }
 0x597   :  { %18531 = vmatmul.mubr.msk.f32.gmra.mrb[56].mxu1 %vm38_vm2, %v6501_v37  ;;  %v7214_v37 = vld [vmem:[#allocation2 + $0x15a] sm:$0xff] }
 0x598   :  { %18533 = vmatprep.mubr.msk.f32.mxu1 %vm38_vm2, %v6502_v17  ;;  %v7215_v17 = vld [vmem:[#allocation2 + $0x16a] sm:$0xff] }
 0x59b   :  { %18534 = vmatmul.mubr.msk.f32.gmra.mrb[58].mxu1 %vm38_vm2, %v6503_v23  ;;  %v7216_v23 = vld [vmem:[#allocation2 + $0x172] sm:$0xff] }
 0x59c   :  { %18536 = vmatprep.mubr.msk.f32.mxu1 %vm38_vm2, %v24043_v5  ;;  %v6512_v5 = vld [vmem:[#allocation2 + $0x211] sm:$0xff] }
 0x59f   :  { %18537 = vmatmul.mubr.msk.f32.gmra.mrb[60].mxu1 %vm38_vm2, %v24047_v53  ;;  %v6513_v53 = vld [vmem:[#allocation2 + $0x219] sm:$0xff] }
 0x5a0   :  { %18539 = vmatprep.mubr.msk.f32.mxu1 %vm38_vm2, %v6506_v11  ;;  %v7219_v11 = vld [vmem:[#allocation2 + $0x19a] sm:$0xff] }
 0x5a3   :  { %18540 = vmatmul.mubr.msk.f32.gmra.mrb[62].mxu1 %vm38_vm2, %v6507_v59  ;;  %v7220_v59 = vld [vmem:[#allocation2 + $0x1a2] sm:$0xff] }
 0x5a4   :  { %18542 = vmatprep.mubr.msk.f32.mxu1 %vm38_vm2, %v6508_v20  ;;  %v7221_v20 = vld [vmem:[#allocation2 + $0x1e2] sm:$0xff] }
 0x5a7   :  { %18543 = vmatmul.mubr.msk.f32.gmra.mrb[64].mxu1 %vm38_vm2, %v6509_v41  ;;  %v7222_v41 = vld [vmem:[#allocation2 + $0x1ea] sm:$0xff] }
 0x5a8   :  { %18545 = vmatprep.mubr.msk.f32.mxu1 %vm38_vm2, %v6510_v57  ;;  %v7223_v57 = vld [vmem:[#allocation2 + $0x1fa] sm:$0xff] }
 0x5ab   :  { %18546 = vmatmul.mubr.msk.f32.gmra.mrb[66].mxu1 %vm38_vm2, %v6511_v40  ;;  %v7224_v40 = vld [vmem:[#allocation2 + $0x202] sm:$0xff] }
 0x5ac   :  { %18548 = vmatprep.mubr.msk.f32.mxu1 %vm38_vm2, %v6512_v5  ;;  %v7227_v5 = vld [vmem:[#allocation2 + $0x22a] sm:$0xff] }
 0x5af   :  { %18549 = vmatmul.mubr.msk.f32.gmra.mrb[68].mxu1 %vm38_vm2, %v6513_v53  ;;  %v7228_v53 = vld [vmem:[#allocation2 + $0x232] sm:$0xff] }
 0x5b0   :  { %18551 = vmatprep.mubr.msk.f32.mxu1 %vm38_vm2, %v6514_v44  ;;  %v7229_v44 = vld [vmem:[#allocation2 + $0x242] sm:$0xff] }
 0x5b3   :  { %18552 = vmatmul.mubr.msk.f32.gmra.mrb[70].mxu1 %vm38_vm2, %v6515_v48  ;;  %v7230_v48 = vld [vmem:[#allocation2 + $0x24a] sm:$0xff] }
 0x5b4   :  { %18554 = vmatprep.mubr.msk.f32.mxu1 %vm38_vm2, %v6516_v29  ;;  %v7231_v29 = vld [vmem:[#allocation2 + $0x25a] sm:$0xff] }
 0x5b7   :  { %18555 = vmatmul.mubr.msk.f32.gmra.mrb[72].mxu1 %vm38_vm2, %v6517_v14  ;;  %v7232_v14 = vld [vmem:[#allocation2 + $0x262] sm:$0xff] }
 0x5b8   :  { %18557 = vmatprep.mubr.msk.f32.mxu1 %vm38_vm2, %v6518_v13  ;;  %v7233_v13 = vld [vmem:[#allocation2 + $0x272] sm:$0xff] }
 0x5bb   :  { %18558 = vmatmul.mubr.msk.f32.gmra.mrb[74].mxu1 %vm38_vm2, %v6519_v32  ;;  %v7234_v32 = vld [vmem:[#allocation2 + $0x27a] sm:$0xff] }
 0x5bc   :  { %18560 = vmatprep.mubr.msk.f32.mxu1 %vm38_vm2, %v6520_v30  ;;  %v7235_v30 = vld [vmem:[#allocation2 + $0x28a] sm:$0xff] }
 0x5bf   :  { %18561 = vmatmul.mubr.msk.f32.gmra.mrb[76].mxu1 %vm38_vm2, %v6521_v50  ;;  %v7236_v50 = vld [vmem:[#allocation2 + $0x292] sm:$0xff] }
 0x5c0   :  { %18563 = vmatprep.mubr.msk.f32.mxu1 %vm38_vm2, %v6522_v22  ;;  %v7237_v22 = vld [vmem:[#allocation2 + $0x2a2] sm:$0xff] }
 0x5c3   :  { %18564 = vmatmul.mubr.msk.f32.gmra.mrb[78].mxu1 %vm38_vm2, %v6523_v63  ;;  %v7238_v63 = vld [vmem:[#allocation2 + $0x2aa] sm:$0xff] }
 0x5c4   :  { %18566 = vmatprep.mubr.msk.f32.mxu1 %vm38_vm2, %v6524_v18  ;;  %v7239_v18 = vld [vmem:[#allocation2 + $0x2ba] sm:$0xff] }
 0x5c7   :  { %18567 = vmatmul.mubr.msk.f32.gmra.mrb[80].mxu1 %vm38_vm2, %v6525_v45  ;;  %v7240_v45 = vld [vmem:[#allocation2 + $0x2c2] sm:$0xff] }
 0x5c8   :  { %18569 = vmatprep.mubr.msk.f32.mxu1 %vm38_vm2, %v6526_v2  ;;  %v7241_v2 = vld [vmem:[#allocation2 + $0x2d2] sm:$0xff] }
 0x5cb   :  { %18570 = vmatmul.mubr.msk.f32.gmra.mrb[82].mxu1 %vm38_vm2, %v6527_v46  ;;  %v7242_v46 = vld [vmem:[#allocation2 + $0x2da] sm:$0xff] }
 0x5cc   :  { %18572 = vmatprep.mubr.msk.f32.mxu1 %vm38_vm2, %v6528_v7  ;;  %v7243_v7 = vld [vmem:[#allocation2 + $0x2ea] sm:$0xff] }
 0x5cf   :  { %18573 = vmatmul.mubr.msk.f32.gmra.mrb[84].mxu1 %vm38_vm2, %v6529_v24  ;;  %v7244_v24 = vld [vmem:[#allocation2 + $0x2f2] sm:$0xff] }
 0x5d0   :  { %18575 = vmatprep.mubr.msk.f32.mxu1 %vm38_vm2, %v6530_v52  ;;  %v7245_v52 = vld [vmem:[#allocation2 + $0x302] sm:$0xff] }
 0x5d3   :  { %18576 = vmatmul.mubr.msk.f32.gmra.mrb[86].mxu1 %vm38_vm2, %v6531_v6  ;;  %v7246_v6 = vld [vmem:[#allocation2 + $0x30a] sm:$0xff] }
 0x5d4   :  { %18578 = vmatprep.mubr.msk.f32.mxu1 %vm38_vm2, %v6532_v42  ;;  %v7247_v42 = vld [vmem:[#allocation2 + $0x31a] sm:$0xff] }
 0x5d7   :  { %18579 = vmatmul.mubr.msk.f32.gmra.mrb[88].mxu1 %vm38_vm2, %v6533_v9  ;;  %v7248_v9 = vld [vmem:[#allocation2 + $0x322] sm:$0xff] }
 0x5d8   :  { %18581 = vmatprep.mubr.msk.f32.mxu1 %vm38_vm2, %v6534_v31  ;;  %v7251_v31 = vld [vmem:[#allocation2 + $0x34a] sm:$0xff] }
 0x5db   :  { %18582 = vmatmul.mubr.msk.f32.gmra.mrb[90].mxu1 %vm38_vm2, %v6535_v49  ;;  %v7252_v49 = vld [vmem:[#allocation2 + $0x352] sm:$0xff] }
 0x5dc   :  { %18584 = vmatprep.mubr.msk.f32.mxu1 %vm38_vm2, %v24111_v3  ;;  %v7193_v3 = vld [vmem:[#allocation2 + $0x62] sm:$0xff] }
 0x5df   :  { %18585 = vmatmul.mubr.msk.f32.gmra.mrb[92].mxu1 %vm38_vm2, %v24115_v62  ;;  %v7194_v62 = vld [vmem:[#allocation2 + $0x6a] sm:$0xff] }
 0x5e0   :  { %18587 = vmatprep.mubr.msk.f32.mxu1 %vm38_vm2, %v6538_v35  ;;  %v8581_v35 = vld [vmem:[%s27359_s9] sm:$0xff] }
 0x5e3   :  { %18588 = vmatmul.mubr.msk.f32.gmra.mrb[94].mxu1 %vm38_vm2, %v6539_v12  ;;  %v8582_v12 = vld [vmem:[%s27359_s9 + $0x8] sm:$0xff] }
 0x5e4   :  { %18606 = vmatprep.mubr.msk.f32.mxu1 %vm38_vm2, %v7189_v58  ;;  %v19862_v58 = vpack.c.bf16 %v8582_v12, %v8581_v35 }
 0x5e6   :  { %19863 = vmatprep.subr.bf16.mxu0 %v19862_v58 }
 0x5e7   :  { %18607 = vmatmul.mubr.msk.f32.vlgmr.msra.gmra.mrb[32].mxu1 %vm38_vm2, %v7190_v21  ;;  %19865 = vmatpush3.bf16.msra.mxu0 %v19862_v58 }
 0x5e8   :  { %18609 = vmatprep.mubr.msk.f32.mxu1 %vm38_vm2, %v7191_v1 }
 0x5eb   :  { %18610 = vmatmul.mubr.msk.f32.gmra.mrb[34].mxu1 %vm38_vm2, %v7192_v51 }
 0x5ec   :  { %18612 = vmatprep.mubr.msk.f32.mxu1 %vm38_vm2, %v7193_v3 }
 0x5ef   :  { %18613 = vmatmul.mubr.msk.f32.gmra.mrb[36].mxu1 %vm38_vm2, %v7194_v62 }
 0x5f0   :  { %18615 = vmatprep.mubr.msk.f32.mxu1 %vm38_vm2, %v7195_v16 }
 0x5f3   :  { %18616 = vmatmul.mubr.msk.f32.gmra.mrb[38].mxu1 %vm38_vm2, %v7196_v34 }
 0x5f4   :  { %18618 = vmatprep.mubr.msk.f32.mxu1 %vm38_vm2, %v7197_v10 }
 0x5f7   :  { %18619 = vmatmul.mubr.msk.f32.gmra.mrb[40].mxu1 %vm38_vm2, %v7198_v4 }
 0x5f8   :  { %18621 = vmatprep.mubr.msk.f32.mxu1 %vm38_vm2, %v7199_v36 }
 0x5fb   :  { %18622 = vmatmul.mubr.msk.f32.gmra.mrb[42].mxu1 %vm38_vm2, %v7200_v25 }
 0x5fc   :  { %18624 = vmatprep.mubr.msk.f32.mxu1 %vm38_vm2, %v7201_v19 }
 0x5ff   :  { %18625 = vmatmul.mubr.msk.f32.gmra.mrb[44].mxu1 %vm38_vm2, %v7202_v26 }
 0x600   :  { %18627 = vmatprep.mubr.msk.f32.mxu1 %vm38_vm2, %v7203_v28 }
 0x603   :  { %18628 = vmatmul.mubr.msk.f32.gmra.mrb[46].mxu1 %vm38_vm2, %v7204_v27 }
 0x604   :  { %18630 = vmatprep.mubr.msk.f32.mxu1 %vm38_vm2, %v7205_v39 }
 0x607   :  { %18631 = vmatmul.mubr.msk.f32.gmra.mrb[48].mxu1 %vm38_vm2, %v7206_v56 }
 0x608   :  { %18633 = vmatprep.mubr.msk.f32.mxu1 %vm38_vm2, %v7207_v47 }
 0x60b   :  { %18634 = vmatmul.mubr.msk.f32.gmra.mrb[50].mxu1 %vm38_vm2, %v7208_v60 }
 0x60c   :  { %18636 = vmatprep.mubr.msk.f32.mxu1 %vm38_vm2, %v7209_v54 }
 0x60f   :  { %18637 = vmatmul.mubr.msk.f32.gmra.mrb[52].mxu1 %vm38_vm2, %v7210_v0 }
 0x610   :  { %18639 = vmatprep.mubr.msk.f32.mxu1 %vm38_vm2, %v7211_v8 }
 0x613   :  { %18640 = vmatmul.mubr.msk.f32.gmra.mrb[54].mxu1 %vm38_vm2, %v7212_v38 }
 0x614   :  { %18642 = vmatprep.mubr.msk.f32.mxu1 %vm38_vm2, %v7213_v33 }
 0x617   :  { %18643 = vmatmul.mubr.msk.f32.gmra.mrb[56].mxu1 %vm38_vm2, %v7214_v37 }
 0x618   :  { %18645 = vmatprep.mubr.msk.f32.mxu1 %vm38_vm2, %v7215_v17 }
 0x61b   :  { %18646 = vmatmul.mubr.msk.f32.gmra.mrb[58].mxu1 %vm38_vm2, %v7216_v23 }
 0x61c   :  { %18648 = vmatprep.mubr.msk.f32.mxu1 %vm38_vm2, %v24207_v55  ;;  %v7225_v55 = vld [vmem:[#allocation2 + $0x212] sm:$0xff] }
 0x61f   :  { %18649 = vmatmul.mubr.msk.f32.gmra.mrb[60].mxu1 %vm38_vm2, %v24211_v43  ;;  %v7226_v43 = vld [vmem:[#allocation2 + $0x21a] sm:$0xff] }
 0x620   :  { %18651 = vmatprep.mubr.msk.f32.mxu1 %vm38_vm2, %v7219_v11 }
 0x623   :  { %18652 = vmatmul.mubr.msk.f32.gmra.mrb[62].mxu1 %vm38_vm2, %v7220_v59 }
 0x624   :  { %18654 = vmatprep.mubr.msk.f32.mxu1 %vm38_vm2, %v7221_v20 }
 0x627   :  { %18655 = vmatmul.mubr.msk.f32.gmra.mrb[64].mxu1 %vm38_vm2, %v7222_v41 }
 0x628   :  { %18657 = vmatprep.mubr.msk.f32.mxu1 %vm38_vm2, %v7223_v57 }
 0x62b   :  { %18658 = vmatmul.mubr.msk.f32.gmra.mrb[66].mxu1 %vm38_vm2, %v7224_v40 }
 0x62c   :  { %18660 = vmatprep.mubr.msk.f32.mxu1 %vm38_vm2, %v7225_v55 }
 0x62f   :  { %18661 = vmatmul.mubr.msk.f32.gmra.mrb[68].mxu1 %vm38_vm2, %v7226_v43 }
 0x630   :  { %18663 = vmatprep.mubr.msk.f32.mxu1 %vm38_vm2, %v7227_v5 }
 0x633   :  { %18664 = vmatmul.mubr.msk.f32.gmra.mrb[70].mxu1 %vm38_vm2, %v7228_v53 }
 0x634   :  { %18666 = vmatprep.mubr.msk.f32.mxu1 %vm38_vm2, %v7229_v44 }
 0x637   :  { %18667 = vmatmul.mubr.msk.f32.gmra.mrb[72].mxu1 %vm38_vm2, %v7230_v48 }
 0x638   :  { %18669 = vmatprep.mubr.msk.f32.mxu1 %vm38_vm2, %v7231_v29 }
 0x63b   :  { %18670 = vmatmul.mubr.msk.f32.gmra.mrb[74].mxu1 %vm38_vm2, %v7232_v14 }
 0x63c   :  { %18672 = vmatprep.mubr.msk.f32.mxu1 %vm38_vm2, %v7233_v13 }
 0x63f   :  { %18673 = vmatmul.mubr.msk.f32.gmra.mrb[76].mxu1 %vm38_vm2, %v7234_v32 }
 0x640   :  { %18675 = vmatprep.mubr.msk.f32.mxu1 %vm38_vm2, %v7235_v30 }
 0x643   :  { %18676 = vmatmul.mubr.msk.f32.gmra.mrb[78].mxu1 %vm38_vm2, %v7236_v50 }
 0x644   :  { %18678 = vmatprep.mubr.msk.f32.mxu1 %vm38_vm2, %v7237_v22 }
 0x647   :  { %18679 = vmatmul.mubr.msk.f32.gmra.mrb[80].mxu1 %vm38_vm2, %v7238_v63 }
 0x648   :  { %18681 = vmatprep.mubr.msk.f32.mxu1 %vm38_vm2, %v7239_v18 }
 0x64b   :  { %18682 = vmatmul.mubr.msk.f32.gmra.mrb[82].mxu1 %vm38_vm2, %v7240_v45 }
 0x64c   :  { %18684 = vmatprep.mubr.msk.f32.mxu1 %vm38_vm2, %v7241_v2 }
 0x64f   :  { %18685 = vmatmul.mubr.msk.f32.gmra.mrb[84].mxu1 %vm38_vm2, %v7242_v46 }
 0x650   :  { %18687 = vmatprep.mubr.msk.f32.mxu1 %vm38_vm2, %v7243_v7 }
 0x653   :  { %18688 = vmatmul.mubr.msk.f32.gmra.mrb[86].mxu1 %vm38_vm2, %v7244_v24 }
 0x654   :  { %18690 = vmatprep.mubr.msk.f32.mxu1 %vm38_vm2, %v7245_v52 }
 0x657   :  { %18691 = vmatmul.mubr.msk.f32.gmra.mrb[88].mxu1 %vm38_vm2, %v7246_v6 }
 0x658   :  { %18693 = vmatprep.mubr.msk.f32.mxu1 %vm38_vm2, %v7247_v42 }
 0x65b   :  { %18694 = vmatmul.mubr.msk.f32.gmra.mrb[90].mxu1 %vm38_vm2, %v7248_v9 }
 0x65c   :  { %18696 = vmatprep.mubr.msk.f32.mxu1 %vm38_vm2, %v24275_v15  ;;  %v24543_v15 = vld [vmem:[%s27358_s6] ss:$0 sm:$0xff] }
 0x65f   :  { %18697 = vmatmul.mubr.msk.f32.gmra.mrb[92].mxu1 %vm38_vm2, %v24279_v61 }
 0x660   :  { %18699 = vmatprep.mubr.msk.f32.mxu1 %vm38_vm2, %v7251_v31 }
 0x663   :  { %18700 = vmatmul.mubr.msk.f32.gmra.mrb[94].mxu1 %vm38_vm2, %v7252_v49 }
 0x6ba   :  { %v18608_v61 = vpop.f32.mrb[32].mxu1 }
 0x6bb   :  { %v20012_v21 = vadd.f32 %v18608_v61, %v24543_v15  ;;  %v7519_v1 = vpop.f32.mrb[33].mxu1 }
 0x6bc   :  { %v20013_v51 = vadd.f32 %v24543_v15, %v7519_v1 }
 0x6bd   :  { %v24547_v3 = vmax.f32 %v20012_v21, 0.0 }
 0x6be   :  { %v24549_v62 = vmax.f32 %v20013_v51, 0.0  ;;  %v18611_v16 = vpop.f32.mrb[34].mxu1 }
 0x6bf   :  { %v8100_v34 = vmul.f32 %v24547_v3, %v24547_v3  ;;  %v20014_v10 = vadd.f32 %v18611_v16, %v24543_v15  ;;  %v7529_v4 = vpop.f32.mrb[35].mxu1  ;;  %v7967_v36 = vsel %vm38_vm2, %v24547_v3, 0.0 }
 0x6c0   :  { %v7966_v25 = vsel %vm38_vm2, %v24549_v62, 0.0  ;;  %v8099_v19 = vmul.f32 %v24549_v62, %v24549_v62  ;;  %v20015_v26 = vadd.f32 %v24543_v15, %v7529_v4 }
 0x6c1   :  { %v24561_v28 = vmax.f32 %v20014_v10, 0.0  ;;  %v8164_v27 = vsel %vm38_vm2, %v8100_v34, 0.0  ;;  %v7968_v60 = vadd.f32 %v7967_v36, %v7966_v25 }
 0x6c2   :  { %v8163_v39 = vsel %vm38_vm2, %v8099_v19, 0.0  ;;  %v24565_v56 = vmax.f32 %v20015_v26, 0.0  ;;  %v18614_v47 = vpop.f32.mrb[36].mxu1 }
 0x6c3   :  { %v8102_v54 = vmul.f32 %v24561_v28, %v24561_v28  ;;  %v20016_v0 = vadd.f32 %v18614_v47, %v24543_v15  ;;  %v7539_v8 = vpop.f32.mrb[37].mxu1  ;;  %v8165_v17 = vadd.f32 %v8164_v27, %v8163_v39  ;;  %v7971_v59 = vsel %vm38_vm2, %v24561_v28, 0.0 }
 0x6c4   :  { %v7969_v38 = vsel %vm38_vm2, %v24565_v56, 0.0  ;;  %v8101_v33 = vmul.f32 %v24565_v56, %v24565_v56  ;;  %v20017_v37 = vadd.f32 %v24543_v15, %v7539_v8 }
 0x6c5   :  { %v7970_v23 = vadd.f32 %v7969_v38, %v7968_v60  ;;  %v24575_v11 = vmax.f32 %v20016_v0, 0.0  ;;  %v8168_v40 = vsel %vm38_vm2, %v8102_v54, 0.0 }
 0x6c6   :  { %v8166_v20 = vsel %vm38_vm2, %v8101_v33, 0.0  ;;  %v24580_v41 = vmax.f32 %v20017_v37, 0.0  ;;  %v18617_v57 = vpop.f32.mrb[38].mxu1 }
 0x6c7   :  { %v7972_v55 = vadd.f32 %v7971_v59, %v7970_v23  ;;  %v8167_v43 = vadd.f32 %v8166_v20, %v8165_v17  ;;  %v8104_v5 = vmul.f32 %v24575_v11, %v24575_v11  ;;  %v7549_v53 = vpop.f32.mrb[39].mxu1  ;;  %v20018_v29 = vadd.f32 %v18617_v57, %v24543_v15 }
 0x6c8   :  { %v7973_v44 = vsel %vm38_vm2, %v24580_v41, 0.0  ;;  %v8103_v48 = vmul.f32 %v24580_v41, %v24580_v41  ;;  %v20019_v14 = vadd.f32 %v24543_v15, %v7549_v53  ;;  %v7975_v30 = vsel %vm38_vm2, %v24575_v11, 0.0 }
 0x6c9   :  { %v8169_v13 = vadd.f32 %v8168_v40, %v8167_v43  ;;  %v7974_v32 = vadd.f32 %v7973_v44, %v7972_v55  ;;  %v24594_v22 = vmax.f32 %v20018_v29, 0.0  ;;  %v8172_v24 = vsel %vm38_vm2, %v8104_v5, 0.0 }
 0x6ca   :  { %v8170_v50 = vsel %vm38_vm2, %v8103_v48, 0.0  ;;  %v24596_v63 = vmax.f32 %v20019_v14, 0.0  ;;  %v18620_v18 = vpop.f32.mrb[40].mxu1 }
 0x6cb   :  { %v8171_v45 = vadd.f32 %v8170_v50, %v8169_v13  ;;  %v7976_v2 = vadd.f32 %v7975_v30, %v7974_v32  ;;  %v20020_v46 = vadd.f32 %v18620_v18, %v24543_v15  ;;  %v7559_v7 = vpop.f32.mrb[41].mxu1  ;;  %v8106_v52 = vmul.f32 %v24594_v22, %v24594_v22 }
 0x6cc   :  { %v7977_v6 = vsel %vm38_vm2, %v24596_v63, 0.0  ;;  %v8105_v42 = vmul.f32 %v24596_v63, %v24596_v63  ;;  %v20021_v35 = vadd.f32 %v24543_v15, %v7559_v7  ;;  %v7979_v61 = vsel %vm38_vm2, %v24594_v22, 0.0 }
 0x6cd   :  { %v7978_v9 = vadd.f32 %v7977_v6, %v7976_v2  ;;  %v8173_v31 = vadd.f32 %v8172_v24, %v8171_v45  ;;  %v24606_v49 = vmax.f32 %v20020_v46, 0.0  ;;  %v8176_v21 = vsel %vm38_vm2, %v8106_v52, 0.0 }
 0x6ce   :  { %v8174_v12 = vsel %vm38_vm2, %v8105_v42, 0.0  ;;  %v18623_v58 = vpop.f32.mrb[42].mxu1  ;;  %v24613_v51 = vmax.f32 %v20021_v35, 0.0 }
 0x6cf   :  { %v8175_v1 = vadd.f32 %v8174_v12, %v8173_v31  ;;  %v7569_v16 = vpop.f32.mrb[43].mxu1  ;;  %v8108_v34 = vmul.f32 %v24606_v49, %v24606_v49  ;;  %v7980_v10 = vadd.f32 %v7979_v61, %v7978_v9  ;;  %v20022_v4 = vadd.f32 %v18623_v58, %v24543_v15 }
 0x6d0   :  { %v20023_v36 = vadd.f32 %v24543_v15, %v7569_v16  ;;  %v7981_v25 = vsel %vm38_vm2, %v24613_v51, 0.0  ;;  %v8107_v19 = vmul.f32 %v24613_v51, %v24613_v51  ;;  %v7983_v54 = vsel %vm38_vm2, %v24606_v49, 0.0 }
 0x6d1   :  { %v8177_v26 = vadd.f32 %v8176_v21, %v8175_v1  ;;  %v7982_v27 = vadd.f32 %v7981_v25, %v7980_v10  ;;  %v24623_v39 = vmax.f32 %v20022_v4, 0.0  ;;  %v8180_v33 = vsel %vm38_vm2, %v8108_v34, 0.0 }
 0x6d2   :  { %v24625_v47 = vmax.f32 %v20023_v36, 0.0  ;;  %v18626_v60 = vpop.f32.mrb[44].mxu1  ;;  %v8178_v0 = vsel %vm38_vm2, %v8107_v19, 0.0 }
 0x6d3   :  { %v20024_v8 = vadd.f32 %v18626_v60, %v24543_v15  ;;  %v7579_v38 = vpop.f32.mrb[45].mxu1  ;;  %v8179_v37 = vadd.f32 %v8178_v0, %v8177_v26  ;;  %v8110_v17 = vmul.f32 %v24623_v39, %v24623_v39  ;;  %v7984_v23 = vadd.f32 %v7983_v54, %v7982_v27 }
 0x6d4   :  { %v7985_v59 = vsel %vm38_vm2, %v24625_v47, 0.0  ;;  %v8109_v20 = vmul.f32 %v24625_v47, %v24625_v47  ;;  %v20025_v40 = vadd.f32 %v24543_v15, %v7579_v38  ;;  %v7987_v53 = vsel %vm38_vm2, %v24623_v39, 0.0 }
 0x6d5   :  { %v24638_v57 = vmax.f32 %v20024_v8, 0.0  ;;  %v7986_v55 = vadd.f32 %v7985_v59, %v7984_v23  ;;  %v8181_v43 = vadd.f32 %v8180_v33, %v8179_v37  ;;  %v8184_v18 = vsel %vm38_vm2, %v8110_v17, 0.0 }
 0x6d6   :  { %v18629_v5 = vpop.f32.mrb[46].mxu1  ;;  %v8182_v44 = vsel %vm38_vm2, %v8109_v20, 0.0  ;;  %v24646_v29 = vmax.f32 %v20025_v40, 0.0 }
 0x6d7   :  { %v8112_v48 = vmul.f32 %v24638_v57, %v24638_v57  ;;  %v7589_v14 = vpop.f32.mrb[47].mxu1  ;;  %v8183_v13 = vadd.f32 %v8182_v44, %v8181_v43  ;;  %v7988_v32 = vadd.f32 %v7987_v53, %v7986_v55  ;;  %v20026_v30 = vadd.f32 %v18629_v5, %v24543_v15 }
 0x6d8   :  { %v20027_v50 = vadd.f32 %v24543_v15, %v7589_v14  ;;  %v7989_v45 = vsel %vm38_vm2, %v24646_v29, 0.0  ;;  %v8111_v2 = vmul.f32 %v24646_v29, %v24646_v29  ;;  %v7991_v42 = vsel %vm38_vm2, %v24638_v57, 0.0 }
 0x6d9   :  { %v7990_v46 = vadd.f32 %v7989_v45, %v7988_v32  ;;  %v8185_v7 = vadd.f32 %v8184_v18, %v8183_v13  ;;  %v24655_v24 = vmax.f32 %v20026_v30, 0.0  ;;  %v8188_v12 = vsel %vm38_vm2, %v8112_v48, 0.0 }
 0x6da   :  { %v24657_v52 = vmax.f32 %v20027_v50, 0.0  ;;  %v18632_v6 = vpop.f32.mrb[48].mxu1  ;;  %v8186_v9 = vsel %vm38_vm2, %v8111_v2, 0.0 }
 0x6db   :  { %v20028_v31 = vadd.f32 %v18632_v6, %v24543_v15  ;;  %v7599_v35 = vpop.f32.mrb[49].mxu1  ;;  %v8187_v58 = vadd.f32 %v8186_v9, %v8185_v7  ;;  %v8114_v61 = vmul.f32 %v24655_v24, %v24655_v24  ;;  %v7992_v21 = vadd.f32 %v7991_v42, %v7990_v46 }
 0x6dc   :  { %v7993_v1 = vsel %vm38_vm2, %v24657_v52, 0.0  ;;  %v8113_v16 = vmul.f32 %v24657_v52, %v24657_v52  ;;  %v20029_v10 = vadd.f32 %v24543_v15, %v7599_v35  ;;  %v7995_v19 = vsel %vm38_vm2, %v24655_v24, 0.0 }
 0x6dd   :  { %v24670_v34 = vmax.f32 %v20028_v31, 0.0  ;;  %v7994_v4 = vadd.f32 %v7993_v1, %v7992_v21  ;;  %v8189_v36 = vadd.f32 %v8188_v12, %v8187_v58  ;;  %v8192_v37 = vsel %vm38_vm2, %v8114_v61, 0.0 }
 0x6de   :  { %v18635_v25 = vpop.f32.mrb[50].mxu1  ;;  %v8190_v26 = vsel %vm38_vm2, %v8113_v16, 0.0  ;;  %v24678_v60 = vmax.f32 %v20029_v10, 0.0 }
 0x6df   :  { %v8116_v27 = vmul.f32 %v24670_v34, %v24670_v34  ;;  %v7609_v54 = vpop.f32.mrb[51].mxu1  ;;  %v8191_v0 = vadd.f32 %v8190_v26, %v8189_v36  ;;  %v7996_v8 = vadd.f32 %v7995_v19, %v7994_v4  ;;  %v20030_v38 = vadd.f32 %v18635_v25, %v24543_v15 }
 0x6e0   :  { %v20031_v33 = vadd.f32 %v24543_v15, %v7609_v54  ;;  %v7997_v17 = vsel %vm38_vm2, %v24678_v60, 0.0  ;;  %v8115_v23 = vmul.f32 %v24678_v60, %v24678_v60  ;;  %v7999_v5 = vsel %vm38_vm2, %v24670_v34, 0.0 }
 0x6e1   :  { %v7998_v59 = vadd.f32 %v7997_v17, %v7996_v8  ;;  %v8193_v20 = vadd.f32 %v8192_v37, %v8191_v0  ;;  %v24687_v40 = vmax.f32 %v20030_v38, 0.0  ;;  %v8196_v14 = vsel %vm38_vm2, %v8116_v27, 0.0 }
 0x6e2   :  { %v24689_v55 = vmax.f32 %v20031_v33, 0.0  ;;  %v18638_v43 = vpop.f32.mrb[52].mxu1  ;;  %v8194_v53 = vsel %vm38_vm2, %v8115_v23, 0.0 }
 0x6e3   :  { %v20032_v44 = vadd.f32 %v18638_v43, %v24543_v15  ;;  %v7619_v48 = vpop.f32.mrb[53].mxu1  ;;  %v8195_v13 = vadd.f32 %v8194_v53, %v8193_v20  ;;  %v8118_v32 = vmul.f32 %v24687_v40, %v24687_v40  ;;  %v8000_v30 = vadd.f32 %v7999_v5, %v7998_v59 }
 0x6e4   :  { %v8001_v50 = vsel %vm38_vm2, %v24689_v55, 0.0  ;;  %v8117_v18 = vmul.f32 %v24689_v55, %v24689_v55  ;;  %v20033_v2 = vadd.f32 %v24543_v15, %v7619_v48  ;;  %v8003_v42 = vsel %vm38_vm2, %v24687_v40, 0.0 }
 0x6e5   :  { %v24702_v45 = vmax.f32 %v20032_v44, 0.0  ;;  %v8002_v46 = vadd.f32 %v8001_v50, %v8000_v30  ;;  %v8197_v7 = vadd.f32 %v8196_v14, %v8195_v13  ;;  %v8200_v16 = vsel %vm38_vm2, %v8118_v32, 0.0 }
 0x6e6   :  { %v18641_v6 = vpop.f32.mrb[54].mxu1  ;;  %v8198_v9 = vsel %vm38_vm2, %v8117_v18, 0.0  ;;  %v24710_v35 = vmax.f32 %v20033_v2, 0.0 }
 0x6e7   :  { %v8120_v31 = vmul.f32 %v24702_v45, %v24702_v45  ;;  %v7629_v12 = vpop.f32.mrb[55].mxu1  ;;  %v8199_v58 = vadd.f32 %v8198_v9, %v8197_v7  ;;  %v8004_v61 = vadd.f32 %v8003_v42, %v8002_v46  ;;  %v20034_v21 = vadd.f32 %v18641_v6, %v24543_v15 }
 0x6e8   :  { %v20035_v1 = vadd.f32 %v24543_v15, %v7629_v12  ;;  %v8005_v10 = vsel %vm38_vm2, %v24710_v35, 0.0  ;;  %v8119_v4 = vmul.f32 %v24710_v35, %v24710_v35  ;;  %v8007_v54 = vsel %vm38_vm2, %v24702_v45, 0.0 }
 0x6e9   :  { %v8006_v36 = vadd.f32 %v8005_v10, %v8004_v61  ;;  %v8201_v25 = vadd.f32 %v8200_v16, %v8199_v58  ;;  %v24719_v19 = vmax.f32 %v20034_v21, 0.0  ;;  %v8204_v33 = vsel %vm38_vm2, %v8120_v31, 0.0 }
 0x6ea   :  { %v24721_v26 = vmax.f32 %v20035_v1, 0.0  ;;  %v18644_v27 = vpop.f32.mrb[56].mxu1  ;;  %v8202_v0 = vsel %vm38_vm2, %v8119_v4, 0.0 }
 0x6eb   :  { %v20036_v8 = vadd.f32 %v18644_v27, %v24543_v15  ;;  %v7639_v38 = vpop.f32.mrb[57].mxu1  ;;  %v8203_v37 = vadd.f32 %v8202_v0, %v8201_v25  ;;  %v8122_v17 = vmul.f32 %v24719_v19, %v24719_v19  ;;  %v8008_v23 = vadd.f32 %v8007_v54, %v8006_v36 }
 0x6ec   :  { %v8009_v59 = vsel %vm38_vm2, %v24721_v26, 0.0  ;;  %v8121_v20 = vmul.f32 %v24721_v26, %v24721_v26  ;;  %v20037_v5 = vadd.f32 %v24543_v15, %v7639_v38  ;;  %v8011_v14 = vsel %vm38_vm2, %v24719_v19, 0.0 }
 0x6ed   :  { %v24734_v43 = vmax.f32 %v20036_v8, 0.0  ;;  %v8010_v53 = vadd.f32 %v8009_v59, %v8008_v23  ;;  %v8205_v44 = vadd.f32 %v8204_v33, %v8203_v37  ;;  %v8208_v6 = vsel %vm38_vm2, %v8122_v17, 0.0 }
 0x6ee   :  { %v18647_v48 = vpop.f32.mrb[58].mxu1  ;;  %v8206_v13 = vsel %vm38_vm2, %v8121_v20, 0.0  ;;  %v24742_v30 = vmax.f32 %v20037_v5, 0.0 }
 0x6ef   :  { %v8124_v32 = vmul.f32 %v24734_v43, %v24734_v43  ;;  %v7649_v50 = vpop.f32.mrb[59].mxu1  ;;  %v8207_v18 = vadd.f32 %v8206_v13, %v8205_v44  ;;  %v8012_v2 = vadd.f32 %v8011_v14, %v8010_v53  ;;  %v20038_v46 = vadd.f32 %v18647_v48, %v24543_v15 }
 0x6f0   :  { %v20039_v7 = vadd.f32 %v24543_v15, %v7649_v50  ;;  %v8013_v42 = vsel %vm38_vm2, %v24742_v30, 0.0  ;;  %v8123_v9 = vmul.f32 %v24742_v30, %v24742_v30  ;;  %v8015_v1 = vsel %vm38_vm2, %v24734_v43, 0.0 }
 0x6f1   :  { %v8014_v31 = vadd.f32 %v8013_v42, %v8012_v2  ;;  %v8209_v12 = vadd.f32 %v8208_v6, %v8207_v18  ;;  %v24751_v58 = vmax.f32 %v20038_v46, 0.0  ;;  %v8212_v36 = vsel %vm38_vm2, %v8124_v32, 0.0 }
 0x6f2   :  { %v24753_v61 = vmax.f32 %v20039_v7, 0.0  ;;  %v18650_v21 = vpop.f32.mrb[60].mxu1  ;;  %v8210_v16 = vsel %vm38_vm2, %v8123_v9, 0.0 }
 0x6f3   :  { %v20040_v10 = vadd.f32 %v18650_v21, %v24543_v15  ;;  %v7659_v4 = vpop.f32.mrb[61].mxu1  ;;  %v8211_v25 = vadd.f32 %v8210_v16, %v8209_v12  ;;  %v8126_v27 = vmul.f32 %v24751_v58, %v24751_v58  ;;  %v8016_v54 = vadd.f32 %v8015_v1, %v8014_v31 }
 0x6f4   :  { %v8017_v0 = vsel %vm38_vm2, %v24753_v61, 0.0  ;;  %v8125_v8 = vmul.f32 %v24753_v61, %v24753_v61  ;;  %v20041_v33 = vadd.f32 %v24543_v15, %v7659_v4  ;;  %v8019_v59 = vsel %vm38_vm2, %v24751_v58, 0.0 }
 0x6f5   :  { %v24766_v38 = vmax.f32 %v20040_v10, 0.0  ;;  %v8018_v37 = vadd.f32 %v8017_v0, %v8016_v54  ;;  %v8213_v17 = vadd.f32 %v8212_v36, %v8211_v25  ;;  %v8216_v50 = vsel %vm38_vm2, %v8126_v27, 0.0 }
 0x6f6   :  { %v18653_v23 = vpop.f32.mrb[62].mxu1  ;;  %v8214_v20 = vsel %vm38_vm2, %v8125_v8, 0.0  ;;  %v24774_v53 = vmax.f32 %v20041_v33, 0.0 }
 0x6f7   :  { %v8128_v5 = vmul.f32 %v24766_v38, %v24766_v38  ;;  %v7669_v44 = vpop.f32.mrb[63].mxu1  ;;  %v8215_v48 = vadd.f32 %v8214_v20, %v8213_v17  ;;  %v8020_v14 = vadd.f32 %v8019_v59, %v8018_v37  ;;  %v20042_v13 = vadd.f32 %v18653_v23, %v24543_v15 }
 0x6f8   :  { %v20043_v32 = vadd.f32 %v24543_v15, %v7669_v44  ;;  %v8021_v18 = vsel %vm38_vm2, %v24774_v53, 0.0  ;;  %v8127_v2 = vmul.f32 %v24774_v53, %v24774_v53  ;;  %v8023_v31 = vsel %vm38_vm2, %v24766_v38, 0.0 }
 0x6f9   :  { %v8022_v46 = vadd.f32 %v8021_v18, %v8020_v14  ;;  %v8217_v7 = vadd.f32 %v8216_v50, %v8215_v48  ;;  %v24783_v6 = vmax.f32 %v20042_v13, 0.0  ;;  %v8220_v16 = vsel %vm38_vm2, %v8128_v5, 0.0 }
 0x6fa   :  { %v24785_v42 = vmax.f32 %v20043_v32, 0.0  ;;  %v18656_v9 = vpop.f32.mrb[64].mxu1  ;;  %v8218_v12 = vsel %vm38_vm2, %v8127_v2, 0.0 }
 0x6fb   :  { %v20044_v21 = vadd.f32 %v18656_v9, %v24543_v15  ;;  %v7679_v1 = vpop.f32.mrb[65].mxu1  ;;  %v8219_v10 = vadd.f32 %v8218_v12, %v8217_v7  ;;  %v8130_v4 = vmul.f32 %v24783_v6, %v24783_v6  ;;  %v8024_v36 = vadd.f32 %v8023_v31, %v8022_v46 }
 0x6fc   :  { %v8025_v25 = vsel %vm38_vm2, %v24785_v42, 0.0  ;;  %v8129_v27 = vmul.f32 %v24785_v42, %v24785_v42  ;;  %v20045_v0 = vadd.f32 %v24543_v15, %v7679_v1  ;;  %v8027_v17 = vsel %vm38_vm2, %v24783_v6, 0.0 }
 0x6fd   :  { %v24798_v54 = vmax.f32 %v20044_v21, 0.0  ;;  %v8026_v8 = vadd.f32 %v8025_v25, %v8024_v36  ;;  %v8221_v33 = vadd.f32 %v8220_v16, %v8219_v10  ;;  %v8224_v32 = vsel %vm38_vm2, %v8130_v4, 0.0 }
 0x6fe   :  { %v18659_v37 = vpop.f32.mrb[66].mxu1  ;;  %v8222_v23 = vsel %vm38_vm2, %v8129_v27, 0.0  ;;  %v24806_v20 = vmax.f32 %v20045_v0, 0.0 }
 0x6ff   :  { %v8132_v59 = vmul.f32 %v24798_v54, %v24798_v54  ;;  %v7689_v5 = vpop.f32.mrb[67].mxu1  ;;  %v8223_v44 = vadd.f32 %v8222_v23, %v8221_v33  ;;  %v8028_v48 = vadd.f32 %v8027_v17, %v8026_v8  ;;  %v20046_v14 = vadd.f32 %v18659_v37, %v24543_v15 }
 0x700   :  { %v20047_v13 = vadd.f32 %v24543_v15, %v7689_v5  ;;  %v8029_v50 = vsel %vm38_vm2, %v24806_v20, 0.0  ;;  %v8131_v18 = vmul.f32 %v24806_v20, %v24806_v20  ;;  %v8031_v12 = vsel %vm38_vm2, %v24798_v54, 0.0 }
 0x701   :  { %v8030_v2 = vadd.f32 %v8029_v50, %v8028_v48  ;;  %v8225_v46 = vadd.f32 %v8224_v32, %v8223_v44  ;;  %v24815_v7 = vmax.f32 %v20046_v14, 0.0  ;;  %v8228_v10 = vsel %vm38_vm2, %v8132_v59, 0.0  ;;  %v8583_v32 = vld [vmem:[%s27359_s9 + $0x10] sm:$0xff]  ;;  %v8584_v50 = vld [vmem:[%s27359_s9 + $0x18] sm:$0xff] }
 0x702   :  { %v24817_v9 = vmax.f32 %v20047_v13, 0.0  ;;  %v18662_v31 = vpop.f32.mrb[68].mxu1  ;;  %v8226_v21 = vsel %vm38_vm2, %v8131_v18, 0.0 }
 0x703   :  { %v20048_v1 = vadd.f32 %v18662_v31, %v24543_v15  ;;  %v7699_v16 = vpop.f32.mrb[69].mxu1  ;;  %v8227_v4 = vadd.f32 %v8226_v21, %v8225_v46  ;;  %v8134_v36 = vmul.f32 %v24815_v7, %v24815_v7  ;;  %v8032_v25 = vadd.f32 %v8031_v12, %v8030_v2  ;;  %v8585_v12 = vld [vmem:[%s27359_s9 + $0x20] sm:$0xff]  ;;  %v8586_v21 = vld [vmem:[%s27359_s9 + $0x28] sm:$0xff] }
 0x704   :  { %v8033_v27 = vsel %vm38_vm2, %v24817_v9, 0.0  ;;  %v8133_v0 = vmul.f32 %v24817_v9, %v24817_v9  ;;  %v20049_v33 = vadd.f32 %v24543_v15, %v7699_v16  ;;  %v8035_v37 = vsel %vm38_vm2, %v24815_v7, 0.0 }
 0x705   :  { %v24830_v8 = vmax.f32 %v20048_v1, 0.0  ;;  %v8034_v17 = vadd.f32 %v8033_v27, %v8032_v25  ;;  %v8229_v23 = vadd.f32 %v8228_v10, %v8227_v4  ;;  %v8232_v5 = vsel %vm38_vm2, %v8134_v36, 0.0  ;;  %v8587_v36 = vld [vmem:[%s27359_s9 + $0x30] sm:$0xff]  ;;  %v8588_v25 = vld [vmem:[%s27359_s9 + $0x38] sm:$0xff]  ;;  %v8517_v27 = vld [vmem:[#allocation3] sm:$0xff] }
 0x706   :  { %v18665_v59 = vpop.f32.mrb[70].mxu1  ;;  %v8230_v44 = vsel %vm38_vm2, %v8133_v0, 0.0  ;;  %v24839_v14 = vmax.f32 %v20049_v33, 0.0  ;;  %v19866_v4 = vpack.c.bf16 %v8584_v50, %v8583_v32  ;;  %18718 = vmatprep.mubr.msk.f32.mxu0 %vm38_vm2, %v8517_v27  ;;  %v19870_v50 = vpack.c.bf16 %v8586_v21, %v8585_v12 }
 0x707   :  { %27974 = vst [vmem:[#allocation11_spill] sm:$0xff] %v24830_v8  ;;  %v8136_v48 = vmul.f32 %v24830_v8, %v24830_v8  ;;  %v7709_v13 = vpop.f32.mrb[71].mxu1  ;;  %v8231_v18 = vadd.f32 %v8230_v44, %v8229_v23  ;;  %v8036_v2 = vadd.f32 %v8035_v37, %v8034_v17  ;;  %v20050_v46 = vadd.f32 %v18665_v59, %v24543_v15 }
 0x708   :  { %v20051_v31 = vadd.f32 %v24543_v15, %v7709_v13  ;;  %v8039_v1 = vsel %vm38_vm2, %v24830_v8, 0.0  ;;  %v8037_v16 = vsel %vm38_vm2, %v24839_v14, 0.0  ;;  %v8135_v10 = vmul.f32 %v24839_v14, %v24839_v14  ;;  %19867 = vmatprep.subr.bf16.mxu0 %v19866_v4 }
 0x709   :  { %v8038_v0 = vadd.f32 %v8037_v16, %v8036_v2  ;;  %v8233_v33 = vadd.f32 %v8232_v5, %v8231_v18  ;;  %v24867_v37 = vmax.f32 %v20050_v46, 0.0  ;;  %v8236_v59 = vsel %vm38_vm2, %v8136_v48, 0.0  ;;  %19869 = vmatpush3.bf16.msra.mxu0 %v19866_v4  ;;  %v9295_v4 = vld [vmem:[%s27359_s9 + $0x48] sm:$0xff] }
 0x70a   :  { %v24869_v17 = vmax.f32 %v20051_v31, 0.0  ;;  %v18668_v23 = vpop.f32.mrb[72].mxu1  ;;  %v8234_v44 = vsel %vm38_vm2, %v8135_v10, 0.0  ;;  %v19874_v2 = vpack.c.bf16 %v8588_v25, %v8587_v36  ;;  %19871 = vmatprep.subr.bf16.mxu0 %v19870_v50 }
 0x70b   :  { %27975 = vst [vmem:[#allocation14_spill] sm:$0xff] %v24867_v37  ;;  %v20052_v13 = vadd.f32 %v18668_v23, %v24543_v15  ;;  %v7719_v32 = vpop.f32.mrb[73].mxu1  ;;  %v8235_v8 = vadd.f32 %v8234_v44, %v8233_v33  ;;  %v8138_v5 = vmul.f32 %v24867_v37, %v24867_v37  ;;  %v8040_v18 = vadd.f32 %v8039_v1, %v8038_v0  ;;  %v9294_v1 = vld [vmem:[%s27359_s9 + $0x40] sm:$0xff] }
 0x70c   :  { %v8041_v46 = vsel %vm38_vm2, %v24869_v17, 0.0  ;;  %v8137_v48 = vmul.f32 %v24869_v17, %v24869_v17  ;;  %v20053_v16 = vadd.f32 %v24543_v15, %v7719_v32  ;;  %v8043_v36 = vsel %vm38_vm2, %v24867_v37, 0.0 }
 0x70d   :  { %v24881_v31 = vmax.f32 %v20052_v13, 0.0  ;;  %v8042_v10 = vadd.f32 %v8041_v46, %v8040_v18  ;;  %v8237_v12 = vadd.f32 %v8236_v59, %v8235_v8  ;;  %19873 = vmatpush3.bf16.msra.mxu0 %v19870_v50  ;;  %v8240_v13 = vsel %vm38_vm2, %v8138_v5, 0.0 }
 0x70e   :  { %v18671_v21 = vpop.f32.mrb[74].mxu1  ;;  %v8238_v25 = vsel %vm38_vm2, %v8137_v48, 0.0  ;;  %v24895_v0 = vmax.f32 %v20053_v16, 0.0  ;;  %19875 = vmatprep.subr.bf16.mxu0 %v19874_v2  ;;  %v19878_v46 = vpack.c.bf16 %v9295_v4, %v9294_v1 }
 0x70f   :  { %27976 = vst [vmem:[#allocation13_spill] sm:$0xff] %v24881_v31  ;;  %v8140_v27 = vmul.f32 %v24881_v31, %v24881_v31  ;;  %v7729_v8 = vpop.f32.mrb[75].mxu1  ;;  %v8239_v33 = vadd.f32 %v8238_v25, %v8237_v12  ;;  %v8044_v23 = vadd.f32 %v8043_v36, %v8042_v10  ;;  %v20054_v59 = vadd.f32 %v18671_v21, %v24543_v15 }
 0x710   :  { %v20055_v44 = vadd.f32 %v24543_v15, %v7729_v8  ;;  %v8045_v32 = vsel %vm38_vm2, %v24895_v0, 0.0  ;;  %v8139_v18 = vmul.f32 %v24895_v0, %v24895_v0  ;;  %v8047_v50 = vsel %vm38_vm2, %v24881_v31, 0.0 }
 0x711   :  { %v8046_v48 = vadd.f32 %v8045_v32, %v8044_v23  ;;  %v8241_v16 = vadd.f32 %v8240_v13, %v8239_v33  ;;  %v24904_v37 = vmax.f32 %v20054_v59, 0.0  ;;  %v8244_v25 = vsel %vm38_vm2, %v8140_v27, 0.0  ;;  %19877 = vmatpush3.bf16.msra.mxu0 %v19874_v2  ;;  %v8518_v33 = vld [vmem:[#allocation3 + $0x8] sm:$0xff] }
 0x712   :  { %v24906_v10 = vmax.f32 %v20055_v44, 0.0  ;;  %v18674_v12 = vpop.f32.mrb[76].mxu1  ;;  %v8242_v5 = vsel %vm38_vm2, %v8139_v18, 0.0  ;;  %19879 = vmatprep.subr.bf16.mxu0 %v19878_v46 }
 0x713   :  { %27977 = vst [vmem:[#allocation16_spill] sm:$0xff] %v24904_v37  ;;  %v20056_v21 = vadd.f32 %v18674_v12, %v24543_v15  ;;  %v7739_v36 = vpop.f32.mrb[77].mxu1  ;;  %v8243_v8 = vadd.f32 %v8242_v5, %v8241_v16  ;;  %v8142_v1 = vmul.f32 %v24904_v37, %v24904_v37  ;;  %v8048_v4 = vadd.f32 %v8047_v50, %v8046_v48 }
 0x714   :  { %27978 = vst [vmem:[#allocation15_spill] sm:$0xff] %v24906_v10  ;;  %v8049_v23 = vsel %vm38_vm2, %v24906_v10, 0.0  ;;  %v8141_v59 = vmul.f32 %v24906_v10, %v24906_v10  ;;  %v20057_v13 = vadd.f32 %v24543_v15, %v7739_v36  ;;  %v8051_v16 = vsel %vm38_vm2, %v24904_v37, 0.0  ;;  %18719 = vmatmul.mubr.msk.f32.vlgmr.msra.gmra.mrb[32].mxu0 %vm38_vm2, %v8518_v33  ;;  %v9297_v33 = vld [vmem:[%s27359_s9 + $0x58] sm:$0xff] }
 0x715   :  { %v24919_v44 = vmax.f32 %v20056_v21, 0.0  ;;  %v8050_v32 = vadd.f32 %v8049_v23, %v8048_v4  ;;  %v8245_v27 = vadd.f32 %v8244_v25, %v8243_v8  ;;  %19881 = vmatpush3.bf16.msra.mxu0 %v19878_v46  ;;  %v8248_v8 = vsel %vm38_vm2, %v8142_v1, 0.0 }
 0x716   :  { %v18677_v18 = vpop.f32.mrb[78].mxu1  ;;  %v8246_v2 = vsel %vm38_vm2, %v8141_v59, 0.0  ;;  %v24927_v12 = vmax.f32 %v20057_v13, 0.0  ;;  %v9296_v59 = vld [vmem:[%s27359_s9 + $0x50] sm:$0xff] }
 0x717   :  { %27979 = vst [vmem:[#allocation18_spill] sm:$0xff] %v24919_v44  ;;  %v8144_v48 = vmul.f32 %v24919_v44, %v24919_v44  ;;  %v7749_v50 = vpop.f32.mrb[79].mxu1  ;;  %v8247_v5 = vadd.f32 %v8246_v2, %v8245_v27  ;;  %v8052_v21 = vadd.f32 %v8051_v16, %v8050_v32  ;;  %v20058_v36 = vadd.f32 %v18677_v18, %v24543_v15 }
 0x718   :  { %27980 = vst [vmem:[#allocation17_spill] sm:$0xff] %v24927_v12  ;;  %v20059_v25 = vadd.f32 %v24543_v15, %v7749_v50  ;;  %v8053_v4 = vsel %vm38_vm2, %v24927_v12, 0.0  ;;  %v8143_v23 = vmul.f32 %v24927_v12, %v24927_v12  ;;  %v8055_v18 = vsel %vm38_vm2, %v24919_v44, 0.0 }
 0x719   :  { %v8054_v13 = vadd.f32 %v8053_v4, %v8052_v21  ;;  %v8249_v32 = vadd.f32 %v8248_v8, %v8247_v5  ;;  %v24943_v27 = vmax.f32 %v20058_v36, 0.0  ;;  %v19882_v12 = vpack.c.bf16 %v9297_v33, %v9296_v59 }
 0x71a   :  { %v24945_v46 = vmax.f32 %v20059_v25, 0.0  ;;  %v18680_v1 = vpop.f32.mrb[80].mxu1  ;;  %v8250_v16 = vsel %vm38_vm2, %v8143_v23, 0.0  ;;  %v8252_v37 = vsel %vm38_vm2, %v8144_v48, 0.0 }
 0x71b   :  { %27981 = vst [vmem:[#allocation20_spill] sm:$0xff] %v24943_v27  ;;  %v20060_v2 = vadd.f32 %v18680_v1, %v24543_v15  ;;  %v7759_v50 = vpop.f32.mrb[81].mxu1  ;;  %v8251_v10 = vadd.f32 %v8250_v16, %v8249_v32  ;;  %v8146_v5 = vmul.f32 %v24943_v27, %v24943_v27  ;;  %v8056_v21 = vadd.f32 %v8055_v18, %v8054_v13 }
 0x71c   :  { %27982 = vst [vmem:[#allocation19_spill] sm:$0xff] %v24945_v46  ;;  %v8057_v36 = vsel %vm38_vm2, %v24945_v46, 0.0  ;;  %v8145_v25 = vmul.f32 %v24945_v46, %v24945_v46  ;;  %v20061_v4 = vadd.f32 %v24543_v15, %v7759_v50  ;;  %19883 = vmatprep.subr.bf16.mxu0 %v19882_v12  ;;  %v8059_v48 = vsel %vm38_vm2, %v24943_v27, 0.0 }
 0x71d   :  { %v24958_v8 = vmax.f32 %v20060_v2, 0.0  ;;  %v8058_v23 = vadd.f32 %v8057_v36, %v8056_v21  ;;  %v8253_v59 = vadd.f32 %v8252_v37, %v8251_v10  ;;  %19885 = vmatpush3.bf16.msra.mxu0 %v19882_v12  ;;  %v8256_v37 = vsel %vm38_vm2, %v8146_v5, 0.0 }
 0x71e   :  { %v18683_v33 = vpop.f32.mrb[82].mxu1  ;;  %v8254_v13 = vsel %vm38_vm2, %v8145_v25, 0.0  ;;  %v24966_v1 = vmax.f32 %v20061_v4, 0.0 }
 0x71f   :  { %27983 = vst [vmem:[#allocation22_spill] sm:$0xff] %v24958_v8  ;;  %v8148_v32 = vmul.f32 %v24958_v8, %v24958_v8  ;;  %v7769_v18 = vpop.f32.mrb[83].mxu1  ;;  %v8255_v16 = vadd.f32 %v8254_v13, %v8253_v59  ;;  %v8060_v2 = vadd.f32 %v8059_v48, %v8058_v23  ;;  %v20062_v50 = vadd.f32 %v18683_v33, %v24543_v15 }
 0x720   :  { %27984 = vst [vmem:[#allocation23_spill] sm:$0xff] %v24966_v1  ;;  %v20063_v21 = vadd.f32 %v24543_v15, %v7769_v18  ;;  %v8061_v10 = vsel %vm38_vm2, %v24966_v1, 0.0  ;;  %v8147_v12 = vmul.f32 %v24966_v1, %v24966_v1  ;;  %v8063_v23 = vsel %vm38_vm2, %v24958_v8, 0.0 }
 0x721   :  { %v8062_v36 = vadd.f32 %v8061_v10, %v8060_v2  ;;  %v8257_v25 = vadd.f32 %v8256_v37, %v8255_v16  ;;  %v24975_v27 = vmax.f32 %v20062_v50, 0.0  ;;  %v8260_v13 = vsel %vm38_vm2, %v8148_v32, 0.0 }
 0x722   :  { %v24977_v4 = vmax.f32 %v20063_v21, 0.0  ;;  %v18686_v59 = vpop.f32.mrb[84].mxu1  ;;  %v8258_v33 = vsel %vm38_vm2, %v8147_v12, 0.0 }
 0x723   :  { %27985 = vst [vmem:[#allocation21_spill] sm:$0xff] %v24975_v27  ;;  %v20064_v5 = vadd.f32 %v18686_v59, %v24543_v15  ;;  %v7779_v48 = vpop.f32.mrb[85].mxu1  ;;  %v8259_v18 = vadd.f32 %v8258_v33, %v8257_v25  ;;  %v8150_v2 = vmul.f32 %v24975_v27, %v24975_v27  ;;  %v8064_v16 = vadd.f32 %v8063_v23, %v8062_v36 }
 0x724   :  { %27986 = vst [vmem:[#allocation24_spill] sm:$0xff] %v24977_v4  ;;  %v8065_v50 = vsel %vm38_vm2, %v24977_v4, 0.0  ;;  %v8149_v21 = vmul.f32 %v24977_v4, %v24977_v4  ;;  %v20065_v10 = vadd.f32 %v24543_v15, %v7779_v48  ;;  %v8067_v32 = vsel %vm38_vm2, %v24975_v27, 0.0 }
 0x725   :  { %v24990_v37 = vmax.f32 %v20064_v5, 0.0  ;;  %v8066_v12 = vadd.f32 %v8065_v50, %v8064_v16  ;;  %v8261_v59 = vadd.f32 %v8260_v13, %v8259_v18  ;;  %v8264_v13 = vsel %vm38_vm2, %v8150_v2, 0.0 }
 0x726   :  { %v18689_v8 = vpop.f32.mrb[86].mxu1  ;;  %v8262_v25 = vsel %vm38_vm2, %v8149_v21, 0.0  ;;  %v24998_v23 = vmax.f32 %v20065_v10, 0.0 }
 0x727   :  { %27987 = vst [vmem:[#allocation25_spill] sm:$0xff] %v24990_v37  ;;  %v8152_v36 = vmul.f32 %v24990_v37, %v24990_v37  ;;  %v7789_v33 = vpop.f32.mrb[87].mxu1  ;;  %v8263_v1 = vadd.f32 %v8262_v25, %v8261_v59  ;;  %v8068_v4 = vadd.f32 %v8067_v32, %v8066_v12  ;;  %v20066_v5 = vadd.f32 %v18689_v8, %v24543_v15 }
 0x728   :  { %27988 = vst [vmem:[#allocation26_spill] sm:$0xff] %v24998_v23  ;;  %v20067_v48 = vadd.f32 %v24543_v15, %v7789_v33  ;;  %v8069_v18 = vsel %vm38_vm2, %v24998_v23, 0.0  ;;  %v8151_v16 = vmul.f32 %v24998_v23, %v24998_v23  ;;  %v8071_v8 = vsel %vm38_vm2, %v24990_v37, 0.0 }
 0x729   :  { %v8070_v50 = vadd.f32 %v8069_v18, %v8068_v4  ;;  %v8265_v21 = vadd.f32 %v8264_v13, %v8263_v1  ;;  %v25007_v27 = vmax.f32 %v20066_v5, 0.0  ;;  %v8268_v25 = vsel %vm38_vm2, %v8152_v36, 0.0 }
 0x72a   :  { %v25009_v10 = vmax.f32 %v20067_v48, 0.0  ;;  %v18692_v59 = vpop.f32.mrb[88].mxu1  ;;  %v8266_v12 = vsel %vm38_vm2, %v8151_v16, 0.0 }
 0x72b   :  { %27989 = vst [vmem:[#allocation27_spill] sm:$0xff] %v25007_v27  ;;  %v20068_v2 = vadd.f32 %v18692_v59, %v24543_v15  ;;  %v7799_v32 = vpop.f32.mrb[89].mxu1  ;;  %v8267_v33 = vadd.f32 %v8266_v12, %v8265_v21  ;;  %v8154_v4 = vmul.f32 %v25007_v27, %v25007_v27  ;;  %v8072_v1 = vadd.f32 %v8071_v8, %v8070_v50 }
 0x72c   :  { %27990 = vst [vmem:[#allocation4_spill] sm:$0xff] %v25009_v10  ;;  %v8073_v5 = vsel %vm38_vm2, %v25009_v10, 0.0  ;;  %v8153_v48 = vmul.f32 %v25009_v10, %v25009_v10  ;;  %v20069_v18 = vadd.f32 %v24543_v15, %v7799_v32  ;;  %v8075_v36 = vsel %vm38_vm2, %v25007_v27, 0.0 }
 0x72d   :  { %v25022_v13 = vmax.f32 %v20068_v2, 0.0  ;;  %v8074_v16 = vadd.f32 %v8073_v5, %v8072_v1  ;;  %v8269_v59 = vadd.f32 %v8268_v25, %v8267_v33  ;;  %v8272_v25 = vsel %vm38_vm2, %v8154_v4, 0.0 }
 0x72e   :  { %v18695_v37 = vpop.f32.mrb[90].mxu1  ;;  %v8270_v21 = vsel %vm38_vm2, %v8153_v48, 0.0  ;;  %v25030_v8 = vmax.f32 %v20069_v18, 0.0 }
 0x72f   :  { %27991 = vst [vmem:[#allocation6_spill] sm:$0xff] %v25022_v13  ;;  %v8156_v50 = vmul.f32 %v25022_v13, %v25022_v13  ;;  %v7809_v12 = vpop.f32.mrb[91].mxu1  ;;  %v8271_v23 = vadd.f32 %v8270_v21, %v8269_v59  ;;  %v8076_v10 = vadd.f32 %v8075_v36, %v8074_v16  ;;  %v20070_v2 = vadd.f32 %v18695_v37, %v24543_v15 }
 0x730   :  { %27992 = vst [vmem:[#allocation5_spill] sm:$0xff] %v25030_v8  ;;  %v20071_v32 = vadd.f32 %v24543_v15, %v7809_v12  ;;  %v8077_v33 = vsel %vm38_vm2, %v25030_v8, 0.0  ;;  %v8155_v1 = vmul.f32 %v25030_v8, %v25030_v8  ;;  %v8079_v37 = vsel %vm38_vm2, %v25022_v13, 0.0 }
 0x731   :  { %v8078_v5 = vadd.f32 %v8077_v33, %v8076_v10  ;;  %v8273_v48 = vadd.f32 %v8272_v25, %v8271_v23  ;;  %v25039_v27 = vmax.f32 %v20070_v2, 0.0  ;;  %v8276_v21 = vsel %vm38_vm2, %v8156_v50, 0.0 }
 0x732   :  { %v25041_v18 = vmax.f32 %v20071_v32, 0.0  ;;  %v18698_v59 = vpop.f32.mrb[92].mxu1  ;;  %v8274_v16 = vsel %vm38_vm2, %v8155_v1, 0.0 }
 0x733   :  { %27993 = vst [vmem:[#allocation8_spill] sm:$0xff] %v25039_v27  ;;  %v20072_v4 = vadd.f32 %v18698_v59, %v24543_v15  ;;  %v7819_v36 = vpop.f32.mrb[93].mxu1  ;;  %v8275_v12 = vadd.f32 %v8274_v16, %v8273_v48  ;;  %v8158_v10 = vmul.f32 %v25039_v27, %v25039_v27  ;;  %v8080_v23 = vadd.f32 %v8079_v37, %v8078_v5 }
 0x734   :  { %27994 = vst [vmem:[#allocation7_spill] sm:$0xff] %v25041_v18  ;;  %v8081_v2 = vsel %vm38_vm2, %v25041_v18, 0.0  ;;  %v8157_v32 = vmul.f32 %v25041_v18, %v25041_v18  ;;  %v20073_v33 = vadd.f32 %v24543_v15, %v7819_v36  ;;  %v8083_v50 = vsel %vm38_vm2, %v25039_v27, 0.0 }
 0x735   :  { %v25054_v25 = vmax.f32 %v20072_v4, 0.0  ;;  %v8082_v1 = vadd.f32 %v8081_v2, %v8080_v23  ;;  %v8277_v59 = vadd.f32 %v8276_v21, %v8275_v12  ;;  %v21170_v4 = vld [vmem:[%s27358_s6] ss:$0 sm:$0xff]  ;;  %v8280_v15 = vsel %vm38_vm2, %v8158_v10, 0.0 }
 0x736   :  { %v18701_v13 = vpop.f32.mrb[94].mxu1  ;;  %v8278_v48 = vsel %vm38_vm2, %v8157_v32, 0.0  ;;  %v25060_v16 = vmax.f32 %v20073_v33, 0.0  ;;  %v9298_v23 = vld [vmem:[%s27359_s9 + $0x60] sm:$0xff] }
 0x737   :  { %27995 = vst [vmem:[#allocation10_spill] sm:$0xff] %v25054_v25  ;;  %v7829_v5 = vpop.f32.mrb[95].mxu1  ;;  %v8279_v37 = vadd.f32 %v8278_v48, %v8277_v59  ;;  %v8084_v8 = vadd.f32 %v8083_v50, %v8082_v1  ;;  %v20074_v18 = vadd.f32 %v21170_v4, %v18701_v13  ;;  %v8160_v36 = vmul.f32 %v25054_v25, %v25054_v25  ;;  %v9299_v13 = vld [vmem:[%s27359_s9 + $0x68] sm:$0xff] }
 0x738   :  { %27996 = vst [vmem:[#allocation9_spill] sm:$0xff] %v25060_v16  ;;  %v20075_v46 = vadd.f32 %v21170_v4, %v7829_v5  ;;  %v8085_v21 = vsel %vm38_vm2, %v25060_v16, 0.0  ;;  %v8159_v12 = vmul.f32 %v25060_v16, %v25060_v16  ;;  %v8087_v1 = vsel %vm38_vm2, %v25054_v25, 0.0 }
 0x739   :  { %v8086_v2 = vadd.f32 %v8085_v21, %v8084_v8  ;;  %v8281_v32 = vadd.f32 %v8280_v15, %v8279_v37  ;;  %v25078_v10 = vmax.f32 %v20074_v18, 0.0  ;;  %v19886_v50 = vpack.c.bf16 %v9299_v13, %v9298_v23 }
 0x73a   :  { %v7964_v33 = vmax.f32 %v20075_v46, 0.0  ;;  %v8282_v59 = vsel %vm38_vm2, %v8159_v12, 0.0  ;;  %v8284_v4 = vsel %vm38_vm2, %v8160_v36, 0.0 }
 0x73b   :  { %27997 = vst [vmem:[#allocation12_spill] sm:$0xff] %v25078_v10  ;;  %v8283_v48 = vadd.f32 %v8282_v59, %v8281_v32  ;;  %v8088_v5 = vadd.f32 %v8087_v1, %v8086_v2  ;;  %v8162_v16 = vmul.f32 %v25078_v10, %v25078_v10  ;;  %19887 = vmatprep.subr.bf16.mxu0 %v19886_v50  ;;  %v8091_v46 = vsel %vm38_vm2, %v25078_v10, 0.0 }
 0x73c   :  { %v8089_v27 = vsel %vm38_vm2, %v7964_v33, 0.0  ;;  %v8161_v8 = vmul.f32 %v7964_v33, %v7964_v33  ;;  %19889 = vmatpush3.bf16.msra.mxu0 %v19886_v50 }
 0x73d   :  { %v8090_v18 = vadd.f32 %v8089_v27, %v8088_v5  ;;  %v8285_v37 = vadd.f32 %v8284_v4, %v8283_v48  ;;  %v8288_v23 = vsel %vm38_vm2, %v8162_v16, 0.0  ;;  %v9300_v16 = vld [vmem:[%s27359_s9 + $0x70] sm:$0xff] }
 0x73e   :  { %v8286_v15 = vsel %vm38_vm2, %v8161_v8, 0.0 }
 0x73f   :  { %v8092_v21 = vadd.f32 %v8091_v46, %v8090_v18  ;;  %v8287_v12 = vadd.f32 %v8286_v15, %v8285_v37  ;;  %v9301_v46 = vld [vmem:[%s27359_s9 + $0x78] sm:$0xff] }
 0x740   :  { %v19890_v15 = vpack.c.bf16 %v9301_v46, %v9300_v16  ;;  %v28004_v16 = vld [vmem:[#allocation17_spill] sm:$0xff] }
 0x741   :  { %v8093_v36 = vrot.slane %v8092_v21, 4  ;;  %v8289_v13 = vadd.f32 %v8288_v23, %v8287_v12  ;;  %v27998_v23 = vld [vmem:[#allocation28_spill] sm:$0xff] }
 0x742   :  { %19891 = vmatprep.subr.bf16.mxu0 %v19890_v15 }
 0x743   :  { %v8094_v2 = vadd.f32 %v8093_v36, %v8092_v21  ;;  %v8290_v32 = vrot.slane %v8289_v13, 4  ;;  %19893 = vmatpush3.bf16.msra.mxu0 %v19890_v15  ;;  %v28005_v15 = vld [vmem:[#allocation18_spill] sm:$0xff] }
 0x745   :  { %v8095_v1 = vrot.slane %v8094_v2, 2  ;;  %v8291_v59 = vadd.f32 %v8290_v32, %v8289_v13 }
 0x747   :  { %v8096_v25 = vadd.f32 %v8095_v1, %v8094_v2  ;;  %v8292_v44 = vrot.slane %v8291_v59, 2 }
 0x749   :  { %v8097_v27 = vrot.slane %v8096_v25, 1  ;;  %v8293_v48 = vadd.f32 %v8292_v44, %v8291_v59  ;;  %v8302_v44 = vld [vmem:[%s27360_s7] sm:$0x1] }
 0x74b   :  { %v8098_v50 = vadd.f32 %v8097_v27, %v8096_v25  ;;  %v8294_v5 = vrot.slane %v8293_v48, 1 }
 0x74d   :  { %v8295_v4 = vadd.f32 %v8294_v5, %v8293_v48  ;;  %v8296_v10 = vmul.f32 0.001953125, %v8098_v50  ;;  %v27999_v50 = vld [vmem:[#allocation11_spill] sm:$0xff]  ;;  %v28000_v5 = vld [vmem:[#allocation14_spill] sm:$0xff] }
 0x74f   :  { %v8297_v31 = vmul.f32 0.001953125, %v8295_v4  ;;  %v8298_v8 = vmul.f32 %v8296_v10, %v8296_v10  ;;  %v28001_v4 = vld [vmem:[#allocation13_spill] sm:$0xff] }
 0x751   :  { %v8299_v18 = vsub.f32 %v8297_v31, %v8298_v8  ;;  %v8304_v31 = vld [vmem:[%s27361_s8] sm:$0x1]  ;;  %v28002_v8 = vld [vmem:[#allocation15_spill] sm:$0xff] }
 0x753   :  { %v8300_v37 = vadd.f32 1e-05, %v8299_v18 }
 0x755   :  { %21167 = vrsqrt.f32 %v8300_v37  ;;  %v28003_v37 = vld [vmem:[#allocation16_spill] sm:$0xff] }
 0x75f   :  { %v21168_v25 = vpop.eup %21167 }
 0x760   :  { %v8303_v21 = vmul.f32 %v21168_v25, %v8302_v44  ;;  %v28006_v44 = vld [vmem:[#allocation19_spill] sm:$0xff] }
 0x762   :  { %v8305_v12 = vmul.f32 %v8303_v21, %v8296_v10  ;;  %v25104_v36 = vrot.slane %v8303_v21, %v27998_v23  ;;  %v28007_v21 = vld [vmem:[#allocation20_spill] sm:$0xff] }
 0x764   :  { %v8306_v13 = vsub.f32 %v8304_v31, %v8305_v12  ;;  %v8373_v2 = vmul.f32 %v25104_v36, %v7964_v33  ;;  %v25109_v32 = vmul.f32 %v25104_v36, %v24549_v62  ;;  %v25113_v1 = vmul.f32 %v25104_v36, %v24547_v3  ;;  %v28008_v12 = vld [vmem:[#allocation23_spill] sm:$0xff] }
 0x765   :  { %v25117_v59 = vmul.f32 %v25104_v36, %v24565_v56  ;;  %v25121_v10 = vmul.f32 %v25104_v36, %v24561_v28  ;;  %v25125_v27 = vmul.f32 %v25104_v36, %v24580_v41  ;;  %v25129_v62 = vmul.f32 %v25104_v36, %v24575_v11 }
 0x766   :  { %v25132_v33 = vrot.slane %v8306_v13, %v27998_v23  ;;  %v25136_v3 = vmul.f32 %v25104_v36, %v24596_v63  ;;  %v25140_v56 = vmul.f32 %v25104_v36, %v24594_v22  ;;  %v25144_v28 = vmul.f32 %v25104_v36, %v24613_v51  ;;  %v28009_v13 = vld [vmem:[#allocation22_spill] sm:$0xff] }
 0x767   :  { %v25148_v41 = vmul.f32 %v25104_v36, %v24606_v49  ;;  %v25152_v11 = vmul.f32 %v25104_v36, %v24625_v47  ;;  %v25156_v63 = vmul.f32 %v25104_v36, %v24623_v39  ;;  %v25160_v22 = vmul.f32 %v25104_v36, %v24646_v29 }
 0x768   :  { %v8443_v48 = vadd.f32 %v25132_v33, %v8373_v2  ;;  %v25165_v51 = vmul.f32 %v25104_v36, %v24638_v57  ;;  %v25169_v49 = vmul.f32 %v25104_v36, %v24657_v52  ;;  %v25173_v47 = vmul.f32 %v25104_v36, %v24655_v24 }
 0x769   :  { %v25177_v39 = vmul.f32 %v25104_v36, %v24678_v60  ;;  %v25181_v29 = vmul.f32 %v25104_v36, %v24670_v34  ;;  %v25185_v57 = vmul.f32 %v25104_v36, %v24689_v55  ;;  %v25189_v52 = vmul.f32 %v25104_v36, %v24687_v40 }
 0x76a   :  { %8508 = vst.msk [vmem:[#allocation3 + $0x331] sm:$0xff] %vm38_vm2, %v8443_v48  ;;  %v25194_v24 = vmul.f32 %v25104_v36, %v24710_v35  ;;  %v25198_v60 = vmul.f32 %v25104_v36, %v24702_v45  ;;  %v25202_v34 = vmul.f32 %v25104_v36, %v24721_v26  ;;  %v25206_v55 = vmul.f32 %v25104_v36, %v24719_v19  ;;  %v28010_v48 = vld [vmem:[#allocation24_spill] sm:$0xff] }
 0x76b   :  { %v25210_v40 = vmul.f32 %v25104_v36, %v24742_v30  ;;  %v25214_v35 = vmul.f32 %v25104_v36, %v24734_v43  ;;  %v25218_v45 = vmul.f32 %v25104_v36, %v24753_v61  ;;  %v25222_v26 = vmul.f32 %v25104_v36, %v24751_v58 }
 0x76c   :  { %v25226_v19 = vmul.f32 %v25104_v36, %v24774_v53  ;;  %v25230_v30 = vmul.f32 %v25104_v36, %v24766_v38  ;;  %v25234_v43 = vmul.f32 %v25104_v36, %v24785_v42  ;;  %v25238_v61 = vmul.f32 %v25104_v36, %v24783_v6 }
 0x76d   :  { %v25242_v58 = vmul.f32 %v25104_v36, %v24806_v20  ;;  %v25246_v53 = vmul.f32 %v25104_v36, %v24798_v54  ;;  %v25250_v38 = vmul.f32 %v25104_v36, %v24817_v9  ;;  %v25254_v42 = vmul.f32 %v25104_v36, %v24815_v7 }
 0x76e   :  { %v25258_v6 = vmul.f32 %v25104_v36, %v24839_v14  ;;  %v25262_v20 = vmul.f32 %v25104_v36, %v27999_v50  ;;  %v25266_v54 = vmul.f32 %v25104_v36, %v24869_v17  ;;  %v25270_v9 = vmul.f32 %v25104_v36, %v28000_v5  ;;  %v28011_v5 = vld [vmem:[#allocation21_spill] sm:$0xff] }
 0x76f   :  { %v25274_v7 = vmul.f32 %v25104_v36, %v24895_v0  ;;  %v25278_v14 = vmul.f32 %v25104_v36, %v28001_v4  ;;  %v25282_v18 = vmul.f32 %v25104_v36, %v28002_v8  ;;  %v25286_v17 = vmul.f32 %v25104_v36, %v28003_v37  ;;  %v28013_v8 = vld [vmem:[#allocation26_spill] sm:$0xff] }
 0x770   :  { %v25290_v46 = vmul.f32 %v25104_v36, %v28004_v16  ;;  %v25294_v0 = vmul.f32 %v25104_v36, %v28005_v15  ;;  %v25298_v25 = vmul.f32 %v25104_v36, %v28006_v44  ;;  %v25302_v31 = vmul.f32 %v25104_v36, %v28007_v21  ;;  %v28015_v16 = vld [vmem:[#allocation25_spill] sm:$0xff]  ;;  %v28017_v44 = vld [vmem:[#allocation4_spill] sm:$0xff] }
 0x771   :  { %v25306_v23 = vmul.f32 %v25104_v36, %v28008_v12  ;;  %v25310_v2 = vmul.f32 %v25104_v36, %v28009_v13  ;;  %v25314_v50 = vmul.f32 %v25104_v36, %v28010_v48  ;;  %v25318_v4 = vmul.f32 %v25104_v36, %v28011_v5  ;;  %v28019_v12 = vld [vmem:[#allocation27_spill] sm:$0xff]  ;;  %v28021_v48 = vld [vmem:[#allocation5_spill] sm:$0xff] }
 0x772   :  { %v25322_v37 = vmul.f32 %v25104_v36, %v28013_v8  ;;  %v25326_v15 = vmul.f32 %v25104_v36, %v28015_v16  ;;  %v25330_v21 = vmul.f32 %v25104_v36, %v28017_v44  ;;  %v25334_v13 = vmul.f32 %v25104_v36, %v28019_v12 }
 0x773   :  { %28012 = vst [vmem:[#allocation29_spill] sm:$0xff] %v25318_v4  ;;  %v25338_v5 = vmul.f32 %v25104_v36, %v28021_v48  ;;  %v28023_v4 = vld [vmem:[#allocation6_spill] sm:$0xff] }
 0x774   :  { %28014 = vst [vmem:[#allocation30_spill] sm:$0xff] %v25322_v37  ;;  %28016 = vst [vmem:[#allocation31_spill] sm:$0xff] %v25326_v15  ;;  %v25342_v8 = vmul.f32 %v25104_v36, %v28023_v4  ;;  %v28024_v37 = vld [vmem:[#allocation7_spill] sm:$0xff]  ;;  %v28026_v15 = vld [vmem:[#allocation8_spill] sm:$0xff] }
 0x775   :  { %28018 = vst [vmem:[#allocation32_spill] sm:$0xff] %v25330_v21  ;;  %28020 = vst [vmem:[#allocation33_spill] sm:$0xff] %v25334_v13  ;;  %v25346_v16 = vmul.f32 %v25104_v36, %v28024_v37  ;;  %v25350_v44 = vmul.f32 %v25104_v36, %v28026_v15  ;;  %v28027_v21 = vld [vmem:[#allocation9_spill] sm:$0xff]  ;;  %v28028_v13 = vld [vmem:[#allocation10_spill] sm:$0xff]  ;;  %v8381_v37 = vadd.f32 %v25132_v33, %v25109_v32 }
 0x776   :  { %28022 = vst [vmem:[#allocation34_spill] sm:$0xff] %v25338_v5  ;;  %v25354_v12 = vmul.f32 %v25104_v36, %v28027_v21  ;;  %v25358_v48 = vmul.f32 %v25104_v36, %v28028_v13  ;;  %v28030_v5 = vld [vmem:[#allocation12_spill] sm:$0xff]  ;;  %v8383_v15 = vadd.f32 %v25132_v33, %v25117_v59  ;;  %v8384_v21 = vadd.f32 %v25132_v33, %v25121_v10 }
 0x777   :  { %28025 = vst [vmem:[#allocation35_spill] sm:$0xff] %v25346_v16  ;;  %v25362_v4 = vmul.f32 %v25104_v36, %v28030_v5  ;;  %v8382_v16 = vadd.f32 %v25132_v33, %v25113_v1  ;;  %v8385_v13 = vadd.f32 %v25132_v33, %v25125_v27  ;;  %v8387_v36 = vadd.f32 %v25132_v33, %v25136_v3 }
 0x778   :  { %28029 = vst [vmem:[#allocation36_spill] sm:$0xff] %v25358_v48  ;;  %v8386_v48 = vadd.f32 %v25132_v33, %v25129_v62  ;;  %v8388_v32 = vadd.f32 %v25132_v33, %v25140_v56  ;;  %v8389_v1 = vadd.f32 %v25132_v33, %v25144_v28  ;;  %8446 = vst.msk [vmem:[#allocation3 + $0x19] sm:$0xff] %vm38_vm2, %v8381_v37 }
 0x779   :  { %v8390_v59 = vadd.f32 %v25132_v33, %v25148_v41  ;;  %v8391_v10 = vadd.f32 %v25132_v33, %v25152_v11  ;;  %v8392_v27 = vadd.f32 %v25132_v33, %v25156_v63  ;;  %v8393_v62 = vadd.f32 %v25132_v33, %v25160_v22  ;;  %8447 = vst.msk [vmem:[#allocation3 + $0x21] sm:$0xff] %vm38_vm2, %v8382_v16 }
 0x77a   :  { %8448 = vst.msk [vmem:[#allocation3 + $0x31] sm:$0xff] %vm38_vm2, %v8383_v15  ;;  %8449 = vst.msk [vmem:[#allocation3 + $0x39] sm:$0xff] %vm38_vm2, %v8384_v21  ;;  %v8394_v3 = vadd.f32 %v25132_v33, %v25165_v51  ;;  %v8395_v56 = vadd.f32 %v25132_v33, %v25169_v49  ;;  %v8396_v28 = vadd.f32 %v25132_v33, %v25173_v47 }
 0x77b   :  { %8450 = vst.msk [vmem:[#allocation3 + $0x49] sm:$0xff] %vm38_vm2, %v8385_v13  ;;  %v8397_v41 = vadd.f32 %v25132_v33, %v25177_v39  ;;  %8451 = vst.msk [vmem:[#allocation3 + $0x51] sm:$0xff] %vm38_vm2, %v8386_v48  ;;  %v8398_v11 = vadd.f32 %v25132_v33, %v25181_v29  ;;  %v8399_v63 = vadd.f32 %v25132_v33, %v25185_v57  ;;  %v28032_v5 = vld [vmem:[#allocation30_spill] sm:$0xff]  ;;  %v28033_v48 = vld [vmem:[#allocation31_spill] sm:$0xff] }
 0x77c   :  { %8452 = vst.msk [vmem:[#allocation3 + $0x61] sm:$0xff] %vm38_vm2, %v8387_v36  ;;  %8453 = vst.msk [vmem:[#allocation3 + $0x69] sm:$0xff] %vm38_vm2, %v8388_v32  ;;  %v8400_v22 = vadd.f32 %v25132_v33, %v25189_v52  ;;  %v8401_v51 = vadd.f32 %v25132_v33, %v25194_v24  ;;  %v8402_v49 = vadd.f32 %v25132_v33, %v25198_v60  ;;  %v28034_v15 = vld [vmem:[#allocation32_spill] sm:$0xff]  ;;  %v28035_v13 = vld [vmem:[#allocation33_spill] sm:$0xff] }
 0x77d   :  { %8454 = vst.msk [vmem:[#allocation3 + $0x79] sm:$0xff] %vm38_vm2, %v8389_v1  ;;  %8455 = vst.msk [vmem:[#allocation3 + $0x81] sm:$0xff] %vm38_vm2, %v8390_v59  ;;  %v8403_v47 = vadd.f32 %v25132_v33, %v25202_v34  ;;  %v8404_v39 = vadd.f32 %v25132_v33, %v25206_v55  ;;  %v8405_v29 = vadd.f32 %v25132_v33, %v25210_v40  ;;  %v28036_v32 = vld [vmem:[#allocation34_spill] sm:$0xff] }
 0x77e   :  { %8456 = vst.msk [vmem:[#allocation3 + $0x91] sm:$0xff] %vm38_vm2, %v8391_v10  ;;  %8457 = vst.msk [vmem:[#allocation3 + $0x99] sm:$0xff] %vm38_vm2, %v8392_v27  ;;  %v8406_v57 = vadd.f32 %v25132_v33, %v25214_v35  ;;  %v8407_v52 = vadd.f32 %v25132_v33, %v25218_v45  ;;  %v8408_v24 = vadd.f32 %v25132_v33, %v25222_v26  ;;  %v28037_v27 = vld [vmem:[#allocation35_spill] sm:$0xff] }
 0x77f   :  { %8458 = vst.msk [vmem:[#allocation3 + $0xa9] sm:$0xff] %vm38_vm2, %v8393_v62  ;;  %8459 = vst.msk [vmem:[#allocation3 + $0xb1] sm:$0xff] %vm38_vm2, %v8394_v3  ;;  %v8409_v60 = vadd.f32 %v25132_v33, %v25226_v19  ;;  %v8410_v34 = vadd.f32 %v25132_v33, %v25230_v30  ;;  %v8411_v55 = vadd.f32 %v25132_v33, %v25234_v43  ;;  %v25467_v43 = vld [vmem:[#allocation3 + $0x18] sm:$0xff] }
 0x780   :  { %8460 = vst.msk [vmem:[#allocation3 + $0xc1] sm:$0xff] %vm38_vm2, %v8395_v56  ;;  %8461 = vst.msk [vmem:[#allocation3 + $0xc9] sm:$0xff] %vm38_vm2, %v8396_v28  ;;  %v8412_v40 = vadd.f32 %v25132_v33, %v25238_v61  ;;  %v8413_v35 = vadd.f32 %v25132_v33, %v25242_v58  ;;  %v8414_v45 = vadd.f32 %v25132_v33, %v25246_v53  ;;  %18721 = vmatprep.mubr.msk.f32.mxu0 %vm38_vm2, %v25467_v43  ;;  %v28038_v28 = vld [vmem:[#allocation36_spill] sm:$0xff] }
 0x781   :  { %8462 = vst.msk [vmem:[#allocation3 + $0xd9] sm:$0xff] %vm38_vm2, %v8397_v41  ;;  %8463 = vst.msk [vmem:[#allocation3 + $0xe1] sm:$0xff] %vm38_vm2, %v8398_v11  ;;  %v8415_v26 = vadd.f32 %v25132_v33, %v25250_v38  ;;  %v8416_v19 = vadd.f32 %v25132_v33, %v25254_v42  ;;  %v8417_v30 = vadd.f32 %v25132_v33, %v25258_v6  ;;  %v25483_v42 = vld [vmem:[#allocation3 + $0x20] sm:$0xff]  ;;  %v25545_v59 = vld [vmem:[#allocation3 + $0x38] sm:$0xff] }
 0x782   :  { %8464 = vst.msk [vmem:[#allocation3 + $0xf1] sm:$0xff] %vm38_vm2, %v8399_v63  ;;  %8465 = vst.msk [vmem:[#allocation3 + $0xf9] sm:$0xff] %vm38_vm2, %v8400_v22  ;;  %v8418_v61 = vadd.f32 %v25132_v33, %v25262_v20  ;;  %v8419_v58 = vadd.f32 %v25132_v33, %v25266_v54  ;;  %v8420_v53 = vadd.f32 %v25132_v33, %v25270_v9  ;;  %18722 = vmatmul.mubr.msk.f32.gmra.mrb[34].mxu0 %vm38_vm2, %v25483_v42 }
 0x783   :  { %8466 = vst.msk [vmem:[#allocation3 + $0x109] sm:$0xff] %vm38_vm2, %v8401_v51  ;;  %8467 = vst.msk [vmem:[#allocation3 + $0x111] sm:$0xff] %vm38_vm2, %v8402_v49  ;;  %v8421_v38 = vadd.f32 %v25132_v33, %v25274_v7  ;;  %v8422_v6 = vadd.f32 %v25132_v33, %v25278_v14  ;;  %v8423_v20 = vadd.f32 %v25132_v33, %v25282_v18  ;;  %v25499_v7 = vld [vmem:[#allocation3 + $0x30] sm:$0xff]  ;;  %v25590_v11 = vld [vmem:[#allocation3 + $0x68] sm:$0xff] }
 0x784   :  { %8468 = vst.msk [vmem:[#allocation3 + $0x121] sm:$0xff] %vm38_vm2, %v8403_v47  ;;  %8469 = vst.msk [vmem:[#allocation3 + $0x129] sm:$0xff] %vm38_vm2, %v8404_v39  ;;  %v8424_v54 = vadd.f32 %v25132_v33, %v25286_v17  ;;  %v8425_v9 = vadd.f32 %v25132_v33, %v25290_v46  ;;  %v8426_v14 = vadd.f32 %v25132_v33, %v25294_v0  ;;  %18724 = vmatprep.mubr.msk.f32.mxu0 %vm38_vm2, %v25499_v7  ;;  %v25594_v63 = vld [vmem:[#allocation3 + $0x78] sm:$0xff]  ;;  %v25598_v22 = vld [vmem:[#allocation3 + $0x80] sm:$0xff] }
 0x785   :  { %8470 = vst.msk [vmem:[#allocation3 + $0x139] sm:$0xff] %vm38_vm2, %v8405_v29  ;;  %8471 = vst.msk [vmem:[#allocation3 + $0x141] sm:$0xff] %vm38_vm2, %v8406_v57  ;;  %v8427_v18 = vadd.f32 %v25132_v33, %v25298_v25  ;;  %v8428_v17 = vadd.f32 %v25132_v33, %v25302_v31  ;;  %v8429_v46 = vadd.f32 %v25132_v33, %v25306_v23  ;;  %v28031_v31 = vld [vmem:[#allocation29_spill] sm:$0xff]  ;;  %v25602_v51 = vld [vmem:[#allocation3 + $0x90] sm:$0xff] }
 0x786   :  { %8472 = vst.msk [vmem:[#allocation3 + $0x151] sm:$0xff] %vm38_vm2, %v8407_v52  ;;  %8473 = vst.msk [vmem:[#allocation3 + $0x159] sm:$0xff] %vm38_vm2, %v8408_v24  ;;  %v8430_v0 = vadd.f32 %v25132_v33, %v25310_v2  ;;  %v8431_v25 = vadd.f32 %v25132_v33, %v25314_v50  ;;  %v8432_v23 = vadd.f32 %v25132_v33, %v28031_v31  ;;  %v10007_v2 = vld [vmem:[%s27359_s9 + $0x80] sm:$0xff]  ;;  %v10008_v50 = vld [vmem:[%s27359_s9 + $0x88] sm:$0xff]  ;;  %18725 = vmatmul.mubr.msk.f32.gmra.mrb[36].mxu0 %vm38_vm2, %v25545_v59 }
 0x787   :  { %8474 = vst.msk [vmem:[#allocation3 + $0x169] sm:$0xff] %vm38_vm2, %v8409_v60  ;;  %8475 = vst.msk [vmem:[#allocation3 + $0x171] sm:$0xff] %vm38_vm2, %v8410_v34  ;;  %v8433_v16 = vadd.f32 %v25132_v33, %v28032_v5  ;;  %v8434_v37 = vadd.f32 %v25132_v33, %v28033_v48  ;;  %v8435_v21 = vadd.f32 %v25132_v33, %v28034_v15  ;;  %v25606_v49 = vld [vmem:[#allocation3 + $0x98] sm:$0xff]  ;;  %v25610_v47 = vld [vmem:[#allocation3 + $0xa8] sm:$0xff] }
 0x788   :  { %8476 = vst.msk [vmem:[#allocation3 + $0x181] sm:$0xff] %vm38_vm2, %v8411_v55  ;;  %8477 = vst.msk [vmem:[#allocation3 + $0x189] sm:$0xff] %vm38_vm2, %v8412_v40  ;;  %v8436_v36 = vadd.f32 %v25132_v33, %v28035_v13  ;;  %v8437_v1 = vadd.f32 %v25132_v33, %v28036_v32  ;;  %v8438_v10 = vadd.f32 %v25132_v33, %v25342_v8  ;;  %v25561_v8 = vld [vmem:[#allocation3 + $0x48] sm:$0xff]  ;;  %v25614_v39 = vld [vmem:[#allocation3 + $0xb0] sm:$0xff] }
 0x789   :  { %8478 = vst.msk [vmem:[#allocation3 + $0x1c9] sm:$0xff] %vm38_vm2, %v8413_v35  ;;  %8479 = vst.msk [vmem:[#allocation3 + $0x1d1] sm:$0xff] %vm38_vm2, %v8414_v45  ;;  %v8439_v62 = vadd.f32 %v25132_v33, %v28037_v27  ;;  %v8440_v3 = vadd.f32 %v25132_v33, %v25350_v44  ;;  %v8441_v56 = vadd.f32 %v25132_v33, %v25354_v12  ;;  %18727 = vmatprep.mubr.msk.f32.mxu0 %vm38_vm2, %v25561_v8  ;;  %v25618_v29 = vld [vmem:[#allocation3 + $0xc0] sm:$0xff]  ;;  %v25622_v57 = vld [vmem:[#allocation3 + $0xc8] sm:$0xff] }
 0x78a   :  { %8480 = vst.msk [vmem:[#allocation3 + $0x1e1] sm:$0xff] %vm38_vm2, %v8415_v26  ;;  %8481 = vst.msk [vmem:[#allocation3 + $0x1e9] sm:$0xff] %vm38_vm2, %v8416_v19  ;;  %v8442_v41 = vadd.f32 %v25132_v33, %v28038_v28  ;;  %v8444_v44 = vadd.f32 %v25132_v33, %v25362_v4  ;;  %v25573_v12 = vpack.c.bf16 %v10008_v50, %v10007_v2  ;;  %v25581_v33 = vld [vmem:[#allocation3 + $0x50] sm:$0xff]  ;;  %v25586_v4 = vld [vmem:[#allocation3 + $0x60] sm:$0xff] }
 0x78b   :  { %8482 = vst.msk [vmem:[#allocation3 + $0x1f9] sm:$0xff] %vm38_vm2, %v8417_v30  ;;  %8483 = vst.msk [vmem:[#allocation3 + $0x201] sm:$0xff] %vm38_vm2, %v8418_v61  ;;  %18728 = vmatmul.mubr.msk.f32.gmra.mrb[38].mxu0 %vm38_vm2, %v25581_v33  ;;  %v25626_v52 = vld [vmem:[#allocation3 + $0xd8] sm:$0xff]  ;;  %v25630_v24 = vld [vmem:[#allocation3 + $0xe0] sm:$0xff] }
 0x78c   :  { %8484 = vst.msk [vmem:[#allocation3 + $0x211] sm:$0xff] %vm38_vm2, %v8419_v58  ;;  %8485 = vst.msk [vmem:[#allocation3 + $0x219] sm:$0xff] %vm38_vm2, %v8420_v53  ;;  %19895 = vmatprep.subr.bf16.mxu0 %v25573_v12  ;;  %18730 = vmatprep.mubr.msk.f32.mxu0 %vm38_vm2, %v25586_v4  ;;  %v25634_v60 = vld [vmem:[#allocation3 + $0xf0] sm:$0xff]  ;;  %v25638_v34 = vld [vmem:[#allocation3 + $0xf8] sm:$0xff] }
 0x78d   :  { %8486 = vst.msk [vmem:[#allocation3 + $0x229] sm:$0xff] %vm38_vm2, %v8421_v38  ;;  %8487 = vst.msk [vmem:[#allocation3 + $0x231] sm:$0xff] %vm38_vm2, %v8422_v6  ;;  %v25642_v55 = vld [vmem:[#allocation3 + $0x108] sm:$0xff]  ;;  %v25646_v40 = vld [vmem:[#allocation3 + $0x110] sm:$0xff] }
 0x78e   :  { %8488 = vst.msk [vmem:[#allocation3 + $0x241] sm:$0xff] %vm38_vm2, %v8423_v20  ;;  %8489 = vst.msk [vmem:[#allocation3 + $0x249] sm:$0xff] %vm38_vm2, %v8424_v54  ;;  %v25650_v35 = vld [vmem:[#allocation3 + $0x120] sm:$0xff]  ;;  %v25654_v45 = vld [vmem:[#allocation3 + $0x128] sm:$0xff] }
 0x78f   :  { %8490 = vst.msk [vmem:[#allocation3 + $0x259] sm:$0xff] %vm38_vm2, %v8425_v9  ;;  %8491 = vst.msk [vmem:[#allocation3 + $0x261] sm:$0xff] %vm38_vm2, %v8426_v14  ;;  %18731 = vmatmul.mubr.msk.f32.gmra.mrb[40].mxu0 %vm38_vm2, %v25590_v11  ;;  %v25658_v26 = vld [vmem:[#allocation3 + $0x138] sm:$0xff]  ;;  %v25662_v19 = vld [vmem:[#allocation3 + $0x140] sm:$0xff] }
 0x790   :  { %8492 = vst.msk [vmem:[#allocation3 + $0x271] sm:$0xff] %vm38_vm2, %v8427_v18  ;;  %8493 = vst.msk [vmem:[#allocation3 + $0x279] sm:$0xff] %vm38_vm2, %v8428_v17  ;;  %18733 = vmatprep.mubr.msk.f32.mxu0 %vm38_vm2, %v25594_v63  ;;  %v25666_v30 = vld [vmem:[#allocation3 + $0x150] sm:$0xff]  ;;  %v25670_v61 = vld [vmem:[#allocation3 + $0x158] sm:$0xff] }
 0x791   :  { %8494 = vst.msk [vmem:[#allocation3 + $0x289] sm:$0xff] %vm38_vm2, %v8429_v46  ;;  %8495 = vst.msk [vmem:[#allocation3 + $0x291] sm:$0xff] %vm38_vm2, %v8430_v0  ;;  %v25674_v58 = vld [vmem:[#allocation3 + $0x168] sm:$0xff]  ;;  %v8549_v53 = vld [vmem:[#allocation3 + $0x1b0] sm:$0xff] }
 0x792   :  { %8496 = vst.msk [vmem:[#allocation3 + $0x2a1] sm:$0xff] %vm38_vm2, %v8431_v25  ;;  %8497 = vst.msk [vmem:[#allocation3 + $0x2a9] sm:$0xff] %vm38_vm2, %v8432_v23  ;;  %v25678_v38 = vld [vmem:[#allocation3 + $0x170] sm:$0xff]  ;;  %v8550_v6 = vld [vmem:[#allocation3 + $0x1b8] sm:$0xff] }
 0x793   :  { %8498 = vst.msk [vmem:[#allocation3 + $0x2b9] sm:$0xff] %vm38_vm2, %v8433_v16  ;;  %8499 = vst.msk [vmem:[#allocation3 + $0x2c1] sm:$0xff] %vm38_vm2, %v8434_v37  ;;  %18734 = vmatmul.mubr.msk.f32.gmra.mrb[42].mxu0 %vm38_vm2, %v25598_v22  ;;  %v25684_v20 = vld [vmem:[#allocation3 + $0x1c8] sm:$0xff]  ;;  %v25688_v54 = vld [vmem:[#allocation3 + $0x1d0] sm:$0xff] }
 0x794   :  { %8500 = vst.msk [vmem:[#allocation3 + $0x2d1] sm:$0xff] %vm38_vm2, %v8435_v21  ;;  %8501 = vst.msk [vmem:[#allocation3 + $0x2d9] sm:$0xff] %vm38_vm2, %v8436_v36  ;;  %18736 = vmatprep.mubr.msk.f32.mxu0 %vm38_vm2, %v25602_v51  ;;  %v25692_v9 = vld [vmem:[#allocation3 + $0x1e0] sm:$0xff]  ;;  %v25696_v14 = vld [vmem:[#allocation3 + $0x1e8] sm:$0xff] }
 0x795   :  { %8502 = vst.msk [vmem:[#allocation3 + $0x2e9] sm:$0xff] %vm38_vm2, %v8437_v1  ;;  %8503 = vst.msk [vmem:[#allocation3 + $0x2f1] sm:$0xff] %vm38_vm2, %v8438_v10  ;;  %v25700_v18 = vld [vmem:[#allocation3 + $0x1f8] sm:$0xff]  ;;  %v25704_v17 = vld [vmem:[#allocation3 + $0x200] sm:$0xff] }
 0x796   :  { %8504 = vst.msk [vmem:[#allocation3 + $0x301] sm:$0xff] %vm38_vm2, %v8439_v62  ;;  %8505 = vst.msk [vmem:[#allocation3 + $0x309] sm:$0xff] %vm38_vm2, %v8440_v3  ;;  %v25708_v46 = vld [vmem:[#allocation3 + $0x210] sm:$0xff]  ;;  %v25712_v0 = vld [vmem:[#allocation3 + $0x218] sm:$0xff] }
 0x797   :  { %8506 = vst.msk [vmem:[#allocation3 + $0x319] sm:$0xff] %vm38_vm2, %v8441_v56  ;;  %8507 = vst.msk [vmem:[#allocation3 + $0x321] sm:$0xff] %vm38_vm2, %v8442_v41  ;;  %18737 = vmatmul.mubr.msk.f32.gmra.mrb[44].mxu0 %vm38_vm2, %v25606_v49  ;;  %v25716_v25 = vld [vmem:[#allocation3 + $0x228] sm:$0xff]  ;;  %v25720_v31 = vld [vmem:[#allocation3 + $0x230] sm:$0xff] }
 0x798   :  { %8509 = vst.msk [vmem:[#allocation3 + $0x339] sm:$0xff] %vm38_vm2, %v8444_v44  ;;  %18739 = vmatprep.mubr.msk.f32.mxu0 %vm38_vm2, %v25610_v47  ;;  %v25724_v23 = vld [vmem:[#allocation3 + $0x240] sm:$0xff]  ;;  %v25728_v5 = vld [vmem:[#allocation3 + $0x248] sm:$0xff]  ;;  %v25732_v16 = vld [vmem:[#allocation3 + $0x258] sm:$0xff] }
 0x799   :  { %v25736_v2 = vld [vmem:[#allocation3 + $0x260] sm:$0xff]  ;;  %v25740_v50 = vld [vmem:[#allocation3 + $0x270] sm:$0xff]  ;;  %v25744_v48 = vld [vmem:[#allocation3 + $0x278] sm:$0xff] }
 0x79a   :  { %v25748_v37 = vld [vmem:[#allocation3 + $0x288] sm:$0xff]  ;;  %v25752_v15 = vld [vmem:[#allocation3 + $0x290] sm:$0xff]  ;;  %v25756_v21 = vld [vmem:[#allocation3 + $0x2a0] sm:$0xff] }
 0x79b   :  { %18740 = vmatmul.mubr.msk.f32.gmra.mrb[46].mxu0 %vm38_vm2, %v25614_v39  ;;  %v25760_v13 = vld [vmem:[#allocation3 + $0x2a8] sm:$0xff]  ;;  %v25764_v36 = vld [vmem:[#allocation3 + $0x2b8] sm:$0xff]  ;;  %v25768_v32 = vld [vmem:[#allocation3 + $0x2c0] sm:$0xff] }
 0x79c   :  { %18742 = vmatprep.mubr.msk.f32.mxu0 %vm38_vm2, %v25618_v29  ;;  %v25772_v1 = vld [vmem:[#allocation3 + $0x2d0] sm:$0xff]  ;;  %v25776_v10 = vld [vmem:[#allocation3 + $0x2d8] sm:$0xff]  ;;  %v25780_v27 = vld [vmem:[#allocation3 + $0x2e8] sm:$0xff] }
 0x79d   :  { %28039 = vst [vmem:[#allocation37_spill] sm:$0xff] %v25780_v27  ;;  %v25784_v62 = vld [vmem:[#allocation3 + $0x2f0] sm:$0xff]  ;;  %v25788_v3 = vld [vmem:[#allocation3 + $0x300] sm:$0xff]  ;;  %v25792_v56 = vld [vmem:[#allocation3 + $0x308] sm:$0xff] }
 0x79e   :  { %28040 = vst [vmem:[#allocation38_spill] sm:$0xff] %v25784_v62  ;;  %28041 = vst [vmem:[#allocation39_spill] sm:$0xff] %v25788_v3  ;;  %v25796_v28 = vld [vmem:[#allocation3 + $0x318] sm:$0xff]  ;;  %v9230_v41 = vld [vmem:[#allocation3 + $0x1] sm:$0xff] }
 0x79f   :  { %18743 = vmatmul.mubr.msk.f32.gmra.mrb[48].mxu0 %vm38_vm2, %v25622_v57  ;;  %28042 = vst [vmem:[#allocation40_spill] sm:$0xff] %v25792_v56  ;;  %28043 = vst [vmem:[#allocation41_spill] sm:$0xff] %v25796_v28  ;;  %v25800_v44 = vld [vmem:[#allocation3 + $0x320] sm:$0xff] }
 0x7a0   :  { %18745 = vmatprep.mubr.msk.f32.mxu0 %vm38_vm2, %v25626_v52  ;;  %28044 = vst [vmem:[#allocation42_spill] sm:$0xff] %v25800_v44 }
 0x7a3   :  { %18746 = vmatmul.mubr.msk.f32.gmra.mrb[50].mxu0 %vm38_vm2, %v25630_v24 }
 0x7a4   :  { %18748 = vmatprep.mubr.msk.f32.mxu0 %vm38_vm2, %v25634_v60 }
 0x7a7   :  { %18749 = vmatmul.mubr.msk.f32.gmra.mrb[52].mxu0 %vm38_vm2, %v25638_v34 }
 0x7a8   :  { %18751 = vmatprep.mubr.msk.f32.mxu0 %vm38_vm2, %v25642_v55 }
 0x7ab   :  { %18752 = vmatmul.mubr.msk.f32.gmra.mrb[54].mxu0 %vm38_vm2, %v25646_v40 }
 0x7ac   :  { %18754 = vmatprep.mubr.msk.f32.mxu0 %vm38_vm2, %v25650_v35 }
 0x7af   :  { %18755 = vmatmul.mubr.msk.f32.gmra.mrb[56].mxu0 %vm38_vm2, %v25654_v45 }
 0x7b0   :  { %18757 = vmatprep.mubr.msk.f32.mxu0 %vm38_vm2, %v25658_v26 }
 0x7b3   :  { %18758 = vmatmul.mubr.msk.f32.gmra.mrb[58].mxu0 %vm38_vm2, %v25662_v19 }
 0x7b4   :  { %18760 = vmatprep.mubr.msk.f32.mxu0 %vm38_vm2, %v25666_v30 }
 0x7b7   :  { %18761 = vmatmul.mubr.msk.f32.gmra.mrb[60].mxu0 %vm38_vm2, %v25670_v61 }
 0x7b8   :  { %18763 = vmatprep.mubr.msk.f32.mxu0 %vm38_vm2, %v25674_v58 }
 0x7bb   :  { %18764 = vmatmul.mubr.msk.f32.gmra.mrb[62].mxu0 %vm38_vm2, %v25678_v38 }
 0x7bc   :  { %18766 = vmatprep.mubr.msk.f32.mxu0 %vm38_vm2, %v8549_v53  ;;  %v10009_v53 = vld [vmem:[%s27359_s9 + $0x90] sm:$0xff] }
 0x7bf   :  { %18767 = vmatmul.mubr.msk.f32.gmra.mrb[64].mxu0 %vm38_vm2, %v8550_v6  ;;  %v10010_v6 = vld [vmem:[%s27359_s9 + $0x98] sm:$0xff] }
 0x7c0   :  { %18769 = vmatprep.mubr.msk.f32.mxu0 %vm38_vm2, %v25684_v20 }
 0x7c3   :  { %18770 = vmatmul.mubr.msk.f32.gmra.mrb[66].mxu0 %vm38_vm2, %v25688_v54 }
 0x7c4   :  { %18772 = vmatprep.mubr.msk.f32.mxu0 %vm38_vm2, %v25692_v9 }
 0x7c7   :  { %18773 = vmatmul.mubr.msk.f32.gmra.mrb[68].mxu0 %vm38_vm2, %v25696_v14 }
 0x7c8   :  { %18775 = vmatprep.mubr.msk.f32.mxu0 %vm38_vm2, %v25700_v18 }
 0x7cb   :  { %18776 = vmatmul.mubr.msk.f32.gmra.mrb[70].mxu0 %vm38_vm2, %v25704_v17 }
 0x7cc   :  { %18778 = vmatprep.mubr.msk.f32.mxu0 %vm38_vm2, %v25708_v46 }
 0x7cf   :  { %18779 = vmatmul.mubr.msk.f32.gmra.mrb[72].mxu0 %vm38_vm2, %v25712_v0 }
 0x7d0   :  { %18781 = vmatprep.mubr.msk.f32.mxu0 %vm38_vm2, %v25716_v25 }
 0x7d3   :  { %18782 = vmatmul.mubr.msk.f32.gmra.mrb[74].mxu0 %vm38_vm2, %v25720_v31 }
 0x7d4   :  { %18784 = vmatprep.mubr.msk.f32.mxu0 %vm38_vm2, %v25724_v23 }
 0x7d7   :  { %18785 = vmatmul.mubr.msk.f32.gmra.mrb[76].mxu0 %vm38_vm2, %v25728_v5 }
 0x7d8   :  { %18787 = vmatprep.mubr.msk.f32.mxu0 %vm38_vm2, %v25732_v16 }
 0x7db   :  { %18788 = vmatmul.mubr.msk.f32.gmra.mrb[78].mxu0 %vm38_vm2, %v25736_v2 }
 0x7dc   :  { %18790 = vmatprep.mubr.msk.f32.mxu0 %vm38_vm2, %v25740_v50 }
 0x7df   :  { %18791 = vmatmul.mubr.msk.f32.gmra.mrb[80].mxu0 %vm38_vm2, %v25744_v48 }
 0x7e0   :  { %18793 = vmatprep.mubr.msk.f32.mxu0 %vm38_vm2, %v25748_v37 }
 0x7e3   :  { %18794 = vmatmul.mubr.msk.f32.gmra.mrb[82].mxu0 %vm38_vm2, %v25752_v15 }
 0x7e4   :  { %18796 = vmatprep.mubr.msk.f32.mxu0 %vm38_vm2, %v25756_v21 }
 0x7e7   :  { %18797 = vmatmul.mubr.msk.f32.gmra.mrb[84].mxu0 %vm38_vm2, %v25760_v13 }
 0x7e8   :  { %18799 = vmatprep.mubr.msk.f32.mxu0 %vm38_vm2, %v25764_v36 }
 0x7eb   :  { %18800 = vmatmul.mubr.msk.f32.gmra.mrb[86].mxu0 %vm38_vm2, %v25768_v32 }
 0x7ec   :  { %18802 = vmatprep.mubr.msk.f32.mxu0 %vm38_vm2, %v25772_v1 }
 0x7ef   :  { %18803 = vmatmul.mubr.msk.f32.gmra.mrb[88].mxu0 %vm38_vm2, %v25776_v10 }
 0x7f0   :  { %18805 = vmatprep.mubr.msk.f32.mxu0 %vm38_vm2, %v25780_v27  ;;  %v25818_v27 = vld [vmem:[#allocation3 + $0x19] sm:$0xff] }
 0x7f1   :  { %28045 = vst [vmem:[#allocation43_spill] sm:$0xff] %v25818_v27 }
 0x7f3   :  { %18806 = vmatmul.mubr.msk.f32.gmra.mrb[90].mxu0 %vm38_vm2, %v25784_v62  ;;  %v10012_v62 = vld [vmem:[%s27359_s9 + $0xa8] sm:$0xff] }
 0x7f4   :  { %18808 = vmatprep.mubr.msk.f32.mxu0 %vm38_vm2, %v25788_v3  ;;  %v19898_v3 = vpack.c.bf16 %v10010_v6, %v10009_v53  ;;  %v25823_v53 = vld [vmem:[#allocation3 + $0x21] sm:$0xff]  ;;  %v10013_v6 = vld [vmem:[%s27359_s9 + $0xb0] sm:$0xff] }
 0x7f5   :  { %28046 = vst [vmem:[#allocation44_spill] sm:$0xff] %v25823_v53 }
 0x7f7   :  { %18809 = vmatmul.mubr.msk.f32.gmra.mrb[92].mxu0 %vm38_vm2, %v25792_v56  ;;  %v9231_v56 = vld [vmem:[#allocation3 + $0x9] sm:$0xff] }
 0x7f8   :  { %18811 = vmatprep.mubr.msk.f32.mxu0 %vm38_vm2, %v25796_v28  ;;  %v10011_v28 = vld [vmem:[%s27359_s9 + $0xa0] sm:$0xff] }
 0x7fb   :  { %18812 = vmatmul.mubr.msk.f32.gmra.mrb[94].mxu0 %vm38_vm2, %v25800_v44  ;;  %v10014_v44 = vld [vmem:[%s27359_s9 + $0xb8] sm:$0xff] }
 0x7fc   :  { %18830 = vmatprep.mubr.msk.f32.mxu0 %vm38_vm2, %v9230_v41  ;;  %v19902_v41 = vpack.c.bf16 %v10012_v62, %v10011_v28  ;;  %v25837_v62 = vld [vmem:[#allocation3 + $0x39] sm:$0xff] }
 0x7fd   :  { %28048 = vst [vmem:[#allocation46_spill] sm:$0xff] %v25837_v62  ;;  %v10720_v28 = vld [vmem:[%s27359_s9 + $0xc0] sm:$0xff] }
 0x7ff   :  { %18831 = vmatmul.mubr.msk.f32.vlgmr.msra.gmra.mrb[32].mxu0 %vm38_vm2, %v9231_v56  ;;  %v25833_v56 = vld [vmem:[#allocation3 + $0x31] sm:$0xff] }
 0x800   :  { %19897 = vmatpush3.bf16.msra.mxu0 %v25573_v12  ;;  %18833 = vmatprep.mubr.msk.f32.mxu0 %vm38_vm2, %v25818_v27  ;;  %28047 = vst [vmem:[#allocation45_spill] sm:$0xff] %v25833_v56  ;;  %v19906_v12 = vpack.c.bf16 %v10014_v44, %v10013_v6  ;;  %v10721_v27 = vld [vmem:[%s27359_s9 + $0xc8] sm:$0xff]  ;;  %v25853_v44 = vld [vmem:[#allocation3 + $0x51] sm:$0xff] }
 0x801   :  { %19899 = vmatprep.subr.bf16.mxu0 %v19898_v3  ;;  %28050 = vst [vmem:[#allocation48_spill] sm:$0xff] %v25853_v44  ;;  %v25857_v6 = vld [vmem:[#allocation3 + $0x61] sm:$0xff] }
 0x802   :  { %28051 = vst [vmem:[#allocation49_spill] sm:$0xff] %v25857_v6 }
 0x803   :  { %18834 = vmatmul.mubr.msk.f32.gmra.mrb[34].mxu0 %vm38_vm2, %v25823_v53  ;;  %v25847_v53 = vld [vmem:[#allocation3 + $0x49] sm:$0xff] }
 0x804   :  { %18836 = vmatprep.mubr.msk.f32.mxu0 %vm38_vm2, %v25833_v56  ;;  %19901 = vmatpush3.bf16.msra.mxu0 %v19898_v3  ;;  %28049 = vst [vmem:[#allocation47_spill] sm:$0xff] %v25847_v53  ;;  %v25851_v3 = vpack.c.bf16 %v10721_v27, %v10720_v28  ;;  %v25866_v27 = vld [vmem:[#allocation3 + $0x79] sm:$0xff]  ;;  %v25874_v28 = vld [vmem:[#allocation3 + $0x91] sm:$0xff] }
 0x805   :  { %19903 = vmatprep.subr.bf16.mxu0 %v19902_v41  ;;  %28053 = vst [vmem:[#allocation51_spill] sm:$0xff] %v25866_v27  ;;  %28055 = vst [vmem:[#allocation53_spill] sm:$0xff] %v25874_v28  ;;  %v26090_v56 = vld [vmem:[#allocation3 + $0x1a] sm:$0xff] }
 0x806   :  { %28105 = vst [vmem:[#allocation103_spill] sm:$0xff] %v26090_v56 }
 0x807   :  { %18837 = vmatmul.mubr.msk.f32.gmra.mrb[36].mxu0 %vm38_vm2, %v25837_v62  ;;  %v25862_v62 = vld [vmem:[#allocation3 + $0x69] sm:$0xff] }
 0x808   :  { %18839 = vmatprep.mubr.msk.f32.mxu0 %vm38_vm2, %v25847_v53  ;;  %19905 = vmatpush3.bf16.msra.mxu0 %v19902_v41  ;;  %28052 = vst [vmem:[#allocation50_spill] sm:$0xff] %v25862_v62  ;;  %v25870_v41 = vld [vmem:[#allocation3 + $0x81] sm:$0xff] }
 0x809   :  { %19907 = vmatprep.subr.bf16.mxu0 %v19906_v12  ;;  %28054 = vst [vmem:[#allocation52_spill] sm:$0xff] %v25870_v41  ;;  %v10725_v53 = vld [vmem:[%s27359_s9 + $0xe8] sm:$0xff] }
 0x80b   :  { %18840 = vmatmul.mubr.msk.f32.gmra.mrb[38].mxu0 %vm38_vm2, %v25853_v44 }
 0x80c   :  { %18842 = vmatprep.mubr.msk.f32.mxu0 %vm38_vm2, %v25857_v6  ;;  %19909 = vmatpush3.bf16.msra.mxu0 %v19906_v12  ;;  %v25878_v12 = vld [vmem:[#allocation3 + $0x99] sm:$0xff]  ;;  %v25950_v6 = vld [vmem:[#allocation3 + $0x171] sm:$0xff] }
 0x80d   :  { %19911 = vmatprep.subr.bf16.mxu0 %v25851_v3  ;;  %28056 = vst [vmem:[#allocation54_spill] sm:$0xff] %v25878_v12  ;;  %28074 = vst [vmem:[#allocation72_spill] sm:$0xff] %v25950_v6 }
 0x80f   :  { %18843 = vmatmul.mubr.msk.f32.gmra.mrb[40].mxu0 %vm38_vm2, %v25862_v62  ;;  %v25882_v62 = vld [vmem:[#allocation3 + $0xa9] sm:$0xff] }
 0x810   :  { %18845 = vmatprep.mubr.msk.f32.mxu0 %vm38_vm2, %v25866_v27  ;;  %28057 = vst [vmem:[#allocation55_spill] sm:$0xff] %v25882_v62  ;;  %v25886_v27 = vld [vmem:[#allocation3 + $0xb1] sm:$0xff] }
 0x811   :  { %28058 = vst [vmem:[#allocation56_spill] sm:$0xff] %v25886_v27 }
 0x813   :  { %18846 = vmatmul.mubr.msk.f32.gmra.mrb[42].mxu0 %vm38_vm2, %v25870_v41  ;;  %v25890_v41 = vld [vmem:[#allocation3 + $0xc1] sm:$0xff] }
 0x814   :  { %18848 = vmatprep.mubr.msk.f32.mxu0 %vm38_vm2, %v25874_v28  ;;  %28059 = vst [vmem:[#allocation57_spill] sm:$0xff] %v25890_v41  ;;  %v25894_v28 = vld [vmem:[#allocation3 + $0xc9] sm:$0xff] }
 0x815   :  { %28060 = vst [vmem:[#allocation58_spill] sm:$0xff] %v25894_v28 }
 0x817   :  { %18849 = vmatmul.mubr.msk.f32.gmra.mrb[44].mxu0 %vm38_vm2, %v25878_v12  ;;  %v25898_v12 = vld [vmem:[#allocation3 + $0xd9] sm:$0xff] }
 0x818   :  { %18851 = vmatprep.mubr.msk.f32.mxu0 %vm38_vm2, %v25882_v62  ;;  %28061 = vst [vmem:[#allocation59_spill] sm:$0xff] %v25898_v12  ;;  %v25902_v62 = vld [vmem:[#allocation3 + $0xe1] sm:$0xff] }
 0x819   :  { %28062 = vst [vmem:[#allocation60_spill] sm:$0xff] %v25902_v62 }
 0x81b   :  { %18852 = vmatmul.mubr.msk.f32.gmra.mrb[46].mxu0 %vm38_vm2, %v25886_v27  ;;  %v25906_v27 = vld [vmem:[#allocation3 + $0xf1] sm:$0xff] }
 0x81c   :  { %18854 = vmatprep.mubr.msk.f32.mxu0 %vm38_vm2, %v25890_v41  ;;  %28063 = vst [vmem:[#allocation61_spill] sm:$0xff] %v25906_v27  ;;  %v25910_v41 = vld [vmem:[#allocation3 + $0xf9] sm:$0xff] }
 0x81d   :  { %28064 = vst [vmem:[#allocation62_spill] sm:$0xff] %v25910_v41 }
 0x81f   :  { %18855 = vmatmul.mubr.msk.f32.gmra.mrb[48].mxu0 %vm38_vm2, %v25894_v28  ;;  %v25914_v28 = vld [vmem:[#allocation3 + $0x109] sm:$0xff] }
 0x820   :  { %18857 = vmatprep.mubr.msk.f32.mxu0 %vm38_vm2, %v25898_v12  ;;  %28065 = vst [vmem:[#allocation63_spill] sm:$0xff] %v25914_v28  ;;  %v25918_v12 = vld [vmem:[#allocation3 + $0x111] sm:$0xff] }
 0x821   :  { %28066 = vst [vmem:[#allocation64_spill] sm:$0xff] %v25918_v12 }
 0x823   :  { %18858 = vmatmul.mubr.msk.f32.gmra.mrb[50].mxu0 %vm38_vm2, %v25902_v62  ;;  %v25922_v62 = vld [vmem:[#allocation3 + $0x121] sm:$0xff] }
 0x824   :  { %18860 = vmatprep.mubr.msk.f32.mxu0 %vm38_vm2, %v25906_v27  ;;  %28067 = vst [vmem:[#allocation65_spill] sm:$0xff] %v25922_v62  ;;  %v25926_v27 = vld [vmem:[#allocation3 + $0x129] sm:$0xff] }
 0x825   :  { %28068 = vst [vmem:[#allocation66_spill] sm:$0xff] %v25926_v27 }
 0x827   :  { %18861 = vmatmul.mubr.msk.f32.gmra.mrb[52].mxu0 %vm38_vm2, %v25910_v41  ;;  %v25930_v41 = vld [vmem:[#allocation3 + $0x139] sm:$0xff] }
 0x828   :  { %18863 = vmatprep.mubr.msk.f32.mxu0 %vm38_vm2, %v25914_v28  ;;  %28069 = vst [vmem:[#allocation67_spill] sm:$0xff] %v25930_v41  ;;  %v25934_v28 = vld [vmem:[#allocation3 + $0x141] sm:$0xff] }
 0x829   :  { %28070 = vst [vmem:[#allocation68_spill] sm:$0xff] %v25934_v28 }
 0x82b   :  { %18864 = vmatmul.mubr.msk.f32.gmra.mrb[54].mxu0 %vm38_vm2, %v25918_v12  ;;  %v25938_v12 = vld [vmem:[#allocation3 + $0x151] sm:$0xff] }
 0x82c   :  { %18866 = vmatprep.mubr.msk.f32.mxu0 %vm38_vm2, %v25922_v62  ;;  %28071 = vst [vmem:[#allocation69_spill] sm:$0xff] %v25938_v12  ;;  %v25942_v62 = vld [vmem:[#allocation3 + $0x159] sm:$0xff] }
 0x82d   :  { %28072 = vst [vmem:[#allocation70_spill] sm:$0xff] %v25942_v62 }
 0x82f   :  { %18867 = vmatmul.mubr.msk.f32.gmra.mrb[56].mxu0 %vm38_vm2, %v25926_v27  ;;  %v25946_v27 = vld [vmem:[#allocation3 + $0x169] sm:$0xff] }
 0x830   :  { %18869 = vmatprep.mubr.msk.f32.mxu0 %vm38_vm2, %v25930_v41  ;;  %28073 = vst [vmem:[#allocation71_spill] sm:$0xff] %v25946_v27  ;;  %v9262_v41 = vld [vmem:[#allocation3 + $0x1b1] sm:$0xff] }
 0x833   :  { %18870 = vmatmul.mubr.msk.f32.gmra.mrb[58].mxu0 %vm38_vm2, %v25934_v28  ;;  %v9263_v28 = vld [vmem:[#allocation3 + $0x1b9] sm:$0xff] }
 0x834   :  { %18872 = vmatprep.mubr.msk.f32.mxu0 %vm38_vm2, %v25938_v12  ;;  %v25956_v12 = vld [vmem:[#allocation3 + $0x1c9] sm:$0xff] }
 0x835   :  { %28075 = vst [vmem:[#allocation73_spill] sm:$0xff] %v25956_v12 }
 0x837   :  { %18873 = vmatmul.mubr.msk.f32.gmra.mrb[60].mxu0 %vm38_vm2, %v25942_v62  ;;  %v25960_v62 = vld [vmem:[#allocation3 + $0x1d1] sm:$0xff] }
 0x838   :  { %18875 = vmatprep.mubr.msk.f32.mxu0 %vm38_vm2, %v25946_v27  ;;  %28076 = vst [vmem:[#allocation74_spill] sm:$0xff] %v25960_v62  ;;  %v25964_v27 = vld [vmem:[#allocation3 + $0x1e1] sm:$0xff] }
 0x839   :  { %28077 = vst [vmem:[#allocation75_spill] sm:$0xff] %v25964_v27 }
 0x83b   :  { %18876 = vmatmul.mubr.msk.f32.gmra.mrb[62].mxu0 %vm38_vm2, %v25950_v6  ;;  %v25968_v6 = vld [vmem:[#allocation3 + $0x1e9] sm:$0xff] }
 0x83c   :  { %18878 = vmatprep.mubr.msk.f32.mxu0 %vm38_vm2, %v9262_v41  ;;  %28078 = vst [vmem:[#allocation76_spill] sm:$0xff] %v25968_v6  ;;  %v25972_v41 = vld [vmem:[#allocation3 + $0x1f9] sm:$0xff] }
 0x83d   :  { %28079 = vst [vmem:[#allocation77_spill] sm:$0xff] %v25972_v41 }
 0x83f   :  { %18879 = vmatmul.mubr.msk.f32.gmra.mrb[64].mxu0 %vm38_vm2, %v9263_v28  ;;  %v25976_v28 = vld [vmem:[#allocation3 + $0x201] sm:$0xff] }
 0x840   :  { %18881 = vmatprep.mubr.msk.f32.mxu0 %vm38_vm2, %v25956_v12  ;;  %28080 = vst [vmem:[#allocation78_spill] sm:$0xff] %v25976_v28  ;;  %v26072_v12 = vld [vmem:[#allocation3 + $0x321] sm:$0xff] }
 0x841   :  { %28104 = vst [vmem:[#allocation102_spill] sm:$0xff] %v26072_v12 }
 0x843   :  { %18882 = vmatmul.mubr.msk.f32.gmra.mrb[66].mxu0 %vm38_vm2, %v25960_v62  ;;  %v25980_v62 = vld [vmem:[#allocation3 + $0x211] sm:$0xff] }
 0x844   :  { %18884 = vmatprep.mubr.msk.f32.mxu0 %vm38_vm2, %v25964_v27  ;;  %28081 = vst [vmem:[#allocation79_spill] sm:$0xff] %v25980_v62  ;;  %v25984_v27 = vld [vmem:[#allocation3 + $0x219] sm:$0xff] }
 0x845   :  { %28082 = vst [vmem:[#allocation80_spill] sm:$0xff] %v25984_v27 }
 0x847   :  { %18885 = vmatmul.mubr.msk.f32.gmra.mrb[68].mxu0 %vm38_vm2, %v25968_v6  ;;  %v25988_v6 = vld [vmem:[#allocation3 + $0x229] sm:$0xff] }
 0x848   :  { %18887 = vmatprep.mubr.msk.f32.mxu0 %vm38_vm2, %v25972_v41  ;;  %28083 = vst [vmem:[#allocation81_spill] sm:$0xff] %v25988_v6  ;;  %v25992_v41 = vld [vmem:[#allocation3 + $0x231] sm:$0xff] }
 0x849   :  { %28084 = vst [vmem:[#allocation82_spill] sm:$0xff] %v25992_v41 }
 0x84b   :  { %18888 = vmatmul.mubr.msk.f32.gmra.mrb[70].mxu0 %vm38_vm2, %v25976_v28  ;;  %v25996_v28 = vld [vmem:[#allocation3 + $0x241] sm:$0xff] }
 0x84c   :  { %18890 = vmatprep.mubr.msk.f32.mxu0 %vm38_vm2, %v25980_v62  ;;  %28085 = vst [vmem:[#allocation83_spill] sm:$0xff] %v25996_v28  ;;  %v26000_v62 = vld [vmem:[#allocation3 + $0x249] sm:$0xff] }
 0x84d   :  { %28086 = vst [vmem:[#allocation84_spill] sm:$0xff] %v26000_v62 }
 0x84f   :  { %18891 = vmatmul.mubr.msk.f32.gmra.mrb[72].mxu0 %vm38_vm2, %v25984_v27  ;;  %v26004_v27 = vld [vmem:[#allocation3 + $0x259] sm:$0xff] }
 0x850   :  { %18893 = vmatprep.mubr.msk.f32.mxu0 %vm38_vm2, %v25988_v6  ;;  %28087 = vst [vmem:[#allocation85_spill] sm:$0xff] %v26004_v27  ;;  %v26008_v6 = vld [vmem:[#allocation3 + $0x261] sm:$0xff] }
 0x851   :  { %28088 = vst [vmem:[#allocation86_spill] sm:$0xff] %v26008_v6 }
 0x853   :  { %18894 = vmatmul.mubr.msk.f32.gmra.mrb[74].mxu0 %vm38_vm2, %v25992_v41  ;;  %v26012_v41 = vld [vmem:[#allocation3 + $0x271] sm:$0xff] }
 0x854   :  { %18896 = vmatprep.mubr.msk.f32.mxu0 %vm38_vm2, %v25996_v28  ;;  %28089 = vst [vmem:[#allocation87_spill] sm:$0xff] %v26012_v41  ;;  %v26016_v28 = vld [vmem:[#allocation3 + $0x279] sm:$0xff] }
 0x855   :  { %28090 = vst [vmem:[#allocation88_spill] sm:$0xff] %v26016_v28 }
 0x857   :  { %18897 = vmatmul.mubr.msk.f32.gmra.mrb[76].mxu0 %vm38_vm2, %v26000_v62  ;;  %v26020_v62 = vld [vmem:[#allocation3 + $0x289] sm:$0xff] }
 0x858   :  { %18899 = vmatprep.mubr.msk.f32.mxu0 %vm38_vm2, %v26004_v27  ;;  %28091 = vst [vmem:[#allocation89_spill] sm:$0xff] %v26020_v62  ;;  %v26024_v27 = vld [vmem:[#allocation3 + $0x291] sm:$0xff] }
 0x859   :  { %28092 = vst [vmem:[#allocation90_spill] sm:$0xff] %v26024_v27 }
 0x85b   :  { %18900 = vmatmul.mubr.msk.f32.gmra.mrb[78].mxu0 %vm38_vm2, %v26008_v6  ;;  %v26028_v6 = vld [vmem:[#allocation3 + $0x2a1] sm:$0xff] }
 0x85c   :  { %18902 = vmatprep.mubr.msk.f32.mxu0 %vm38_vm2, %v26012_v41  ;;  %28093 = vst [vmem:[#allocation91_spill] sm:$0xff] %v26028_v6  ;;  %v26032_v41 = vld [vmem:[#allocation3 + $0x2a9] sm:$0xff] }
 0x85d   :  { %28094 = vst [vmem:[#allocation92_spill] sm:$0xff] %v26032_v41 }
 0x85f   :  { %18903 = vmatmul.mubr.msk.f32.gmra.mrb[80].mxu0 %vm38_vm2, %v26016_v28  ;;  %v26036_v28 = vld [vmem:[#allocation3 + $0x2b9] sm:$0xff] }
 0x860   :  { %18905 = vmatprep.mubr.msk.f32.mxu0 %vm38_vm2, %v26020_v62  ;;  %28095 = vst [vmem:[#allocation93_spill] sm:$0xff] %v26036_v28  ;;  %v26040_v62 = vld [vmem:[#allocation3 + $0x2c1] sm:$0xff] }
 0x861   :  { %28096 = vst [vmem:[#allocation94_spill] sm:$0xff] %v26040_v62 }
 0x863   :  { %18906 = vmatmul.mubr.msk.f32.gmra.mrb[82].mxu0 %vm38_vm2, %v26024_v27  ;;  %v26044_v27 = vld [vmem:[#allocation3 + $0x2d1] sm:$0xff] }
 0x864   :  { %18908 = vmatprep.mubr.msk.f32.mxu0 %vm38_vm2, %v26028_v6  ;;  %28097 = vst [vmem:[#allocation95_spill] sm:$0xff] %v26044_v27  ;;  %v26048_v6 = vld [vmem:[#allocation3 + $0x2d9] sm:$0xff] }
 0x865   :  { %28098 = vst [vmem:[#allocation96_spill] sm:$0xff] %v26048_v6 }
 0x867   :  { %18909 = vmatmul.mubr.msk.f32.gmra.mrb[84].mxu0 %vm38_vm2, %v26032_v41  ;;  %v26052_v41 = vld [vmem:[#allocation3 + $0x2e9] sm:$0xff] }
 0x868   :  { %18911 = vmatprep.mubr.msk.f32.mxu0 %vm38_vm2, %v26036_v28  ;;  %28099 = vst [vmem:[#allocation97_spill] sm:$0xff] %v26052_v41  ;;  %v26056_v28 = vld [vmem:[#allocation3 + $0x2f1] sm:$0xff] }
 0x869   :  { %28100 = vst [vmem:[#allocation98_spill] sm:$0xff] %v26056_v28 }
 0x86b   :  { %18912 = vmatmul.mubr.msk.f32.gmra.mrb[86].mxu0 %vm38_vm2, %v26040_v62  ;;  %v26060_v62 = vld [vmem:[#allocation3 + $0x301] sm:$0xff] }
 0x86c   :  { %18914 = vmatprep.mubr.msk.f32.mxu0 %vm38_vm2, %v26044_v27  ;;  %28101 = vst [vmem:[#allocation99_spill] sm:$0xff] %v26060_v62  ;;  %v26064_v27 = vld [vmem:[#allocation3 + $0x309] sm:$0xff] }
 0x86d   :  { %28102 = vst [vmem:[#allocation100_spill] sm:$0xff] %v26064_v27 }
 0x86f   :  { %18915 = vmatmul.mubr.msk.f32.gmra.mrb[88].mxu0 %vm38_vm2, %v26048_v6  ;;  %v26068_v6 = vld [vmem:[#allocation3 + $0x319] sm:$0xff] }
 0x870   :  { %18917 = vmatprep.mubr.msk.f32.mxu0 %vm38_vm2, %v26052_v41  ;;  %28103 = vst [vmem:[#allocation101_spill] sm:$0xff] %v26068_v6  ;;  %v9943_v41 = vld [vmem:[#allocation3 + $0x2] sm:$0xff] }
 0x873   :  { %18918 = vmatmul.mubr.msk.f32.gmra.mrb[90].mxu0 %vm38_vm2, %v26056_v28  ;;  %v10722_v28 = vld [vmem:[%s27359_s9 + $0xd0] sm:$0xff] }
 0x874   :  { %18920 = vmatprep.mubr.msk.f32.mxu0 %vm38_vm2, %v26060_v62  ;;  %v10723_v62 = vld [vmem:[%s27359_s9 + $0xd8] sm:$0xff] }
 0x875   :  { %v19914_v44 = vpack.c.bf16 %v10723_v62, %v10722_v28  ;;  %v26095_v62 = vld [vmem:[#allocation3 + $0x22] sm:$0xff]  ;;  %v10726_v28 = vld [vmem:[%s27359_s9 + $0xf0] sm:$0xff] }
 0x876   :  { %28106 = vst [vmem:[#allocation104_spill] sm:$0xff] %v26095_v62 }
 0x877   :  { %18921 = vmatmul.mubr.msk.f32.gmra.mrb[92].mxu0 %vm38_vm2, %v26064_v27  ;;  %v9944_v27 = vld [vmem:[#allocation3 + $0xa] sm:$0xff] }
 0x878   :  { %18923 = vmatprep.mubr.msk.f32.mxu0 %vm38_vm2, %v26068_v6  ;;  %v10724_v6 = vld [vmem:[%s27359_s9 + $0xe0] sm:$0xff] }
 0x87b   :  { %18924 = vmatmul.mubr.msk.f32.gmra.mrb[94].mxu0 %vm38_vm2, %v26072_v12  ;;  %v10727_v12 = vld [vmem:[%s27359_s9 + $0xf8] sm:$0xff] }
 0x87c   :  { %18942 = vmatprep.mubr.msk.f32.mxu0 %vm38_vm2, %v9943_v41  ;;  %v19918_v41 = vpack.c.bf16 %v10725_v53, %v10724_v6  ;;  %v19922_v53 = vpack.c.bf16 %v10727_v12, %v10726_v28  ;;  %v11433_v6 = vld [vmem:[%s27359_s9 + $0x100] sm:$0xff]  ;;  %v26125_v12 = vld [vmem:[#allocation3 + $0x52] sm:$0xff] }
 0x87d   :  { %v26129_v28 = vld [vmem:[#allocation3 + $0x62] sm:$0xff] }
 0x87e   :  { %28108 = vst [vmem:[#allocation106_spill] sm:$0xff] %v26129_v28 }
 0x87f   :  { %18943 = vmatmul.mubr.msk.f32.vlgmr.msra.gmra.mrb[32].mxu0 %vm38_vm2, %v9944_v27  ;;  %v26105_v27 = vld [vmem:[#allocation3 + $0x32] sm:$0xff] }
 0x880   :  { %19913 = vmatpush3.bf16.msra.mxu0 %v25851_v3  ;;  %18945 = vmatprep.mubr.msk.f32.mxu0 %vm38_vm2, %v26090_v56  ;;  %v26109_v3 = vld [vmem:[#allocation3 + $0x3a] sm:$0xff]  ;;  %v11434_v56 = vld [vmem:[%s27359_s9 + $0x108] sm:$0xff] }
 0x881   :  { %19915 = vmatprep.subr.bf16.mxu0 %v19914_v44  ;;  %28107 = vst [vmem:[#allocation105_spill] sm:$0xff] %v26109_v3 }
 0x883   :  { %18946 = vmatmul.mubr.msk.f32.gmra.mrb[34].mxu0 %vm38_vm2, %v26095_v62  ;;  %v26119_v62 = vld [vmem:[#allocation3 + $0x4a] sm:$0xff] }
 0x884   :  { %18948 = vmatprep.mubr.msk.f32.mxu0 %vm38_vm2, %v26105_v27  ;;  %19917 = vmatpush3.bf16.msra.mxu0 %v19914_v44  ;;  %v26123_v44 = vpack.c.bf16 %v11434_v56, %v11433_v6  ;;  %v26138_v56 = vld [vmem:[#allocation3 + $0x7a] sm:$0xff]  ;;  %v26146_v6 = vld [vmem:[#allocation3 + $0x92] sm:$0xff] }
 0x885   :  { %19919 = vmatprep.subr.bf16.mxu0 %v19918_v41  ;;  %28110 = vst [vmem:[#allocation108_spill] sm:$0xff] %v26138_v56  ;;  %28112 = vst [vmem:[#allocation110_spill] sm:$0xff] %v26146_v6 }
 0x887   :  { %18949 = vmatmul.mubr.msk.f32.gmra.mrb[36].mxu0 %vm38_vm2, %v26109_v3  ;;  %v26134_v3 = vld [vmem:[#allocation3 + $0x6a] sm:$0xff] }
 0x888   :  { %18951 = vmatprep.mubr.msk.f32.mxu0 %vm38_vm2, %v26119_v62  ;;  %19921 = vmatpush3.bf16.msra.mxu0 %v19918_v41  ;;  %28109 = vst [vmem:[#allocation107_spill] sm:$0xff] %v26134_v3  ;;  %v26142_v41 = vld [vmem:[#allocation3 + $0x82] sm:$0xff] }
 0x889   :  { %19923 = vmatprep.subr.bf16.mxu0 %v19922_v53  ;;  %28111 = vst [vmem:[#allocation109_spill] sm:$0xff] %v26142_v41 }
 0x88b   :  { %18952 = vmatmul.mubr.msk.f32.gmra.mrb[38].mxu0 %vm38_vm2, %v26125_v12 }
 0x88c   :  { %18954 = vmatprep.mubr.msk.f32.mxu0 %vm38_vm2, %v26129_v28  ;;  %19925 = vmatpush3.bf16.msra.mxu0 %v19922_v53  ;;  %v26150_v53 = vld [vmem:[#allocation3 + $0x9a] sm:$0xff]  ;;  %v26222_v28 = vld [vmem:[#allocation3 + $0x172] sm:$0xff] }
 0x88d   :  { %19927 = vmatprep.subr.bf16.mxu0 %v26123_v44  ;;  %28113 = vst [vmem:[#allocation111_spill] sm:$0xff] %v26150_v53  ;;  %28131 = vst [vmem:[#allocation11_spill] sm:$0xff] %v26222_v28 }
 0x88f   :  { %18955 = vmatmul.mubr.msk.f32.gmra.mrb[40].mxu0 %vm38_vm2, %v26134_v3  ;;  %v26154_v3 = vld [vmem:[#allocation3 + $0xaa] sm:$0xff] }
 0x890   :  { %18957 = vmatprep.mubr.msk.f32.mxu0 %vm38_vm2, %v26138_v56  ;;  %28114 = vst [vmem:[#allocation112_spill] sm:$0xff] %v26154_v3  ;;  %v26158_v56 = vld [vmem:[#allocation3 + $0xb2] sm:$0xff] }
 0x891   :  { %28115 = vst [vmem:[#allocation113_spill] sm:$0xff] %v26158_v56 }
 0x893   :  { %18958 = vmatmul.mubr.msk.f32.gmra.mrb[42].mxu0 %vm38_vm2, %v26142_v41  ;;  %v26162_v41 = vld [vmem:[#allocation3 + $0xc2] sm:$0xff] }
 0x894   :  { %18960 = vmatprep.mubr.msk.f32.mxu0 %vm38_vm2, %v26146_v6  ;;  %28116 = vst [vmem:[#allocation114_spill] sm:$0xff] %v26162_v41  ;;  %v26166_v6 = vld [vmem:[#allocation3 + $0xca] sm:$0xff] }
 0x895   :  { %28117 = vst [vmem:[#allocation115_spill] sm:$0xff] %v26166_v6 }
 0x897   :  { %18961 = vmatmul.mubr.msk.f32.gmra.mrb[44].mxu0 %vm38_vm2, %v26150_v53  ;;  %v26170_v53 = vld [vmem:[#allocation3 + $0xda] sm:$0xff] }
 0x898   :  { %18963 = vmatprep.mubr.msk.f32.mxu0 %vm38_vm2, %v26154_v3  ;;  %28118 = vst [vmem:[#allocation116_spill] sm:$0xff] %v26170_v53  ;;  %v26174_v3 = vld [vmem:[#allocation3 + $0xe2] sm:$0xff] }
 0x899   :  { %28119 = vst [vmem:[#allocation117_spill] sm:$0xff] %v26174_v3 }
 0x89b   :  { %18964 = vmatmul.mubr.msk.f32.gmra.mrb[46].mxu0 %vm38_vm2, %v26158_v56  ;;  %v26178_v56 = vld [vmem:[#allocation3 + $0xf2] sm:$0xff] }
 0x89c   :  { %18966 = vmatprep.mubr.msk.f32.mxu0 %vm38_vm2, %v26162_v41  ;;  %28120 = vst [vmem:[#allocation118_spill] sm:$0xff] %v26178_v56  ;;  %v26182_v41 = vld [vmem:[#allocation3 + $0xfa] sm:$0xff] }
 0x89d   :  { %28121 = vst [vmem:[#allocation119_spill] sm:$0xff] %v26182_v41 }
 0x89f   :  { %18967 = vmatmul.mubr.msk.f32.gmra.mrb[48].mxu0 %vm38_vm2, %v26166_v6  ;;  %v26186_v6 = vld [vmem:[#allocation3 + $0x10a] sm:$0xff] }
 0x8a0   :  { %18969 = vmatprep.mubr.msk.f32.mxu0 %vm38_vm2, %v26170_v53  ;;  %28122 = vst [vmem:[#allocation120_spill] sm:$0xff] %v26186_v6  ;;  %v26190_v53 = vld [vmem:[#allocation3 + $0x112] sm:$0xff] }
 0x8a1   :  { %28123 = vst [vmem:[#allocation121_spill] sm:$0xff] %v26190_v53 }
 0x8a3   :  { %18970 = vmatmul.mubr.msk.f32.gmra.mrb[50].mxu0 %vm38_vm2, %v26174_v3  ;;  %v26194_v3 = vld [vmem:[#allocation3 + $0x122] sm:$0xff] }
 0x8a4   :  { %18972 = vmatprep.mubr.msk.f32.mxu0 %vm38_vm2, %v26178_v56  ;;  %28124 = vst [vmem:[#allocation122_spill] sm:$0xff] %v26194_v3  ;;  %v26198_v56 = vld [vmem:[#allocation3 + $0x12a] sm:$0xff] }
 0x8a5   :  { %28125 = vst [vmem:[#allocation123_spill] sm:$0xff] %v26198_v56 }
 0x8a7   :  { %18973 = vmatmul.mubr.msk.f32.gmra.mrb[52].mxu0 %vm38_vm2, %v26182_v41  ;;  %v26202_v41 = vld [vmem:[#allocation3 + $0x13a] sm:$0xff] }
 0x8a8   :  { %18975 = vmatprep.mubr.msk.f32.mxu0 %vm38_vm2, %v26186_v6  ;;  %28126 = vst [vmem:[#allocation124_spill] sm:$0xff] %v26202_v41  ;;  %v26206_v6 = vld [vmem:[#allocation3 + $0x142] sm:$0xff] }
 0x8a9   :  { %28127 = vst [vmem:[#allocation125_spill] sm:$0xff] %v26206_v6 }
 0x8ab   :  { %18976 = vmatmul.mubr.msk.f32.gmra.mrb[54].mxu0 %vm38_vm2, %v26190_v53  ;;  %v26210_v53 = vld [vmem:[#allocation3 + $0x152] sm:$0xff] }
 0x8ac   :  { %18978 = vmatprep.mubr.msk.f32.mxu0 %vm38_vm2, %v26194_v3  ;;  %28128 = vst [vmem:[#allocation126_spill] sm:$0xff] %v26210_v53  ;;  %v26214_v3 = vld [vmem:[#allocation3 + $0x15a] sm:$0xff] }
 0x8ad   :  { %28129 = vst [vmem:[#allocation127_spill] sm:$0xff] %v26214_v3 }
 0x8af   :  { %18979 = vmatmul.mubr.msk.f32.gmra.mrb[56].mxu0 %vm38_vm2, %v26198_v56  ;;  %v26218_v56 = vld [vmem:[#allocation3 + $0x16a] sm:$0xff] }
 0x8b0   :  { %18981 = vmatprep.mubr.msk.f32.mxu0 %vm38_vm2, %v26202_v41  ;;  %28130 = vst [vmem:[#allocation28_spill] sm:$0xff] %v26218_v56  ;;  %v9975_v41 = vld [vmem:[#allocation3 + $0x1b2] sm:$0xff] }
 0x8b3   :  { %18982 = vmatmul.mubr.msk.f32.gmra.mrb[58].mxu0 %vm38_vm2, %v26206_v6  ;;  %v9976_v6 = vld [vmem:[#allocation3 + $0x1ba] sm:$0xff] }
 0x8b4   :  { %18984 = vmatprep.mubr.msk.f32.mxu0 %vm38_vm2, %v26210_v53  ;;  %v26228_v53 = vld [vmem:[#allocation3 + $0x1ca] sm:$0xff] }
 0x8b5   :  { %28132 = vst [vmem:[#allocation14_spill] sm:$0xff] %v26228_v53 }
 0x8b7   :  { %18985 = vmatmul.mubr.msk.f32.gmra.mrb[60].mxu0 %vm38_vm2, %v26214_v3  ;;  %v26232_v3 = vld [vmem:[#allocation3 + $0x1d2] sm:$0xff] }
 0x8b8   :  { %18987 = vmatprep.mubr.msk.f32.mxu0 %vm38_vm2, %v26218_v56  ;;  %28133 = vst [vmem:[#allocation13_spill] sm:$0xff] %v26232_v3  ;;  %v26236_v56 = vld [vmem:[#allocation3 + $0x1e2] sm:$0xff] }
 0x8b9   :  { %28134 = vst [vmem:[#allocation15_spill] sm:$0xff] %v26236_v56 }
 0x8bb   :  { %18988 = vmatmul.mubr.msk.f32.gmra.mrb[62].mxu0 %vm38_vm2, %v26222_v28  ;;  %v26240_v28 = vld [vmem:[#allocation3 + $0x1ea] sm:$0xff] }
 0x8bc   :  { %18990 = vmatprep.mubr.msk.f32.mxu0 %vm38_vm2, %v9975_v41  ;;  %28135 = vst [vmem:[#allocation16_spill] sm:$0xff] %v26240_v28  ;;  %v26244_v41 = vld [vmem:[#allocation3 + $0x1fa] sm:$0xff] }
 0x8bd   :  { %28136 = vst [vmem:[#allocation17_spill] sm:$0xff] %v26244_v41 }
 0x8bf   :  { %18991 = vmatmul.mubr.msk.f32.gmra.mrb[64].mxu0 %vm38_vm2, %v9976_v6  ;;  %v26248_v6 = vld [vmem:[#allocation3 + $0x202] sm:$0xff] }
 0x8c0   :  { %18993 = vmatprep.mubr.msk.f32.mxu0 %vm38_vm2, %v26228_v53  ;;  %28137 = vst [vmem:[#allocation18_spill] sm:$0xff] %v26248_v6  ;;  %v11438_v53 = vld [vmem:[%s27359_s9 + $0x128] sm:$0xff] }
 0x8c3   :  { %18994 = vmatmul.mubr.msk.f32.gmra.mrb[66].mxu0 %vm38_vm2, %v26232_v3  ;;  %v26252_v3 = vld [vmem:[#allocation3 + $0x212] sm:$0xff] }
 0x8c4   :  { %18996 = vmatprep.mubr.msk.f32.mxu0 %vm38_vm2, %v26236_v56  ;;  %28138 = vst [vmem:[#allocation19_spill] sm:$0xff] %v26252_v3  ;;  %v26256_v56 = vld [vmem:[#allocation3 + $0x21a] sm:$0xff] }
 0x8c5   :  { %28139 = vst [vmem:[#allocation20_spill] sm:$0xff] %v26256_v56 }
 0x8c7   :  { %18997 = vmatmul.mubr.msk.f32.gmra.mrb[68].mxu0 %vm38_vm2, %v26240_v28  ;;  %v26260_v28 = vld [vmem:[#allocation3 + $0x22a] sm:$0xff] }
 0x8c8   :  { %18999 = vmatprep.mubr.msk.f32.mxu0 %vm38_vm2, %v26244_v41  ;;  %28140 = vst [vmem:[#allocation23_spill] sm:$0xff] %v26260_v28  ;;  %v26264_v41 = vld [vmem:[#allocation3 + $0x232] sm:$0xff] }
 0x8c9   :  { %28141 = vst [vmem:[#allocation22_spill] sm:$0xff] %v26264_v41 }
 0x8cb   :  { %19000 = vmatmul.mubr.msk.f32.gmra.mrb[70].mxu0 %vm38_vm2, %v26248_v6  ;;  %v26268_v6 = vld [vmem:[#allocation3 + $0x242] sm:$0xff] }
 0x8cc   :  { %19002 = vmatprep.mubr.msk.f32.mxu0 %vm38_vm2, %v26252_v3  ;;  %28142 = vst [vmem:[#allocation24_spill] sm:$0xff] %v26268_v6  ;;  %v26272_v3 = vld [vmem:[#allocation3 + $0x24a] sm:$0xff] }
 0x8cd   :  { %28143 = vst [vmem:[#allocation21_spill] sm:$0xff] %v26272_v3 }
 0x8cf   :  { %19003 = vmatmul.mubr.msk.f32.gmra.mrb[72].mxu0 %vm38_vm2, %v26256_v56  ;;  %v26276_v56 = vld [vmem:[#allocation3 + $0x25a] sm:$0xff] }
 0x8d0   :  { %19005 = vmatprep.mubr.msk.f32.mxu0 %vm38_vm2, %v26260_v28  ;;  %28144 = vst [vmem:[#allocation26_spill] sm:$0xff] %v26276_v56  ;;  %v26280_v28 = vld [vmem:[#allocation3 + $0x262] sm:$0xff] }
 0x8d1   :  { %28145 = vst [vmem:[#allocation25_spill] sm:$0xff] %v26280_v28 }
 0x8d3   :  { %19006 = vmatmul.mubr.msk.f32.gmra.mrb[74].mxu0 %vm38_vm2, %v26264_v41  ;;  %v26284_v41 = vld [vmem:[#allocation3 + $0x272] sm:$0xff] }
 0x8d4   :  { %19008 = vmatprep.mubr.msk.f32.mxu0 %vm38_vm2, %v26268_v6  ;;  %28146 = vst [vmem:[#allocation4_spill] sm:$0xff] %v26284_v41  ;;  %v26288_v6 = vld [vmem:[#allocation3 + $0x27a] sm:$0xff] }
 0x8d5   :  { %28147 = vst [vmem:[#allocation27_spill] sm:$0xff] %v26288_v6 }
 0x8d7   :  { %19009 = vmatmul.mubr.msk.f32.gmra.mrb[76].mxu0 %vm38_vm2, %v26272_v3  ;;  %v26292_v3 = vld [vmem:[#allocation3 + $0x28a] sm:$0xff] }
 0x8d8   :  { %19011 = vmatprep.mubr.msk.f32.mxu0 %vm38_vm2, %v26276_v56  ;;  %28148 = vst [vmem:[#allocation5_spill] sm:$0xff] %v26292_v3  ;;  %v26296_v56 = vld [vmem:[#allocation3 + $0x292] sm:$0xff] }
 0x8d9   :  { %28149 = vst [vmem:[#allocation6_spill] sm:$0xff] %v26296_v56 }
 0x8db   :  { %19012 = vmatmul.mubr.msk.f32.gmra.mrb[78].mxu0 %vm38_vm2, %v26280_v28  ;;  %v26300_v28 = vld [vmem:[#allocation3 + $0x2a2] sm:$0xff] }
 0x8dc   :  { %19014 = vmatprep.mubr.msk.f32.mxu0 %vm38_vm2, %v26284_v41  ;;  %28150 = vst [vmem:[#allocation7_spill] sm:$0xff] %v26300_v28  ;;  %v26304_v41 = vld [vmem:[#allocation3 + $0x2aa] sm:$0xff] }
 0x8dd   :  { %28151 = vst [vmem:[#allocation8_spill] sm:$0xff] %v26304_v41 }
 0x8df   :  { %19015 = vmatmul.mubr.msk.f32.gmra.mrb[80].mxu0 %vm38_vm2, %v26288_v6  ;;  %v26308_v6 = vld [vmem:[#allocation3 + $0x2ba] sm:$0xff] }
 0x8e0   :  { %19017 = vmatprep.mubr.msk.f32.mxu0 %vm38_vm2, %v26292_v3  ;;  %28152 = vst [vmem:[#allocation9_spill] sm:$0xff] %v26308_v6  ;;  %v26312_v3 = vld [vmem:[#allocation3 + $0x2c2] sm:$0xff] }
 0x8e1   :  { %28153 = vst [vmem:[#allocation10_spill] sm:$0xff] %v26312_v3 }
 0x8e3   :  { %19018 = vmatmul.mubr.msk.f32.gmra.mrb[82].mxu0 %vm38_vm2, %v26296_v56  ;;  %v26316_v56 = vld [vmem:[#allocation3 + $0x2d2] sm:$0xff] }
 0x8e4   :  { %19020 = vmatprep.mubr.msk.f32.mxu0 %vm38_vm2, %v26300_v28  ;;  %28154 = vst [vmem:[#allocation12_spill] sm:$0xff] %v26316_v56  ;;  %v26320_v28 = vld [vmem:[#allocation3 + $0x2da] sm:$0xff] }
 0x8e5   :  { %28155 = vst [vmem:[#allocation29_spill] sm:$0xff] %v26320_v28 }
 0x8e7   :  { %19021 = vmatmul.mubr.msk.f32.gmra.mrb[84].mxu0 %vm38_vm2, %v26304_v41  ;;  %v26324_v41 = vld [vmem:[#allocation3 + $0x2ea] sm:$0xff] }
 0x8e8   :  { %19023 = vmatprep.mubr.msk.f32.mxu0 %vm38_vm2, %v26308_v6  ;;  %28156 = vst [vmem:[#allocation30_spill] sm:$0xff] %v26324_v41  ;;  %v26328_v6 = vld [vmem:[#allocation3 + $0x2f2] sm:$0xff] }
 0x8e9   :  { %28157 = vst [vmem:[#allocation31_spill] sm:$0xff] %v26328_v6 }
 0x8eb   :  { %19024 = vmatmul.mubr.msk.f32.gmra.mrb[86].mxu0 %vm38_vm2, %v26312_v3  ;;  %v26332_v3 = vld [vmem:[#allocation3 + $0x302] sm:$0xff] }
 0x8ec   :  { %19026 = vmatprep.mubr.msk.f32.mxu0 %vm38_vm2, %v26316_v56  ;;  %28158 = vst [vmem:[#allocation32_spill] sm:$0xff] %v26332_v3  ;;  %v26336_v56 = vld [vmem:[#allocation3 + $0x30a] sm:$0xff] }
 0x8ed   :  { %28159 = vst [vmem:[#allocation33_spill] sm:$0xff] %v26336_v56 }
 0x8ef   :  { %19027 = vmatmul.mubr.msk.f32.gmra.mrb[88].mxu0 %vm38_vm2, %v26320_v28  ;;  %v26340_v28 = vld [vmem:[#allocation3 + $0x31a] sm:$0xff] }
 0x8f0   :  { %19029 = vmatprep.mubr.msk.f32.mxu0 %vm38_vm2, %v26324_v41  ;;  %28160 = vst [vmem:[#allocation34_spill] sm:$0xff] %v26340_v28  ;;  %v26344_v41 = vld [vmem:[#allocation3 + $0x322] sm:$0xff] }
 0x8f1   :  { %28161 = vst [vmem:[#allocation35_spill] sm:$0xff] %v26344_v41 }
 0x8f3   :  { %19030 = vmatmul.mubr.msk.f32.gmra.mrb[90].mxu0 %vm38_vm2, %v26328_v6  ;;  %v11435_v6 = vld [vmem:[%s27359_s9 + $0x110] sm:$0xff] }
 0x8f4   :  { %19032 = vmatprep.mubr.msk.f32.mxu0 %vm38_vm2, %v26332_v3  ;;  %v11436_v3 = vld [vmem:[%s27359_s9 + $0x118] sm:$0xff] }
 0x8f7   :  { %19033 = vmatmul.mubr.msk.f32.gmra.mrb[92].mxu0 %vm38_vm2, %v26336_v56  ;;  %v19930_v56 = vpack.c.bf16 %v11436_v3, %v11435_v6  ;;  %v11440_v3 = vld [vmem:[%s27359_s9 + $0x138] sm:$0xff]  ;;  %v28198_v6 = vld [vmem:[#allocation73_spill] sm:$0xff] }
 0x8f8   :  { %19035 = vmatprep.mubr.msk.f32.mxu0 %vm38_vm2, %v26340_v28  ;;  %v11437_v28 = vld [vmem:[%s27359_s9 + $0x120] sm:$0xff] }
 0x8fb   :  { %19036 = vmatmul.mubr.msk.f32.gmra.mrb[94].mxu0 %vm38_vm2, %v26344_v41  ;;  %v19934_v41 = vpack.c.bf16 %v11438_v53, %v11437_v28  ;;  %v28196_v28 = vld [vmem:[#allocation71_spill] sm:$0xff]  ;;  %v26600_v53 = vld [vmem:[#allocation3 + $0x181] sm:$0xff] }
 0x8fc   :  { %19054 = vmatprep.mubr.msk.f32.mxu0 %vm38_vm2, %v25467_v43  ;;  %v11439_v43 = vld [vmem:[%s27359_s9 + $0x130] sm:$0xff] }
 0x8ff   :  { %19055 = vmatmul.mubr.msk.f32.vlgmr.msra.gmra.mrb[32].mxu0 %vm38_vm2, %v25483_v42  ;;  %v19938_v42 = vpack.c.bf16 %v11440_v3, %v11439_v43  ;;  %v28199_v43 = vld [vmem:[#allocation74_spill] sm:$0xff]  ;;  %v28200_v3 = vld [vmem:[#allocation75_spill] sm:$0xff] }
 0x900   :  { %19929 = vmatpush3.bf16.msra.mxu0 %v26123_v44  ;;  %19057 = vmatprep.mubr.msk.f32.mxu0 %vm38_vm2, %v25499_v7  ;;  %v12146_v7 = vld [vmem:[%s27359_s9 + $0x140] sm:$0xff]  ;;  %v12147_v44 = vld [vmem:[%s27359_s9 + $0x148] sm:$0xff] }
 0x901   :  { %19931 = vmatprep.subr.bf16.mxu0 %v19930_v56 }
 0x903   :  { %19058 = vmatmul.mubr.msk.f32.gmra.mrb[34].mxu0 %vm38_vm2, %v25545_v59  ;;  %v26387_v59 = vpack.c.bf16 %v12147_v44, %v12146_v7  ;;  %v28202_v7 = vld [vmem:[#allocation77_spill] sm:$0xff]  ;;  %v28203_v44 = vld [vmem:[#allocation78_spill] sm:$0xff] }
 0x904   :  { %19060 = vmatprep.mubr.msk.f32.mxu0 %vm38_vm2, %v25561_v8  ;;  %19933 = vmatpush3.bf16.msra.mxu0 %v19930_v56  ;;  %v26436_v8 = vld [vmem:[#allocation3 + $0x180] sm:$0xff] }
 0x905   :  { %19935 = vmatprep.subr.bf16.mxu0 %v19934_v41  ;;  %v28197_v56 = vld [vmem:[#allocation72_spill] sm:$0xff] }
 0x907   :  { %19061 = vmatmul.mubr.msk.f32.gmra.mrb[36].mxu0 %vm38_vm2, %v25581_v33  ;;  %v26440_v33 = vld [vmem:[#allocation3 + $0x188] sm:$0xff] }
 0x908   :  { %19063 = vmatprep.mubr.msk.f32.mxu0 %vm38_vm2, %v25586_v4  ;;  %19937 = vmatpush3.bf16.msra.mxu0 %v19934_v41  ;;  %v28162_v4 = vld [vmem:[#allocation37_spill] sm:$0xff] }
 0x909   :  { %19939 = vmatprep.subr.bf16.mxu0 %v19938_v42  ;;  %v26604_v41 = vld [vmem:[#allocation3 + $0x189] sm:$0xff] }
 0x90b   :  { %19064 = vmatmul.mubr.msk.f32.gmra.mrb[38].mxu0 %vm38_vm2, %v25590_v11  ;;  %v28163_v11 = vld [vmem:[#allocation38_spill] sm:$0xff] }
 0x90c   :  { %19066 = vmatprep.mubr.msk.f32.mxu0 %vm38_vm2, %v25594_v63  ;;  %19941 = vmatpush3.bf16.msra.mxu0 %v19938_v42  ;;  %v28164_v63 = vld [vmem:[#allocation39_spill] sm:$0xff]  ;;  %v28201_v42 = vld [vmem:[#allocation76_spill] sm:$0xff] }
 0x90d   :  { %19943 = vmatprep.subr.bf16.mxu0 %v26387_v59 }
 0x90f   :  { %19067 = vmatmul.mubr.msk.f32.gmra.mrb[40].mxu0 %vm38_vm2, %v25598_v22  ;;  %v28165_v22 = vld [vmem:[#allocation40_spill] sm:$0xff] }
 0x910   :  { %19069 = vmatprep.mubr.msk.f32.mxu0 %vm38_vm2, %v25602_v51  ;;  %v28166_v51 = vld [vmem:[#allocation41_spill] sm:$0xff] }
 0x913   :  { %19070 = vmatmul.mubr.msk.f32.gmra.mrb[42].mxu0 %vm38_vm2, %v25606_v49  ;;  %v28167_v49 = vld [vmem:[#allocation42_spill] sm:$0xff] }
 0x914   :  { %19072 = vmatprep.mubr.msk.f32.mxu0 %vm38_vm2, %v25610_v47  ;;  %v26504_v47 = vld [vmem:[#allocation3 + $0x330] sm:$0xff] }
 0x917   :  { %19073 = vmatmul.mubr.msk.f32.gmra.mrb[44].mxu0 %vm38_vm2, %v25614_v39  ;;  %v26508_v39 = vld [vmem:[#allocation3 + $0x338] sm:$0xff] }
 0x918   :  { %19075 = vmatprep.mubr.msk.f32.mxu0 %vm38_vm2, %v25618_v29  ;;  %v12148_v29 = vld [vmem:[%s27359_s9 + $0x150] sm:$0xff] }
 0x91b   :  { %19076 = vmatmul.mubr.msk.f32.gmra.mrb[46].mxu0 %vm38_vm2, %v25622_v57  ;;  %v12149_v57 = vld [vmem:[%s27359_s9 + $0x158] sm:$0xff] }
 0x91c   :  { %19078 = vmatprep.mubr.msk.f32.mxu0 %vm38_vm2, %v25626_v52  ;;  %v28168_v52 = vld [vmem:[#allocation43_spill] sm:$0xff] }
 0x91f   :  { %19079 = vmatmul.mubr.msk.f32.gmra.mrb[48].mxu0 %vm38_vm2, %v25630_v24  ;;  %v19946_v24 = vpack.c.bf16 %v12149_v57, %v12148_v29  ;;  %v28211_v29 = vld [vmem:[#allocation86_spill] sm:$0xff]  ;;  %v28212_v57 = vld [vmem:[#allocation87_spill] sm:$0xff] }
 0x920   :  { %19081 = vmatprep.mubr.msk.f32.mxu0 %vm38_vm2, %v25634_v60  ;;  %v12150_v60 = vld [vmem:[%s27359_s9 + $0x160] sm:$0xff] }
 0x923   :  { %19082 = vmatmul.mubr.msk.f32.gmra.mrb[50].mxu0 %vm38_vm2, %v25638_v34  ;;  %v12151_v34 = vld [vmem:[%s27359_s9 + $0x168] sm:$0xff] }
 0x924   :  { %19084 = vmatprep.mubr.msk.f32.mxu0 %vm38_vm2, %v25642_v55  ;;  %v28169_v55 = vld [vmem:[#allocation44_spill] sm:$0xff] }
 0x927   :  { %19085 = vmatmul.mubr.msk.f32.gmra.mrb[52].mxu0 %vm38_vm2, %v25646_v40  ;;  %v28170_v40 = vld [vmem:[#allocation45_spill] sm:$0xff] }
 0x928   :  { %19087 = vmatprep.mubr.msk.f32.mxu0 %vm38_vm2, %v25650_v35  ;;  %v19950_v35 = vpack.c.bf16 %v12151_v34, %v12150_v60  ;;  %v28215_v60 = vld [vmem:[#allocation90_spill] sm:$0xff]  ;;  %v28216_v34 = vld [vmem:[#allocation91_spill] sm:$0xff] }
 0x92b   :  { %19088 = vmatmul.mubr.msk.f32.gmra.mrb[54].mxu0 %vm38_vm2, %v25654_v45  ;;  %v12152_v45 = vld [vmem:[%s27359_s9 + $0x170] sm:$0xff] }
 0x92c   :  { %19090 = vmatprep.mubr.msk.f32.mxu0 %vm38_vm2, %v25658_v26  ;;  %v12153_v26 = vld [vmem:[%s27359_s9 + $0x178] sm:$0xff] }
 0x92f   :  { %19091 = vmatmul.mubr.msk.f32.gmra.mrb[56].mxu0 %vm38_vm2, %v25662_v19  ;;  %v28171_v19 = vld [vmem:[#allocation46_spill] sm:$0xff] }
 0x930   :  { %19093 = vmatprep.mubr.msk.f32.mxu0 %vm38_vm2, %v25666_v30  ;;  %v28172_v30 = vld [vmem:[#allocation47_spill] sm:$0xff] }
 0x933   :  { %19094 = vmatmul.mubr.msk.f32.gmra.mrb[58].mxu0 %vm38_vm2, %v25670_v61  ;;  %v19954_v61 = vpack.c.bf16 %v12153_v26, %v12152_v45  ;;  %v28220_v45 = vld [vmem:[#allocation95_spill] sm:$0xff]  ;;  %v28221_v26 = vld [vmem:[#allocation96_spill] sm:$0xff] }
 0x934   :  { %19096 = vmatprep.mubr.msk.f32.mxu0 %vm38_vm2, %v25674_v58  ;;  %v12860_v58 = vld [vmem:[%s27359_s9 + $0x180] sm:$0xff] }
 0x937   :  { %19097 = vmatmul.mubr.msk.f32.gmra.mrb[60].mxu0 %vm38_vm2, %v25678_v38  ;;  %v12861_v38 = vld [vmem:[%s27359_s9 + $0x188] sm:$0xff] }
 0x938   :  { %19099 = vmatprep.mubr.msk.f32.mxu0 %vm38_vm2, %v26436_v8 }
 0x93b   :  { %19100 = vmatmul.mubr.msk.f32.gmra.mrb[62].mxu0 %vm38_vm2, %v26440_v33 }
 0x93c   :  { %19102 = vmatprep.mubr.msk.f32.mxu0 %vm38_vm2, %v25684_v20  ;;  %v28173_v20 = vld [vmem:[#allocation48_spill] sm:$0xff] }
 0x93f   :  { %19103 = vmatmul.mubr.msk.f32.gmra.mrb[64].mxu0 %vm38_vm2, %v25688_v54  ;;  %v28174_v54 = vld [vmem:[#allocation49_spill] sm:$0xff] }
 0x940   :  { %19105 = vmatprep.mubr.msk.f32.mxu0 %vm38_vm2, %v25692_v9  ;;  %v26551_v9 = vpack.c.bf16 %v12861_v38, %v12860_v58  ;;  %v28225_v58 = vld [vmem:[#allocation100_spill] sm:$0xff]  ;;  %v28226_v38 = vld [vmem:[#allocation101_spill] sm:$0xff] }
 0x943   :  { %19106 = vmatmul.mubr.msk.f32.gmra.mrb[66].mxu0 %vm38_vm2, %v25696_v14  ;;  %v28175_v14 = vld [vmem:[#allocation50_spill] sm:$0xff] }
 0x944   :  { %19108 = vmatprep.mubr.msk.f32.mxu0 %vm38_vm2, %v25700_v18  ;;  %v28176_v18 = vld [vmem:[#allocation51_spill] sm:$0xff] }
 0x947   :  { %19109 = vmatmul.mubr.msk.f32.gmra.mrb[68].mxu0 %vm38_vm2, %v25704_v17  ;;  %v28177_v17 = vld [vmem:[#allocation52_spill] sm:$0xff] }
 0x948   :  { %19111 = vmatprep.mubr.msk.f32.mxu0 %vm38_vm2, %v25708_v46  ;;  %v28178_v46 = vld [vmem:[#allocation53_spill] sm:$0xff] }
 0x94b   :  { %19112 = vmatmul.mubr.msk.f32.gmra.mrb[70].mxu0 %vm38_vm2, %v25712_v0  ;;  %v28179_v0 = vld [vmem:[#allocation54_spill] sm:$0xff] }
 0x94c   :  { %19114 = vmatprep.mubr.msk.f32.mxu0 %vm38_vm2, %v25716_v25  ;;  %v28180_v25 = vld [vmem:[#allocation55_spill] sm:$0xff] }
 0x94f   :  { %19115 = vmatmul.mubr.msk.f32.gmra.mrb[72].mxu0 %vm38_vm2, %v25720_v31  ;;  %v28181_v31 = vld [vmem:[#allocation56_spill] sm:$0xff] }
 0x950   :  { %19117 = vmatprep.mubr.msk.f32.mxu0 %vm38_vm2, %v25724_v23  ;;  %v28182_v23 = vld [vmem:[#allocation57_spill] sm:$0xff] }
 0x953   :  { %19118 = vmatmul.mubr.msk.f32.gmra.mrb[74].mxu0 %vm38_vm2, %v25728_v5  ;;  %v28183_v5 = vld [vmem:[#allocation58_spill] sm:$0xff] }
 0x954   :  { %19120 = vmatprep.mubr.msk.f32.mxu0 %vm38_vm2, %v25732_v16  ;;  %v28184_v16 = vld [vmem:[#allocation59_spill] sm:$0xff] }
 0x957   :  { %19121 = vmatmul.mubr.msk.f32.gmra.mrb[76].mxu0 %vm38_vm2, %v25736_v2  ;;  %v28185_v2 = vld [vmem:[#allocation60_spill] sm:$0xff] }
 0x958   :  { %19123 = vmatprep.mubr.msk.f32.mxu0 %vm38_vm2, %v25740_v50  ;;  %v28186_v50 = vld [vmem:[#allocation61_spill] sm:$0xff] }
 0x95b   :  { %19124 = vmatmul.mubr.msk.f32.gmra.mrb[78].mxu0 %vm38_vm2, %v25744_v48  ;;  %v28187_v48 = vld [vmem:[#allocation62_spill] sm:$0xff] }
 0x95c   :  { %19126 = vmatprep.mubr.msk.f32.mxu0 %vm38_vm2, %v25748_v37  ;;  %v28188_v37 = vld [vmem:[#allocation63_spill] sm:$0xff] }
 0x95f   :  { %19127 = vmatmul.mubr.msk.f32.gmra.mrb[80].mxu0 %vm38_vm2, %v25752_v15  ;;  %v28189_v15 = vld [vmem:[#allocation64_spill] sm:$0xff] }
 0x960   :  { %19129 = vmatprep.mubr.msk.f32.mxu0 %vm38_vm2, %v25756_v21  ;;  %v28190_v21 = vld [vmem:[#allocation65_spill] sm:$0xff] }
 0x963   :  { %19130 = vmatmul.mubr.msk.f32.gmra.mrb[82].mxu0 %vm38_vm2, %v25760_v13  ;;  %v28191_v13 = vld [vmem:[#allocation66_spill] sm:$0xff] }
 0x964   :  { %19132 = vmatprep.mubr.msk.f32.mxu0 %vm38_vm2, %v25764_v36  ;;  %v28192_v36 = vld [vmem:[#allocation67_spill] sm:$0xff] }
 0x967   :  { %19133 = vmatmul.mubr.msk.f32.gmra.mrb[84].mxu0 %vm38_vm2, %v25768_v32  ;;  %v28193_v32 = vld [vmem:[#allocation68_spill] sm:$0xff] }
 0x968   :  { %19135 = vmatprep.mubr.msk.f32.mxu0 %vm38_vm2, %v25772_v1  ;;  %v28194_v1 = vld [vmem:[#allocation69_spill] sm:$0xff] }
 0x96b   :  { %19136 = vmatmul.mubr.msk.f32.gmra.mrb[86].mxu0 %vm38_vm2, %v25776_v10  ;;  %v28195_v10 = vld [vmem:[#allocation70_spill] sm:$0xff] }
 0x96c   :  { %19138 = vmatprep.mubr.msk.f32.mxu0 %vm38_vm2, %v28162_v4  ;;  %v28205_v4 = vld [vmem:[#allocation80_spill] sm:$0xff] }
 0x96f   :  { %19139 = vmatmul.mubr.msk.f32.gmra.mrb[88].mxu0 %vm38_vm2, %v28163_v11  ;;  %v28206_v11 = vld [vmem:[#allocation81_spill] sm:$0xff] }
 0x970   :  { %19141 = vmatprep.mubr.msk.f32.mxu0 %vm38_vm2, %v28164_v63  ;;  %v28207_v63 = vld [vmem:[#allocation82_spill] sm:$0xff] }
 0x973   :  { %19142 = vmatmul.mubr.msk.f32.gmra.mrb[90].mxu0 %vm38_vm2, %v28165_v22  ;;  %v28208_v22 = vld [vmem:[#allocation83_spill] sm:$0xff] }
 0x974   :  { %19144 = vmatprep.mubr.msk.f32.mxu0 %vm38_vm2, %v28166_v51  ;;  %v28209_v51 = vld [vmem:[#allocation84_spill] sm:$0xff] }
 0x977   :  { %19145 = vmatmul.mubr.msk.f32.gmra.mrb[92].mxu0 %vm38_vm2, %v28167_v49  ;;  %v28210_v49 = vld [vmem:[#allocation85_spill] sm:$0xff] }
 0x978   :  { %19147 = vmatprep.mubr.msk.f32.mxu0 %vm38_vm2, %v26504_v47 }
 0x97b   :  { %19148 = vmatmul.mubr.msk.f32.gmra.mrb[94].mxu0 %vm38_vm2, %v26508_v39 }
 0x97c   :  { %19166 = vmatprep.mubr.msk.f32.mxu0 %vm38_vm2, %v28168_v52  ;;  %v28213_v52 = vld [vmem:[#allocation88_spill] sm:$0xff] }
 0x97f   :  { %19167 = vmatmul.mubr.msk.f32.vlgmr.msra.gmra.mrb[32].mxu0 %vm38_vm2, %v28169_v55  ;;  %v28217_v55 = vld [vmem:[#allocation92_spill] sm:$0xff] }
 0x980   :  { %19945 = vmatpush3.bf16.msra.mxu0 %v26387_v59  ;;  %19169 = vmatprep.mubr.msk.f32.mxu0 %vm38_vm2, %v28170_v40  ;;  %v28204_v59 = vld [vmem:[#allocation79_spill] sm:$0xff]  ;;  %v28218_v40 = vld [vmem:[#allocation93_spill] sm:$0xff] }
 0x981   :  { %19947 = vmatprep.subr.bf16.mxu0 %v19946_v24 }
 0x983   :  { %19170 = vmatmul.mubr.msk.f32.gmra.mrb[34].mxu0 %vm38_vm2, %v28171_v19  ;;  %v28222_v19 = vld [vmem:[#allocation97_spill] sm:$0xff] }
 0x984   :  { %19172 = vmatprep.mubr.msk.f32.mxu0 %vm38_vm2, %v28172_v30  ;;  %19949 = vmatpush3.bf16.msra.mxu0 %v19946_v24  ;;  %v28214_v24 = vld [vmem:[#allocation89_spill] sm:$0xff]  ;;  %v28223_v30 = vld [vmem:[#allocation98_spill] sm:$0xff] }
 0x985   :  { %19951 = vmatprep.subr.bf16.mxu0 %v19950_v35 }
 0x987   :  { %19173 = vmatmul.mubr.msk.f32.gmra.mrb[36].mxu0 %vm38_vm2, %v28173_v20  ;;  %v28227_v20 = vld [vmem:[#allocation102_spill] sm:$0xff] }
 0x988   :  { %19175 = vmatprep.mubr.msk.f32.mxu0 %vm38_vm2, %v28174_v54  ;;  %19953 = vmatpush3.bf16.msra.mxu0 %v19950_v35  ;;  %v28219_v35 = vld [vmem:[#allocation94_spill] sm:$0xff] }
 0x989   :  { %19955 = vmatprep.subr.bf16.mxu0 %v19954_v61  ;;  %v26668_v54 = vld [vmem:[#allocation3 + $0x331] sm:$0xff] }
 0x98b   :  { %19176 = vmatmul.mubr.msk.f32.gmra.mrb[38].mxu0 %vm38_vm2, %v28175_v14  ;;  %v26672_v14 = vld [vmem:[#allocation3 + $0x339] sm:$0xff] }
 0x98c   :  { %19178 = vmatprep.mubr.msk.f32.mxu0 %vm38_vm2, %v28176_v18  ;;  %19957 = vmatpush3.bf16.msra.mxu0 %v19954_v61  ;;  %v28224_v61 = vld [vmem:[#allocation99_spill] sm:$0xff]  ;;  %v12862_v18 = vld [vmem:[%s27359_s9 + $0x190] sm:$0xff] }
 0x98d   :  { %19959 = vmatprep.subr.bf16.mxu0 %v26551_v9 }
 0x98f   :  { %19179 = vmatmul.mubr.msk.f32.gmra.mrb[40].mxu0 %vm38_vm2, %v28177_v17  ;;  %v12863_v17 = vld [vmem:[%s27359_s9 + $0x198] sm:$0xff] }
 0x990   :  { %19181 = vmatprep.mubr.msk.f32.mxu0 %vm38_vm2, %v28178_v46  ;;  %v28228_v46 = vld [vmem:[#allocation103_spill] sm:$0xff] }
 0x993   :  { %19182 = vmatmul.mubr.msk.f32.gmra.mrb[42].mxu0 %vm38_vm2, %v28179_v0  ;;  %v19962_v0 = vpack.c.bf16 %v12863_v17, %v12862_v18  ;;  %v28270_v18 = vld [vmem:[#allocation27_spill] sm:$0xff]  ;;  %v28271_v17 = vld [vmem:[#allocation5_spill] sm:$0xff] }
 0x994   :  { %19184 = vmatprep.mubr.msk.f32.mxu0 %vm38_vm2, %v28180_v25  ;;  %v12864_v25 = vld [vmem:[%s27359_s9 + $0x1a0] sm:$0xff] }
 0x997   :  { %19185 = vmatmul.mubr.msk.f32.gmra.mrb[44].mxu0 %vm38_vm2, %v28181_v31  ;;  %v12865_v31 = vld [vmem:[%s27359_s9 + $0x1a8] sm:$0xff] }
 0x998   :  { %19187 = vmatprep.mubr.msk.f32.mxu0 %vm38_vm2, %v28182_v23  ;;  %v28229_v23 = vld [vmem:[#allocation104_spill] sm:$0xff] }
 0x99b   :  { %19188 = vmatmul.mubr.msk.f32.gmra.mrb[46].mxu0 %vm38_vm2, %v28183_v5  ;;  %v19966_v5 = vpack.c.bf16 %v12865_v31, %v12864_v25  ;;  %v28274_v25 = vld [vmem:[#allocation8_spill] sm:$0xff]  ;;  %v28275_v31 = vld [vmem:[#allocation9_spill] sm:$0xff] }
 0x99c   :  { %19190 = vmatprep.mubr.msk.f32.mxu0 %vm38_vm2, %v28184_v16  ;;  %v12866_v16 = vld [vmem:[%s27359_s9 + $0x1b0] sm:$0xff] }
 0x99f   :  { %19191 = vmatmul.mubr.msk.f32.gmra.mrb[48].mxu0 %vm38_vm2, %v28185_v2  ;;  %v12867_v2 = vld [vmem:[%s27359_s9 + $0x1b8] sm:$0xff] }
 0x9a0   :  { %19193 = vmatprep.mubr.msk.f32.mxu0 %vm38_vm2, %v28186_v50  ;;  %v28230_v50 = vld [vmem:[#allocation105_spill] sm:$0xff] }
 0x9a3   :  { %19194 = vmatmul.mubr.msk.f32.gmra.mrb[50].mxu0 %vm38_vm2, %v28187_v48  ;;  %v13574_v48 = vld [vmem:[%s27359_s9 + $0x1c8] sm:$0xff] }
 0x9a4   :  { %19196 = vmatprep.mubr.msk.f32.mxu0 %vm38_vm2, %v28188_v37  ;;  %v28231_v37 = vld [vmem:[#allocation106_spill] sm:$0xff] }
 0x9a7   :  { %19197 = vmatmul.mubr.msk.f32.gmra.mrb[52].mxu0 %vm38_vm2, %v28189_v15  ;;  %v28232_v15 = vld [vmem:[#allocation107_spill] sm:$0xff] }
 0x9a8   :  { %19199 = vmatprep.mubr.msk.f32.mxu0 %vm38_vm2, %v28190_v21  ;;  %v28233_v21 = vld [vmem:[#allocation108_spill] sm:$0xff] }
 0x9ab   :  { %19200 = vmatmul.mubr.msk.f32.gmra.mrb[54].mxu0 %vm38_vm2, %v28191_v13  ;;  %v28234_v13 = vld [vmem:[#allocation109_spill] sm:$0xff] }
 0x9ac   :  { %19202 = vmatprep.mubr.msk.f32.mxu0 %vm38_vm2, %v28192_v36  ;;  %v28236_v36 = vld [vmem:[#allocation111_spill] sm:$0xff] }
 0x9af   :  { %19203 = vmatmul.mubr.msk.f32.gmra.mrb[56].mxu0 %vm38_vm2, %v28193_v32  ;;  %v28237_v32 = vld [vmem:[#allocation112_spill] sm:$0xff] }
 0x9b0   :  { %19205 = vmatprep.mubr.msk.f32.mxu0 %vm38_vm2, %v28194_v1  ;;  %v28238_v1 = vld [vmem:[#allocation113_spill] sm:$0xff] }
 0x9b3   :  { %19206 = vmatmul.mubr.msk.f32.gmra.mrb[58].mxu0 %vm38_vm2, %v28195_v10  ;;  %v28239_v10 = vld [vmem:[#allocation114_spill] sm:$0xff] }
 0x9b4   :  { %19208 = vmatprep.mubr.msk.f32.mxu0 %vm38_vm2, %v28196_v28  ;;  %v28240_v28 = vld [vmem:[#allocation115_spill] sm:$0xff] }
 0x9b7   :  { %19209 = vmatmul.mubr.msk.f32.gmra.mrb[60].mxu0 %vm38_vm2, %v28197_v56  ;;  %v28241_v56 = vld [vmem:[#allocation116_spill] sm:$0xff] }
 0x9b8   :  { %19211 = vmatprep.mubr.msk.f32.mxu0 %vm38_vm2, %v26600_v53 }
 0x9bb   :  { %19212 = vmatmul.mubr.msk.f32.gmra.mrb[62].mxu0 %vm38_vm2, %v26604_v41 }
 0x9bc   :  { %19214 = vmatprep.mubr.msk.f32.mxu0 %vm38_vm2, %v28198_v6  ;;  %v28242_v6 = vld [vmem:[#allocation117_spill] sm:$0xff] }
 0x9bf   :  { %19215 = vmatmul.mubr.msk.f32.gmra.mrb[64].mxu0 %vm38_vm2, %v28199_v43  ;;  %v28243_v43 = vld [vmem:[#allocation118_spill] sm:$0xff] }
 0x9c0   :  { %19217 = vmatprep.mubr.msk.f32.mxu0 %vm38_vm2, %v28200_v3  ;;  %v28244_v3 = vld [vmem:[#allocation119_spill] sm:$0xff] }
 0x9c3   :  { %19218 = vmatmul.mubr.msk.f32.gmra.mrb[66].mxu0 %vm38_vm2, %v28201_v42  ;;  %v28245_v42 = vld [vmem:[#allocation120_spill] sm:$0xff] }
 0x9c4   :  { %19220 = vmatprep.mubr.msk.f32.mxu0 %vm38_vm2, %v28202_v7  ;;  %v28246_v7 = vld [vmem:[#allocation121_spill] sm:$0xff] }
 0x9c7   :  { %19221 = vmatmul.mubr.msk.f32.gmra.mrb[68].mxu0 %vm38_vm2, %v28203_v44  ;;  %v28247_v44 = vld [vmem:[#allocation122_spill] sm:$0xff] }
 0x9c8   :  { %19223 = vmatprep.mubr.msk.f32.mxu0 %vm38_vm2, %v28204_v59  ;;  %v28248_v59 = vld [vmem:[#allocation123_spill] sm:$0xff] }
 0x9cb   :  { %19224 = vmatmul.mubr.msk.f32.gmra.mrb[70].mxu0 %vm38_vm2, %v28205_v4  ;;  %v28249_v4 = vld [vmem:[#allocation124_spill] sm:$0xff] }
 0x9cc   :  { %19226 = vmatprep.mubr.msk.f32.mxu0 %vm38_vm2, %v28206_v11  ;;  %v28250_v11 = vld [vmem:[#allocation125_spill] sm:$0xff] }
 0x9cf   :  { %19227 = vmatmul.mubr.msk.f32.gmra.mrb[72].mxu0 %vm38_vm2, %v28207_v63  ;;  %v28251_v63 = vld [vmem:[#allocation126_spill] sm:$0xff] }
 0x9d0   :  { %19229 = vmatprep.mubr.msk.f32.mxu0 %vm38_vm2, %v28208_v22  ;;  %v28252_v22 = vld [vmem:[#allocation127_spill] sm:$0xff] }
 0x9d3   :  { %19230 = vmatmul.mubr.msk.f32.gmra.mrb[74].mxu0 %vm38_vm2, %v28209_v51  ;;  %v28253_v51 = vld [vmem:[#allocation28_spill] sm:$0xff] }
 0x9d4   :  { %19232 = vmatprep.mubr.msk.f32.mxu0 %vm38_vm2, %v28210_v49  ;;  %v28254_v49 = vld [vmem:[#allocation11_spill] sm:$0xff] }
 0x9d7   :  { %19233 = vmatmul.mubr.msk.f32.gmra.mrb[76].mxu0 %vm38_vm2, %v28211_v29  ;;  %v26764_v29 = vld [vmem:[#allocation3 + $0x182] sm:$0xff] }
 0x9d8   :  { %19235 = vmatprep.mubr.msk.f32.mxu0 %vm38_vm2, %v28212_v57  ;;  %v26768_v57 = vld [vmem:[#allocation3 + $0x18a] sm:$0xff] }
 0x9db   :  { %19236 = vmatmul.mubr.msk.f32.gmra.mrb[78].mxu0 %vm38_vm2, %v28213_v52  ;;  %v28255_v52 = vld [vmem:[#allocation14_spill] sm:$0xff] }
 0x9dc   :  { %19238 = vmatprep.mubr.msk.f32.mxu0 %vm38_vm2, %v28214_v24  ;;  %v28256_v24 = vld [vmem:[#allocation13_spill] sm:$0xff] }
 0x9df   :  { %19239 = vmatmul.mubr.msk.f32.gmra.mrb[80].mxu0 %vm38_vm2, %v28215_v60  ;;  %v28257_v60 = vld [vmem:[#allocation15_spill] sm:$0xff] }
 0x9e0   :  { %19241 = vmatprep.mubr.msk.f32.mxu0 %vm38_vm2, %v28216_v34  ;;  %v28258_v34 = vld [vmem:[#allocation16_spill] sm:$0xff] }
 0x9e3   :  { %19242 = vmatmul.mubr.msk.f32.gmra.mrb[82].mxu0 %vm38_vm2, %v28217_v55  ;;  %v28259_v55 = vld [vmem:[#allocation17_spill] sm:$0xff] }
 0x9e4   :  { %19244 = vmatprep.mubr.msk.f32.mxu0 %vm38_vm2, %v28218_v40  ;;  %v28260_v40 = vld [vmem:[#allocation18_spill] sm:$0xff] }
 0x9e7   :  { %19245 = vmatmul.mubr.msk.f32.gmra.mrb[84].mxu0 %vm38_vm2, %v28219_v35  ;;  %v28261_v35 = vld [vmem:[#allocation19_spill] sm:$0xff] }
 0x9e8   :  { %19247 = vmatprep.mubr.msk.f32.mxu0 %vm38_vm2, %v28220_v45  ;;  %v28262_v45 = vld [vmem:[#allocation20_spill] sm:$0xff] }
 0x9eb   :  { %19248 = vmatmul.mubr.msk.f32.gmra.mrb[86].mxu0 %vm38_vm2, %v28221_v26  ;;  %v28263_v26 = vld [vmem:[#allocation23_spill] sm:$0xff] }
 0x9ec   :  { %19250 = vmatprep.mubr.msk.f32.mxu0 %vm38_vm2, %v28222_v19  ;;  %v28264_v19 = vld [vmem:[#allocation22_spill] sm:$0xff] }
 0x9ef   :  { %19251 = vmatmul.mubr.msk.f32.gmra.mrb[88].mxu0 %vm38_vm2, %v28223_v30  ;;  %v28265_v30 = vld [vmem:[#allocation24_spill] sm:$0xff] }
 0x9f0   :  { %19253 = vmatprep.mubr.msk.f32.mxu0 %vm38_vm2, %v28224_v61  ;;  %v28266_v61 = vld [vmem:[#allocation21_spill] sm:$0xff] }
 0x9f3   :  { %19254 = vmatmul.mubr.msk.f32.gmra.mrb[90].mxu0 %vm38_vm2, %v28225_v58  ;;  %v28267_v58 = vld [vmem:[#allocation26_spill] sm:$0xff] }
 0x9f4   :  { %19256 = vmatprep.mubr.msk.f32.mxu0 %vm38_vm2, %v28226_v38  ;;  %v28268_v38 = vld [vmem:[#allocation25_spill] sm:$0xff] }
 0x9f7   :  { %19257 = vmatmul.mubr.msk.f32.gmra.mrb[92].mxu0 %vm38_vm2, %v28227_v20  ;;  %v28269_v20 = vld [vmem:[#allocation4_spill] sm:$0xff] }
 0x9f8   :  { %19259 = vmatprep.mubr.msk.f32.mxu0 %vm38_vm2, %v26668_v54 }
 0x9fb   :  { %19260 = vmatmul.mubr.msk.f32.gmra.mrb[94].mxu0 %vm38_vm2, %v26672_v14 }
 0x9fc   :  { %19278 = vmatprep.mubr.msk.f32.mxu0 %vm38_vm2, %v28228_v46  ;;  %v28272_v46 = vld [vmem:[#allocation6_spill] sm:$0xff] }
 0x9ff   :  { %19279 = vmatmul.mubr.msk.f32.vlgmr.msra.gmra.mrb[32].mxu0 %vm38_vm2, %v28229_v23  ;;  %v28276_v23 = vld [vmem:[#allocation10_spill] sm:$0xff] }
 0xa00   :  { %19961 = vmatpush3.bf16.msra.mxu0 %v26551_v9  ;;  %19281 = vmatprep.mubr.msk.f32.mxu0 %vm38_vm2, %v26105_v27  ;;  %v19970_v9 = vpack.c.bf16 %v12867_v2, %v12866_v16  ;;  %v13573_v27 = vld [vmem:[%s27359_s9 + $0x1c0] sm:$0xff]  ;;  %v28278_v16 = vld [vmem:[#allocation29_spill] sm:$0xff]  ;;  %v28279_v2 = vld [vmem:[#allocation30_spill] sm:$0xff] }
 0xa01   :  { %19963 = vmatprep.subr.bf16.mxu0 %v19962_v0 }
 0xa03   :  { %19282 = vmatmul.mubr.msk.f32.gmra.mrb[34].mxu0 %vm38_vm2, %v28230_v50  ;;  %v28280_v50 = vld [vmem:[#allocation31_spill] sm:$0xff] }
 0xa04   :  { %19284 = vmatprep.mubr.msk.f32.mxu0 %vm38_vm2, %v26119_v62  ;;  %19965 = vmatpush3.bf16.msra.mxu0 %v19962_v0  ;;  %v26715_v62 = vpack.c.bf16 %v13574_v48, %v13573_v27  ;;  %v28273_v0 = vld [vmem:[#allocation7_spill] sm:$0xff]  ;;  %v28282_v27 = vld [vmem:[#allocation33_spill] sm:$0xff]  ;;  %v28283_v48 = vld [vmem:[#allocation34_spill] sm:$0xff] }
 0xa05   :  { %19967 = vmatprep.subr.bf16.mxu0 %v19966_v5 }
 0xa07   :  { %19285 = vmatmul.mubr.msk.f32.gmra.mrb[36].mxu0 %vm38_vm2, %v26125_v12  ;;  %v28235_v12 = vld [vmem:[#allocation110_spill] sm:$0xff] }
 0xa08   :  { %19287 = vmatprep.mubr.msk.f32.mxu0 %vm38_vm2, %v28231_v37  ;;  %19969 = vmatpush3.bf16.msra.mxu0 %v19966_v5  ;;  %v28277_v5 = vld [vmem:[#allocation12_spill] sm:$0xff]  ;;  %v28284_v37 = vld [vmem:[#allocation35_spill] sm:$0xff] }
 0xa09   :  { %19971 = vmatprep.subr.bf16.mxu0 %v19970_v9 }
 0xa0b   :  { %19288 = vmatmul.mubr.msk.f32.gmra.mrb[38].mxu0 %vm38_vm2, %v28232_v15  ;;  %v26832_v15 = vld [vmem:[#allocation3 + $0x332] sm:$0xff] }
 0xa0c   :  { %19290 = vmatprep.mubr.msk.f32.mxu0 %vm38_vm2, %v28233_v21  ;;  %19973 = vmatpush3.bf16.msra.mxu0 %v19970_v9  ;;  %v28281_v9 = vld [vmem:[#allocation32_spill] sm:$0xff] }
 0xa0d   :  { %19975 = vmatprep.subr.bf16.mxu0 %v26715_v62  ;;  %v26836_v21 = vld [vmem:[#allocation3 + $0x33a] sm:$0xff] }
 0xa0f   :  { %19291 = vmatmul.mubr.msk.f32.gmra.mrb[40].mxu0 %vm38_vm2, %v28234_v13  ;;  %v13575_v13 = vld [vmem:[%s27359_s9 + $0x1d0] sm:$0xff] }
 0xa10   :  { %19293 = vmatprep.mubr.msk.f32.mxu0 %vm38_vm2, %v28235_v12  ;;  %v13576_v12 = vld [vmem:[%s27359_s9 + $0x1d8] sm:$0xff] }
 0xa13   :  { %19294 = vmatmul.mubr.msk.f32.gmra.mrb[42].mxu0 %vm38_vm2, %v28236_v36  ;;  %v12796_v36 = vld [vmem:[#allocation3 + $0x30] sm:$0xff] }
 0xa14   :  { %19296 = vmatprep.mubr.msk.f32.mxu0 %vm38_vm2, %v28237_v32  ;;  %v19978_v32 = vpack.c.bf16 %v13576_v12, %v13575_v13  ;;  %v12840_v13 = vld [vmem:[#allocation3 + $0x270] sm:$0xff]  ;;  %v12841_v12 = vld [vmem:[#allocation3 + $0x278] sm:$0xff] }
 0xa17   :  { %19297 = vmatmul.mubr.msk.f32.gmra.mrb[44].mxu0 %vm38_vm2, %v28238_v1  ;;  %v12797_v1 = vld [vmem:[#allocation3 + $0x38] sm:$0xff] }
 0xa18   :  { %19299 = vmatprep.mubr.msk.f32.mxu0 %vm38_vm2, %v28239_v10  ;;  %v13577_v10 = vld [vmem:[%s27359_s9 + $0x1e0] sm:$0xff] }
 0xa1b   :  { %19300 = vmatmul.mubr.msk.f32.gmra.mrb[46].mxu0 %vm38_vm2, %v28240_v28  ;;  %v13578_v28 = vld [vmem:[%s27359_s9 + $0x1e8] sm:$0xff] }
 0xa1c   :  { %19302 = vmatprep.mubr.msk.f32.mxu0 %vm38_vm2, %v28241_v56  ;;  %v12798_v56 = vld [vmem:[#allocation3 + $0x48] sm:$0xff] }
 0xa1f   :  { %19303 = vmatmul.mubr.msk.f32.gmra.mrb[48].mxu0 %vm38_vm2, %v28242_v6  ;;  %v19982_v6 = vpack.c.bf16 %v13578_v28, %v13577_v10  ;;  %v12845_v10 = vld [vmem:[#allocation3 + $0x2a8] sm:$0xff]  ;;  %v12846_v28 = vld [vmem:[#allocation3 + $0x2b8] sm:$0xff] }
 0xa20   :  { %19305 = vmatprep.mubr.msk.f32.mxu0 %vm38_vm2, %v28243_v43  ;;  %v12799_v43 = vld [vmem:[#allocation3 + $0x50] sm:$0xff] }
 0xa23   :  { %19306 = vmatmul.mubr.msk.f32.gmra.mrb[50].mxu0 %vm38_vm2, %v28244_v3  ;;  %v13579_v3 = vld [vmem:[%s27359_s9 + $0x1f0] sm:$0xff] }
 0xa24   :  { %19308 = vmatprep.mubr.msk.f32.mxu0 %vm38_vm2, %v28245_v42  ;;  %v13580_v42 = vld [vmem:[%s27359_s9 + $0x1f8] sm:$0xff] }
 0xa27   :  { %19309 = vmatmul.mubr.msk.f32.gmra.mrb[52].mxu0 %vm38_vm2, %v28246_v7  ;;  %v12800_v7 = vld [vmem:[#allocation3 + $0x60] sm:$0xff] }
 0xa28   :  { %19311 = vmatprep.mubr.msk.f32.mxu0 %vm38_vm2, %v28247_v44  ;;  %v12801_v44 = vld [vmem:[#allocation3 + $0x68] sm:$0xff] }
 0xa2b   :  { %19312 = vmatmul.mubr.msk.f32.gmra.mrb[54].mxu0 %vm38_vm2, %v28248_v59  ;;  %v14286_v59 = vld [vmem:[%s27359_s9 + $0x200] sm:$0xff] }
 0xa2c   :  { %19314 = vmatprep.mubr.msk.f32.mxu0 %vm38_vm2, %v28249_v4  ;;  %v14287_v4 = vld [vmem:[%s27359_s9 + $0x208] sm:$0xff] }
 0xa2f   :  { %19315 = vmatmul.mubr.msk.f32.gmra.mrb[56].mxu0 %vm38_vm2, %v28250_v11  ;;  %v12802_v11 = vld [vmem:[#allocation3 + $0x78] sm:$0xff] }
 0xa30   :  { %19317 = vmatprep.mubr.msk.f32.mxu0 %vm38_vm2, %v28251_v63  ;;  %v26872_v63 = vpack.c.bf16 %v14287_v4, %v14286_v59  ;;  %v12855_v59 = vld [vmem:[#allocation3 + $0x320] sm:$0xff]  ;;  %v12858_v4 = vld [vmem:[#allocation3 + $0x348] sm:$0xff] }
 0xa33   :  { %19318 = vmatmul.mubr.msk.f32.gmra.mrb[58].mxu0 %vm38_vm2, %v28252_v22  ;;  %v12803_v22 = vld [vmem:[#allocation3 + $0x80] sm:$0xff] }
 0xa34   :  { %19320 = vmatprep.mubr.msk.f32.mxu0 %vm38_vm2, %v28253_v51  ;;  %v12804_v51 = vld [vmem:[#allocation3 + $0x90] sm:$0xff] }
 0xa37   :  { %19321 = vmatmul.mubr.msk.f32.gmra.mrb[60].mxu0 %vm38_vm2, %v28254_v49  ;;  %v12805_v49 = vld [vmem:[#allocation3 + $0x98] sm:$0xff] }
 0xa38   :  { %19323 = vmatprep.mubr.msk.f32.mxu0 %vm38_vm2, %v26764_v29 }
 0xa3b   :  { %19324 = vmatmul.mubr.msk.f32.gmra.mrb[62].mxu0 %vm38_vm2, %v26768_v57 }
 0xa3c   :  { %19326 = vmatprep.mubr.msk.f32.mxu0 %vm38_vm2, %v28255_v52  ;;  %v12806_v52 = vld [vmem:[#allocation3 + $0xa8] sm:$0xff] }
 0xa3f   :  { %19327 = vmatmul.mubr.msk.f32.gmra.mrb[64].mxu0 %vm38_vm2, %v28256_v24  ;;  %v12807_v24 = vld [vmem:[#allocation3 + $0xb0] sm:$0xff] }
 0xa40   :  { %19329 = vmatprep.mubr.msk.f32.mxu0 %vm38_vm2, %v28257_v60  ;;  %v12808_v60 = vld [vmem:[#allocation3 + $0xc0] sm:$0xff] }
 0xa43   :  { %19330 = vmatmul.mubr.msk.f32.gmra.mrb[66].mxu0 %vm38_vm2, %v28258_v34  ;;  %v12809_v34 = vld [vmem:[#allocation3 + $0xc8] sm:$0xff] }
 0xa44   :  { %19332 = vmatprep.mubr.msk.f32.mxu0 %vm38_vm2, %v28259_v55  ;;  %v12810_v55 = vld [vmem:[#allocation3 + $0xd8] sm:$0xff] }
 0xa47   :  { %19333 = vmatmul.mubr.msk.f32.gmra.mrb[68].mxu0 %vm38_vm2, %v28260_v40  ;;  %v12811_v40 = vld [vmem:[#allocation3 + $0xe0] sm:$0xff] }
 0xa48   :  { %19335 = vmatprep.mubr.msk.f32.mxu0 %vm38_vm2, %v28261_v35  ;;  %v12812_v35 = vld [vmem:[#allocation3 + $0xf0] sm:$0xff] }
 0xa4b   :  { %19336 = vmatmul.mubr.msk.f32.gmra.mrb[70].mxu0 %vm38_vm2, %v28262_v45  ;;  %v12813_v45 = vld [vmem:[#allocation3 + $0xf8] sm:$0xff] }
 0xa4c   :  { %19338 = vmatprep.mubr.msk.f32.mxu0 %vm38_vm2, %v28263_v26  ;;  %v12814_v26 = vld [vmem:[#allocation3 + $0x108] sm:$0xff] }
 0xa4f   :  { %19339 = vmatmul.mubr.msk.f32.gmra.mrb[72].mxu0 %vm38_vm2, %v28264_v19  ;;  %v12815_v19 = vld [vmem:[#allocation3 + $0x110] sm:$0xff] }
 0xa50   :  { %19341 = vmatprep.mubr.msk.f32.mxu0 %vm38_vm2, %v28265_v30  ;;  %v12816_v30 = vld [vmem:[#allocation3 + $0x120] sm:$0xff] }
 0xa53   :  { %19342 = vmatmul.mubr.msk.f32.gmra.mrb[74].mxu0 %vm38_vm2, %v28266_v61  ;;  %v12817_v61 = vld [vmem:[#allocation3 + $0x128] sm:$0xff] }
 0xa54   :  { %19344 = vmatprep.mubr.msk.f32.mxu0 %vm38_vm2, %v28267_v58  ;;  %v12818_v58 = vld [vmem:[#allocation3 + $0x138] sm:$0xff] }
 0xa57   :  { %19345 = vmatmul.mubr.msk.f32.gmra.mrb[76].mxu0 %vm38_vm2, %v28268_v38  ;;  %v12819_v38 = vld [vmem:[#allocation3 + $0x140] sm:$0xff] }
 0xa58   :  { %19347 = vmatprep.mubr.msk.f32.mxu0 %vm38_vm2, %v28269_v20  ;;  %v12820_v20 = vld [vmem:[#allocation3 + $0x150] sm:$0xff] }
 0xa5b   :  { %19348 = vmatmul.mubr.msk.f32.gmra.mrb[78].mxu0 %vm38_vm2, %v28270_v18  ;;  %v12821_v18 = vld [vmem:[#allocation3 + $0x158] sm:$0xff] }
 0xa5c   :  { %19350 = vmatprep.mubr.msk.f32.mxu0 %vm38_vm2, %v28271_v17  ;;  %v12822_v17 = vld [vmem:[#allocation3 + $0x168] sm:$0xff] }
 0xa5f   :  { %19351 = vmatmul.mubr.msk.f32.gmra.mrb[80].mxu0 %vm38_vm2, %v28272_v46  ;;  %v12823_v46 = vld [vmem:[#allocation3 + $0x170] sm:$0xff] }
 0xa60   :  { %19353 = vmatprep.mubr.msk.f32.mxu0 %vm38_vm2, %v28273_v0  ;;  %v12826_v0 = vld [vmem:[#allocation3 + $0x198] sm:$0xff] }
 0xa63   :  { %19354 = vmatmul.mubr.msk.f32.gmra.mrb[82].mxu0 %vm38_vm2, %v28274_v25  ;;  %v12827_v25 = vld [vmem:[#allocation3 + $0x1a0] sm:$0xff] }
 0xa64   :  { %19356 = vmatprep.mubr.msk.f32.mxu0 %vm38_vm2, %v28275_v31  ;;  %v12828_v31 = vld [vmem:[#allocation3 + $0x1e0] sm:$0xff] }
 0xa67   :  { %19357 = vmatmul.mubr.msk.f32.gmra.mrb[84].mxu0 %vm38_vm2, %v28276_v23  ;;  %v12829_v23 = vld [vmem:[#allocation3 + $0x1e8] sm:$0xff] }
 0xa68   :  { %19359 = vmatprep.mubr.msk.f32.mxu0 %vm38_vm2, %v28277_v5  ;;  %v12830_v5 = vld [vmem:[#allocation3 + $0x1f8] sm:$0xff] }
 0xa6b   :  { %19360 = vmatmul.mubr.msk.f32.gmra.mrb[86].mxu0 %vm38_vm2, %v28278_v16  ;;  %v12831_v16 = vld [vmem:[#allocation3 + $0x200] sm:$0xff] }
 0xa6c   :  { %19362 = vmatprep.mubr.msk.f32.mxu0 %vm38_vm2, %v28279_v2  ;;  %v12834_v2 = vld [vmem:[#allocation3 + $0x228] sm:$0xff] }
 0xa6f   :  { %19363 = vmatmul.mubr.msk.f32.gmra.mrb[88].mxu0 %vm38_vm2, %v28280_v50  ;;  %v12835_v50 = vld [vmem:[#allocation3 + $0x230] sm:$0xff] }
 0xa70   :  { %19365 = vmatprep.mubr.msk.f32.mxu0 %vm38_vm2, %v28281_v9  ;;  %v12836_v9 = vld [vmem:[#allocation3 + $0x240] sm:$0xff] }
 0xa73   :  { %19366 = vmatmul.mubr.msk.f32.gmra.mrb[90].mxu0 %vm38_vm2, %v28282_v27  ;;  %v12837_v27 = vld [vmem:[#allocation3 + $0x248] sm:$0xff] }
 0xa74   :  { %19368 = vmatprep.mubr.msk.f32.mxu0 %vm38_vm2, %v28283_v48  ;;  %v12838_v48 = vld [vmem:[#allocation3 + $0x258] sm:$0xff] }
 0xa77   :  { %19369 = vmatmul.mubr.msk.f32.gmra.mrb[92].mxu0 %vm38_vm2, %v28284_v37  ;;  %v12839_v37 = vld [vmem:[#allocation3 + $0x260] sm:$0xff] }
 0xa78   :  { %19371 = vmatprep.mubr.msk.f32.mxu0 %vm38_vm2, %v26832_v15 }
 0xa7b   :  { %19372 = vmatmul.mubr.msk.f32.gmra.mrb[94].mxu0 %vm38_vm2, %v26836_v21 }
 0xa7c   :  { %19390 = vmatprep.mubr.msk.f32.mxu0 %vm38_vm2, %v12796_v36  ;;  %v12842_v36 = vld [vmem:[#allocation3 + $0x288] sm:$0xff] }
 0xa7f   :  { %19391 = vmatmul.mubr.msk.f32.vlgmr.msra.gmra.mrb[32].mxu0 %vm38_vm2, %v12797_v1  ;;  %v12844_v1 = vld [vmem:[#allocation3 + $0x2a0] sm:$0xff] }
 0xa80   :  { %19977 = vmatpush3.bf16.msra.mxu0 %v26715_v62  ;;  %19393 = vmatprep.mubr.msk.f32.mxu0 %vm38_vm2, %v12798_v56  ;;  %v19986_v62 = vpack.c.bf16 %v13580_v42, %v13579_v3  ;;  %v12847_v56 = vld [vmem:[#allocation3 + $0x2c0] sm:$0xff]  ;;  %v12850_v3 = vld [vmem:[#allocation3 + $0x2e8] sm:$0xff]  ;;  %v12851_v42 = vld [vmem:[#allocation3 + $0x2f0] sm:$0xff] }
 0xa81   :  { %19979 = vmatprep.subr.bf16.mxu0 %v19978_v32 }
 0xa83   :  { %19394 = vmatmul.mubr.msk.f32.gmra.mrb[34].mxu0 %vm38_vm2, %v12799_v43  ;;  %v12849_v43 = vld [vmem:[#allocation3 + $0x2d8] sm:$0xff] }
 0xa84   :  { %19396 = vmatprep.mubr.msk.f32.mxu0 %vm38_vm2, %v12800_v7  ;;  %19981 = vmatpush3.bf16.msra.mxu0 %v19978_v32  ;;  %v12843_v32 = vld [vmem:[#allocation3 + $0x290] sm:$0xff]  ;;  %v12852_v7 = vld [vmem:[#allocation3 + $0x300] sm:$0xff] }
 0xa85   :  { %19983 = vmatprep.subr.bf16.mxu0 %v19982_v6 }
 0xa87   :  { %19397 = vmatmul.mubr.msk.f32.gmra.mrb[36].mxu0 %vm38_vm2, %v12801_v44  ;;  %v12854_v44 = vld [vmem:[#allocation3 + $0x318] sm:$0xff] }
 0xa88   :  { %19399 = vmatprep.mubr.msk.f32.mxu0 %vm38_vm2, %v12802_v11  ;;  %19985 = vmatpush3.bf16.msra.mxu0 %v19982_v6  ;;  %v12848_v6 = vld [vmem:[#allocation3 + $0x2d0] sm:$0xff] }
 0xa89   :  { %19987 = vmatprep.subr.bf16.mxu0 %v19986_v62  ;;  %v12859_v11 = vld [vmem:[#allocation3 + $0x350] sm:$0xff] }
 0xa8b   :  { %19400 = vmatmul.mubr.msk.f32.gmra.mrb[38].mxu0 %vm38_vm2, %v12803_v22  ;;  %v14288_v22 = vld [vmem:[%s27359_s9 + $0x210] sm:$0xff] }
 0xa8c   :  { %19402 = vmatprep.mubr.msk.f32.mxu0 %vm38_vm2, %v12804_v51  ;;  %19989 = vmatpush3.bf16.msra.mxu0 %v19986_v62  ;;  %v12853_v62 = vld [vmem:[#allocation3 + $0x308] sm:$0xff]  ;;  %v14289_v51 = vld [vmem:[%s27359_s9 + $0x218] sm:$0xff] }
 0xa8d   :  { %19991 = vmatprep.subr.bf16.mxu0 %v26872_v63 }
 0xa8f   :  { %19403 = vmatmul.mubr.msk.f32.gmra.mrb[40].mxu0 %vm38_vm2, %v12805_v49  ;;  %v13509_v49 = vld [vmem:[#allocation3 + $0x31] sm:$0xff] }
 0xa90   :  { %19405 = vmatprep.mubr.msk.f32.mxu0 %vm38_vm2, %v12806_v52  ;;  %v13510_v52 = vld [vmem:[#allocation3 + $0x39] sm:$0xff] }
 0xa93   :  { %19406 = vmatmul.mubr.msk.f32.gmra.mrb[42].mxu0 %vm38_vm2, %v12807_v24  ;;  %v14291_v24 = vld [vmem:[%s27359_s9 + $0x228] sm:$0xff] }
 0xa94   :  { %19408 = vmatprep.mubr.msk.f32.mxu0 %vm38_vm2, %v12808_v60  ;;  %v13511_v60 = vld [vmem:[#allocation3 + $0x49] sm:$0xff] }
 0xa97   :  { %19409 = vmatmul.mubr.msk.f32.gmra.mrb[44].mxu0 %vm38_vm2, %v12809_v34 }
 0xa98   :  { %19411 = vmatprep.mubr.msk.f32.mxu0 %vm38_vm2, %v12810_v55  ;;  %v13512_v55 = vld [vmem:[#allocation3 + $0x51] sm:$0xff] }
 0xa9b   :  { %19412 = vmatmul.mubr.msk.f32.gmra.mrb[46].mxu0 %vm38_vm2, %v12811_v40  ;;  %v14292_v40 = vld [vmem:[%s27359_s9 + $0x230] sm:$0xff] }
 0xa9c   :  { %19414 = vmatprep.mubr.msk.f32.mxu0 %vm38_vm2, %v12812_v35  ;;  %v14293_v35 = vld [vmem:[%s27359_s9 + $0x238] sm:$0xff] }
 0xa9f   :  { %19415 = vmatmul.mubr.msk.f32.gmra.mrb[48].mxu0 %vm38_vm2, %v12813_v45  ;;  %v13513_v45 = vld [vmem:[#allocation3 + $0x61] sm:$0xff] }
 0xaa0   :  { %19417 = vmatprep.mubr.msk.f32.mxu0 %vm38_vm2, %v12814_v26  ;;  %v13514_v26 = vld [vmem:[#allocation3 + $0x69] sm:$0xff] }
 0xaa3   :  { %19418 = vmatmul.mubr.msk.f32.gmra.mrb[50].mxu0 %vm38_vm2, %v12815_v19  ;;  %v13515_v19 = vld [vmem:[#allocation3 + $0x79] sm:$0xff] }
 0xaa4   :  { %19420 = vmatprep.mubr.msk.f32.mxu0 %vm38_vm2, %v12816_v30  ;;  %v13516_v30 = vld [vmem:[#allocation3 + $0x81] sm:$0xff] }
 0xaa7   :  { %19421 = vmatmul.mubr.msk.f32.gmra.mrb[52].mxu0 %vm38_vm2, %v12817_v61  ;;  %v13517_v61 = vld [vmem:[#allocation3 + $0x91] sm:$0xff] }
 0xaa8   :  { %19423 = vmatprep.mubr.msk.f32.mxu0 %vm38_vm2, %v12818_v58  ;;  %v13518_v58 = vld [vmem:[#allocation3 + $0x99] sm:$0xff] }
 0xaab   :  { %19424 = vmatmul.mubr.msk.f32.gmra.mrb[54].mxu0 %vm38_vm2, %v12819_v38  ;;  %v13519_v38 = vld [vmem:[#allocation3 + $0xa9] sm:$0xff] }
 0xaac   :  { %19426 = vmatprep.mubr.msk.f32.mxu0 %vm38_vm2, %v12820_v20  ;;  %v13520_v20 = vld [vmem:[#allocation3 + $0xb1] sm:$0xff] }
 0xaaf   :  { %19427 = vmatmul.mubr.msk.f32.gmra.mrb[56].mxu0 %vm38_vm2, %v12821_v18  ;;  %v13521_v18 = vld [vmem:[#allocation3 + $0xc1] sm:$0xff] }
 0xab0   :  { %19429 = vmatprep.mubr.msk.f32.mxu0 %vm38_vm2, %v12822_v17  ;;  %v13522_v17 = vld [vmem:[#allocation3 + $0xc9] sm:$0xff] }
 0xab3   :  { %19430 = vmatmul.mubr.msk.f32.gmra.mrb[58].mxu0 %vm38_vm2, %v12823_v46  ;;  %v13523_v46 = vld [vmem:[#allocation3 + $0xd9] sm:$0xff] }
 0xab4   :  { %19432 = vmatprep.mubr.msk.f32.mxu0 %vm38_vm2, %v26436_v8  ;;  %v12832_v8 = vld [vmem:[#allocation3 + $0x210] sm:$0xff] }
 0xab7   :  { %19433 = vmatmul.mubr.msk.f32.gmra.mrb[60].mxu0 %vm38_vm2, %v26440_v33  ;;  %v12833_v33 = vld [vmem:[#allocation3 + $0x218] sm:$0xff] }
 0xab8   :  { %19435 = vmatprep.mubr.msk.f32.mxu0 %vm38_vm2, %v12826_v0  ;;  %v13524_v0 = vld [vmem:[#allocation3 + $0xe1] sm:$0xff] }
 0xabb   :  { %19436 = vmatmul.mubr.msk.f32.gmra.mrb[62].mxu0 %vm38_vm2, %v12827_v25  ;;  %v13525_v25 = vld [vmem:[#allocation3 + $0xf1] sm:$0xff] }
 0xabc   :  { %19438 = vmatprep.mubr.msk.f32.mxu0 %vm38_vm2, %v12828_v31  ;;  %v13526_v31 = vld [vmem:[#allocation3 + $0xf9] sm:$0xff] }
 0xabf   :  { %19439 = vmatmul.mubr.msk.f32.gmra.mrb[64].mxu0 %vm38_vm2, %v12829_v23  ;;  %v13527_v23 = vld [vmem:[#allocation3 + $0x109] sm:$0xff] }
 0xac0   :  { %19441 = vmatprep.mubr.msk.f32.mxu0 %vm38_vm2, %v12830_v5  ;;  %v13528_v5 = vld [vmem:[#allocation3 + $0x111] sm:$0xff] }
 0xac3   :  { %19442 = vmatmul.mubr.msk.f32.gmra.mrb[66].mxu0 %vm38_vm2, %v12831_v16  ;;  %v13529_v16 = vld [vmem:[#allocation3 + $0x121] sm:$0xff] }
 0xac4   :  { %19444 = vmatprep.mubr.msk.f32.mxu0 %vm38_vm2, %v12832_v8  ;;  %v13530_v8 = vld [vmem:[#allocation3 + $0x129] sm:$0xff] }
 0xac7   :  { %19445 = vmatmul.mubr.msk.f32.gmra.mrb[68].mxu0 %vm38_vm2, %v12833_v33  ;;  %v13531_v33 = vld [vmem:[#allocation3 + $0x139] sm:$0xff] }
 0xac8   :  { %19447 = vmatprep.mubr.msk.f32.mxu0 %vm38_vm2, %v12834_v2  ;;  %v13532_v2 = vld [vmem:[#allocation3 + $0x141] sm:$0xff] }
 0xacb   :  { %19448 = vmatmul.mubr.msk.f32.gmra.mrb[70].mxu0 %vm38_vm2, %v12835_v50  ;;  %v13533_v50 = vld [vmem:[#allocation3 + $0x151] sm:$0xff] }
 0xacc   :  { %19450 = vmatprep.mubr.msk.f32.mxu0 %vm38_vm2, %v12836_v9  ;;  %v13534_v9 = vld [vmem:[#allocation3 + $0x159] sm:$0xff] }
 0xacf   :  { %19451 = vmatmul.mubr.msk.f32.gmra.mrb[72].mxu0 %vm38_vm2, %v12837_v27  ;;  %v13535_v27 = vld [vmem:[#allocation3 + $0x169] sm:$0xff] }
 0xad0   :  { %19453 = vmatprep.mubr.msk.f32.mxu0 %vm38_vm2, %v12838_v48  ;;  %v13536_v48 = vld [vmem:[#allocation3 + $0x171] sm:$0xff] }
 0xad3   :  { %19454 = vmatmul.mubr.msk.f32.gmra.mrb[74].mxu0 %vm38_vm2, %v12839_v37  ;;  %v13539_v37 = vld [vmem:[#allocation3 + $0x199] sm:$0xff] }
 0xad4   :  { %19456 = vmatprep.mubr.msk.f32.mxu0 %vm38_vm2, %v12840_v13  ;;  %v13540_v13 = vld [vmem:[#allocation3 + $0x1a1] sm:$0xff] }
 0xad7   :  { %19457 = vmatmul.mubr.msk.f32.gmra.mrb[76].mxu0 %vm38_vm2, %v12841_v12  ;;  %v13541_v12 = vld [vmem:[#allocation3 + $0x1e1] sm:$0xff] }
 0xad8   :  { %19459 = vmatprep.mubr.msk.f32.mxu0 %vm38_vm2, %v12842_v36  ;;  %v13542_v36 = vld [vmem:[#allocation3 + $0x1e9] sm:$0xff] }
 0xadb   :  { %19460 = vmatmul.mubr.msk.f32.gmra.mrb[78].mxu0 %vm38_vm2, %v12843_v32  ;;  %v13543_v32 = vld [vmem:[#allocation3 + $0x1f9] sm:$0xff] }
 0xadc   :  { %19462 = vmatprep.mubr.msk.f32.mxu0 %vm38_vm2, %v12844_v1  ;;  %v13544_v1 = vld [vmem:[#allocation3 + $0x201] sm:$0xff] }
 0xadf   :  { %19463 = vmatmul.mubr.msk.f32.gmra.mrb[80].mxu0 %vm38_vm2, %v12845_v10  ;;  %v13547_v10 = vld [vmem:[#allocation3 + $0x229] sm:$0xff] }
 0xae0   :  { %19465 = vmatprep.mubr.msk.f32.mxu0 %vm38_vm2, %v12846_v28  ;;  %v13548_v28 = vld [vmem:[#allocation3 + $0x231] sm:$0xff] }
 0xae3   :  { %19466 = vmatmul.mubr.msk.f32.gmra.mrb[82].mxu0 %vm38_vm2, %v12847_v56  ;;  %v13549_v56 = vld [vmem:[#allocation3 + $0x241] sm:$0xff] }
 0xae4   :  { %19468 = vmatprep.mubr.msk.f32.mxu0 %vm38_vm2, %v12848_v6  ;;  %v13550_v6 = vld [vmem:[#allocation3 + $0x249] sm:$0xff] }
 0xae7   :  { %19469 = vmatmul.mubr.msk.f32.gmra.mrb[84].mxu0 %vm38_vm2, %v12849_v43  ;;  %v13551_v43 = vld [vmem:[#allocation3 + $0x259] sm:$0xff] }
 0xae8   :  { %19471 = vmatprep.mubr.msk.f32.mxu0 %vm38_vm2, %v12850_v3  ;;  %v13552_v3 = vld [vmem:[#allocation3 + $0x261] sm:$0xff] }
 0xaeb   :  { %19472 = vmatmul.mubr.msk.f32.gmra.mrb[86].mxu0 %vm38_vm2, %v12851_v42  ;;  %v13553_v42 = vld [vmem:[#allocation3 + $0x271] sm:$0xff] }
 0xaec   :  { %19474 = vmatprep.mubr.msk.f32.mxu0 %vm38_vm2, %v12852_v7  ;;  %v13554_v7 = vld [vmem:[#allocation3 + $0x279] sm:$0xff] }
 0xaef   :  { %19475 = vmatmul.mubr.msk.f32.gmra.mrb[88].mxu0 %vm38_vm2, %v12853_v62  ;;  %v13555_v62 = vld [vmem:[#allocation3 + $0x289] sm:$0xff] }
 0xaf0   :  { %19477 = vmatprep.mubr.msk.f32.mxu0 %vm38_vm2, %v12854_v44  ;;  %v13556_v44 = vld [vmem:[#allocation3 + $0x291] sm:$0xff] }
 0xaf3   :  { %19478 = vmatmul.mubr.msk.f32.gmra.mrb[90].mxu0 %vm38_vm2, %v12855_v59  ;;  %v13557_v59 = vld [vmem:[#allocation3 + $0x2a1] sm:$0xff] }
 0xaf4   :  { %19480 = vmatprep.mubr.msk.f32.mxu0 %vm38_vm2, %v26504_v47  ;;  %v19994_v47 = vpack.c.bf16 %v14289_v51, %v14288_v22  ;;  %v13560_v22 = vld [vmem:[#allocation3 + $0x2c1] sm:$0xff]  ;;  %v13561_v51 = vld [vmem:[#allocation3 + $0x2d1] sm:$0xff] }
 0xaf7   :  { %19481 = vmatmul.mubr.msk.f32.gmra.mrb[92].mxu0 %vm38_vm2, %v26508_v39  ;;  %v14290_v39 = vld [vmem:[%s27359_s9 + $0x220] sm:$0xff] }
 0xaf8   :  { %19483 = vmatprep.mubr.msk.f32.mxu0 %vm38_vm2, %v12858_v4  ;;  %v19998_v34 = vpack.c.bf16 %v14291_v24, %v14290_v39  ;;  %v13558_v4 = vld [vmem:[#allocation3 + $0x2a9] sm:$0xff]  ;;  %v13565_v39 = vld [vmem:[#allocation3 + $0x301] sm:$0xff] }
 0xaf9   :  { %v13566_v24 = vld [vmem:[#allocation3 + $0x309] sm:$0xff] }
 0xafb   :  { %19484 = vmatmul.mubr.msk.f32.gmra.mrb[94].mxu0 %vm38_vm2, %v12859_v11  ;;  %v13559_v11 = vld [vmem:[#allocation3 + $0x2b9] sm:$0xff] }
 0xafc   :  { %19502 = vmatprep.mubr.msk.f32.mxu0 %vm38_vm2, %v13509_v49  ;;  %v13562_v49 = vld [vmem:[#allocation3 + $0x2d9] sm:$0xff] }
 0xaff   :  { %19503 = vmatmul.mubr.msk.f32.vlgmr.msra.gmra.mrb[32].mxu0 %vm38_vm2, %v13510_v52  ;;  %v13564_v52 = vld [vmem:[#allocation3 + $0x2f1] sm:$0xff] }
 0xb00   :  { %19993 = vmatpush3.bf16.msra.mxu0 %v26872_v63  ;;  %19505 = vmatprep.mubr.msk.f32.mxu0 %vm38_vm2, %v13511_v60  ;;  %v20002_v63 = vpack.c.bf16 %v14293_v35, %v14292_v40  ;;  %v13567_v60 = vld [vmem:[#allocation3 + $0x319] sm:$0xff]  ;;  %v13572_v40 = vld [vmem:[#allocation3 + $0x351] sm:$0xff] }
 0xb01   :  { %19995 = vmatprep.subr.bf16.mxu0 %v19994_v47  ;;  %v14222_v35 = vld [vmem:[#allocation3 + $0x32] sm:$0xff] }
 0xb03   :  { %19506 = vmatmul.mubr.msk.f32.gmra.mrb[34].mxu0 %vm38_vm2, %v13512_v55  ;;  %v13571_v55 = vld [vmem:[#allocation3 + $0x349] sm:$0xff] }
 0xb04   :  { %19508 = vmatprep.mubr.msk.f32.mxu0 %vm38_vm2, %v13513_v45  ;;  %19997 = vmatpush3.bf16.msra.mxu0 %v19994_v47  ;;  %v13563_v47 = vld [vmem:[#allocation3 + $0x2e9] sm:$0xff]  ;;  %v14223_v45 = vld [vmem:[#allocation3 + $0x3a] sm:$0xff] }
 0xb05   :  { %19999 = vmatprep.subr.bf16.mxu0 %v19998_v34 }
 0xb07   :  { %19509 = vmatmul.mubr.msk.f32.gmra.mrb[36].mxu0 %vm38_vm2, %v13514_v26  ;;  %v14225_v26 = vld [vmem:[#allocation3 + $0x52] sm:$0xff] }
 0xb08   :  { %19511 = vmatprep.mubr.msk.f32.mxu0 %vm38_vm2, %v13515_v19  ;;  %20001 = vmatpush3.bf16.msra.mxu0 %v19998_v34  ;;  %v13568_v34 = vld [vmem:[#allocation3 + $0x321] sm:$0xff] }
 0xb09   :  { %20003 = vmatprep.subr.bf16.mxu0 %v20002_v63  ;;  %v14228_v19 = vld [vmem:[#allocation3 + $0x7a] sm:$0xff] }
 0xb0b   :  { %19512 = vmatmul.mubr.msk.f32.gmra.mrb[38].mxu0 %vm38_vm2, %v13516_v30  ;;  %v14229_v30 = vld [vmem:[#allocation3 + $0x82] sm:$0xff] }
 0xb0c   :  { %19514 = vmatprep.mubr.msk.f32.mxu0 %vm38_vm2, %v13517_v61  ;;  %20005 = vmatpush3.bf16.msra.mxu0 %v20002_v63  ;;  %v14224_v63 = vld [vmem:[#allocation3 + $0x4a] sm:$0xff]  ;;  %v14230_v61 = vld [vmem:[#allocation3 + $0x92] sm:$0xff] }
 0xb0f   :  { %19515 = vmatmul.mubr.msk.f32.gmra.mrb[40].mxu0 %vm38_vm2, %v13518_v58  ;;  %v14231_v58 = vld [vmem:[#allocation3 + $0x9a] sm:$0xff] }
 0xb10   :  { %19517 = vmatprep.mubr.msk.f32.mxu0 %vm38_vm2, %v13519_v38  ;;  %v14232_v38 = vld [vmem:[#allocation3 + $0xaa] sm:$0xff] }
 0xb13   :  { %19518 = vmatmul.mubr.msk.f32.gmra.mrb[42].mxu0 %vm38_vm2, %v13520_v20  ;;  %v14233_v20 = vld [vmem:[#allocation3 + $0xb2] sm:$0xff] }
 0xb14   :  { %19520 = vmatprep.mubr.msk.f32.mxu0 %vm38_vm2, %v13521_v18  ;;  %v14234_v18 = vld [vmem:[#allocation3 + $0xc2] sm:$0xff] }
 0xb17   :  { %19521 = vmatmul.mubr.msk.f32.gmra.mrb[44].mxu0 %vm38_vm2, %v13522_v17  ;;  %v14235_v17 = vld [vmem:[#allocation3 + $0xca] sm:$0xff] }
 0xb18   :  { %19523 = vmatprep.mubr.msk.f32.mxu0 %vm38_vm2, %v13523_v46  ;;  %v14236_v46 = vld [vmem:[#allocation3 + $0xda] sm:$0xff] }
 0xb1b   :  { %19524 = vmatmul.mubr.msk.f32.gmra.mrb[46].mxu0 %vm38_vm2, %v13524_v0  ;;  %v14237_v0 = vld [vmem:[#allocation3 + $0xe2] sm:$0xff] }
 0xb1c   :  { %19526 = vmatprep.mubr.msk.f32.mxu0 %vm38_vm2, %v13525_v25  ;;  %v14238_v25 = vld [vmem:[#allocation3 + $0xf2] sm:$0xff] }
 0xb1f   :  { %19527 = vmatmul.mubr.msk.f32.gmra.mrb[48].mxu0 %vm38_vm2, %v13526_v31  ;;  %v14239_v31 = vld [vmem:[#allocation3 + $0xfa] sm:$0xff] }
 0xb20   :  { %19529 = vmatprep.mubr.msk.f32.mxu0 %vm38_vm2, %v13527_v23  ;;  %v14240_v23 = vld [vmem:[#allocation3 + $0x10a] sm:$0xff] }
 0xb23   :  { %19530 = vmatmul.mubr.msk.f32.gmra.mrb[50].mxu0 %vm38_vm2, %v13528_v5  ;;  %v14241_v5 = vld [vmem:[#allocation3 + $0x112] sm:$0xff] }
 0xb24   :  { %19532 = vmatprep.mubr.msk.f32.mxu0 %vm38_vm2, %v13529_v16  ;;  %v14242_v16 = vld [vmem:[#allocation3 + $0x122] sm:$0xff] }
 0xb27   :  { %19533 = vmatmul.mubr.msk.f32.gmra.mrb[52].mxu0 %vm38_vm2, %v13530_v8  ;;  %v14243_v8 = vld [vmem:[#allocation3 + $0x12a] sm:$0xff] }
 0xb28   :  { %19535 = vmatprep.mubr.msk.f32.mxu0 %vm38_vm2, %v13531_v33  ;;  %v14244_v33 = vld [vmem:[#allocation3 + $0x13a] sm:$0xff] }
 0xb2b   :  { %19536 = vmatmul.mubr.msk.f32.gmra.mrb[54].mxu0 %vm38_vm2, %v13532_v2  ;;  %v14245_v2 = vld [vmem:[#allocation3 + $0x142] sm:$0xff] }
 0xb2c   :  { %19538 = vmatprep.mubr.msk.f32.mxu0 %vm38_vm2, %v13533_v50  ;;  %v14246_v50 = vld [vmem:[#allocation3 + $0x152] sm:$0xff] }
 0xb2f   :  { %19539 = vmatmul.mubr.msk.f32.gmra.mrb[56].mxu0 %vm38_vm2, %v13534_v9  ;;  %v14247_v9 = vld [vmem:[#allocation3 + $0x15a] sm:$0xff] }
 0xb30   :  { %19541 = vmatprep.mubr.msk.f32.mxu0 %vm38_vm2, %v13535_v27  ;;  %v14248_v27 = vld [vmem:[#allocation3 + $0x16a] sm:$0xff] }
 0xb33   :  { %19542 = vmatmul.mubr.msk.f32.gmra.mrb[58].mxu0 %vm38_vm2, %v13536_v48  ;;  %v14249_v48 = vld [vmem:[#allocation3 + $0x172] sm:$0xff] }
 0xb34   :  { %19544 = vmatprep.mubr.msk.f32.mxu0 %vm38_vm2, %v26600_v53  ;;  %v13545_v53 = vld [vmem:[#allocation3 + $0x211] sm:$0xff] }
 0xb37   :  { %19545 = vmatmul.mubr.msk.f32.gmra.mrb[60].mxu0 %vm38_vm2, %v26604_v41  ;;  %v13546_v41 = vld [vmem:[#allocation3 + $0x219] sm:$0xff] }
 0xb38   :  { %19547 = vmatprep.mubr.msk.f32.mxu0 %vm38_vm2, %v13539_v37  ;;  %v14252_v37 = vld [vmem:[#allocation3 + $0x19a] sm:$0xff] }
 0xb3b   :  { %19548 = vmatmul.mubr.msk.f32.gmra.mrb[62].mxu0 %vm38_vm2, %v13540_v13  ;;  %v14253_v13 = vld [vmem:[#allocation3 + $0x1a2] sm:$0xff] }
 0xb3c   :  { %19550 = vmatprep.mubr.msk.f32.mxu0 %vm38_vm2, %v13541_v12  ;;  %v14254_v12 = vld [vmem:[#allocation3 + $0x1e2] sm:$0xff] }
 0xb3f   :  { %19551 = vmatmul.mubr.msk.f32.gmra.mrb[64].mxu0 %vm38_vm2, %v13542_v36  ;;  %v14255_v36 = vld [vmem:[#allocation3 + $0x1ea] sm:$0xff] }
 0xb40   :  { %19553 = vmatprep.mubr.msk.f32.mxu0 %vm38_vm2, %v13543_v32  ;;  %v14256_v32 = vld [vmem:[#allocation3 + $0x1fa] sm:$0xff] }
 0xb43   :  { %19554 = vmatmul.mubr.msk.f32.gmra.mrb[66].mxu0 %vm38_vm2, %v13544_v1  ;;  %v14257_v1 = vld [vmem:[#allocation3 + $0x202] sm:$0xff] }
 0xb44   :  { %19556 = vmatprep.mubr.msk.f32.mxu0 %vm38_vm2, %v13545_v53  ;;  %v14260_v53 = vld [vmem:[#allocation3 + $0x22a] sm:$0xff] }
 0xb47   :  { %19557 = vmatmul.mubr.msk.f32.gmra.mrb[68].mxu0 %vm38_vm2, %v13546_v41  ;;  %v14261_v41 = vld [vmem:[#allocation3 + $0x232] sm:$0xff] }
 0xb48   :  { %19559 = vmatprep.mubr.msk.f32.mxu0 %vm38_vm2, %v13547_v10  ;;  %v14262_v10 = vld [vmem:[#allocation3 + $0x242] sm:$0xff] }
 0xb4b   :  { %19560 = vmatmul.mubr.msk.f32.gmra.mrb[70].mxu0 %vm38_vm2, %v13548_v28  ;;  %v14263_v28 = vld [vmem:[#allocation3 + $0x24a] sm:$0xff] }
 0xb4c   :  { %19562 = vmatprep.mubr.msk.f32.mxu0 %vm38_vm2, %v13549_v56  ;;  %v14264_v56 = vld [vmem:[#allocation3 + $0x25a] sm:$0xff] }
 0xb4f   :  { %19563 = vmatmul.mubr.msk.f32.gmra.mrb[72].mxu0 %vm38_vm2, %v13550_v6  ;;  %v14265_v6 = vld [vmem:[#allocation3 + $0x262] sm:$0xff] }
 0xb50   :  { %19565 = vmatprep.mubr.msk.f32.mxu0 %vm38_vm2, %v13551_v43  ;;  %v14266_v43 = vld [vmem:[#allocation3 + $0x272] sm:$0xff] }
 0xb53   :  { %19566 = vmatmul.mubr.msk.f32.gmra.mrb[74].mxu0 %vm38_vm2, %v13552_v3  ;;  %v14267_v3 = vld [vmem:[#allocation3 + $0x27a] sm:$0xff] }
 0xb54   :  { %19568 = vmatprep.mubr.msk.f32.mxu0 %vm38_vm2, %v13553_v42  ;;  %v14268_v42 = vld [vmem:[#allocation3 + $0x28a] sm:$0xff] }
 0xb57   :  { %19569 = vmatmul.mubr.msk.f32.gmra.mrb[76].mxu0 %vm38_vm2, %v13554_v7  ;;  %v14269_v7 = vld [vmem:[#allocation3 + $0x292] sm:$0xff] }
 0xb58   :  { %19571 = vmatprep.mubr.msk.f32.mxu0 %vm38_vm2, %v13555_v62  ;;  %v14270_v62 = vld [vmem:[#allocation3 + $0x2a2] sm:$0xff] }
 0xb5b   :  { %19572 = vmatmul.mubr.msk.f32.gmra.mrb[78].mxu0 %vm38_vm2, %v13556_v44  ;;  %v14271_v44 = vld [vmem:[#allocation3 + $0x2aa] sm:$0xff] }
 0xb5c   :  { %19574 = vmatprep.mubr.msk.f32.mxu0 %vm38_vm2, %v13557_v59  ;;  %v14272_v59 = vld [vmem:[#allocation3 + $0x2ba] sm:$0xff] }
 0xb5f   :  { %19575 = vmatmul.mubr.msk.f32.gmra.mrb[80].mxu0 %vm38_vm2, %v13558_v4  ;;  %v14273_v4 = vld [vmem:[#allocation3 + $0x2c2] sm:$0xff] }
 0xb60   :  { %19577 = vmatprep.mubr.msk.f32.mxu0 %vm38_vm2, %v13559_v11  ;;  %v14274_v11 = vld [vmem:[#allocation3 + $0x2d2] sm:$0xff] }
 0xb63   :  { %19578 = vmatmul.mubr.msk.f32.gmra.mrb[82].mxu0 %vm38_vm2, %v13560_v22  ;;  %v14275_v22 = vld [vmem:[#allocation3 + $0x2da] sm:$0xff] }
 0xb64   :  { %19580 = vmatprep.mubr.msk.f32.mxu0 %vm38_vm2, %v13561_v51  ;;  %v14276_v51 = vld [vmem:[#allocation3 + $0x2ea] sm:$0xff] }
 0xb67   :  { %19581 = vmatmul.mubr.msk.f32.gmra.mrb[84].mxu0 %vm38_vm2, %v13562_v49  ;;  %v14277_v49 = vld [vmem:[#allocation3 + $0x2f2] sm:$0xff] }
 0xb68   :  { %19583 = vmatprep.mubr.msk.f32.mxu0 %vm38_vm2, %v13563_v47  ;;  %v14278_v47 = vld [vmem:[#allocation3 + $0x302] sm:$0xff] }
 0xb6b   :  { %19584 = vmatmul.mubr.msk.f32.gmra.mrb[86].mxu0 %vm38_vm2, %v13564_v52  ;;  %v14279_v52 = vld [vmem:[#allocation3 + $0x30a] sm:$0xff] }
 0xb6c   :  { %19586 = vmatprep.mubr.msk.f32.mxu0 %vm38_vm2, %v13565_v39  ;;  %v14280_v39 = vld [vmem:[#allocation3 + $0x31a] sm:$0xff] }
 0xb6f   :  { %19587 = vmatmul.mubr.msk.f32.gmra.mrb[88].mxu0 %vm38_vm2, %v13566_v24  ;;  %v14281_v24 = vld [vmem:[#allocation3 + $0x322] sm:$0xff] }
 0xb70   :  { %19589 = vmatprep.mubr.msk.f32.mxu0 %vm38_vm2, %v13567_v60  ;;  %v14284_v60 = vld [vmem:[#allocation3 + $0x34a] sm:$0xff] }
 0xb73   :  { %19590 = vmatmul.mubr.msk.f32.gmra.mrb[90].mxu0 %vm38_vm2, %v13568_v34  ;;  %v14285_v34 = vld [vmem:[#allocation3 + $0x352] sm:$0xff] }
 0xb74   :  { %19592 = vmatprep.mubr.msk.f32.mxu0 %vm38_vm2, %v26668_v54  ;;  %v14226_v54 = vld [vmem:[#allocation3 + $0x62] sm:$0xff] }
 0xb77   :  { %19593 = vmatmul.mubr.msk.f32.gmra.mrb[92].mxu0 %vm38_vm2, %v26672_v14  ;;  %v14227_v14 = vld [vmem:[#allocation3 + $0x6a] sm:$0xff] }
 0xb78   :  { %19595 = vmatprep.mubr.msk.f32.mxu0 %vm38_vm2, %v13571_v55  ;;  %v27094_v55 = vld [vmem:[%s27362_s10] ss:$0 sm:$0xff] }
 0xb7b   :  { %19596 = vmatmul.mubr.msk.f32.gmra.mrb[94].mxu0 %vm38_vm2, %v13572_v40 }
 0xb7c   :  { %19614 = vmatprep.mubr.msk.f32.mxu0 %vm38_vm2, %v14222_v35 }
 0xb7f   :  { %19615 = vmatmul.mubr.msk.f32.vlgmr.msra.gmra.mrb[32].mxu0 %vm38_vm2, %v14223_v45 }
 0xb80   :  { %19617 = vmatprep.mubr.msk.f32.mxu0 %vm38_vm2, %v14224_v63 }
 0xb83   :  { %19618 = vmatmul.mubr.msk.f32.gmra.mrb[34].mxu0 %vm38_vm2, %v14225_v26 }
 0xb84   :  { %19620 = vmatprep.mubr.msk.f32.mxu0 %vm38_vm2, %v14226_v54 }
 0xb87   :  { %19621 = vmatmul.mubr.msk.f32.gmra.mrb[36].mxu0 %vm38_vm2, %v14227_v14 }
 0xb88   :  { %19623 = vmatprep.mubr.msk.f32.mxu0 %vm38_vm2, %v14228_v19 }
 0xb8b   :  { %19624 = vmatmul.mubr.msk.f32.gmra.mrb[38].mxu0 %vm38_vm2, %v14229_v30 }
 0xb8c   :  { %19626 = vmatprep.mubr.msk.f32.mxu0 %vm38_vm2, %v14230_v61 }
 0xb8f   :  { %19627 = vmatmul.mubr.msk.f32.gmra.mrb[40].mxu0 %vm38_vm2, %v14231_v58 }
 0xb90   :  { %19629 = vmatprep.mubr.msk.f32.mxu0 %vm38_vm2, %v14232_v38 }
 0xb93   :  { %19630 = vmatmul.mubr.msk.f32.gmra.mrb[42].mxu0 %vm38_vm2, %v14233_v20 }
 0xb94   :  { %19632 = vmatprep.mubr.msk.f32.mxu0 %vm38_vm2, %v14234_v18 }
 0xb97   :  { %19633 = vmatmul.mubr.msk.f32.gmra.mrb[44].mxu0 %vm38_vm2, %v14235_v17 }
 0xb98   :  { %19635 = vmatprep.mubr.msk.f32.mxu0 %vm38_vm2, %v14236_v46 }
 0xb9b   :  { %19636 = vmatmul.mubr.msk.f32.gmra.mrb[46].mxu0 %vm38_vm2, %v14237_v0 }
 0xb9c   :  { %19638 = vmatprep.mubr.msk.f32.mxu0 %vm38_vm2, %v14238_v25 }
 0xb9f   :  { %19639 = vmatmul.mubr.msk.f32.gmra.mrb[48].mxu0 %vm38_vm2, %v14239_v31 }
 0xba0   :  { %19641 = vmatprep.mubr.msk.f32.mxu0 %vm38_vm2, %v14240_v23 }
 0xba3   :  { %19642 = vmatmul.mubr.msk.f32.gmra.mrb[50].mxu0 %vm38_vm2, %v14241_v5 }
 0xba4   :  { %19644 = vmatprep.mubr.msk.f32.mxu0 %vm38_vm2, %v14242_v16 }
 0xba7   :  { %19645 = vmatmul.mubr.msk.f32.gmra.mrb[52].mxu0 %vm38_vm2, %v14243_v8 }
 0xba8   :  { %19647 = vmatprep.mubr.msk.f32.mxu0 %vm38_vm2, %v14244_v33 }
 0xbab   :  { %19648 = vmatmul.mubr.msk.f32.gmra.mrb[54].mxu0 %vm38_vm2, %v14245_v2 }
 0xbac   :  { %19650 = vmatprep.mubr.msk.f32.mxu0 %vm38_vm2, %v14246_v50 }
 0xbaf   :  { %19651 = vmatmul.mubr.msk.f32.gmra.mrb[56].mxu0 %vm38_vm2, %v14247_v9 }
 0xbb0   :  { %19653 = vmatprep.mubr.msk.f32.mxu0 %vm38_vm2, %v14248_v27 }
 0xbb3   :  { %19654 = vmatmul.mubr.msk.f32.gmra.mrb[58].mxu0 %vm38_vm2, %v14249_v48 }
 0xbb4   :  { %19656 = vmatprep.mubr.msk.f32.mxu0 %vm38_vm2, %v26764_v29  ;;  %v14258_v29 = vld [vmem:[#allocation3 + $0x212] sm:$0xff] }
 0xbb7   :  { %19657 = vmatmul.mubr.msk.f32.gmra.mrb[60].mxu0 %vm38_vm2, %v26768_v57  ;;  %v14259_v57 = vld [vmem:[#allocation3 + $0x21a] sm:$0xff] }
 0xbb8   :  { %19659 = vmatprep.mubr.msk.f32.mxu0 %vm38_vm2, %v14252_v37 }
 0xbbb   :  { %19660 = vmatmul.mubr.msk.f32.gmra.mrb[62].mxu0 %vm38_vm2, %v14253_v13 }
 0xbbc   :  { %19662 = vmatprep.mubr.msk.f32.mxu0 %vm38_vm2, %v14254_v12 }
 0xbbf   :  { %19663 = vmatmul.mubr.msk.f32.gmra.mrb[64].mxu0 %vm38_vm2, %v14255_v36 }
 0xbc0   :  { %19665 = vmatprep.mubr.msk.f32.mxu0 %vm38_vm2, %v14256_v32 }
 0xbc3   :  { %19666 = vmatmul.mubr.msk.f32.gmra.mrb[66].mxu0 %vm38_vm2, %v14257_v1 }
 0xbc4   :  { %19668 = vmatprep.mubr.msk.f32.mxu0 %vm38_vm2, %v14258_v29 }
 0xbc7   :  { %19669 = vmatmul.mubr.msk.f32.gmra.mrb[68].mxu0 %vm38_vm2, %v14259_v57 }
 0xbc8   :  { %19671 = vmatprep.mubr.msk.f32.mxu0 %vm38_vm2, %v14260_v53 }
 0xbcb   :  { %19672 = vmatmul.mubr.msk.f32.gmra.mrb[70].mxu0 %vm38_vm2, %v14261_v41 }
 0xbcc   :  { %19674 = vmatprep.mubr.msk.f32.mxu0 %vm38_vm2, %v14262_v10 }
 0xbcf   :  { %19675 = vmatmul.mubr.msk.f32.gmra.mrb[72].mxu0 %vm38_vm2, %v14263_v28 }
 0xbd0   :  { %19677 = vmatprep.mubr.msk.f32.mxu0 %vm38_vm2, %v14264_v56 }
 0xbd3   :  { %19678 = vmatmul.mubr.msk.f32.gmra.mrb[74].mxu0 %vm38_vm2, %v14265_v6 }
 0xbd4   :  { %19680 = vmatprep.mubr.msk.f32.mxu0 %vm38_vm2, %v14266_v43 }
 0xbd7   :  { %19681 = vmatmul.mubr.msk.f32.gmra.mrb[76].mxu0 %vm38_vm2, %v14267_v3 }
 0xbd8   :  { %19683 = vmatprep.mubr.msk.f32.mxu0 %vm38_vm2, %v14268_v42 }
 0xbdb   :  { %19684 = vmatmul.mubr.msk.f32.gmra.mrb[78].mxu0 %vm38_vm2, %v14269_v7 }
 0xbdc   :  { %19686 = vmatprep.mubr.msk.f32.mxu0 %vm38_vm2, %v14270_v62 }
 0xbdf   :  { %19687 = vmatmul.mubr.msk.f32.gmra.mrb[80].mxu0 %vm38_vm2, %v14271_v44 }
 0xbe0   :  { %19689 = vmatprep.mubr.msk.f32.mxu0 %vm38_vm2, %v14272_v59 }
 0xbe3   :  { %19690 = vmatmul.mubr.msk.f32.gmra.mrb[82].mxu0 %vm38_vm2, %v14273_v4 }
 0xbe4   :  { %19692 = vmatprep.mubr.msk.f32.mxu0 %vm38_vm2, %v14274_v11 }
 0xbe7   :  { %19693 = vmatmul.mubr.msk.f32.gmra.mrb[84].mxu0 %vm38_vm2, %v14275_v22 }
 0xbe8   :  { %19695 = vmatprep.mubr.msk.f32.mxu0 %vm38_vm2, %v14276_v51 }
 0xbeb   :  { %19696 = vmatmul.mubr.msk.f32.gmra.mrb[86].mxu0 %vm38_vm2, %v14277_v49 }
 0xbec   :  { %19698 = vmatprep.mubr.msk.f32.mxu0 %vm38_vm2, %v14278_v47 }
 0xbef   :  { %19699 = vmatmul.mubr.msk.f32.gmra.mrb[88].mxu0 %vm38_vm2, %v14279_v52 }
 0xbf0   :  { %19701 = vmatprep.mubr.msk.f32.mxu0 %vm38_vm2, %v14280_v39 }
 0xbf3   :  { %19702 = vmatmul.mubr.msk.f32.gmra.mrb[90].mxu0 %vm38_vm2, %v14281_v24 }
 0xbf4   :  { %19704 = vmatprep.mubr.msk.f32.mxu0 %vm38_vm2, %v26832_v15 }
 0xbf7   :  { %19705 = vmatmul.mubr.msk.f32.gmra.mrb[92].mxu0 %vm38_vm2, %v26836_v21 }
 0xbf8   :  { %19707 = vmatprep.mubr.msk.f32.mxu0 %vm38_vm2, %v14284_v60 }
 0xbfb   :  { %19708 = vmatmul.mubr.msk.f32.gmra.mrb[94].mxu0 %vm38_vm2, %v14285_v34 }
 0xc52   :  { %v19616_v40 = vpop.f32.mrb[32].mxu0 }
 0xc53   :  { %v20076_v35 = vadd.f32 %v19616_v40, %v27094_v55  ;;  %v14552_v45 = vpop.f32.mrb[33].mxu0 }
 0xc54   :  { %v20077_v15 = vadd.f32 %v27094_v55, %v14552_v45 }
 0xc55   :  { %14936 = vst [vmem:[%s27363_s11 + $0x8] sm:$0xff] %v20076_v35 }
 0xc56   :  { %14935 = vst [vmem:[%s27363_s11] sm:$0xff] %v20077_v15  ;;  %v19619_v21 = vpop.f32.mrb[34].mxu0 }
 0xc57   :  { %v20078_v63 = vadd.f32 %v19619_v21, %v27094_v55  ;;  %v14562_v26 = vpop.f32.mrb[35].mxu0 }
 0xc58   :  { %v20079_v54 = vadd.f32 %v27094_v55, %v14562_v26 }
 0xc59   :  { %14938 = vst [vmem:[%s27363_s11 + $0x18] sm:$0xff] %v20078_v63 }
 0xc5a   :  { %14937 = vst [vmem:[%s27363_s11 + $0x10] sm:$0xff] %v20079_v54  ;;  %v19622_v14 = vpop.f32.mrb[36].mxu0 }
 0xc5b   :  { %v20080_v19 = vadd.f32 %v19622_v14, %v27094_v55  ;;  %v14572_v30 = vpop.f32.mrb[37].mxu0 }
 0xc5c   :  { %v20081_v61 = vadd.f32 %v27094_v55, %v14572_v30 }
 0xc5d   :  { %14940 = vst [vmem:[%s27363_s11 + $0x28] sm:$0xff] %v20080_v19 }
 0xc5e   :  { %14939 = vst [vmem:[%s27363_s11 + $0x20] sm:$0xff] %v20081_v61  ;;  %v19625_v58 = vpop.f32.mrb[38].mxu0 }
 0xc5f   :  { %v20082_v38 = vadd.f32 %v19625_v58, %v27094_v55  ;;  %v14582_v20 = vpop.f32.mrb[39].mxu0 }
 0xc60   :  { %v20083_v18 = vadd.f32 %v27094_v55, %v14582_v20 }
 0xc61   :  { %14942 = vst [vmem:[%s27363_s11 + $0x38] sm:$0xff] %v20082_v38 }
 0xc62   :  { %14941 = vst [vmem:[%s27363_s11 + $0x30] sm:$0xff] %v20083_v18  ;;  %v19628_v17 = vpop.f32.mrb[40].mxu0 }
 0xc63   :  { %v20084_v46 = vadd.f32 %v19628_v17, %v27094_v55  ;;  %v14592_v0 = vpop.f32.mrb[41].mxu0 }
 0xc64   :  { %v20085_v25 = vadd.f32 %v27094_v55, %v14592_v0 }
 0xc65   :  { %14944 = vst [vmem:[%s27363_s11 + $0x48] sm:$0xff] %v20084_v46 }
 0xc66   :  { %14943 = vst [vmem:[%s27363_s11 + $0x40] sm:$0xff] %v20085_v25  ;;  %v19631_v31 = vpop.f32.mrb[42].mxu0 }
 0xc67   :  { %v20086_v23 = vadd.f32 %v19631_v31, %v27094_v55  ;;  %v14602_v5 = vpop.f32.mrb[43].mxu0 }
 0xc68   :  { %v20087_v16 = vadd.f32 %v27094_v55, %v14602_v5 }
 0xc69   :  { %14946 = vst [vmem:[%s27363_s11 + $0x58] sm:$0xff] %v20086_v23 }
 0xc6a   :  { %14945 = vst [vmem:[%s27363_s11 + $0x50] sm:$0xff] %v20087_v16  ;;  %v19634_v8 = vpop.f32.mrb[44].mxu0 }
 0xc6b   :  { %v20088_v33 = vadd.f32 %v19634_v8, %v27094_v55  ;;  %v14612_v2 = vpop.f32.mrb[45].mxu0 }
 0xc6c   :  { %v20089_v50 = vadd.f32 %v27094_v55, %v14612_v2 }
 0xc6d   :  { %14948 = vst [vmem:[%s27363_s11 + $0x68] sm:$0xff] %v20088_v33 }
 0xc6e   :  { %14947 = vst [vmem:[%s27363_s11 + $0x60] sm:$0xff] %v20089_v50  ;;  %v19637_v9 = vpop.f32.mrb[46].mxu0 }
 0xc6f   :  { %v20090_v27 = vadd.f32 %v19637_v9, %v27094_v55  ;;  %v14622_v48 = vpop.f32.mrb[47].mxu0 }
 0xc70   :  { %v20091_v37 = vadd.f32 %v27094_v55, %v14622_v48 }
 0xc71   :  { %14950 = vst [vmem:[%s27363_s11 + $0x78] sm:$0xff] %v20090_v27 }
 0xc72   :  { %14949 = vst [vmem:[%s27363_s11 + $0x70] sm:$0xff] %v20091_v37  ;;  %v19640_v13 = vpop.f32.mrb[48].mxu0 }
 0xc73   :  { %v20092_v12 = vadd.f32 %v19640_v13, %v27094_v55  ;;  %v14632_v36 = vpop.f32.mrb[49].mxu0 }
 0xc74   :  { %v20093_v32 = vadd.f32 %v27094_v55, %v14632_v36 }
 0xc75   :  { %14952 = vst [vmem:[%s27363_s11 + $0x88] sm:$0xff] %v20092_v12 }
 0xc76   :  { %14951 = vst [vmem:[%s27363_s11 + $0x80] sm:$0xff] %v20093_v32  ;;  %v19643_v1 = vpop.f32.mrb[50].mxu0 }
 0xc77   :  { %v20094_v29 = vadd.f32 %v19643_v1, %v27094_v55  ;;  %v14642_v57 = vpop.f32.mrb[51].mxu0 }
 0xc78   :  { %v20095_v53 = vadd.f32 %v27094_v55, %v14642_v57 }
 0xc79   :  { %14954 = vst [vmem:[%s27363_s11 + $0x98] sm:$0xff] %v20094_v29 }
 0xc7a   :  { %14953 = vst [vmem:[%s27363_s11 + $0x90] sm:$0xff] %v20095_v53  ;;  %v19646_v41 = vpop.f32.mrb[52].mxu0 }
 0xc7b   :  { %v20096_v10 = vadd.f32 %v19646_v41, %v27094_v55  ;;  %v14652_v28 = vpop.f32.mrb[53].mxu0 }
 0xc7c   :  { %v20097_v56 = vadd.f32 %v27094_v55, %v14652_v28 }
 0xc7d   :  { %14956 = vst [vmem:[%s27363_s11 + $0xa8] sm:$0xff] %v20096_v10 }
 0xc7e   :  { %14955 = vst [vmem:[%s27363_s11 + $0xa0] sm:$0xff] %v20097_v56  ;;  %v19649_v6 = vpop.f32.mrb[54].mxu0 }
 0xc7f   :  { %v20098_v43 = vadd.f32 %v19649_v6, %v27094_v55  ;;  %v14662_v3 = vpop.f32.mrb[55].mxu0 }
 0xc80   :  { %v20099_v42 = vadd.f32 %v27094_v55, %v14662_v3 }
 0xc81   :  { %14958 = vst [vmem:[%s27363_s11 + $0xb8] sm:$0xff] %v20098_v43 }
 0xc82   :  { %14957 = vst [vmem:[%s27363_s11 + $0xb0] sm:$0xff] %v20099_v42  ;;  %v19652_v7 = vpop.f32.mrb[56].mxu0 }
 0xc83   :  { %v20100_v62 = vadd.f32 %v19652_v7, %v27094_v55  ;;  %v14672_v44 = vpop.f32.mrb[57].mxu0 }
 0xc84   :  { %v20101_v59 = vadd.f32 %v27094_v55, %v14672_v44 }
 0xc85   :  { %14960 = vst [vmem:[%s27363_s11 + $0xc8] sm:$0xff] %v20100_v62 }
 0xc86   :  { %14959 = vst [vmem:[%s27363_s11 + $0xc0] sm:$0xff] %v20101_v59  ;;  %v19655_v4 = vpop.f32.mrb[58].mxu0 }
 0xc87   :  { %v20102_v11 = vadd.f32 %v19655_v4, %v27094_v55  ;;  %v14682_v22 = vpop.f32.mrb[59].mxu0 }
 0xc88   :  { %v20103_v51 = vadd.f32 %v27094_v55, %v14682_v22 }
 0xc89   :  { %14962 = vst [vmem:[%s27363_s11 + $0xd8] sm:$0xff] %v20102_v11 }
 0xc8a   :  { %14961 = vst [vmem:[%s27363_s11 + $0xd0] sm:$0xff] %v20103_v51  ;;  %v19658_v49 = vpop.f32.mrb[60].mxu0 }
 0xc8b   :  { %v20104_v47 = vadd.f32 %v19658_v49, %v27094_v55  ;;  %v14692_v52 = vpop.f32.mrb[61].mxu0 }
 0xc8c   :  { %v20105_v39 = vadd.f32 %v27094_v55, %v14692_v52 }
 0xc8d   :  { %14964 = vst [vmem:[%s27363_s11 + $0xe8] sm:$0xff] %v20104_v47 }
 0xc8e   :  { %14963 = vst [vmem:[%s27363_s11 + $0xe0] sm:$0xff] %v20105_v39  ;;  %v19661_v24 = vpop.f32.mrb[62].mxu0 }
 0xc8f   :  { %v20106_v60 = vadd.f32 %v19661_v24, %v27094_v55  ;;  %v14702_v34 = vpop.f32.mrb[63].mxu0 }
 0xc90   :  { %v20107_v40 = vadd.f32 %v27094_v55, %v14702_v34 }
 0xc91   :  { %14966 = vst [vmem:[%s27363_s11 + $0xf8] sm:$0xff] %v20106_v60 }
 0xc92   :  { %14965 = vst [vmem:[%s27363_s11 + $0xf0] sm:$0xff] %v20107_v40  ;;  %v19664_v35 = vpop.f32.mrb[64].mxu0 }
 0xc93   :  { %v20108_v45 = vadd.f32 %v19664_v35, %v27094_v55  ;;  %v14712_v15 = vpop.f32.mrb[65].mxu0 }
 0xc94   :  { %v20109_v21 = vadd.f32 %v27094_v55, %v14712_v15 }
 0xc95   :  { %14968 = vst [vmem:[%s27363_s11 + $0x108] sm:$0xff] %v20108_v45 }
 0xc96   :  { %14967 = vst [vmem:[%s27363_s11 + $0x100] sm:$0xff] %v20109_v21  ;;  %v19667_v63 = vpop.f32.mrb[66].mxu0 }
 0xc97   :  { %v20110_v26 = vadd.f32 %v19667_v63, %v27094_v55  ;;  %v14722_v54 = vpop.f32.mrb[67].mxu0 }
 0xc98   :  { %v20111_v14 = vadd.f32 %v27094_v55, %v14722_v54 }
 0xc99   :  { %14970 = vst [vmem:[%s27363_s11 + $0x118] sm:$0xff] %v20110_v26 }
 0xc9a   :  { %14969 = vst [vmem:[%s27363_s11 + $0x110] sm:$0xff] %v20111_v14  ;;  %v19670_v19 = vpop.f32.mrb[68].mxu0 }
 0xc9b   :  { %v20112_v30 = vadd.f32 %v19670_v19, %v27094_v55  ;;  %v14732_v61 = vpop.f32.mrb[69].mxu0 }
 0xc9c   :  { %v20113_v58 = vadd.f32 %v27094_v55, %v14732_v61 }
 0xc9d   :  { %14972 = vst [vmem:[%s27363_s11 + $0x128] sm:$0xff] %v20112_v30 }
 0xc9e   :  { %14971 = vst [vmem:[%s27363_s11 + $0x120] sm:$0xff] %v20113_v58  ;;  %v19673_v38 = vpop.f32.mrb[70].mxu0 }
 0xc9f   :  { %v20114_v20 = vadd.f32 %v19673_v38, %v27094_v55  ;;  %v14742_v18 = vpop.f32.mrb[71].mxu0 }
 0xca0   :  { %v20115_v17 = vadd.f32 %v27094_v55, %v14742_v18 }
 0xca1   :  { %14974 = vst [vmem:[%s27363_s11 + $0x138] sm:$0xff] %v20114_v20 }
 0xca2   :  { %14973 = vst [vmem:[%s27363_s11 + $0x130] sm:$0xff] %v20115_v17  ;;  %v19676_v46 = vpop.f32.mrb[72].mxu0 }
 0xca3   :  { %v20116_v0 = vadd.f32 %v19676_v46, %v27094_v55  ;;  %v14752_v25 = vpop.f32.mrb[73].mxu0 }
 0xca4   :  { %v20117_v31 = vadd.f32 %v27094_v55, %v14752_v25 }
 0xca5   :  { %14976 = vst [vmem:[%s27363_s11 + $0x148] sm:$0xff] %v20116_v0 }
 0xca6   :  { %14975 = vst [vmem:[%s27363_s11 + $0x140] sm:$0xff] %v20117_v31  ;;  %v19679_v23 = vpop.f32.mrb[74].mxu0 }
 0xca7   :  { %v20118_v5 = vadd.f32 %v19679_v23, %v27094_v55  ;;  %v14762_v16 = vpop.f32.mrb[75].mxu0 }
 0xca8   :  { %v20119_v8 = vadd.f32 %v27094_v55, %v14762_v16 }
 0xca9   :  { %14978 = vst [vmem:[%s27363_s11 + $0x158] sm:$0xff] %v20118_v5 }
 0xcaa   :  { %14977 = vst [vmem:[%s27363_s11 + $0x150] sm:$0xff] %v20119_v8  ;;  %v19682_v33 = vpop.f32.mrb[76].mxu0 }
 0xcab   :  { %v20120_v2 = vadd.f32 %v19682_v33, %v27094_v55  ;;  %v14772_v50 = vpop.f32.mrb[77].mxu0 }
 0xcac   :  { %v20121_v9 = vadd.f32 %v27094_v55, %v14772_v50 }
 0xcad   :  { %14980 = vst [vmem:[%s27363_s11 + $0x168] sm:$0xff] %v20120_v2 }
 0xcae   :  { %14979 = vst [vmem:[%s27363_s11 + $0x160] sm:$0xff] %v20121_v9  ;;  %v19685_v27 = vpop.f32.mrb[78].mxu0 }
 0xcaf   :  { %v20122_v48 = vadd.f32 %v19685_v27, %v27094_v55  ;;  %v14782_v37 = vpop.f32.mrb[79].mxu0 }
 0xcb0   :  { %v20123_v13 = vadd.f32 %v27094_v55, %v14782_v37 }
 0xcb1   :  { %14982 = vst [vmem:[%s27363_s11 + $0x178] sm:$0xff] %v20122_v48 }
 0xcb2   :  { %14981 = vst [vmem:[%s27363_s11 + $0x170] sm:$0xff] %v20123_v13  ;;  %v19688_v12 = vpop.f32.mrb[80].mxu0 }
 0xcb3   :  { %v20124_v36 = vadd.f32 %v19688_v12, %v27094_v55  ;;  %v14792_v32 = vpop.f32.mrb[81].mxu0 }
 0xcb4   :  { %v20125_v1 = vadd.f32 %v27094_v55, %v14792_v32 }
 0xcb5   :  { %14984 = vst [vmem:[%s27363_s11 + $0x188] sm:$0xff] %v20124_v36 }
 0xcb6   :  { %14983 = vst [vmem:[%s27363_s11 + $0x180] sm:$0xff] %v20125_v1  ;;  %v19691_v29 = vpop.f32.mrb[82].mxu0 }
 0xcb7   :  { %v20126_v57 = vadd.f32 %v19691_v29, %v27094_v55  ;;  %v14802_v53 = vpop.f32.mrb[83].mxu0 }
 0xcb8   :  { %v20127_v41 = vadd.f32 %v27094_v55, %v14802_v53 }
 0xcb9   :  { %14986 = vst [vmem:[%s27363_s11 + $0x198] sm:$0xff] %v20126_v57 }
 0xcba   :  { %14985 = vst [vmem:[%s27363_s11 + $0x190] sm:$0xff] %v20127_v41  ;;  %v19694_v10 = vpop.f32.mrb[84].mxu0 }
 0xcbb   :  { %v20128_v28 = vadd.f32 %v19694_v10, %v27094_v55  ;;  %v14812_v56 = vpop.f32.mrb[85].mxu0 }
 0xcbc   :  { %v20129_v6 = vadd.f32 %v27094_v55, %v14812_v56 }
 0xcbd   :  { %14988 = vst [vmem:[%s27363_s11 + $0x1a8] sm:$0xff] %v20128_v28 }
 0xcbe   :  { %14987 = vst [vmem:[%s27363_s11 + $0x1a0] sm:$0xff] %v20129_v6  ;;  %v19697_v43 = vpop.f32.mrb[86].mxu0 }
 0xcbf   :  { %v20130_v3 = vadd.f32 %v19697_v43, %v27094_v55  ;;  %v14822_v42 = vpop.f32.mrb[87].mxu0 }
 0xcc0   :  { %v20131_v7 = vadd.f32 %v27094_v55, %v14822_v42 }
 0xcc1   :  { %14990 = vst [vmem:[%s27363_s11 + $0x1b8] sm:$0xff] %v20130_v3 }
 0xcc2   :  { %14989 = vst [vmem:[%s27363_s11 + $0x1b0] sm:$0xff] %v20131_v7  ;;  %v19700_v62 = vpop.f32.mrb[88].mxu0 }
 0xcc3   :  { %v20132_v44 = vadd.f32 %v19700_v62, %v27094_v55  ;;  %v14832_v59 = vpop.f32.mrb[89].mxu0 }
 0xcc4   :  { %v20133_v4 = vadd.f32 %v27094_v55, %v14832_v59 }
 0xcc5   :  { %14992 = vst [vmem:[%s27363_s11 + $0x1c8] sm:$0xff] %v20132_v44 }
 0xcc6   :  { %14991 = vst [vmem:[%s27363_s11 + $0x1c0] sm:$0xff] %v20133_v4  ;;  %v19703_v11 = vpop.f32.mrb[90].mxu0 }
 0xcc7   :  { %v20134_v22 = vadd.f32 %v19703_v11, %v27094_v55  ;;  %v14842_v51 = vpop.f32.mrb[91].mxu0 }
 0xcc8   :  { %v20135_v49 = vadd.f32 %v27094_v55, %v14842_v51 }
 0xcc9   :  { %14994 = vst [vmem:[%s27363_s11 + $0x1d8] sm:$0xff] %v20134_v22 }
 0xcca   :  { %14993 = vst [vmem:[%s27363_s11 + $0x1d0] sm:$0xff] %v20135_v49  ;;  %v19706_v47 = vpop.f32.mrb[92].mxu0 }
 0xccb   :  { %v20136_v52 = vadd.f32 %v19706_v47, %v27094_v55  ;;  %v14852_v39 = vpop.f32.mrb[93].mxu0 }
 0xccc   :  { %v20137_v24 = vadd.f32 %v27094_v55, %v14852_v39 }
 0xccd   :  { %14996 = vst [vmem:[%s27363_s11 + $0x1e8] sm:$0xff] %v20136_v52 }
 0xcce   :  { %14995 = vst [vmem:[%s27363_s11 + $0x1e0] sm:$0xff] %v20137_v24  ;;  %v19709_v60 = vpop.f32.mrb[94].mxu0 }
 0xccf   :  { %v20138_v34 = vadd.f32 %v19709_v60, %v27094_v55  ;;  %v14862_v40 = vpop.f32.mrb[95].mxu0 }
 0xcd0   :  { %v20139_v35 = vadd.f32 %v27094_v55, %v14862_v40 }
 0xcd1   :  { %14998 = vst [vmem:[%s27363_s11 + $0x1f8] sm:$0xff] %v20138_v34 }
 0xcd2   :  { %14997 = vst [vmem:[%s27363_s11 + $0x1f0] sm:$0xff] %v20139_v35 }

</bundles_post_ra>
